<compile_context>
chip_gen: v6e
topology: v6e:2x2x1
jax: 0.10.0
libtpu: 0.0.40
codegen_flags: <defaults>
</compile_context>

<pallas_src>
import jax
import jax.numpy as jnp
from jax.experimental import pallas as pl
from jax.experimental.pallas import tpu as pltpu

B = 2          # batch
S = 512        # sequence length (512 * 16 == 8192 matches nn.Flatten -> Linear(8192, .))
H = 768        # hidden size
G = 16         # group projection size
F = S * G      # 8192 flattened features
OUT = 512      # start/end logits length
NOUT = 2 * OUT # fused start+end head output width
VOCAB = 1000   # small synthetic vocab for the embedding stand-in

TS_A = 512     # row tile for the group projection kernel (B*S = 1024 rows -> 2 steps)
TK = 4096      # K tile for the head matmul (4 MiB bf16 weight tile -> 2 K steps)
TN = 512       # N tile for the head matmul (2 tiles -> v7x megacore split)


# ------------------------------------------------------------------ kernel A
# relu(x @ Wg + bg) : x folded to [B*S, H] bf16 -> bf16 [B*S, G], grid over rows.
def _group_relu_kernel(x_ref, w_ref, b_ref, o_ref):
    g = jnp.dot(x_ref[...], w_ref[...], preferred_element_type=jnp.float32)
    o_ref[...] = jnp.maximum(g + b_ref[...], 0.0).astype(o_ref.dtype)


def group_relu(x2d, w_t, b):
    rows = x2d.shape[0]
    return pl.pallas_call(
        _group_relu_kernel,
        out_shape=jax.ShapeDtypeStruct((rows, G), jnp.bfloat16),
        grid_spec=pltpu.PrefetchScalarGridSpec(
            num_scalar_prefetch=0,
            grid=(rows // TS_A,),
            in_specs=[
                pl.BlockSpec((TS_A, H), lambda i: (i, 0)),
                pl.BlockSpec((H, G), lambda i: (0, 0)),
                pl.BlockSpec((1, G), lambda i: (0, 0)),
            ],
            out_specs=pl.BlockSpec((TS_A, G), lambda i: (i, 0)),
        ),
        compiler_params=pltpu.CompilerParams(
            dimension_semantics=("parallel",)),
    )(x2d, w_t, b)


# ------------------------------------------------------------------ kernel B
# flat @ W + b for the fused (start|end) head.
# flat: bf16 [B, 8192], w_t: bf16 [8192, 1024], b: f32 [1, 1024] -> f32 [B, 1024]
# Grid = (N tiles, K tiles); K accumulates directly into the resident f32 o_ref
# (output block index is constant over k); N axis is "parallel" so v7x shards
# the 16 MiB weight stream across both TensorCores.
def _head_kernel(flat_ref, w_ref, b_ref, o_ref):
    k = pl.program_id(1)

    @pl.when(k == 0)
    def _():
        o_ref[...] = jnp.zeros_like(o_ref)

    o_ref[...] += jnp.dot(flat_ref[...], w_ref[...],
                          preferred_element_type=jnp.float32)

    @pl.when(k == pl.num_programs(1) - 1)
    def _():
        o_ref[...] += b_ref[...]


def head_matmul(flat, w_t, b):
    return pl.pallas_call(
        _head_kernel,
        out_shape=jax.ShapeDtypeStruct((B, NOUT), jnp.float32),
        grid_spec=pltpu.PrefetchScalarGridSpec(
            num_scalar_prefetch=0,
            grid=(NOUT // TN, F // TK),          # (2 parallel N tiles, 2 K steps)
            in_specs=[
                pl.BlockSpec((B, TK), lambda n, k: (0, k)),
                pl.BlockSpec((TK, TN), lambda n, k: (k, n)),
                pl.BlockSpec((1, TN), lambda n, k: (0, n)),
            ],
            out_specs=pl.BlockSpec((B, TN), lambda n, k: (0, n)),
        ),
        compiler_params=pltpu.CompilerParams(
            dimension_semantics=("parallel", "arbitrary"),
            vmem_limit_bytes=32 * 1024 * 1024),
    )(flat, w_t, b)


# ---------------------------------------------------------------- forward(s)
def predictor_forward(text_embeddings, params):
    # nn.Dropout(0.1): identity in eval mode.
    x2d = text_embeddings.reshape(B * S, H)            # fold batch into MXU M dim (free)
    g2d = group_relu(x2d, params["group_w_t_bf16"], params["group_b"])
    # nn.Flatten(): (B*S, G) -> (B, S*G); tiny (32 KiB) relayout handled by XLA.
    flat = g2d.reshape(B, F)
    # Fused start|end head (weights pre-concatenated + bf16 at param prep).
    logits = head_matmul(flat, params["head_w_t"], params["head_b"])
    return logits[:, :OUT], logits[:, OUT:]


def model_forward(text_ids, text_masks, params):
    # TODO(synk): the pretrained AlbertModel backbone cannot be reproduced
    # without its checkpoint; stand in with a deterministic embedding lookup
    # masked by the attention mask (same output shape [B, S, 768]).
    emb = params["word_emb_bf16"][text_ids]
    emb = emb * text_masks[..., None].astype(emb.dtype)
    return predictor_forward(emb, params)


# ------------------------------------------------------------------- params
def init_params(key):
    ks = jax.random.split(key, 7)
    scale = 0.02
    word_emb = scale * jax.random.normal(ks[0], (VOCAB, H), jnp.float32)
    group_w_t = scale * jax.random.normal(ks[1], (H, G), jnp.float32)
    group_b = scale * jax.random.normal(ks[2], (1, G), jnp.float32)
    start_w_t = scale * jax.random.normal(ks[3], (F, OUT), jnp.float32)
    end_w_t = scale * jax.random.normal(ks[4], (F, OUT), jnp.float32)
    start_b = scale * jax.random.normal(ks[5], (OUT,), jnp.float32)
    end_b = scale * jax.random.normal(ks[6], (OUT,), jnp.float32)
    return {
        # f32 originals kept only for the pure-JAX reference check.
        "word_emb": word_emb,
        "group_w_t": group_w_t,
        "group_b": group_b,
        "start_w_t": start_w_t, "start_b": start_b,
        "end_w_t": end_w_t, "end_b": end_b,
        # bf16 / fused versions prepared ONCE (not inside the forward).
        "word_emb_bf16": word_emb.astype(jnp.bfloat16),
        "group_w_t_bf16": group_w_t.astype(jnp.bfloat16),
        "head_w_t": jnp.concatenate([start_w_t, end_w_t], axis=1).astype(jnp.bfloat16),
        "head_b": jnp.concatenate([start_b, end_b], axis=0).reshape(1, NOUT),
    }


if __name__ == "__main__":
    key = jax.random.PRNGKey(0)
    pkey, ikey = jax.random.split(key, 2)
    params = init_params(pkey)

    text_ids = jax.random.randint(ikey, (B, S), 0, VOCAB, dtype=jnp.int32)
    text_masks = jnp.ones((B, S), dtype=jnp.int32)

    start, end = jax.jit(model_forward)(text_ids, text_masks, params)
    jax.block_until_ready((start, end))
    assert start.shape == (B, OUT) and end.shape == (B, OUT)

    # Pure-JAX f32 reference for the same forward (correctness check;
    # kernel uses bf16 weights/activations with f32 accumulation).
    emb = params["word_emb"][text_ids] * text_masks[..., None].astype(jnp.float32)
    g_ref = jnp.maximum(emb @ params["group_w_t"] + params["group_b"], 0.0)
    flat_ref = g_ref.reshape(B, F)
    start_ref = flat_ref @ params["start_w_t"] + params["start_b"]
    end_ref = flat_ref @ params["end_w_t"] + params["end_b"]
    assert jnp.allclose(start, start_ref, atol=2e-3, rtol=2e-3)
    assert jnp.allclose(end, end_ref, atol=2e-3, rtol=2e-3)

    print("KERNEL_OK")
</pallas_src>

<mosaic_0001>
module attributes {stable_mosaic.version = 11 : i64} {
  func.func @_group_relu_kernel(%arg0: i32, %arg1: memref<512x768xbf16, #tpu.memory_space<vmem>>, %arg2: memref<768x16xbf16, #tpu.memory_space<vmem>>, %arg3: memref<1x16xf32, #tpu.memory_space<vmem>>, %arg4: memref<512x16xbf16, #tpu.memory_space<vmem>>) attributes {dimension_semantics = [#tpu.dimension_semantics<parallel>], iteration_bounds = array<i64: 2>, scalar_prefetch = 0 : i64, scratch_operands = 0 : i64, tpu.core_type = #tpu.core_type<tc>, window_params = [{transform_indices = @transform_0, window_bounds = array<i64: 512, 768>}, {pipeline_mode = #tpu.pipeline_mode<synchronous>, transform_indices = @transform_1, window_bounds = array<i64: 768, 16>}, {pipeline_mode = #tpu.pipeline_mode<synchronous>, transform_indices = @transform_2, window_bounds = array<i64: 1, 16>}, {transform_indices = @transform_3, window_bounds = array<i64: 512, 16>}]} {
    %c0 = arith.constant 0 : index
    %c0_0 = arith.constant 0 : index
    %0 = vector.load %arg1[%c0, %c0_0] : memref<512x768xbf16, #tpu.memory_space<vmem>>, vector<512x768xbf16>
    %c0_1 = arith.constant 0 : index
    %c0_2 = arith.constant 0 : index
    %1 = vector.load %arg2[%c0_1, %c0_2] : memref<768x16xbf16, #tpu.memory_space<vmem>>, vector<768x16xbf16>
    %cst = arith.constant dense<0.000000e+00> : vector<512x16xf32>
    %2 = tpu.matmul %0, %1, %cst {dimension_numbers = #tpu.dot_dimension_numbers<[1], [0], [0], [1], [0, 0, 1, 1], [], []>} : vector<512x768xbf16>, vector<768x16xbf16>, vector<512x16xf32> -> vector<512x16xf32>
    %c0_3 = arith.constant 0 : index
    %c0_4 = arith.constant 0 : index
    %3 = vector.load %arg3[%c0_3, %c0_4] : memref<1x16xf32, #tpu.memory_space<vmem>>, vector<1x16xf32>
    %4 = vector.broadcast %3 : vector<1x16xf32> to vector<512x16xf32>
    %5 = arith.addf %2, %4 : vector<512x16xf32>
    %cst_5 = arith.constant 0.000000e+00 : f32
    %6 = vector.broadcast %cst_5 : f32 to vector<512x16xf32>
    %7 = arith.maximumf %5, %6 : vector<512x16xf32>
    %8 = arith.truncf %7 : vector<512x16xf32> to vector<512x16xbf16>
    %c0_6 = arith.constant 0 : index
    %c0_7 = arith.constant 0 : index
    %9 = vector.load %arg4[%c0_6, %c0_7] : memref<512x16xbf16, #tpu.memory_space<vmem>>, vector<512x16xbf16>
    tpu.vector_store %arg4[%c0_6, %c0_7], %8 {strides = array<i32>} : memref<512x16xbf16, #tpu.memory_space<vmem>>, vector<512x16xbf16>,
    return
  }
  func.func @transform_0(%arg0: i32) -> (i32, i32) {
    %c0_i32 = arith.constant 0 : i32
    %c0_i32_0 = arith.constant 0 : i32
    return %arg0, %c0_i32 : i32, i32
  }
  func.func @transform_1(%arg0: i32) -> (i32, i32) {
    %c0_i32 = arith.constant 0 : i32
    %c0_i32_0 = arith.constant 0 : i32
    %c0_i32_1 = arith.constant 0 : i32
    return %c0_i32, %c0_i32_0 : i32, i32
  }
  func.func @transform_2(%arg0: i32) -> (i32, i32) {
    %c0_i32 = arith.constant 0 : i32
    %c0_i32_0 = arith.constant 0 : i32
    %c0_i32_1 = arith.constant 0 : i32
    return %c0_i32, %c0_i32_0 : i32, i32
  }
  func.func @transform_3(%arg0: i32) -> (i32, i32) {
    %c0_i32 = arith.constant 0 : i32
    %c0_i32_0 = arith.constant 0 : i32
    return %arg0, %c0_i32 : i32, i32
  }
}

module attributes {stable_mosaic.version = 11 : i64} {
  func.func @_head_kernel(%arg0: i32, %arg1: i32, %arg2: memref<2x4096xbf16, #tpu.memory_space<vmem>>, %arg3: memref<4096x512xbf16, #tpu.memory_space<vmem>>, %arg4: memref<1x512xf32, #tpu.memory_space<vmem>>, %arg5: memref<2x512xf32, #tpu.memory_space<vmem>>) attributes {dimension_semantics = [#tpu.dimension_semantics<parallel>, #tpu.dimension_semantics<arbitrary>], iteration_bounds = array<i64: 2, 2>, scalar_prefetch = 0 : i64, scratch_operands = 0 : i64, tpu.core_type = #tpu.core_type<tc>, window_params = [{transform_indices = @transform_0, window_bounds = array<i64: 2, 4096>}, {transform_indices = @transform_1, window_bounds = array<i64: 4096, 512>}, {transform_indices = @transform_2, window_bounds = array<i64: 1, 512>}, {transform_indices = @transform_3, window_bounds = array<i64: 2, 512>}]} {
    %c0_i32 = arith.constant 0 : i32
    %0 = arith.cmpi eq, %arg1, %c0_i32 : i32
    %1 = arith.extui %0 : i1 to i32
    %c0_i32_0 = arith.constant 0 : i32
    %2 = arith.cmpi ne, %1, %c0_i32_0 : i32
    scf.if %2 {
      %cst_9 = arith.constant 0.000000e+00 : f32
      %12 = vector.broadcast %cst_9 : f32 to vector<2x512xf32>
      %c0_10 = arith.constant 0 : index
      %c0_11 = arith.constant 0 : index
      %13 = vector.load %arg5[%c0_10, %c0_11] : memref<2x512xf32, #tpu.memory_space<vmem>>, vector<2x512xf32>
      tpu.vector_store %arg5[%c0_10, %c0_11], %12 {strides = array<i32>} : memref<2x512xf32, #tpu.memory_space<vmem>>, vector<2x512xf32>,
    } else {
    }
    %c0 = arith.constant 0 : index
    %c0_1 = arith.constant 0 : index
    %3 = vector.load %arg5[%c0, %c0_1] : memref<2x512xf32, #tpu.memory_space<vmem>>, vector<2x512xf32>
    %c0_2 = arith.constant 0 : index
    %c0_3 = arith.constant 0 : index
    %4 = vector.load %arg2[%c0_2, %c0_3] : memref<2x4096xbf16, #tpu.memory_space<vmem>>, vector<2x4096xbf16>
    %c0_4 = arith.constant 0 : index
    %c0_5 = arith.constant 0 : index
    %5 = vector.load %arg3[%c0_4, %c0_5] : memref<4096x512xbf16, #tpu.memory_space<vmem>>, vector<4096x512xbf16>
    %cst = arith.constant dense<0.000000e+00> : vector<2x512xf32>
    %6 = tpu.matmul %4, %5, %cst {dimension_numbers = #tpu.dot_dimension_numbers<[1], [0], [0], [1], [0, 0, 1, 1], [], []>} : vector<2x4096xbf16>, vector<4096x512xbf16>, vector<2x512xf32> -> vector<2x512xf32>
    %7 = arith.addf %3, %6 : vector<2x512xf32>
    %c0_6 = arith.constant 0 : index
    %c0_7 = arith.constant 0 : index
    %8 = vector.load %arg5[%c0_6, %c0_7] : memref<2x512xf32, #tpu.memory_space<vmem>>, vector<2x512xf32>
    tpu.vector_store %arg5[%c0_6, %c0_7], %7 {strides = array<i32>} : memref<2x512xf32, #tpu.memory_space<vmem>>, vector<2x512xf32>,
    %c1_i32 = arith.constant 1 : i32
    %9 = arith.cmpi eq, %arg1, %c1_i32 : i32
    %10 = arith.extui %9 : i1 to i32
    %c0_i32_8 = arith.constant 0 : i32
    %11 = arith.cmpi ne, %10, %c0_i32_8 : i32
    scf.if %11 {
      %c0_9 = arith.constant 0 : index
      %c0_10 = arith.constant 0 : index
      %12 = vector.load %arg5[%c0_9, %c0_10] : memref<2x512xf32, #tpu.memory_space<vmem>>, vector<2x512xf32>
      %c0_11 = arith.constant 0 : index
      %c0_12 = arith.constant 0 : index
      %13 = vector.load %arg4[%c0_11, %c0_12] : memref<1x512xf32, #tpu.memory_space<vmem>>, vector<1x512xf32>
      %14 = vector.broadcast %13 : vector<1x512xf32> to vector<2x512xf32>
      %15 = arith.addf %12, %14 : vector<2x512xf32>
      %c0_13 = arith.constant 0 : index
      %c0_14 = arith.constant 0 : index
      %16 = vector.load %arg5[%c0_13, %c0_14] : memref<2x512xf32, #tpu.memory_space<vmem>>, vector<2x512xf32>
      tpu.vector_store %arg5[%c0_13, %c0_14], %15 {strides = array<i32>} : memref<2x512xf32, #tpu.memory_space<vmem>>, vector<2x512xf32>,
    } else {
    }
    return
  }
  func.func @transform_0(%arg0: i32, %arg1: i32) -> (i32, i32) {
    %c0_i32 = arith.constant 0 : i32
    %c0_i32_0 = arith.constant 0 : i32
    return %c0_i32, %arg1 : i32, i32
  }
  func.func @transform_1(%arg0: i32, %arg1: i32) -> (i32, i32) {
    %c0_i32 = arith.constant 0 : i32
    return %arg1, %arg0 : i32, i32
  }
  func.func @transform_2(%arg0: i32, %arg1: i32) -> (i32, i32) {
    %c0_i32 = arith.constant 0 : i32
    %c0_i32_0 = arith.constant 0 : i32
    return %c0_i32, %arg0 : i32, i32
  }
  func.func @transform_3(%arg0: i32, %arg1: i32) -> (i32, i32) {
    %c0_i32 = arith.constant 0 : i32
    %c0_i32_0 = arith.constant 0 : i32
    return %c0_i32, %arg0 : i32, i32
  }
}

</mosaic_0001>

<bundles_post_ra>
// kernel: model_forward.2
= control target key start
LH: loop header
LB: loop body
LE: loop exit
PB: predicated region body
PF: predicated region fallthrough
CT: control target
= control target key end

     0   :  { %s3817_s12 = smov 0   ;;  %s4636_s0 = inlined_call_operand.vmem [shape: bf16[1024,768], index: 0, kind: input, shape index: {}]   ;;  %s4637_s1 = inlined_call_operand.vmem [shape: bf16[768,16], index: 1, kind: input, shape index: {}]   ;;  %s4638_s2 = inlined_call_operand.vmem [shape: f32[1,16], index: 2, kind: input, shape index: {}]   ;;  %s4639_s3 = inlined_call_operand.vmem [shape: bf16[1024,16], index: 3, kind: output, shape index: {}]  }
   0x1 LB: > { %s3029_s13 = sadd.s32 4294967295, %s3794_s12   ;;  %p3033_p0 = scmp.ge.s32.totalorder %s3794_s12, 1  ;;  %s3794_s12 = sphi %s3817_s12, %s13_s12  }
   0x2   : > { %p139_p1 = scmp.lt.s32.totalorder %s3794_s12, 3 }
   0x4   : > { %p140_p2 = pnand %p3033_p0, %p139_p1 }
   0x6   : > { %143 = sbr.rel (%p140_p2) target bundleno = 658 (0x292), region = 32 }
   0xb   : > { %v3451_v0 = vld [vmem:[%s4637_s1 + $0x38] sm:$0xff]   ;;  %v3796_v1 = vmov 0   ;;  %s3034_s16 = sshll.u32 %s3029_s13, 6  ;;  %v3452_v2 = vld [vmem:[%s4637_s1 + $0x30] sm:$0xff]   ;;  %v3453_v3 = vld [vmem:[%s4637_s1 + $0x28] sm:$0xff]   ;;  %vm2908_vm0 = vcmask 125952  }
   0xc   : > { %1721 = vmatprep.subr.bf16.mxu0 %v3796_v1  ;;  %3409 = vmatprep.subr.bf16.mxu1 %v3796_v1  ;;  %p165_p3 = scmp.lt.s32.totalorder %s3034_s16, 127  ;;  %v3454_v4 = vld [vmem:[%s4637_s1 + $0x20] sm:$0xff]   ;;  %v3455_v5 = vld [vmem:[%s4637_s1 + $0x18] sm:$0xff]   ;;  %v3456_v7 = vld [vmem:[%s4637_s1 + $0x10] sm:$0xff]  }
   0xd   : > { %1722 = vmatpush1.bf16.msra.mxu0 %v3451_v0  ;;  %3425 = vmatpush1.bf16.msra.mxu1 %v3451_v0  ;;  %v3457_v9 = vld [vmem:[%s4637_s1 + $0x8] sm:$0xff]   ;;  %v3458_v10 = vld [vmem:[%s4637_s1] sm:$0xff]   ;;  %v3459_v11 = vld [vmem:[%s4637_s1 + $0x78] sm:$0xff]  }
   0xe   : > { %1723 = vmatprep.subr.bf16.mxu0 %v3796_v1  ;;  %3410 = vmatprep.subr.bf16.mxu1 %v3796_v1  ;;  %s4679_s16 = smov (!%p165_p3, %s3034_s16), 127  ;;  %v3460_v12 = vld [vmem:[%s4637_s1 + $0x70] sm:$0xff]   ;;  %v3461_v13 = vld [vmem:[%s4637_s1 + $0x68] sm:$0xff]   ;;  %v3462_v14 = vld [vmem:[%s4637_s1 + $0x60] sm:$0xff]  }
   0xf   : > { %s3441_s23 = smul.u32 24, %s4679_s16  ;;  %v3463_v15 = vld [vmem:[%s4637_s1 + $0x58] sm:$0xff]   ;;  %v3464_v16 = vld [vmem:[%s4637_s1 + $0x50] sm:$0xff]   ;;  %v3465_v17 = vld [vmem:[%s4637_s1 + $0x48] sm:$0xff]   ;;  %s3037_s20 = sshll.u32 %s4679_s16, 2 }
  0x10   : > { %v3466_v18 = vld [vmem:[%s4637_s1 + $0x40] sm:$0xff]   ;;  %v3473_v21 = vld [vmem:[%s4637_s1 + $0xb8] sm:$0xff]   ;;  %v3481_v25 = vld [vmem:[%s4637_s1 + $0xb0] sm:$0xff]  }
  0x11   : > { %1724 = vmatpush1.bf16.msra.mxu0 %v3452_v2  ;;  %3426 = vmatpush1.bf16.msra.mxu1 %v3452_v2  ;;  %s3854_s28 = scalar_lea.vmem %s4636_s0, %s3441_s23  ;;  %v3474_v22 = vld [vmem:[%s4637_s1 + $0x138] sm:$0xff]   ;;  %v3482_v26 = vld [vmem:[%s4637_s1 + $0x130] sm:$0xff]   ;;  %v3489_v31 = vld [vmem:[%s4637_s1 + $0xa8] sm:$0xff]   ;;  %s4352_s23 = scalar_lea.vmem %s4639_s3, %s3037_s20 }
  0x12   : > { %1725 = vmatprep.subr.bf16.mxu0 %v3796_v1  ;;  %3411 = vmatprep.subr.bf16.mxu1 %v3796_v1  ;;  %v3469_v6 = vld [vmem:[%s3854_s28 + $0x4] ss:$24 sps:$4 sm:$0xff]   ;;  %v3467_v19 = vld [vmem:[%s3854_s28] ss:$24 sps:$4 sm:$0xff]   ;;  %v3475_v23 = vld [vmem:[%s3854_s28 + $0x34] ss:$24 sps:$4 sm:$0xff]  }
  0x13   : > { %v3472_v8 = vld [vmem:[%s3854_s28 + $0x304] ss:$24 sps:$4 sm:$0xff]   ;;  %1753 = vmatprep.mubr.bf16.mxu0 %v3469_v6  ;;  %v3470_v20 = vld [vmem:[%s3854_s28 + $0x300] ss:$24 sps:$4 sm:$0xff]   ;;  %v3477_v24 = vld [vmem:[%s3854_s28 + $0x334] ss:$24 sps:$4 sm:$0xff]  }
  0x14   : > { %1881 = vmatprep.mubr.bf16.mxu1 %v3472_v8  ;;  %v3479_v27 = vld [vmem:[%s3854_s28 + $0x30] ss:$24 sps:$4 sm:$0xff]   ;;  %v3483_v29 = vld [vmem:[%s3854_s28 + $0x64] ss:$24 sps:$4 sm:$0xff]   ;;  %v3487_v34 = vld [vmem:[%s3854_s28 + $0x60] ss:$24 sps:$4 sm:$0xff]  }
  0x15   : > { %1726 = vmatpush1.bf16.msra.mxu0 %v3453_v3  ;;  %3427 = vmatpush1.bf16.msra.mxu1 %v3453_v3  ;;  %v3480_v28 = vld [vmem:[%s3854_s28 + $0x330] ss:$24 sps:$4 sm:$0xff]   ;;  %v3485_v30 = vld [vmem:[%s3854_s28 + $0x364] ss:$24 sps:$4 sm:$0xff]   ;;  %v3488_v36 = vld [vmem:[%s3854_s28 + $0x360] ss:$24 sps:$4 sm:$0xff]  }
  0x16   : > { %1727 = vmatprep.subr.bf16.mxu0 %v3796_v1  ;;  %3412 = vmatprep.subr.bf16.mxu1 %v3796_v1  ;;  %v3490_v32 = vld [vmem:[%s4637_s1 + $0x128] sm:$0xff]   ;;  %v3497_v33 = vld [vmem:[%s4637_s1 + $0xa0] sm:$0xff]   ;;  %v3505_v39 = vld [vmem:[%s4637_s1 + $0x98] sm:$0xff]  }
  0x17   : > { %v3498_v35 = vld [vmem:[%s4637_s1 + $0x120] sm:$0xff]   ;;  %v3491_v37 = vld [vmem:[%s3854_s28 + $0x94] ss:$24 sps:$4 sm:$0xff]   ;;  %v3506_v40 = vld [vmem:[%s4637_s1 + $0x118] sm:$0xff]  }
  0x18   : > { %v3493_v38 = vld [vmem:[%s3854_s28 + $0x394] ss:$24 sps:$4 sm:$0xff]   ;;  %v3495_v41 = vld [vmem:[%s3854_s28 + $0x90] ss:$24 sps:$4 sm:$0xff]   ;;  %v3499_v45 = vld [vmem:[%s3854_s28 + $0xc4] ss:$24 sps:$4 sm:$0xff]  }
  0x19   : > { %1728 = vmatpush1.bf16.msra.mxu0 %v3454_v4  ;;  %3428 = vmatpush1.bf16.msra.mxu1 %v3454_v4  ;;  %v3496_v42 = vld [vmem:[%s3854_s28 + $0x390] ss:$24 sps:$4 sm:$0xff]   ;;  %v3501_v46 = vld [vmem:[%s3854_s28 + $0x3c4] ss:$24 sps:$4 sm:$0xff]   ;;  %v3503_v49 = vld [vmem:[%s3854_s28 + $0xc0] ss:$24 sps:$4 sm:$0xff]  }
  0x1a   : > { %1729 = vmatprep.subr.bf16.mxu0 %v3796_v1  ;;  %3413 = vmatprep.subr.bf16.mxu1 %v3796_v1  ;;  %v3513_v43 = vld [vmem:[%s4637_s1 + $0x90] sm:$0xff]   ;;  %v3521_v47 = vld [vmem:[%s4637_s1 + $0x88] sm:$0xff]   ;;  %v3529_v50 = vld [vmem:[%s4637_s1 + $0x80] sm:$0xff]  }
  0x1b   : > { %v3514_v44 = vld [vmem:[%s4637_s1 + $0x110] sm:$0xff]   ;;  %v3522_v48 = vld [vmem:[%s4637_s1 + $0x108] sm:$0xff]   ;;  %v3530_v51 = vld [vmem:[%s4637_s1 + $0x100] sm:$0xff]  }
  0x1c   : > { %v3504_v52 = vld [vmem:[%s3854_s28 + $0x3c0] ss:$24 sps:$4 sm:$0xff]   ;;  %v3507_v53 = vld [vmem:[%s3854_s28 + $0xf4] ss:$24 sps:$4 sm:$0xff]   ;;  %v3511_v59 = vld [vmem:[%s3854_s28 + $0xf0] ss:$24 sps:$4 sm:$0xff]  }
  0x1d   : > { %1730 = vmatpush1.bf16.msra.mxu0 %v3455_v5  ;;  %3429 = vmatpush1.bf16.msra.mxu1 %v3455_v5  ;;  %v3509_v54 = vld [vmem:[%s3854_s28 + $0x3f4] ss:$24 sps:$4 sm:$0xff]   ;;  %v3537_v55 = vld [vmem:[%s4637_s1 + $0xf8] sm:$0xff]   ;;  %v3512_v60 = vld [vmem:[%s3854_s28 + $0x3f0] ss:$24 sps:$4 sm:$0xff]  }
  0x1e   : > { %1731 = vmatprep.subr.bf16.mxu0 %v3796_v1  ;;  %3414 = vmatprep.subr.bf16.mxu1 %v3796_v1  ;;  %v3538_v56 = vld [vmem:[%s4637_s1 + $0x178] sm:$0xff]   ;;  %v3545_v57 = vld [vmem:[%s4637_s1 + $0xf0] sm:$0xff]   ;;  %v3553_v63 = vld [vmem:[%s4637_s1 + $0xe8] sm:$0xff]  }
  0x1f   : > { %v3546_v58 = vld [vmem:[%s4637_s1 + $0x170] sm:$0xff]   ;;  %v3515_v61 = vld [vmem:[%s3854_s28 + $0x124] ss:$24 sps:$4 sm:$0xff]   ;;  %v3554_v0 = vld [vmem:[%s4637_s1 + $0x168] sm:$0xff]  }
  0x20   : > { %v3517_v62 = vld [vmem:[%s3854_s28 + $0x424] ss:$24 sps:$4 sm:$0xff]   ;;  %v3519_v3 = vld [vmem:[%s3854_s28 + $0x120] ss:$24 sps:$4 sm:$0xff]   ;;  %v3523_v6 = vld [vmem:[%s3854_s28 + $0x154] ss:$24 sps:$4 sm:$0xff]  }
  0x21   : > { %1732 = vmatpush1.bf16.msra.mxu0 %v3456_v7  ;;  %3430 = vmatpush1.bf16.msra.mxu1 %v3456_v7  ;;  %v3561_v2 = vld [vmem:[%s4637_s1 + $0xe0] sm:$0xff]   ;;  %v3525_v7 = vld [vmem:[%s3854_s28 + $0x454] ss:$24 sps:$4 sm:$0xff]   ;;  %v3569_v8 = vld [vmem:[%s4637_s1 + $0xd8] sm:$0xff]  }
  0x22   : > { %1733 = vmatprep.subr.bf16.mxu0 %v3796_v1  ;;  %3415 = vmatprep.subr.bf16.mxu1 %v3796_v1  ;;  %v3520_v4 = vld [vmem:[%s3854_s28 + $0x420] ss:$24 sps:$4 sm:$0xff]  }
  0x23   : > { %v3562_v5 = vld [vmem:[%s4637_s1 + $0x160] sm:$0xff]  }
  0x25   : > { %1734 = vmatpush1.bf16.msra.mxu0 %v3457_v9  ;;  %3431 = vmatpush1.bf16.msra.mxu1 %v3457_v9  ;;  %v3570_v9 = vld [vmem:[%s4637_s1 + $0x158] sm:$0xff]  }
  0x26   : > { %1735 = vmatprep.subr.bf16.mxu0 %v3796_v1  ;;  %3416 = vmatprep.subr.bf16.mxu1 %v3796_v1 }
  0x29   : > { %1736 = vmatpush1.bf16.msra.mxu0 %v3458_v10  ;;  %3432 = vmatpush1.bf16.msra.mxu1 %v3458_v10  ;;  %v3577_v10 = vld [vmem:[%s4637_s1 + $0xd0] sm:$0xff]  }
  0x2a   : > { %1737 = vmatprep.subr.bf16.mxu0 %v3796_v1  ;;  %3417 = vmatprep.subr.bf16.mxu1 %v3796_v1 }
  0x2d   : > { %1738 = vmatpush2.bf16.msra.mxu0 %v3459_v11  ;;  %3433 = vmatpush2.bf16.msra.mxu1 %v3459_v11  ;;  %v3578_v11 = vld [vmem:[%s4637_s1 + $0x150] sm:$0xff]  }
  0x2e   : > { %1739 = vmatprep.subr.bf16.mxu0 %v3796_v1  ;;  %3418 = vmatprep.subr.bf16.mxu1 %v3796_v1 }
  0x31   : > { %1740 = vmatpush2.bf16.msra.mxu0 %v3460_v12  ;;  %3434 = vmatpush2.bf16.msra.mxu1 %v3460_v12  ;;  %v3527_v12 = vld [vmem:[%s3854_s28 + $0x150] ss:$24 sps:$4 sm:$0xff]  }
  0x32   : > { %1741 = vmatprep.subr.bf16.mxu0 %v3796_v1  ;;  %3419 = vmatprep.subr.bf16.mxu1 %v3796_v1 }
  0x35   : > { %1742 = vmatpush2.bf16.msra.mxu0 %v3461_v13  ;;  %3435 = vmatpush2.bf16.msra.mxu1 %v3461_v13  ;;  %v3528_v13 = vld [vmem:[%s3854_s28 + $0x450] ss:$24 sps:$4 sm:$0xff]  }
  0x36   : > { %1743 = vmatprep.subr.bf16.mxu0 %v3796_v1  ;;  %3420 = vmatprep.subr.bf16.mxu1 %v3796_v1 }
  0x39   : > { %1744 = vmatpush2.bf16.msra.mxu0 %v3462_v14  ;;  %3436 = vmatpush2.bf16.msra.mxu1 %v3462_v14  ;;  %v3531_v14 = vld [vmem:[%s3854_s28 + $0x184] ss:$24 sps:$4 sm:$0xff]  }
  0x3a   : > { %1745 = vmatprep.subr.bf16.mxu0 %v3796_v1  ;;  %3421 = vmatprep.subr.bf16.mxu1 %v3796_v1 }
  0x3d   : > { %1746 = vmatpush2.bf16.msra.mxu0 %v3463_v15  ;;  %3437 = vmatpush2.bf16.msra.mxu1 %v3463_v15  ;;  %v3533_v15 = vld [vmem:[%s3854_s28 + $0x484] ss:$24 sps:$4 sm:$0xff]  }
  0x3e   : > { %1747 = vmatprep.subr.bf16.mxu0 %v3796_v1  ;;  %3422 = vmatprep.subr.bf16.mxu1 %v3796_v1 }
  0x41   : > { %1748 = vmatpush2.bf16.msra.mxu0 %v3464_v16  ;;  %3438 = vmatpush2.bf16.msra.mxu1 %v3464_v16  ;;  %v3585_v16 = vld [vmem:[%s4637_s1 + $0xc8] sm:$0xff]  }
  0x42   : > { %1749 = vmatprep.subr.bf16.mxu0 %v3796_v1  ;;  %3423 = vmatprep.subr.bf16.mxu1 %v3796_v1 }
  0x45   : > { %1750 = vmatpush2.bf16.msra.mxu0 %v3465_v17  ;;  %3439 = vmatpush2.bf16.msra.mxu1 %v3465_v17  ;;  %v3586_v17 = vld [vmem:[%s4637_s1 + $0x148] sm:$0xff]  }
  0x46   : > { %1751 = vmatprep.subr.bf16.mxu0 %v3796_v1  ;;  %3424 = vmatprep.subr.bf16.mxu1 %v3796_v1 }
  0x49   : > { %1752 = vmatpush2.bf16.msra.mxu0 %v3466_v18  ;;  %3440 = vmatpush2.bf16.msra.mxu1 %v3466_v18  ;;  %v3593_v18 = vld [vmem:[%s4637_s1 + $0xc0] sm:$0xff]  }
  0x4a   : > { %2010 = vmatprep.subr.bf16.mxu1 %v3796_v1  ;;  %2299 = vmatprep.subr.bf16.mxu0 %v3796_v1 }
  0x4c   : > { %1754 = vmatmul.mubr.bf16.vlgmr.msra.gmra.mxu0 %v3467_v19  ;;  %1882 = vmatmul.mubr.bf16.vlgmr.msra.gmra.mxu1 %v3470_v20  ;;  %v3594_v19 = vld [vmem:[%s4637_s1 + $0x140] sm:$0xff]  }
  0x4d   : > { %2011 = vmatpush1.bf16.msra.mxu1 %v3473_v21  ;;  %2300 = vmatpush1.bf16.msra.mxu0 %v3474_v22  ;;  %v3535_v20 = vld [vmem:[%s3854_s28 + $0x180] ss:$24 sps:$4 sm:$0xff]   ;;  %v3539_v22 = vld [vmem:[%s3854_s28 + $0x1b4] ss:$24 sps:$4 sm:$0xff]  }
  0x4e   : > { %1761 = vmatprep.mubr.bf16.mxu0 %v3475_v23  ;;  %1889 = vmatprep.mubr.bf16.mxu1 %v3477_v24  ;;  %v3536_v21 = vld [vmem:[%s3854_s28 + $0x480] ss:$24 sps:$4 sm:$0xff]   ;;  %v3541_v23 = vld [vmem:[%s3854_s28 + $0x4b4] ss:$24 sps:$4 sm:$0xff]   ;;  %v3543_v24 = vld [vmem:[%s3854_s28 + $0x1b0] ss:$24 sps:$4 sm:$0xff]  }
  0x4f   : > { %2012 = vmatprep.subr.bf16.mxu1 %v3796_v1  ;;  %2301 = vmatprep.subr.bf16.mxu0 %v3796_v1 }
  0x51   : > { %2013 = vmatpush1.bf16.msra.mxu1 %v3481_v25  ;;  %2302 = vmatpush1.bf16.msra.mxu0 %v3482_v26  ;;  %v3544_v25 = vld [vmem:[%s3854_s28 + $0x4b0] ss:$24 sps:$4 sm:$0xff]   ;;  %v3547_v26 = vld [vmem:[%s3854_s28 + $0x1e4] ss:$24 sps:$4 sm:$0xff]  }
  0x52   : > { %2014 = vmatprep.subr.bf16.mxu1 %v3796_v1  ;;  %2303 = vmatprep.subr.bf16.mxu0 %v3796_v1 }
  0x54   : > { %1762 = vmatmul.mubr.bf16.gmra.mxu0 %v3479_v27  ;;  %1890 = vmatmul.mubr.bf16.gmra.mxu1 %v3480_v28  ;;  %v3549_v27 = vld [vmem:[%s3854_s28 + $0x4e4] ss:$24 sps:$4 sm:$0xff]   ;;  %v3552_v28 = vld [vmem:[%s3854_s28 + $0x4e0] ss:$24 sps:$4 sm:$0xff]  }
  0x55   : > { %1769 = vmatprep.mubr.bf16.mxu0 %v3483_v29  ;;  %1897 = vmatprep.mubr.bf16.mxu1 %v3485_v30  ;;  %v3555_v29 = vld [vmem:[%s3854_s28 + $0x214] ss:$24 sps:$4 sm:$0xff]  }
  0x56   : > { %2015 = vmatpush1.bf16.msra.mxu1 %v3489_v31  ;;  %2304 = vmatpush1.bf16.msra.mxu0 %v3490_v32  ;;  %v3557_v30 = vld [vmem:[%s3854_s28 + $0x514] ss:$24 sps:$4 sm:$0xff]   ;;  %v3559_v31 = vld [vmem:[%s3854_s28 + $0x210] ss:$24 sps:$4 sm:$0xff]  }
  0x57   : > { %2016 = vmatprep.subr.bf16.mxu1 %v3796_v1  ;;  %2305 = vmatprep.subr.bf16.mxu0 %v3796_v1  ;;  %v3560_v32 = vld [vmem:[%s3854_s28 + $0x510] ss:$24 sps:$4 sm:$0xff]  }
  0x5a   : > { %2017 = vmatpush1.bf16.msra.mxu1 %v3497_v33  ;;  %2306 = vmatpush1.bf16.msra.mxu0 %v3498_v35  ;;  %v3563_v33 = vld [vmem:[%s3854_s28 + $0x244] ss:$24 sps:$4 sm:$0xff]   ;;  %v3567_v35 = vld [vmem:[%s3854_s28 + $0x240] ss:$24 sps:$4 sm:$0xff]  }
  0x5b   : > { %2018 = vmatprep.subr.bf16.mxu1 %v3796_v1  ;;  %2307 = vmatprep.subr.bf16.mxu0 %v3796_v1 }
  0x5c   : > { %1770 = vmatmul.mubr.bf16.gmra.mxu0 %v3487_v34  ;;  %1898 = vmatmul.mubr.bf16.gmra.mxu1 %v3488_v36  ;;  %v3565_v34 = vld [vmem:[%s3854_s28 + $0x544] ss:$24 sps:$4 sm:$0xff]   ;;  %v3568_v36 = vld [vmem:[%s3854_s28 + $0x540] ss:$24 sps:$4 sm:$0xff]  }
  0x5d   : > { %1777 = vmatprep.mubr.bf16.mxu0 %v3491_v37  ;;  %1905 = vmatprep.mubr.bf16.mxu1 %v3493_v38  ;;  %v3571_v37 = vld [vmem:[%s3854_s28 + $0x274] ss:$24 sps:$4 sm:$0xff]  }
  0x5e   : > { %2019 = vmatpush1.bf16.msra.mxu1 %v3505_v39  ;;  %2308 = vmatpush1.bf16.msra.mxu0 %v3506_v40  ;;  %v3573_v38 = vld [vmem:[%s3854_s28 + $0x574] ss:$24 sps:$4 sm:$0xff]   ;;  %v3575_v39 = vld [vmem:[%s3854_s28 + $0x270] ss:$24 sps:$4 sm:$0xff]  }
  0x5f   : > { %2020 = vmatprep.subr.bf16.mxu1 %v3796_v1  ;;  %2309 = vmatprep.subr.bf16.mxu0 %v3796_v1  ;;  %v3576_v40 = vld [vmem:[%s3854_s28 + $0x570] ss:$24 sps:$4 sm:$0xff]  }
  0x62   : > { %2021 = vmatpush1.bf16.msra.mxu1 %v3513_v43  ;;  %2310 = vmatpush1.bf16.msra.mxu0 %v3514_v44  ;;  %v3583_v43 = vld [vmem:[%s3854_s28 + $0x2a0] ss:$24 sps:$4 sm:$0xff]  }
  0x63   : > { %2022 = vmatprep.subr.bf16.mxu1 %v3796_v1  ;;  %2311 = vmatprep.subr.bf16.mxu0 %v3796_v1  ;;  %v3584_v44 = vld [vmem:[%s3854_s28 + $0x5a0] ss:$24 sps:$4 sm:$0xff]  }
  0x64   : > { %1778 = vmatmul.mubr.bf16.gmra.mxu0 %v3495_v41  ;;  %1906 = vmatmul.mubr.bf16.gmra.mxu1 %v3496_v42  ;;  %v3579_v41 = vld [vmem:[%s3854_s28 + $0x2a4] ss:$24 sps:$4 sm:$0xff]  }
  0x65   : > { %1785 = vmatprep.mubr.bf16.mxu0 %v3499_v45  ;;  %1913 = vmatprep.mubr.bf16.mxu1 %v3501_v46  ;;  %v3581_v42 = vld [vmem:[%s3854_s28 + $0x5a4] ss:$24 sps:$4 sm:$0xff]   ;;  %v3587_v45 = vld [vmem:[%s3854_s28 + $0x2d4] ss:$24 sps:$4 sm:$0xff]  }
  0x66   : > { %2023 = vmatpush1.bf16.msra.mxu1 %v3521_v47  ;;  %2312 = vmatpush1.bf16.msra.mxu0 %v3522_v48  ;;  %v3589_v46 = vld [vmem:[%s3854_s28 + $0x5d4] ss:$24 sps:$4 sm:$0xff]   ;;  %v3591_v47 = vld [vmem:[%s3854_s28 + $0x2d0] ss:$24 sps:$4 sm:$0xff]  }
  0x67   : > { %2024 = vmatprep.subr.bf16.mxu1 %v3796_v1  ;;  %2313 = vmatprep.subr.bf16.mxu0 %v3796_v1  ;;  %v3592_v48 = vld [vmem:[%s3854_s28 + $0x5d0] ss:$24 sps:$4 sm:$0xff]  }
  0x6a   : > { %2025 = vmatpush1.bf16.msra.mxu1 %v3529_v50  ;;  %2314 = vmatpush1.bf16.msra.mxu0 %v3530_v51  ;;  %v3600_v50 = vld [vmem:[%s3854_s28 + $0x14] ss:$24 sps:$4 sm:$0xff]   ;;  %v3595_v51 = vld [vmem:[%s3854_s28 + $0x8] ss:$24 sps:$4 sm:$0xff]  }
  0x6b   : > { %2026 = vmatprep.subr.bf16.mxu1 %v3796_v1  ;;  %2315 = vmatprep.subr.bf16.mxu0 %v3796_v1 }
  0x6c   : > { %1786 = vmatmul.mubr.bf16.gmra.mxu0 %v3503_v49  ;;  %1914 = vmatmul.mubr.bf16.gmra.mxu1 %v3504_v52  ;;  %v3597_v49 = vld [vmem:[%s3854_s28 + $0xc] ss:$24 sps:$4 sm:$0xff]   ;;  %v3598_v52 = vld [vmem:[%s3854_s28 + $0x10] ss:$24 sps:$4 sm:$0xff]  }
  0x6d   : > { %1793 = vmatprep.mubr.bf16.mxu0 %v3507_v53  ;;  %1921 = vmatprep.mubr.bf16.mxu1 %v3509_v54  ;;  %v3601_v53 = vld [vmem:[%s3854_s28 + $0x3c] ss:$24 sps:$4 sm:$0xff]  }
  0x6e   : > { %2027 = vmatpush2.bf16.msra.mxu1 %v3537_v55  ;;  %2316 = vmatpush2.bf16.msra.mxu0 %v3538_v56  ;;  %v3603_v54 = vld [vmem:[%s3854_s28 + $0x44] ss:$24 sps:$4 sm:$0xff]   ;;  %v3605_v55 = vld [vmem:[%s3854_s28 + $0x38] ss:$24 sps:$4 sm:$0xff]  }
  0x6f   : > { %2028 = vmatprep.subr.bf16.mxu1 %v3796_v1  ;;  %2317 = vmatprep.subr.bf16.mxu0 %v3796_v1  ;;  %v3606_v56 = vld [vmem:[%s3854_s28 + $0x40] ss:$24 sps:$4 sm:$0xff]  }
  0x72   : > { %2029 = vmatpush2.bf16.msra.mxu1 %v3545_v57  ;;  %2318 = vmatpush2.bf16.msra.mxu0 %v3546_v58  ;;  %v3607_v57 = vld [vmem:[%s3854_s28 + $0x6c] ss:$24 sps:$4 sm:$0xff]  }
  0x73   : > { %2030 = vmatprep.subr.bf16.mxu1 %v3796_v1  ;;  %2319 = vmatprep.subr.bf16.mxu0 %v3796_v1  ;;  %v3609_v58 = vld [vmem:[%s3854_s28 + $0x74] ss:$24 sps:$4 sm:$0xff]  }
  0x74   : > { %1794 = vmatmul.mubr.bf16.gmra.mxu0 %v3511_v59  ;;  %1922 = vmatmul.mubr.bf16.gmra.mxu1 %v3512_v60  ;;  %v3611_v59 = vld [vmem:[%s3854_s28 + $0x68] ss:$24 sps:$4 sm:$0xff]  }
  0x75   : > { %1801 = vmatprep.mubr.bf16.mxu0 %v3515_v61  ;;  %1929 = vmatprep.mubr.bf16.mxu1 %v3517_v62  ;;  %v3612_v60 = vld [vmem:[%s3854_s28 + $0x70] ss:$24 sps:$4 sm:$0xff]   ;;  %v3613_v61 = vld [vmem:[%s3854_s28 + $0x9c] ss:$24 sps:$4 sm:$0xff]  }
  0x76   : > { %2031 = vmatpush2.bf16.msra.mxu1 %v3553_v63  ;;  %2320 = vmatpush2.bf16.msra.mxu0 %v3554_v0  ;;  %v3615_v62 = vld [vmem:[%s3854_s28 + $0xa4] ss:$24 sps:$4 sm:$0xff]   ;;  %v3617_v63 = vld [vmem:[%s3854_s28 + $0x98] ss:$24 sps:$4 sm:$0xff]  }
  0x77   : > { %2032 = vmatprep.subr.bf16.mxu1 %v3796_v1  ;;  %2321 = vmatprep.subr.bf16.mxu0 %v3796_v1  ;;  %v3618_v0 = vld [vmem:[%s3854_s28 + $0xa0] ss:$24 sps:$4 sm:$0xff]  }
  0x7a   : > { %2033 = vmatpush2.bf16.msra.mxu1 %v3561_v2  ;;  %2322 = vmatpush2.bf16.msra.mxu0 %v3562_v5  ;;  %v3619_v2 = vld [vmem:[%s3854_s28 + $0xcc] ss:$24 sps:$4 sm:$0xff]   ;;  %v3624_v5 = vld [vmem:[%s3854_s28 + $0xd0] ss:$24 sps:$4 sm:$0xff]  }
  0x7b   : > { %2034 = vmatprep.subr.bf16.mxu1 %v3796_v1  ;;  %2323 = vmatprep.subr.bf16.mxu0 %v3796_v1 }
  0x7c   : > { %1802 = vmatmul.mubr.bf16.gmra.mxu0 %v3519_v3  ;;  %1930 = vmatmul.mubr.bf16.gmra.mxu1 %v3520_v4  ;;  %v3621_v3 = vld [vmem:[%s3854_s28 + $0xd4] ss:$24 sps:$4 sm:$0xff]   ;;  %v3623_v4 = vld [vmem:[%s3854_s28 + $0xc8] ss:$24 sps:$4 sm:$0xff]  }
  0x7d   : > { %1809 = vmatprep.mubr.bf16.mxu0 %v3523_v6  ;;  %1937 = vmatprep.mubr.bf16.mxu1 %v3525_v7  ;;  %v3625_v6 = vld [vmem:[%s3854_s28 + $0xfc] ss:$24 sps:$4 sm:$0xff]  }
  0x7e   : > { %2035 = vmatpush2.bf16.msra.mxu1 %v3569_v8  ;;  %2324 = vmatpush2.bf16.msra.mxu0 %v3570_v9  ;;  %v3627_v7 = vld [vmem:[%s3854_s28 + $0x104] ss:$24 sps:$4 sm:$0xff]   ;;  %v3629_v8 = vld [vmem:[%s3854_s28 + $0xf8] ss:$24 sps:$4 sm:$0xff]  }
  0x7f   : > { %2036 = vmatprep.subr.bf16.mxu1 %v3796_v1  ;;  %2325 = vmatprep.subr.bf16.mxu0 %v3796_v1  ;;  %v3630_v9 = vld [vmem:[%s3854_s28 + $0x100] ss:$24 sps:$4 sm:$0xff]  }
  0x82   : > { %2037 = vmatpush2.bf16.msra.mxu1 %v3577_v10  ;;  %2326 = vmatpush2.bf16.msra.mxu0 %v3578_v11  ;;  %v3631_v10 = vld [vmem:[%s3854_s28 + $0x12c] ss:$24 sps:$4 sm:$0xff]  }
  0x83   : > { %2038 = vmatprep.subr.bf16.mxu1 %v3796_v1  ;;  %2327 = vmatprep.subr.bf16.mxu0 %v3796_v1  ;;  %v3633_v11 = vld [vmem:[%s3854_s28 + $0x134] ss:$24 sps:$4 sm:$0xff]  }
  0x84   : > { %1810 = vmatmul.mubr.bf16.gmra.mxu0 %v3527_v12  ;;  %1938 = vmatmul.mubr.bf16.gmra.mxu1 %v3528_v13  ;;  %v3635_v12 = vld [vmem:[%s3854_s28 + $0x128] ss:$24 sps:$4 sm:$0xff]  }
  0x85   : > { %1817 = vmatprep.mubr.bf16.mxu0 %v3531_v14  ;;  %1945 = vmatprep.mubr.bf16.mxu1 %v3533_v15  ;;  %v3636_v13 = vld [vmem:[%s3854_s28 + $0x130] ss:$24 sps:$4 sm:$0xff]   ;;  %v3637_v14 = vld [vmem:[%s3854_s28 + $0x15c] ss:$24 sps:$4 sm:$0xff]  }
  0x86   : > { %2039 = vmatpush2.bf16.msra.mxu1 %v3585_v16  ;;  %2328 = vmatpush2.bf16.msra.mxu0 %v3586_v17  ;;  %v3639_v15 = vld [vmem:[%s3854_s28 + $0x164] ss:$24 sps:$4 sm:$0xff]   ;;  %v3641_v16 = vld [vmem:[%s3854_s28 + $0x158] ss:$24 sps:$4 sm:$0xff]  }
  0x87   : > { %2040 = vmatprep.subr.bf16.mxu1 %v3796_v1  ;;  %2329 = vmatprep.subr.bf16.mxu0 %v3796_v1  ;;  %v3551_v1 = vld [vmem:[%s3854_s28 + $0x1e0] ss:$24 sps:$4 sm:$0xff]  }
  0x88   : > { %v3642_v17 = vld [vmem:[%s3854_s28 + $0x160] ss:$24 sps:$4 sm:$0xff]  }
  0x8a   : > { %2041 = vmatpush2.bf16.msra.mxu1 %v3593_v18  ;;  %2330 = vmatpush2.bf16.msra.mxu0 %v3594_v19  ;;  %v3643_v18 = vld [vmem:[%s3854_s28 + $0x18c] ss:$24 sps:$4 sm:$0xff]  }
  0x8b   : > { %v3645_v19 = vld [vmem:[%s3854_s28 + $0x194] ss:$24 sps:$4 sm:$0xff]  }
  0x8c   : > { %1818 = vmatmul.mubr.bf16.gmra.mxu0 %v3535_v20  ;;  %1946 = vmatmul.mubr.bf16.gmra.mxu1 %v3536_v21  ;;  %v3647_v20 = vld [vmem:[%s3854_s28 + $0x188] ss:$24 sps:$4 sm:$0xff]  }
  0x8d   : > { %1825 = vmatprep.mubr.bf16.mxu0 %v3539_v22  ;;  %1953 = vmatprep.mubr.bf16.mxu1 %v3541_v23  ;;  %v3648_v21 = vld [vmem:[%s3854_s28 + $0x190] ss:$24 sps:$4 sm:$0xff]   ;;  %v3649_v22 = vld [vmem:[%s3854_s28 + $0x1bc] ss:$24 sps:$4 sm:$0xff]  }
  0x8e   : > { %v3651_v23 = vld [vmem:[%s3854_s28 + $0x1c4] ss:$24 sps:$4 sm:$0xff]  }
  0x94   : > { %1826 = vmatmul.mubr.bf16.gmra.mxu0 %v3543_v24  ;;  %1954 = vmatmul.mubr.bf16.gmra.mxu1 %v3544_v25 }
  0x95   : > { %1833 = vmatprep.mubr.bf16.mxu0 %v3547_v26  ;;  %1961 = vmatprep.mubr.bf16.mxu1 %v3549_v27 }
  0x9c   : > { %1834 = vmatmul.mubr.bf16.gmra.mxu0 %v3551_v1  ;;  %1962 = vmatmul.mubr.bf16.gmra.mxu1 %v3552_v28 }
  0x9d   : > { %1841 = vmatprep.mubr.bf16.mxu0 %v3555_v29  ;;  %1969 = vmatprep.mubr.bf16.mxu1 %v3557_v30  ;;  %v3653_v29 = vld [vmem:[%s3854_s28 + $0x1b8] ss:$24 sps:$4 sm:$0xff]  }
  0x9e   : > { %v3654_v30 = vld [vmem:[%s3854_s28 + $0x1c0] ss:$24 sps:$4 sm:$0xff]  }
  0xa4   : > { %1842 = vmatmul.mubr.bf16.gmra.mxu0 %v3559_v31  ;;  %1970 = vmatmul.mubr.bf16.gmra.mxu1 %v3560_v32  ;;  %v3655_v31 = vld [vmem:[%s3854_s28 + $0x1ec] ss:$24 sps:$4 sm:$0xff]  }
  0xa5   : > { %1849 = vmatprep.mubr.bf16.mxu0 %v3563_v33  ;;  %1977 = vmatprep.mubr.bf16.mxu1 %v3565_v34  ;;  %v3657_v32 = vld [vmem:[%s3854_s28 + $0x1f4] ss:$24 sps:$4 sm:$0xff]  }
  0xac   : > { %1850 = vmatmul.mubr.bf16.gmra.mxu0 %v3567_v35  ;;  %1978 = vmatmul.mubr.bf16.gmra.mxu1 %v3568_v36 }
  0xad   : > { %1857 = vmatprep.mubr.bf16.mxu0 %v3571_v37  ;;  %1985 = vmatprep.mubr.bf16.mxu1 %v3573_v38 }
  0xb4   : > { %1858 = vmatmul.mubr.bf16.gmra.mxu0 %v3575_v39  ;;  %1986 = vmatmul.mubr.bf16.gmra.mxu1 %v3576_v40 }
  0xb5   : > { %1865 = vmatprep.mubr.bf16.mxu0 %v3579_v41  ;;  %1993 = vmatprep.mubr.bf16.mxu1 %v3581_v42  ;;  %v3659_v41 = vld [vmem:[%s3854_s28 + $0x1e8] ss:$24 sps:$4 sm:$0xff]  }
  0xb6   : > { %v3660_v42 = vld [vmem:[%s3854_s28 + $0x1f0] ss:$24 sps:$4 sm:$0xff]  }
  0xbc   : > { %1866 = vmatmul.mubr.bf16.gmra.mxu0 %v3583_v43  ;;  %1994 = vmatmul.mubr.bf16.gmra.mxu1 %v3584_v44  ;;  %v3661_v43 = vld [vmem:[%s3854_s28 + $0x21c] ss:$24 sps:$4 sm:$0xff]  }
  0xbd   : > { %1873 = vmatprep.mubr.bf16.mxu0 %v3587_v45  ;;  %2001 = vmatprep.mubr.bf16.mxu1 %v3589_v46  ;;  %v3663_v44 = vld [vmem:[%s3854_s28 + $0x224] ss:$24 sps:$4 sm:$0xff]  }
  0xc4   : > { %1874 = vmatmul.mubr.bf16.gmra.mxu0 %v3591_v47  ;;  %2002 = vmatmul.mubr.bf16.gmra.mxu1 %v3592_v48 }
  0xc5   : > { %2042 = vmatprep.mubr.bf16.mxu1 %v3597_v49  ;;  %2331 = vmatprep.mubr.bf16.mxu0 %v3600_v50 }
  0xcc   : > { %2043 = vmatmul.mubr.bf16.vlgmr.msra.gmra.mxu1 %v3595_v51  ;;  %2332 = vmatmul.mubr.bf16.vlgmr.msra.gmra.mxu0 %v3598_v52 }
  0xcd   : > { %2050 = vmatprep.mubr.bf16.mxu1 %v3601_v53  ;;  %2339 = vmatprep.mubr.bf16.mxu0 %v3603_v54  ;;  %v3665_v53 = vld [vmem:[%s3854_s28 + $0x218] ss:$24 sps:$4 sm:$0xff]  }
  0xce   : > { %v3666_v54 = vld [vmem:[%s3854_s28 + $0x220] ss:$24 sps:$4 sm:$0xff]  }
  0xd4   : > { %2051 = vmatmul.mubr.bf16.gmra.mxu1 %v3605_v55  ;;  %2340 = vmatmul.mubr.bf16.gmra.mxu0 %v3606_v56  ;;  %v3669_v55 = vld [vmem:[%s3854_s28 + $0x24c] ss:$24 sps:$4 sm:$0xff]  }
  0xd5   : > { %2058 = vmatprep.mubr.bf16.mxu1 %v3607_v57  ;;  %2347 = vmatprep.mubr.bf16.mxu0 %v3609_v58  ;;  %v3672_v56 = vld [vmem:[%s3854_s28 + $0x254] ss:$24 sps:$4 sm:$0xff]  }
  0xdc   : > { %2059 = vmatmul.mubr.bf16.gmra.mxu1 %v3611_v59  ;;  %2348 = vmatmul.mubr.bf16.gmra.mxu0 %v3612_v60 }
  0xdd   : > { %2066 = vmatprep.mubr.bf16.mxu1 %v3613_v61  ;;  %2355 = vmatprep.mubr.bf16.mxu0 %v3615_v62 }
  0xe4   : > { %2067 = vmatmul.mubr.bf16.gmra.mxu1 %v3617_v63  ;;  %2356 = vmatmul.mubr.bf16.gmra.mxu0 %v3618_v0 }
  0xe5   : > { %2074 = vmatprep.mubr.bf16.mxu1 %v3619_v2  ;;  %2363 = vmatprep.mubr.bf16.mxu0 %v3621_v3  ;;  %v3667_v2 = vld [vmem:[%s3854_s28 + $0x248] ss:$24 sps:$4 sm:$0xff]  }
  0xe6   : > { %v3670_v3 = vld [vmem:[%s3854_s28 + $0x250] ss:$24 sps:$4 sm:$0xff]  }
  0xec   : > { %2075 = vmatmul.mubr.bf16.gmra.mxu1 %v3623_v4  ;;  %2364 = vmatmul.mubr.bf16.gmra.mxu0 %v3624_v5  ;;  %v3675_v4 = vld [vmem:[%s3854_s28 + $0x27c] ss:$24 sps:$4 sm:$0xff]  }
  0xed   : > { %2082 = vmatprep.mubr.bf16.mxu1 %v3625_v6  ;;  %2371 = vmatprep.mubr.bf16.mxu0 %v3627_v7  ;;  %v3678_v5 = vld [vmem:[%s3854_s28 + $0x284] ss:$24 sps:$4 sm:$0xff]  }
  0xf4   : > { %2083 = vmatmul.mubr.bf16.gmra.mxu1 %v3629_v8  ;;  %2372 = vmatmul.mubr.bf16.gmra.mxu0 %v3630_v9 }
  0xf5   : > { %2090 = vmatprep.mubr.bf16.mxu1 %v3631_v10  ;;  %2379 = vmatprep.mubr.bf16.mxu0 %v3633_v11 }
  0xfc   : > { %2091 = vmatmul.mubr.bf16.gmra.mxu1 %v3635_v12  ;;  %2380 = vmatmul.mubr.bf16.gmra.mxu0 %v3636_v13 }
  0xfd   : > { %2098 = vmatprep.mubr.bf16.mxu1 %v3637_v14  ;;  %2387 = vmatprep.mubr.bf16.mxu0 %v3639_v15  ;;  %v3673_v14 = vld [vmem:[%s3854_s28 + $0x278] ss:$24 sps:$4 sm:$0xff]  }
  0xfe   : > { %v3676_v15 = vld [vmem:[%s3854_s28 + $0x280] ss:$24 sps:$4 sm:$0xff]  }
 0x104   : > { %2099 = vmatmul.mubr.bf16.gmra.mxu1 %v3641_v16  ;;  %2388 = vmatmul.mubr.bf16.gmra.mxu0 %v3642_v17  ;;  %v3681_v16 = vld [vmem:[%s3854_s28 + $0x2ac] ss:$24 sps:$4 sm:$0xff]  }
 0x105   : > { %2106 = vmatprep.mubr.bf16.mxu1 %v3643_v18  ;;  %2395 = vmatprep.mubr.bf16.mxu0 %v3645_v19  ;;  %v3684_v17 = vld [vmem:[%s3854_s28 + $0x2b4] ss:$24 sps:$4 sm:$0xff]  }
 0x10c   : > { %v4143_v24 = vpop.f32.mrf.mxu0  ;;  %v4145_v25 = vpop.f32.mrf.mxu1  ;;  %2107 = vmatmul.mubr.bf16.gmra.mxu1 %v3647_v20  ;;  %2396 = vmatmul.mubr.bf16.gmra.mxu0 %v3648_v21 }
 0x10d   : > { %2114 = vmatprep.mubr.bf16.mxu1 %v3649_v22  ;;  %2403 = vmatprep.mubr.bf16.mxu0 %v3651_v23 }
 0x10e   : > { %v1757_v26 = vpop.f32.mrf.mxu0  ;;  %v1885_v27 = vpop.f32.mrf.mxu1 }
 0x110   : > { %v4147_v1 = vpop.f32.mrf.mxu0  ;;  %v4149_v28 = vpop.f32.mrf.mxu1 }
 0x112   : > { %v1760_v33 = vpop.f32.mrf.mxu0  ;;  %v1888_v34 = vpop.f32.mrf.mxu1 }
 0x114   : > { %v4155_v35 = vpop.f32.mrf.mxu0  ;;  %v4157_v36 = vpop.f32.mrf.mxu1  ;;  %2115 = vmatmul.mubr.bf16.gmra.mxu1 %v3653_v29  ;;  %2404 = vmatmul.mubr.bf16.gmra.mxu0 %v3654_v30  ;;  %v3679_v29 = vld [vmem:[%s3854_s28 + $0x2a8] ss:$24 sps:$4 sm:$0xff]  }
 0x115   : > { %2122 = vmatprep.mubr.bf16.mxu1 %v3655_v31  ;;  %2411 = vmatprep.mubr.bf16.mxu0 %v3657_v32  ;;  %v3682_v30 = vld [vmem:[%s3854_s28 + $0x2b0] ss:$24 sps:$4 sm:$0xff]   ;;  %v3687_v31 = vld [vmem:[%s3854_s28 + $0x2dc] ss:$24 sps:$4 sm:$0xff]  }
 0x116   : > { %v1765_v37 = vpop.f32.mrf.mxu0  ;;  %v1893_v38 = vpop.f32.mrf.mxu1  ;;  %v3690_v32 = vld [vmem:[%s3854_s28 + $0x2e4] ss:$24 sps:$4 sm:$0xff]  }
 0x118   : > { %v4159_v39 = vpop.f32.mrf.mxu0  ;;  %v4161_v40 = vpop.f32.mrf.mxu1 }
 0x11a   : > { %v1768_v45 = vpop.f32.mrf.mxu0  ;;  %v1896_v46 = vpop.f32.mrf.mxu1 }
 0x11b   : > { %v3685_v45 = vld [vmem:[%s3854_s28 + $0x2d8] ss:$24 sps:$4 sm:$0xff]  }
 0x11c   : > { %v4167_v47 = vpop.f32.mrf.mxu0  ;;  %v4169_v48 = vpop.f32.mrf.mxu1  ;;  %2123 = vmatmul.mubr.bf16.gmra.mxu1 %v3659_v41  ;;  %2412 = vmatmul.mubr.bf16.gmra.mxu0 %v3660_v42  ;;  %v3688_v46 = vld [vmem:[%s3854_s28 + $0x2e0] ss:$24 sps:$4 sm:$0xff]  }
 0x11d   : > { %2130 = vmatprep.mubr.bf16.mxu1 %v3661_v43  ;;  %2419 = vmatprep.mubr.bf16.mxu0 %v3663_v44 }
 0x11e   : > { %v1773_v49 = vpop.f32.mrf.mxu0  ;;  %v1901_v50 = vpop.f32.mrf.mxu1 }
 0x11f   : > { %v3693_v49 = vld [vmem:[%s3854_s28 + $0x30c] ss:$24 sps:$4 sm:$0xff]  }
 0x120   : > { %v4171_v51 = vpop.f32.mrf.mxu0  ;;  %v4173_v52 = vpop.f32.mrf.mxu1  ;;  %v3696_v50 = vld [vmem:[%s3854_s28 + $0x314] ss:$24 sps:$4 sm:$0xff]  }
 0x122   : > { %v1776_v57 = vpop.f32.mrf.mxu0  ;;  %v1904_v58 = vpop.f32.mrf.mxu1 }
 0x124   : > { %v4179_v59 = vpop.f32.mrf.mxu0  ;;  %v4181_v60 = vpop.f32.mrf.mxu1  ;;  %2131 = vmatmul.mubr.bf16.gmra.mxu1 %v3665_v53  ;;  %2420 = vmatmul.mubr.bf16.gmra.mxu0 %v3666_v54 }
 0x125   : > { %2138 = vmatprep.mubr.bf16.mxu1 %v3669_v55  ;;  %2427 = vmatprep.mubr.bf16.mxu0 %v3672_v56 }
 0x126   : > { %v1781_v61 = vpop.f32.mrf.mxu0  ;;  %v1909_v62 = vpop.f32.mrf.mxu1 }
 0x128   : > { %v4183_v63 = vpop.f32.mrf.mxu0  ;;  %v4185_v0 = vpop.f32.mrf.mxu1 }
 0x12a   : > { %v1784_v6 = vpop.f32.mrf.mxu0  ;;  %v1912_v7 = vpop.f32.mrf.mxu1 }
 0x12c   : > { %v4191_v8 = vpop.f32.mrf.mxu0  ;;  %v4193_v9 = vpop.f32.mrf.mxu1  ;;  %2139 = vmatmul.mubr.bf16.gmra.mxu1 %v3667_v2  ;;  %2428 = vmatmul.mubr.bf16.gmra.mxu0 %v3670_v3  ;;  %v3691_v2 = vld [vmem:[%s3854_s28 + $0x308] ss:$24 sps:$4 sm:$0xff]  }
 0x12d   : > { %2146 = vmatprep.mubr.bf16.mxu1 %v3675_v4  ;;  %2435 = vmatprep.mubr.bf16.mxu0 %v3678_v5  ;;  %v3694_v3 = vld [vmem:[%s3854_s28 + $0x310] ss:$24 sps:$4 sm:$0xff]   ;;  %v3699_v4 = vld [vmem:[%s3854_s28 + $0x33c] ss:$24 sps:$4 sm:$0xff]  }
 0x12e   : > { %v1789_v10 = vpop.f32.mrf.mxu0  ;;  %v1917_v11 = vpop.f32.mrf.mxu1  ;;  %v3702_v5 = vld [vmem:[%s3854_s28 + $0x344] ss:$24 sps:$4 sm:$0xff]  }
 0x130   : > { %v4195_v12 = vpop.f32.mrf.mxu0  ;;  %v4197_v13 = vpop.f32.mrf.mxu1 }
 0x132   : > { %v1792_v18 = vpop.f32.mrf.mxu0  ;;  %v1920_v19 = vpop.f32.mrf.mxu1 }
 0x133   : > { %v3697_v18 = vld [vmem:[%s3854_s28 + $0x338] ss:$24 sps:$4 sm:$0xff]  }
 0x134   : > { %v4203_v20 = vpop.f32.mrf.mxu0  ;;  %v4205_v21 = vpop.f32.mrf.mxu1  ;;  %2147 = vmatmul.mubr.bf16.gmra.mxu1 %v3673_v14  ;;  %2436 = vmatmul.mubr.bf16.gmra.mxu0 %v3676_v15  ;;  %v3700_v19 = vld [vmem:[%s3854_s28 + $0x340] ss:$24 sps:$4 sm:$0xff]  }
 0x135   : > { %2154 = vmatprep.mubr.bf16.mxu1 %v3681_v16  ;;  %2443 = vmatprep.mubr.bf16.mxu0 %v3684_v17 }
 0x136   : > { %v1797_v22 = vpop.f32.mrf.mxu0  ;;  %v1925_v23 = vpop.f32.mrf.mxu1 }
 0x137   : > { %v3705_v22 = vld [vmem:[%s3854_s28 + $0x36c] ss:$24 sps:$4 sm:$0xff]  }
 0x138   : > { %v4207_v26 = vpop.f32.mrf.mxu0  ;;  %v4209_v27 = vpop.f32.mrf.mxu1  ;;  %v3708_v23 = vld [vmem:[%s3854_s28 + $0x374] ss:$24 sps:$4 sm:$0xff]  }
 0x13a   : > { %v1800_v33 = vpop.f32.mrf.mxu0  ;;  %v1928_v34 = vpop.f32.mrf.mxu1 }
 0x13c   : > { %v4215_v37 = vpop.f32.mrf.mxu0  ;;  %v4217_v38 = vpop.f32.mrf.mxu1  ;;  %2155 = vmatmul.mubr.bf16.gmra.mxu1 %v3679_v29  ;;  %2444 = vmatmul.mubr.bf16.gmra.mxu0 %v3682_v30 }
 0x13d   : > { %2162 = vmatprep.mubr.bf16.mxu1 %v3687_v31  ;;  %2451 = vmatprep.mubr.bf16.mxu0 %v3690_v32 }
 0x13e   : > { %v1805_v41 = vpop.f32.mrf.mxu0  ;;  %v1933_v42 = vpop.f32.mrf.mxu1 }
 0x140   : > { %v4219_v43 = vpop.f32.mrf.mxu0  ;;  %v4221_v44 = vpop.f32.mrf.mxu1 }
 0x141   : > { %4640 = vst [vmem:[#allocation2_spill] sm:$0xff] %v4221_v44  ;;  %v3756_v44 = vld [vmem:[%s3854_s28 + $0x4f4] ss:$24 sps:$4 sm:$0xff]  }
 0x142   : > { %v1808_v53 = vpop.f32.mrf.mxu0  ;;  %v1936_v54 = vpop.f32.mrf.mxu1 }
 0x144   : > { %v4227_v55 = vpop.f32.mrf.mxu0  ;;  %v4229_v56 = vpop.f32.mrf.mxu1  ;;  %2163 = vmatmul.mubr.bf16.gmra.mxu1 %v3685_v45  ;;  %2452 = vmatmul.mubr.bf16.gmra.mxu0 %v3688_v46  ;;  %v3703_v45 = vld [vmem:[%s3854_s28 + $0x368] ss:$24 sps:$4 sm:$0xff]  }
 0x145   : > { %4641 = vst [vmem:[#allocation3_spill] sm:$0xff] %v4229_v56  ;;  %2170 = vmatprep.mubr.bf16.mxu1 %v3693_v49  ;;  %2459 = vmatprep.mubr.bf16.mxu0 %v3696_v50  ;;  %v3706_v46 = vld [vmem:[%s3854_s28 + $0x370] ss:$24 sps:$4 sm:$0xff]   ;;  %v3711_v49 = vld [vmem:[%s3854_s28 + $0x39c] ss:$24 sps:$4 sm:$0xff]  }
 0x146   : > { %v1813_v57 = vpop.f32.mrf.mxu0  ;;  %v1941_v58 = vpop.f32.mrf.mxu1  ;;  %v3714_v50 = vld [vmem:[%s3854_s28 + $0x3a4] ss:$24 sps:$4 sm:$0xff]  }
 0x147   : > { %v3753_v56 = vld [vmem:[%s3854_s28 + $0x4ec] ss:$24 sps:$4 sm:$0xff]  }
 0x148   : > { %v4231_v61 = vpop.f32.mrf.mxu0  ;;  %v4233_v62 = vpop.f32.mrf.mxu1 }
 0x149   : > { %4642 = vst [vmem:[#allocation4_spill] sm:$0xff] %v4233_v62 }
 0x14a   : > { %v1816_v6 = vpop.f32.mrf.mxu0  ;;  %v1944_v7 = vpop.f32.mrf.mxu1 }
 0x14b   : > { %v3709_v6 = vld [vmem:[%s3854_s28 + $0x398] ss:$24 sps:$4 sm:$0xff]  }
 0x14c   : > { %v4239_v10 = vpop.f32.mrf.mxu0  ;;  %v4241_v11 = vpop.f32.mrf.mxu1  ;;  %2171 = vmatmul.mubr.bf16.gmra.mxu1 %v3691_v2  ;;  %2460 = vmatmul.mubr.bf16.gmra.mxu0 %v3694_v3  ;;  %v3712_v7 = vld [vmem:[%s3854_s28 + $0x3a0] ss:$24 sps:$4 sm:$0xff]  }
 0x14d   : > { %4643 = vst [vmem:[#allocation5_spill] sm:$0xff] %v4241_v11  ;;  %2178 = vmatprep.mubr.bf16.mxu1 %v3699_v4  ;;  %2467 = vmatprep.mubr.bf16.mxu0 %v3702_v5  ;;  %v3748_v11 = vld [vmem:[%s3854_s28 + $0x4c0] ss:$24 sps:$4 sm:$0xff]  }
 0x14e   : > { %v1821_v14 = vpop.f32.mrf.mxu0  ;;  %v1949_v15 = vpop.f32.mrf.mxu1 }
 0x14f   : > { %v3717_v14 = vld [vmem:[%s3854_s28 + $0x3cc] ss:$24 sps:$4 sm:$0xff]  }
 0x150   : > { %v4243_v16 = vpop.f32.mrf.mxu0  ;;  %v4245_v17 = vpop.f32.mrf.mxu1  ;;  %v3720_v15 = vld [vmem:[%s3854_s28 + $0x3d4] ss:$24 sps:$4 sm:$0xff]  }
 0x151   : > { %4644 = vst [vmem:[#allocation6_spill] sm:$0xff] %v4245_v17 }
 0x152   : > { %v1824_v29 = vpop.f32.mrf.mxu0  ;;  %v1952_v30 = vpop.f32.mrf.mxu1 }
 0x154   : > { %v4251_v31 = vpop.f32.mrf.mxu0  ;;  %v4253_v32 = vpop.f32.mrf.mxu1  ;;  %2179 = vmatmul.mubr.bf16.gmra.mxu1 %v3697_v18  ;;  %2468 = vmatmul.mubr.bf16.gmra.mxu0 %v3700_v19 }
 0x155   : > { %4645 = vst [vmem:[#allocation7_spill] sm:$0xff] %v4253_v32  ;;  %2186 = vmatprep.mubr.bf16.mxu1 %v3705_v22  ;;  %2475 = vmatprep.mubr.bf16.mxu0 %v3708_v23 }
 0x156   : > { %v1829_v33 = vpop.f32.mrf.mxu0  ;;  %v1957_v34 = vpop.f32.mrf.mxu1 }
 0x158   : > { %v4255_v41 = vpop.f32.mrf.mxu0  ;;  %v4257_v42 = vpop.f32.mrf.mxu1 }
 0x159   : > { %4646 = vst [vmem:[#allocation8_spill] sm:$0xff] %v4257_v42  ;;  %v3747_v42 = vld [vmem:[%s3854_s28 + $0x4bc] ss:$24 sps:$4 sm:$0xff]  }
 0x15a   : > { %v1832_v53 = vpop.f32.mrf.mxu0  ;;  %v1960_v54 = vpop.f32.mrf.mxu1 }
 0x15c   : > { %v4263_v57 = vpop.f32.mrf.mxu0  ;;  %v4265_v58 = vpop.f32.mrf.mxu1  ;;  %2187 = vmatmul.mubr.bf16.gmra.mxu1 %v3703_v45  ;;  %2476 = vmatmul.mubr.bf16.gmra.mxu0 %v3706_v46  ;;  %v3715_v45 = vld [vmem:[%s3854_s28 + $0x3c8] ss:$24 sps:$4 sm:$0xff]  }
 0x15d   : > { %4647 = vst [vmem:[#allocation9_spill] sm:$0xff] %v4265_v58  ;;  %2194 = vmatprep.mubr.bf16.mxu1 %v3711_v49  ;;  %2483 = vmatprep.mubr.bf16.mxu0 %v3714_v50  ;;  %v3718_v46 = vld [vmem:[%s3854_s28 + $0x3d0] ss:$24 sps:$4 sm:$0xff]   ;;  %v3723_v49 = vld [vmem:[%s3854_s28 + $0x3fc] ss:$24 sps:$4 sm:$0xff]  }
 0x15e   : > { %v1837_v2 = vpop.f32.mrf.mxu0  ;;  %v1965_v3 = vpop.f32.mrf.mxu1  ;;  %v3726_v50 = vld [vmem:[%s3854_s28 + $0x404] ss:$24 sps:$4 sm:$0xff]   ;;  %v3742_v58 = vld [vmem:[%s3854_s28 + $0x490] ss:$24 sps:$4 sm:$0xff]  }
 0x160   : > { %v4267_v4 = vpop.f32.mrf.mxu0  ;;  %v4269_v5 = vpop.f32.mrf.mxu1 }
 0x161   : > { %4648 = vst [vmem:[#allocation10_spill] sm:$0xff] %v4269_v5 }
 0x162   : > { %v1840_v18 = vpop.f32.mrf.mxu0  ;;  %v1968_v19 = vpop.f32.mrf.mxu1 }
 0x163   : > { %v3721_v18 = vld [vmem:[%s3854_s28 + $0x3f8] ss:$24 sps:$4 sm:$0xff]  }
 0x164   : > { %v4275_v22 = vpop.f32.mrf.mxu0  ;;  %v4277_v23 = vpop.f32.mrf.mxu1  ;;  %2195 = vmatmul.mubr.bf16.gmra.mxu1 %v3709_v6  ;;  %2484 = vmatmul.mubr.bf16.gmra.mxu0 %v3712_v7  ;;  %v3724_v19 = vld [vmem:[%s3854_s28 + $0x400] ss:$24 sps:$4 sm:$0xff]  }
 0x165   : > { %4649 = vst [vmem:[#allocation11_spill] sm:$0xff] %v4277_v23  ;;  %2202 = vmatprep.mubr.bf16.mxu1 %v3717_v14  ;;  %2491 = vmatprep.mubr.bf16.mxu0 %v3720_v15  ;;  %v3736_v23 = vld [vmem:[%s3854_s28 + $0x460] ss:$24 sps:$4 sm:$0xff]  }
 0x166   : > { %v1845_v29 = vpop.f32.mrf.mxu0  ;;  %v1973_v30 = vpop.f32.mrf.mxu1 }
 0x167   : > { %v3729_v29 = vld [vmem:[%s3854_s28 + $0x42c] ss:$24 sps:$4 sm:$0xff]  }
 0x168   : > { %v4279_v33 = vpop.f32.mrf.mxu0  ;;  %v4281_v34 = vpop.f32.mrf.mxu1  ;;  %v3732_v30 = vld [vmem:[%s3854_s28 + $0x434] ss:$24 sps:$4 sm:$0xff]  }
 0x169   : > { %4650 = vst [vmem:[#allocation12_spill] sm:$0xff] %v4281_v34 }
 0x16a   : > { %v1848_v53 = vpop.f32.mrf.mxu0  ;;  %v1976_v54 = vpop.f32.mrf.mxu1 }
 0x16c   : > { %v4287_v2 = vpop.f32.mrf.mxu0  ;;  %v4289_v3 = vpop.f32.mrf.mxu1  ;;  %2203 = vmatmul.mubr.bf16.gmra.mxu1 %v3715_v45  ;;  %2492 = vmatmul.mubr.bf16.gmra.mxu0 %v3718_v46 }
 0x16d   : > { %4651 = vst [vmem:[#allocation13_spill] sm:$0xff] %v4289_v3  ;;  %2210 = vmatprep.mubr.bf16.mxu1 %v3723_v49  ;;  %2499 = vmatprep.mubr.bf16.mxu0 %v3726_v50  ;;  %v3730_v3 = vld [vmem:[%s3854_s28 + $0x430] ss:$24 sps:$4 sm:$0xff]  }
 0x16e   : > { %v1853_v6 = vpop.f32.mrf.mxu0  ;;  %v1981_v7 = vpop.f32.mrf.mxu1 }
 0x170   : > { %v4291_v14 = vpop.f32.mrf.mxu0  ;;  %v4293_v15 = vpop.f32.mrf.mxu1 }
 0x171   : > { %4652 = vst [vmem:[#allocation14_spill] sm:$0xff] %v4293_v15  ;;  %v3727_v15 = vld [vmem:[%s3854_s28 + $0x428] ss:$24 sps:$4 sm:$0xff]  }
 0x172   : > { %v1856_v53 = vpop.f32.mrf.mxu0  ;;  %v1984_v54 = vpop.f32.mrf.mxu1 }
 0x173   : > { %v3735_v53 = vld [vmem:[%s3854_s28 + $0x45c] ss:$24 sps:$4 sm:$0xff]  }
 0x174   : > { %v4299_v45 = vpop.f32.mrf.mxu0  ;;  %v4301_v46 = vpop.f32.mrf.mxu1  ;;  %2211 = vmatmul.mubr.bf16.gmra.mxu1 %v3721_v18  ;;  %2500 = vmatmul.mubr.bf16.gmra.mxu0 %v3724_v19  ;;  %v3738_v54 = vld [vmem:[%s3854_s28 + $0x464] ss:$24 sps:$4 sm:$0xff]  }
 0x175   : > { %4653 = vst [vmem:[#allocation15_spill] sm:$0xff] %v4301_v46  ;;  %2218 = vmatprep.mubr.bf16.mxu1 %v3729_v29  ;;  %2507 = vmatprep.mubr.bf16.mxu0 %v3732_v30 }
 0x176   : > { %v1861_v49 = vpop.f32.mrf.mxu0  ;;  %v1989_v50 = vpop.f32.mrf.mxu1 }
 0x178   : > { %v4303_v6 = vpop.f32.mrf.mxu0  ;;  %v4305_v7 = vpop.f32.mrf.mxu1 }
 0x179   : > { %4654 = vst [vmem:[#allocation16_spill] sm:$0xff] %v4305_v7  ;;  %v3733_v7 = vld [vmem:[%s3854_s28 + $0x458] ss:$24 sps:$4 sm:$0xff]  }
 0x17a   : > { %v1864_v34 = vpop.f32.mrf.mxu0  ;;  %v1992_v46 = vpop.f32.mrf.mxu1 }
 0x17b   : > { %v3741_v34 = vld [vmem:[%s3854_s28 + $0x48c] ss:$24 sps:$4 sm:$0xff]  }
 0x17c   : > { %v4311_v18 = vpop.f32.mrf.mxu0  ;;  %v4313_v19 = vpop.f32.mrf.mxu1  ;;  %2219 = vmatmul.mubr.bf16.gmra.mxu1 %v3727_v15  ;;  %2508 = vmatmul.mubr.bf16.gmra.mxu0 %v3730_v3  ;;  %v3744_v46 = vld [vmem:[%s3854_s28 + $0x494] ss:$24 sps:$4 sm:$0xff]  }
 0x17d   : > { %4655 = vst [vmem:[#allocation17_spill] sm:$0xff] %v4313_v19  ;;  %2226 = vmatprep.mubr.bf16.mxu1 %v3735_v53  ;;  %2515 = vmatprep.mubr.bf16.mxu0 %v3738_v54 }
 0x17e   : > { %v1869_v29 = vpop.f32.mrf.mxu0  ;;  %v1997_v30 = vpop.f32.mrf.mxu1 }
 0x180   : > { %v4315_v49 = vpop.f32.mrf.mxu0  ;;  %v4317_v50 = vpop.f32.mrf.mxu1 }
 0x181   : > { %4656 = vst [vmem:[#allocation18_spill] sm:$0xff] %v4317_v50  ;;  %v3739_v50 = vld [vmem:[%s3854_s28 + $0x488] ss:$24 sps:$4 sm:$0xff]  }
 0x182   : > { %v1872_v5 = vpop.f32.mrf.mxu0  ;;  %v2000_v19 = vpop.f32.mrf.mxu1 }
 0x183   : > { %v3750_v5 = vld [vmem:[%s3854_s28 + $0x4c4] ss:$24 sps:$4 sm:$0xff]   ;;  %v4338_v19 = vld [vmem:[%s4638_s2] ss:$0 sm:$0xff] }
 0x184   : > { %v4323_v15 = vpop.f32.mrf.mxu0  ;;  %v4325_v3 = vpop.f32.mrf.mxu1  ;;  %2227 = vmatmul.mubr.bf16.gmra.mxu1 %v3733_v7  ;;  %2516 = vmatmul.mubr.bf16.gmra.mxu0 %v3736_v23 }
 0x185   : > { %4657 = vst [vmem:[#allocation19_spill] sm:$0xff] %v4325_v3  ;;  %2234 = vmatprep.mubr.bf16.mxu1 %v3741_v34  ;;  %2523 = vmatprep.mubr.bf16.mxu0 %v3744_v46  ;;  %v1756_v34 = vadd.f32 %v4338_v19, %v4143_v24  ;;  %v3745_v24 = vld [vmem:[%s3854_s28 + $0x4b8] ss:$24 sps:$4 sm:$0xff]  }
 0x186   : > { %v1877_v53 = vpop.f32.mrf.mxu0  ;;  %v2005_v54 = vpop.f32.mrf.mxu1 }
 0x188   : > { %v4327_v29 = vpop.f32.mrf.mxu0  ;;  %v4329_v30 = vpop.f32.mrf.mxu1 }
 0x189   : > { %4658 = vst [vmem:[#allocation20_spill] sm:$0xff] %v4329_v30 }
 0x18a   : > { %v1880_v7 = vpop.f32.mrf.mxu0  ;;  %v2008_v23 = vpop.f32.mrf.mxu1 }
 0x18b   : > { %v1759_v7 = vadd.f32 %v4338_v19, %v4147_v1  ;;  %v1764_v1 = vadd.f32 %v4338_v19, %v4155_v35  ;;  %v1767_v35 = vadd.f32 %v4338_v19, %v4159_v39 }
 0x18c   : > { %v2044_v46 = vpop.f32.mrf.mxu1  ;;  %2235 = vmatmul.mubr.bf16.gmra.mxu1 %v3739_v50  ;;  %v2333_v53 = vpop.f32.mrf.mxu0  ;;  %2524 = vmatmul.mubr.bf16.gmra.mxu0 %v3742_v58 }
 0x18d   : > { %v2045_v54 = vadd.f32 %v2044_v46, %v1756_v34  ;;  %2242 = vmatprep.mubr.bf16.mxu1 %v3747_v42  ;;  %2531 = vmatprep.mubr.bf16.mxu0 %v3750_v5 }
 0x18e   : > { %v2046_v30 = vpop.f32.mrf.mxu1  ;;  %v2335_v3 = vpop.f32.mrf.mxu0 }
 0x18f   : > { %v2334_v23 = vadd.f32 %v2333_v53, %v2045_v54 }
 0x190   : > { %v2047_v32 = vpop.f32.mrf.mxu1  ;;  %v2336_v17 = vpop.f32.mrf.mxu0 }
 0x191   : > { %v2588_v62 = vmax.f32 %v2334_v23, 0.0  ;;  %v2048_v50 = vadd.f32 %v2047_v32, %v1759_v7 }
 0x192   : > { %v2049_v42 = vpop.f32.mrf.mxu1  ;;  %v2338_v58 = vpop.f32.mrf.mxu0 }
 0x193   : > { %v3345_v3 = vpack.c.bf16 %v2588_v62, %v2588_v62  ;;  %v2337_v30 = vadd.f32 %v2336_v17, %v2048_v50  ;;  %v3759_v58 = vld [vmem:[%s3854_s28 + $0x51c] ss:$24 sps:$4 sm:$0xff]  }
 0x194   : > { %v2052_v5 = vpop.f32.mrf.mxu1  ;;  %2243 = vmatmul.mubr.bf16.gmra.mxu1 %v3745_v24  ;;  %v2341_v32 = vpop.f32.mrf.mxu0  ;;  %2532 = vmatmul.mubr.bf16.gmra.mxu0 %v3748_v11  ;;  %v3751_v24 = vld [vmem:[%s3854_s28 + $0x4e8] ss:$24 sps:$4 sm:$0xff]  }
 0x195   : > { %2909 = vst.msk [vmem:[%s4352_s23] sm:$0xf] %vm2908_vm0, %v3345_v3  ;;  %v2589_v34 = vmax.f32 %v2337_v30, 0.0  ;;  %v2053_v46 = vadd.f32 %v2052_v5, %v1764_v1  ;;  %2250 = vmatprep.mubr.bf16.mxu1 %v3753_v56  ;;  %2539 = vmatprep.mubr.bf16.mxu0 %v3756_v44  ;;  %v3754_v11 = vld [vmem:[%s3854_s28 + $0x4f0] ss:$24 sps:$4 sm:$0xff]   ;;  %v1772_v3 = vadd.f32 %v4338_v19, %v4167_v47 }
 0x196   : > { %v2054_v53 = vpop.f32.mrf.mxu1  ;;  %v2343_v54 = vpop.f32.mrf.mxu0  ;;  %v3762_v1 = vld [vmem:[%s3854_s28 + $0x524] ss:$24 sps:$4 sm:$0xff]   ;;  %v1775_v47 = vadd.f32 %v4338_v19, %v4171_v51 }
 0x197   : > { %v3346_v62 = vpack.c.bf16 %v2589_v34, %v2589_v34  ;;  %v2342_v17 = vadd.f32 %v2341_v32, %v2053_v46 }
 0x198   : > { %v2055_v7 = vpop.f32.mrf.mxu1  ;;  %v2344_v23 = vpop.f32.mrf.mxu0 }
 0x199   : > { %2910 = vst.msk [vmem:[%s4352_s23 + $0x4] sm:$0xf] %vm2908_vm0, %v3346_v62  ;;  %v2590_v50 = vmax.f32 %v2342_v17, 0.0  ;;  %v2056_v42 = vadd.f32 %v2055_v7, %v1767_v35 }
 0x19a   : > { %v2057_v56 = vpop.f32.mrf.mxu1  ;;  %v2346_v44 = vpop.f32.mrf.mxu0 }
 0x19b   : > { %v3347_v30 = vpack.c.bf16 %v2590_v50, %v2590_v50  ;;  %v2345_v39 = vadd.f32 %v2344_v23, %v2056_v42  ;;  %v3757_v23 = vld [vmem:[%s3854_s28 + $0x518] ss:$24 sps:$4 sm:$0xff]   ;;  %v3765_v42 = vld [vmem:[%s3854_s28 + $0x54c] ss:$24 sps:$4 sm:$0xff]   ;;  %v1780_v44 = vadd.f32 %v4338_v19, %v4179_v59  ;;  %v1783_v59 = vadd.f32 %v4338_v19, %v4183_v63 }
 0x19c   : > { %v2060_v5 = vpop.f32.mrf.mxu1  ;;  %2251 = vmatmul.mubr.bf16.gmra.mxu1 %v3751_v24  ;;  %v2349_v32 = vpop.f32.mrf.mxu0  ;;  %2540 = vmatmul.mubr.bf16.gmra.mxu0 %v3754_v11  ;;  %v3760_v24 = vld [vmem:[%s3854_s28 + $0x520] ss:$24 sps:$4 sm:$0xff]   ;;  %v3768_v56 = vld [vmem:[%s3854_s28 + $0x554] ss:$24 sps:$4 sm:$0xff]  }
 0x19d   : > { %2911 = vst.msk [vmem:[%s4352_s23 + $0x8] sm:$0xf] %vm2908_vm0, %v3347_v30  ;;  %v2591_v34 = vmax.f32 %v2345_v39, 0.0  ;;  %v2061_v46 = vadd.f32 %v2060_v5, %v1772_v3  ;;  %2258 = vmatprep.mubr.bf16.mxu1 %v3759_v58  ;;  %2547 = vmatprep.mubr.bf16.mxu0 %v3762_v1 }
 0x19e   : > { %v2062_v53 = vpop.f32.mrf.mxu1  ;;  %v2351_v54 = vpop.f32.mrf.mxu0 }
 0x19f   : > { %v3348_v35 = vpack.c.bf16 %v2591_v34, %v2591_v34  ;;  %v2350_v62 = vadd.f32 %v2349_v32, %v2061_v46 }
 0x1a0   : > { %v2063_v17 = vpop.f32.mrf.mxu1  ;;  %v2352_v7 = vpop.f32.mrf.mxu0 }
 0x1a1   : > { %2912 = vst.msk [vmem:[%s4352_s23 + $0xc] sm:$0xf] %vm2908_vm0, %v3348_v35  ;;  %v2592_v11 = vmax.f32 %v2350_v62, 0.0  ;;  %v2064_v50 = vadd.f32 %v2063_v17, %v1775_v47  ;;  %v3763_v62 = vld [vmem:[%s3854_s28 + $0x548] ss:$24 sps:$4 sm:$0xff]  }
 0x1a2   : > { %v2065_v58 = vpop.f32.mrf.mxu1  ;;  %v2354_v1 = vpop.f32.mrf.mxu0  ;;  %v3766_v17 = vld [vmem:[%s3854_s28 + $0x550] ss:$24 sps:$4 sm:$0xff]  }
 0x1a3   : > { %v3349_v3 = vpack.c.bf16 %v2592_v11, %v2592_v11  ;;  %v2353_v51 = vadd.f32 %v2352_v7, %v2064_v50  ;;  %v3774_v11 = vld [vmem:[%s3854_s28 + $0x584] ss:$24 sps:$4 sm:$0xff]  }
 0x1a4   : > { %v2068_v30 = vpop.f32.mrf.mxu1  ;;  %2259 = vmatmul.mubr.bf16.gmra.mxu1 %v3757_v23  ;;  %v2357_v39 = vpop.f32.mrf.mxu0  ;;  %2548 = vmatmul.mubr.bf16.gmra.mxu0 %v3760_v24  ;;  %v3771_v24 = vld [vmem:[%s3854_s28 + $0x57c] ss:$24 sps:$4 sm:$0xff]  }
 0x1a5   : > { %2913 = vst.msk [vmem:[%s4352_s23 + $0x10] sm:$0xf] %vm2908_vm0, %v3349_v3  ;;  %v2593_v5 = vmax.f32 %v2353_v51, 0.0  ;;  %v2069_v32 = vadd.f32 %v2068_v30, %v1780_v44  ;;  %2266 = vmatprep.mubr.bf16.mxu1 %v3765_v42  ;;  %2555 = vmatprep.mubr.bf16.mxu0 %v3768_v56  ;;  %v1788_v56 = vadd.f32 %v4338_v19, %v4191_v8 }
 0x1a6   : > { %v2070_v34 = vpop.f32.mrf.mxu1  ;;  %v2359_v46 = vpop.f32.mrf.mxu0  ;;  %v1791_v8 = vadd.f32 %v4338_v19, %v4195_v12 }
 0x1a7   : > { %v3350_v53 = vpack.c.bf16 %v2593_v5, %v2593_v5  ;;  %v2358_v54 = vadd.f32 %v2357_v39, %v2069_v32 }
 0x1a8   : > { %v2071_v47 = vpop.f32.mrf.mxu1  ;;  %v2360_v35 = vpop.f32.mrf.mxu0 }
 0x1a9   : > { %2914 = vst.msk [vmem:[%s4352_s23 + $0x14] sm:$0xf] %vm2908_vm0, %v3350_v53  ;;  %v2594_v7 = vmax.f32 %v2358_v54, 0.0  ;;  %v2072_v23 = vadd.f32 %v2071_v47, %v1783_v59  ;;  %v3769_v59 = vld [vmem:[%s3854_s28 + $0x578] ss:$24 sps:$4 sm:$0xff]  }
 0x1aa   : > { %v2073_v50 = vpop.f32.mrf.mxu1  ;;  %v2362_v42 = vpop.f32.mrf.mxu0  ;;  %v3772_v53 = vld [vmem:[%s3854_s28 + $0x580] ss:$24 sps:$4 sm:$0xff]  }
 0x1ab   : > { %v3351_v58 = vpack.c.bf16 %v2594_v7, %v2594_v7  ;;  %v2361_v63 = vadd.f32 %v2360_v35, %v2072_v23  ;;  %v3777_v35 = vld [vmem:[%s3854_s28 + $0x5ac] ss:$24 sps:$4 sm:$0xff]   ;;  %v1796_v23 = vadd.f32 %v4338_v19, %v4203_v20  ;;  %v1799_v20 = vadd.f32 %v4338_v19, %v4207_v26 }
 0x1ac   : > { %v2076_v1 = vpop.f32.mrf.mxu1  ;;  %2267 = vmatmul.mubr.bf16.gmra.mxu1 %v3763_v62  ;;  %v2365_v44 = vpop.f32.mrf.mxu0  ;;  %2556 = vmatmul.mubr.bf16.gmra.mxu0 %v3766_v17  ;;  %v3780_v62 = vld [vmem:[%s3854_s28 + $0x5b4] ss:$24 sps:$4 sm:$0xff]  }
 0x1ad   : > { %2915 = vst.msk [vmem:[%s4352_s23 + $0x18] sm:$0xf] %vm2908_vm0, %v3351_v58  ;;  %v2595_v3 = vmax.f32 %v2361_v63, 0.0  ;;  %v2077_v51 = vadd.f32 %v2076_v1, %v1788_v56  ;;  %2274 = vmatprep.mubr.bf16.mxu1 %v3771_v24  ;;  %2563 = vmatprep.mubr.bf16.mxu0 %v3774_v11 }
 0x1ae   : > { %v2078_v30 = vpop.f32.mrf.mxu1  ;;  %v2367_v39 = vpop.f32.mrf.mxu0 }
 0x1af   : > { %v3352_v5 = vpack.c.bf16 %v2595_v3, %v2595_v3  ;;  %v2366_v32 = vadd.f32 %v2365_v44, %v2077_v51  ;;  %v3775_v30 = vld [vmem:[%s3854_s28 + $0x5a8] ss:$24 sps:$4 sm:$0xff]  }
 0x1b0   : > { %v2079_v34 = vpop.f32.mrf.mxu1  ;;  %v2368_v46 = vpop.f32.mrf.mxu0  ;;  %v3778_v39 = vld [vmem:[%s3854_s28 + $0x5b0] ss:$24 sps:$4 sm:$0xff]  }
 0x1b1   : > { %2916 = vst.msk [vmem:[%s4352_s23 + $0x1c] sm:$0xf] %vm2908_vm0, %v3352_v5  ;;  %v2596_v54 = vmax.f32 %v2366_v32, 0.0  ;;  %v2080_v47 = vadd.f32 %v2079_v34, %v1791_v8  ;;  %v3783_v32 = vld [vmem:[%s3854_s28 + $0x5dc] ss:$24 sps:$4 sm:$0xff]  }
 0x1b2   : > { %v2081_v17 = vpop.f32.mrf.mxu1  ;;  %v2370_v7 = vpop.f32.mrf.mxu0  ;;  %v3786_v34 = vld [vmem:[%s3854_s28 + $0x5e4] ss:$24 sps:$4 sm:$0xff]  }
 0x1b3   : > { %v3353_v24 = vpack.c.bf16 %v2596_v54, %v2596_v54  ;;  %v2369_v12 = vadd.f32 %v2368_v46, %v2080_v47 }
 0x1b4   : > { %v2084_v11 = vpop.f32.mrf.mxu1  ;;  %2275 = vmatmul.mubr.bf16.gmra.mxu1 %v3769_v59  ;;  %v2373_v50 = vpop.f32.mrf.mxu0  ;;  %2564 = vmatmul.mubr.bf16.gmra.mxu0 %v3772_v53  ;;  %v1804_v53 = vadd.f32 %v4338_v19, %v4215_v37  ;;  %v1807_v37 = vadd.f32 %v4338_v19, %v4219_v43 }
 0x1b5   : > { %2917 = vst.msk [vmem:[%s4352_s23 + $0x20] sm:$0xf] %vm2908_vm0, %v3353_v24  ;;  %v2597_v42 = vmax.f32 %v2369_v12, 0.0  ;;  %v2085_v56 = vadd.f32 %v2084_v11, %v1796_v23  ;;  %2282 = vmatprep.mubr.bf16.mxu1 %v3777_v35  ;;  %2571 = vmatprep.mubr.bf16.mxu0 %v3780_v62 }
 0x1b6   : > { %v2086_v58 = vpop.f32.mrf.mxu1  ;;  %v2375_v63 = vpop.f32.mrf.mxu0 }
 0x1b7   : > { %v3354_v1 = vpack.c.bf16 %v2597_v42, %v2597_v42  ;;  %v2374_v44 = vadd.f32 %v2373_v50, %v2085_v56  ;;  %v3781_v42 = vld [vmem:[%s3854_s28 + $0x5d8] ss:$24 sps:$4 sm:$0xff]  }
 0x1b8   : > { %v2087_v3 = vpop.f32.mrf.mxu1  ;;  %v2376_v51 = vpop.f32.mrf.mxu0  ;;  %v3784_v56 = vld [vmem:[%s3854_s28 + $0x5e0] ss:$24 sps:$4 sm:$0xff]  }
 0x1b9   : > { %2918 = vst.msk [vmem:[%s4352_s23 + $0x24] sm:$0xf] %vm2908_vm0, %v3354_v1  ;;  %v2598_v8 = vmax.f32 %v2374_v44, 0.0  ;;  %v2088_v5 = vadd.f32 %v2087_v3, %v1799_v20  ;;  %v1812_v44 = vadd.f32 %v4338_v19, %v4227_v55 }
 0x1ba   : > { %v2089_v46 = vpop.f32.mrf.mxu1  ;;  %v2378_v59 = vpop.f32.mrf.mxu0 }
 0x1bb   : > { %v3355_v54 = vpack.c.bf16 %v2598_v8, %v2598_v8  ;;  %v2377_v26 = vadd.f32 %v2376_v51, %v2088_v5 }
 0x1bc   : > { %v2092_v47 = vpop.f32.mrf.mxu1  ;;  %2283 = vmatmul.mubr.bf16.gmra.mxu1 %v3775_v30  ;;  %v2381_v35 = vpop.f32.mrf.mxu0  ;;  %2572 = vmatmul.mubr.bf16.gmra.mxu0 %v3778_v39 }
 0x1bd   : > { %2919 = vst.msk [vmem:[%s4352_s23 + $0x28] sm:$0xf] %vm2908_vm0, %v3355_v54  ;;  %v2599_v62 = vmax.f32 %v2377_v26, 0.0  ;;  %v2093_v17 = vadd.f32 %v2092_v47, %v1804_v53  ;;  %2290 = vmatprep.mubr.bf16.mxu1 %v3783_v32  ;;  %2579 = vmatprep.mubr.bf16.mxu0 %v3786_v34  ;;  %v1815_v34 = vadd.f32 %v4338_v19, %v4231_v61 }
 0x1be   : > { %v2094_v7 = vpop.f32.mrf.mxu1  ;;  %v2383_v23 = vpop.f32.mrf.mxu0 }
 0x1bf   : > { %v3356_v24 = vpack.c.bf16 %v2599_v62, %v2599_v62  ;;  %v2382_v12 = vadd.f32 %v2381_v35, %v2093_v17  ;;  %v1820_v62 = vadd.f32 %v4338_v19, %v4239_v10 }
 0x1c0   : > { %v2095_v11 = vpop.f32.mrf.mxu1  ;;  %v2384_v50 = vpop.f32.mrf.mxu0 }
 0x1c1   : > { %2920 = vst.msk [vmem:[%s4352_s23 + $0x2c] sm:$0xf] %vm2908_vm0, %v3356_v24  ;;  %v2600_v58 = vmax.f32 %v2382_v12, 0.0  ;;  %v2096_v63 = vadd.f32 %v2095_v11, %v1807_v37 }
 0x1c2   : > { %v2097_v20 = vpop.f32.mrf.mxu1  ;;  %v2386_v1 = vpop.f32.mrf.mxu0 }
 0x1c3   : > { %v3357_v3 = vpack.c.bf16 %v2600_v58, %v2600_v58  ;;  %v2385_v51 = vadd.f32 %v2384_v50, %v2096_v63  ;;  %v1823_v50 = vadd.f32 %v4338_v19, %v4243_v16 }
 0x1c4   : > { %v2100_v43 = vpop.f32.mrf.mxu1  ;;  %2291 = vmatmul.mubr.bf16.gmra.mxu1 %v3781_v42  ;;  %v2389_v30 = vpop.f32.mrf.mxu0  ;;  %2580 = vmatmul.mubr.bf16.gmra.mxu0 %v3784_v56 }
 0x1c5   : > { %2921 = vst.msk [vmem:[%s4352_s23 + $0x30] sm:$0xf] %vm2908_vm0, %v3357_v3  ;;  %v2601_v39 = vmax.f32 %v2385_v51, 0.0  ;;  %v2101_v8 = vadd.f32 %v2100_v43, %v1812_v44  ;;  %v1828_v3 = vadd.f32 %v4338_v19, %v4251_v31 }
 0x1c6   : > { %v2102_v5 = vpop.f32.mrf.mxu1  ;;  %v2391_v32 = vpop.f32.mrf.mxu0 }
 0x1c7   : > { %v3358_v46 = vpack.c.bf16 %v2601_v39, %v2601_v39  ;;  %v2390_v59 = vadd.f32 %v2389_v30, %v2101_v8 }
 0x1c8   : > { %v2103_v55 = vpop.f32.mrf.mxu1  ;;  %v2392_v53 = vpop.f32.mrf.mxu0 }
 0x1c9   : > { %2922 = vst.msk [vmem:[%s4352_s23 + $0x34] sm:$0xf] %vm2908_vm0, %v3358_v46  ;;  %v2602_v54 = vmax.f32 %v2390_v59, 0.0  ;;  %v2104_v26 = vadd.f32 %v2103_v55, %v1815_v34  ;;  %v1831_v34 = vadd.f32 %v4338_v19, %v4255_v41 }
 0x1ca   : > { %v2105_v47 = vpop.f32.mrf.mxu1  ;;  %v2394_v35 = vpop.f32.mrf.mxu0 }
 0x1cb   : > { %v3359_v17 = vpack.c.bf16 %v2602_v54, %v2602_v54  ;;  %v2393_v7 = vadd.f32 %v2392_v53, %v2104_v26  ;;  %v1836_v35 = vadd.f32 %v4338_v19, %v4263_v57 }
 0x1cc   : > { %v2108_v23 = vpop.f32.mrf.mxu1  ;;  %v2397_v37 = vpop.f32.mrf.mxu0 }
 0x1cd   : > { %2923 = vst.msk [vmem:[%s4352_s23 + $0x38] sm:$0xf] %vm2908_vm0, %v3359_v17  ;;  %v2603_v61 = vmax.f32 %v2393_v7, 0.0  ;;  %v2109_v24 = vadd.f32 %v2108_v23, %v1820_v62 }
 0x1ce   : > { %v2110_v12 = vpop.f32.mrf.mxu1  ;;  %v2399_v11 = vpop.f32.mrf.mxu0 }
 0x1cf   : > { %v3360_v42 = vpack.c.bf16 %v2603_v61, %v2603_v61  ;;  %v2398_v56 = vadd.f32 %v2397_v37, %v2109_v24  ;;  %v1839_v12 = vadd.f32 %v4338_v19, %v4267_v4 }
 0x1d0   : > { %v2111_v58 = vpop.f32.mrf.mxu1  ;;  %v2400_v63 = vpop.f32.mrf.mxu0 }
 0x1d1   : > { %2924 = vst.msk [vmem:[%s4352_s23 + $0x3c] sm:$0xf] %vm2908_vm0, %v3360_v42  ;;  %v2604_v10 = vmax.f32 %v2398_v56, 0.0  ;;  %v2112_v20 = vadd.f32 %v2111_v58, %v1823_v50 }
 0x1d2   : > { %v2113_v1 = vpop.f32.mrf.mxu1  ;;  %v2402_v44 = vpop.f32.mrf.mxu0 }
 0x1d3   : > { %v3361_v51 = vpack.c.bf16 %v2604_v10, %v2604_v10  ;;  %v2401_v43 = vadd.f32 %v2400_v63, %v2112_v20  ;;  %v1844_v20 = vadd.f32 %v4338_v19, %v4275_v22 }
 0x1d4   : > { %v2116_v30 = vpop.f32.mrf.mxu1  ;;  %v2405_v39 = vpop.f32.mrf.mxu0 }
 0x1d5   : > { %2925 = vst.msk [vmem:[%s4352_s23 + $0x40] sm:$0xf] %vm2908_vm0, %v3361_v51  ;;  %v2605_v16 = vmax.f32 %v2401_v43, 0.0  ;;  %v2117_v8 = vadd.f32 %v2116_v30, %v1828_v3 }
 0x1d6   : > { %v2118_v5 = vpop.f32.mrf.mxu1  ;;  %v2407_v32 = vpop.f32.mrf.mxu0 }
 0x1d7   : > { %v3362_v46 = vpack.c.bf16 %v2605_v16, %v2605_v16  ;;  %v2406_v59 = vadd.f32 %v2405_v39, %v2117_v8  ;;  %v1847_v16 = vadd.f32 %v4338_v19, %v4279_v33 }
 0x1d8   : > { %v2119_v55 = vpop.f32.mrf.mxu1  ;;  %v2408_v53 = vpop.f32.mrf.mxu0 }
 0x1d9   : > { %2926 = vst.msk [vmem:[%s4352_s23 + $0x44] sm:$0xf] %vm2908_vm0, %v3362_v46  ;;  %v2606_v31 = vmax.f32 %v2406_v59, 0.0  ;;  %v2120_v54 = vadd.f32 %v2119_v55, %v1831_v34 }
 0x1da   : > { %v2121_v26 = vpop.f32.mrf.mxu1  ;;  %v2410_v47 = vpop.f32.mrf.mxu0 }
 0x1db   : > { %v3363_v62 = vpack.c.bf16 %v2606_v31, %v2606_v31  ;;  %v2409_v17 = vadd.f32 %v2408_v53, %v2120_v54  ;;  %v1852_v53 = vadd.f32 %v4338_v19, %v4287_v2 }
 0x1dc   : > { %v2124_v7 = vpop.f32.mrf.mxu1  ;;  %v2413_v23 = vpop.f32.mrf.mxu0 }
 0x1dd   : > { %2927 = vst.msk [vmem:[%s4352_s23 + $0x48] sm:$0xf] %vm2908_vm0, %v3363_v62  ;;  %v2607_v41 = vmax.f32 %v2409_v17, 0.0  ;;  %v2125_v37 = vadd.f32 %v2124_v7, %v1836_v35  ;;  %v1855_v7 = vadd.f32 %v4338_v19, %v4291_v14 }
 0x1de   : > { %v2126_v61 = vpop.f32.mrf.mxu1  ;;  %v2415_v24 = vpop.f32.mrf.mxu0 }
 0x1df   : > { %v3364_v11 = vpack.c.bf16 %v2607_v41, %v2607_v41  ;;  %v2414_v50 = vadd.f32 %v2413_v23, %v2125_v37 }
 0x1e0   : > { %v2127_v42 = vpop.f32.mrf.mxu1  ;;  %v2416_v56 = vpop.f32.mrf.mxu0 }
 0x1e1   : > { %2928 = vst.msk [vmem:[%s4352_s23 + $0x4c] sm:$0xf] %vm2908_vm0, %v3364_v11  ;;  %v2608_v57 = vmax.f32 %v2414_v50, 0.0  ;;  %v2128_v58 = vadd.f32 %v2127_v42, %v1839_v12  ;;  %v1860_v50 = vadd.f32 %v4338_v19, %v4299_v45 }
 0x1e2   : > { %v2129_v63 = vpop.f32.mrf.mxu1  ;;  %v2418_v10 = vpop.f32.mrf.mxu0 }
 0x1e3   : > { %v3365_v1 = vpack.c.bf16 %v2608_v57, %v2608_v57  ;;  %v2417_v44 = vadd.f32 %v2416_v56, %v2128_v58 }
 0x1e4   : > { %v2132_v3 = vpop.f32.mrf.mxu1  ;;  %v2421_v51 = vpop.f32.mrf.mxu0 }
 0x1e5   : > { %2929 = vst.msk [vmem:[%s4352_s23 + $0x50] sm:$0xf] %vm2908_vm0, %v3365_v1  ;;  %v2609_v4 = vmax.f32 %v2417_v44, 0.0  ;;  %v2133_v43 = vadd.f32 %v2132_v3, %v1844_v20  ;;  %v1863_v1 = vadd.f32 %v4338_v19, %v4303_v6 }
 0x1e6   : > { %v2134_v30 = vpop.f32.mrf.mxu1  ;;  %v2423_v39 = vpop.f32.mrf.mxu0 }
 0x1e7   : > { %v3366_v8 = vpack.c.bf16 %v2609_v4, %v2609_v4  ;;  %v2422_v5 = vadd.f32 %v2421_v51, %v2133_v43 }
 0x1e8   : > { %v2135_v32 = vpop.f32.mrf.mxu1  ;;  %v2424_v34 = vpop.f32.mrf.mxu0 }
 0x1e9   : > { %2930 = vst.msk [vmem:[%s4352_s23 + $0x54] sm:$0xf] %vm2908_vm0, %v3366_v8  ;;  %v2610_v22 = vmax.f32 %v2422_v5, 0.0  ;;  %v2136_v46 = vadd.f32 %v2135_v32, %v1847_v16  ;;  %v1868_v16 = vadd.f32 %v4338_v19, %v4311_v18 }
 0x1ea   : > { %v2137_v59 = vpop.f32.mrf.mxu1  ;;  %v2426_v55 = vpop.f32.mrf.mxu0 }
 0x1eb   : > { %v3367_v31 = vpack.c.bf16 %v2610_v22, %v2610_v22  ;;  %v2425_v54 = vadd.f32 %v2424_v34, %v2136_v46  ;;  %v1871_v55 = vadd.f32 %v4338_v19, %v4315_v49 }
 0x1ec   : > { %v2140_v26 = vpop.f32.mrf.mxu1  ;;  %v2429_v47 = vpop.f32.mrf.mxu0 }
 0x1ed   : > { %2931 = vst.msk [vmem:[%s4352_s23 + $0x58] sm:$0xf] %vm2908_vm0, %v3367_v31  ;;  %v2611_v33 = vmax.f32 %v2425_v54, 0.0  ;;  %v2141_v35 = vadd.f32 %v2140_v26, %v1852_v53 }
 0x1ee   : > { %v2142_v62 = vpop.f32.mrf.mxu1  ;;  %v2431_v17 = vpop.f32.mrf.mxu0 }
 0x1ef   : > { %v3368_v23 = vpack.c.bf16 %v2611_v33, %v2611_v33  ;;  %v2430_v41 = vadd.f32 %v2429_v47, %v2141_v35  ;;  %v1876_v62 = vadd.f32 %v4338_v19, %v4323_v15 }
 0x1f0   : > { %v2143_v37 = vpop.f32.mrf.mxu1  ;;  %v2432_v61 = vpop.f32.mrf.mxu0 }
 0x1f1   : > { %2932 = vst.msk [vmem:[%s4352_s23 + $0x5c] sm:$0xf] %vm2908_vm0, %v3368_v23  ;;  %v2612_v2 = vmax.f32 %v2430_v41, 0.0  ;;  %v2144_v24 = vadd.f32 %v2143_v37, %v1855_v7 }
 0x1f2   : > { %v2145_v12 = vpop.f32.mrf.mxu1  ;;  %v2434_v11 = vpop.f32.mrf.mxu0 }
 0x1f3   : > { %v3369_v42 = vpack.c.bf16 %v2612_v2, %v2612_v2  ;;  %v2433_v56 = vadd.f32 %v2432_v61, %v2144_v24  ;;  %v1879_v24 = vadd.f32 %v4338_v19, %v4327_v29 }
 0x1f4   : > { %v2148_v57 = vpop.f32.mrf.mxu1  ;;  %v2437_v58 = vpop.f32.mrf.mxu0 }
 0x1f5   : > { %2933 = vst.msk [vmem:[%s4352_s23 + $0x60] sm:$0xf] %vm2908_vm0, %v3369_v42  ;;  %v2613_v14 = vmax.f32 %v2433_v56, 0.0  ;;  %v2149_v63 = vadd.f32 %v2148_v57, %v1860_v50 }
 0x1f6   : > { %v2150_v10 = vpop.f32.mrf.mxu1  ;;  %v2439_v20 = vpop.f32.mrf.mxu0 }
 0x1f7   : > { %v3370_v44 = vpack.c.bf16 %v2613_v14, %v2613_v14  ;;  %v2438_v3 = vadd.f32 %v2437_v58, %v2149_v63  ;;  %v1884_v14 = vadd.f32 %v4338_v19, %v4145_v25 }
 0x1f8   : > { %v2151_v51 = vpop.f32.mrf.mxu1  ;;  %v2440_v4 = vpop.f32.mrf.mxu0 }
 0x1f9   : > { %2934 = vst.msk [vmem:[%s4352_s23 + $0x64] sm:$0xf] %vm2908_vm0, %v3370_v44  ;;  %v2614_v45 = vmax.f32 %v2438_v3, 0.0  ;;  %v2152_v43 = vadd.f32 %v2151_v51, %v1863_v1 }
 0x1fa   : > { %v2153_v30 = vpop.f32.mrf.mxu1  ;;  %v2442_v39 = vpop.f32.mrf.mxu0 }
 0x1fb   : > { %v3371_v8 = vpack.c.bf16 %v2614_v45, %v2614_v45  ;;  %v2441_v5 = vadd.f32 %v2440_v4, %v2152_v43  ;;  %v1887_v4 = vadd.f32 %v4338_v19, %v4149_v28 }
 0x1fc   : > { %v2156_v32 = vpop.f32.mrf.mxu1  ;;  %v2445_v34 = vpop.f32.mrf.mxu0 }
 0x1fd   : > { %2935 = vst.msk [vmem:[%s4352_s23 + $0x68] sm:$0xf] %vm2908_vm0, %v3371_v8  ;;  %v2615_v6 = vmax.f32 %v2441_v5, 0.0  ;;  %v2157_v22 = vadd.f32 %v2156_v32, %v1868_v16  ;;  %v1892_v32 = vadd.f32 %v4338_v19, %v4157_v36 }
 0x1fe   : > { %v2158_v46 = vpop.f32.mrf.mxu1  ;;  %v2447_v59 = vpop.f32.mrf.mxu0 }
 0x1ff   : > { %v3372_v53 = vpack.c.bf16 %v2615_v6, %v2615_v6  ;;  %v2446_v31 = vadd.f32 %v2445_v34, %v2157_v22 }
 0x200   : > { %v2159_v54 = vpop.f32.mrf.mxu1  ;;  %v2448_v26 = vpop.f32.mrf.mxu0 }
 0x201   : > { %2936 = vst.msk [vmem:[%s4352_s23 + $0x6c] sm:$0xf] %vm2908_vm0, %v3372_v53  ;;  %v2616_v18 = vmax.f32 %v2446_v31, 0.0  ;;  %v2160_v47 = vadd.f32 %v2159_v54, %v1871_v55  ;;  %v1895_v31 = vadd.f32 %v4338_v19, %v4161_v40 }
 0x202   : > { %v2161_v33 = vpop.f32.mrf.mxu1  ;;  %v2450_v35 = vpop.f32.mrf.mxu0 }
 0x203   : > { %v3373_v17 = vpack.c.bf16 %v2616_v18, %v2616_v18  ;;  %v2449_v7 = vadd.f32 %v2448_v26, %v2160_v47 }
 0x204   : > { %v2164_v23 = vpop.f32.mrf.mxu1  ;;  %v2453_v41 = vpop.f32.mrf.mxu0 }
 0x205   : > { %2937 = vst.msk [vmem:[%s4352_s23 + $0x70] sm:$0xf] %vm2908_vm0, %v3373_v17  ;;  %v2617_v49 = vmax.f32 %v2449_v7, 0.0  ;;  %v2165_v37 = vadd.f32 %v2164_v23, %v1876_v62  ;;  %v1900_v17 = vadd.f32 %v4338_v19, %v4169_v48 }
 0x206   : > { %v2166_v61 = vpop.f32.mrf.mxu1  ;;  %v2455_v2 = vpop.f32.mrf.mxu0 }
 0x207   : > { %v3374_v12 = vpack.c.bf16 %v2617_v49, %v2617_v49  ;;  %v2454_v11 = vadd.f32 %v2453_v41, %v2165_v37 }
 0x208   : > { %v2167_v50 = vpop.f32.mrf.mxu1  ;;  %v2456_v42 = vpop.f32.mrf.mxu0 }
 0x209   : > { %2938 = vst.msk [vmem:[%s4352_s23 + $0x74] sm:$0xf] %vm2908_vm0, %v3374_v12  ;;  %v2618_v15 = vmax.f32 %v2454_v11, 0.0  ;;  %v2168_v56 = vadd.f32 %v2167_v50, %v1879_v24  ;;  %v1903_v24 = vadd.f32 %v4338_v19, %v4173_v52 }
 0x20a   : > { %v2169_v57 = vpop.f32.mrf.mxu1  ;;  %v2458_v58 = vpop.f32.mrf.mxu0 }
 0x20b   : > { %v3375_v63 = vpack.c.bf16 %v2618_v15, %v2618_v15  ;;  %v2457_v10 = vadd.f32 %v2456_v42, %v2168_v56  ;;  %v1908_v58 = vadd.f32 %v4338_v19, %v4181_v60 }
 0x20c   : > { %v2172_v20 = vpop.f32.mrf.mxu1  ;;  %v2461_v1 = vpop.f32.mrf.mxu0 }
 0x20d   : > { %2939 = vst.msk [vmem:[%s4352_s23 + $0x78] sm:$0xf] %vm2908_vm0, %v3375_v63  ;;  %v2619_v29 = vmax.f32 %v2457_v10, 0.0  ;;  %v2173_v44 = vadd.f32 %v2172_v20, %v1884_v14 }
 0x20e   : > { %v2174_v3 = vpop.f32.mrf.mxu1  ;;  %v2463_v51 = vpop.f32.mrf.mxu0 }
 0x20f   : > { %v3376_v45 = vpack.c.bf16 %v2619_v29, %v2619_v29  ;;  %v2462_v43 = vadd.f32 %v2461_v1, %v2173_v44  ;;  %v1911_v3 = vadd.f32 %v4338_v19, %v4185_v0 }
 0x210   : > { %v2175_v30 = vpop.f32.mrf.mxu1  ;;  %v2464_v39 = vpop.f32.mrf.mxu0 }
 0x211   : > { %2940 = vst.msk [vmem:[%s4352_s23 + $0x7c] sm:$0xf] %vm2908_vm0, %v3376_v45  ;;  %v2620_v25 = vmax.f32 %v2462_v43, 0.0  ;;  %v2176_v16 = vadd.f32 %v2175_v30, %v1887_v4 }
 0x212   : > { %v2177_v8 = vpop.f32.mrf.mxu1  ;;  %v2466_v5 = vpop.f32.mrf.mxu0 }
 0x213   : > { %v3377_v34 = vpack.c.bf16 %v2620_v25, %v2620_v25  ;;  %v2465_v6 = vadd.f32 %v2464_v39, %v2176_v16  ;;  %v1916_v16 = vadd.f32 %v4338_v19, %v4193_v9 }
 0x214   : > { %v2180_v22 = vpop.f32.mrf.mxu1  ;;  %v2469_v46 = vpop.f32.mrf.mxu0 }
 0x215   : > { %2941 = vst.msk [vmem:[%s4352_s23 + $0x80] sm:$0xf] %vm2908_vm0, %v3377_v34  ;;  %v2621_v28 = vmax.f32 %v2465_v6, 0.0  ;;  %v2181_v59 = vadd.f32 %v2180_v22, %v1892_v32 }
 0x216   : > { %v2182_v55 = vpop.f32.mrf.mxu1  ;;  %v2471_v53 = vpop.f32.mrf.mxu0 }
 0x217   : > { %v3378_v54 = vpack.c.bf16 %v2621_v28, %v2621_v28  ;;  %v2470_v26 = vadd.f32 %v2469_v46, %v2181_v59  ;;  %v1919_v28 = vadd.f32 %v4338_v19, %v4197_v13 }
 0x218   : > { %v2183_v18 = vpop.f32.mrf.mxu1  ;;  %v2472_v47 = vpop.f32.mrf.mxu0 }
 0x219   : > { %2942 = vst.msk [vmem:[%s4352_s23 + $0x84] sm:$0xf] %vm2908_vm0, %v3378_v54  ;;  %v2622_v36 = vmax.f32 %v2470_v26, 0.0  ;;  %v2184_v33 = vadd.f32 %v2183_v18, %v1895_v31 }
 0x21a   : > { %v2185_v35 = vpop.f32.mrf.mxu1  ;;  %v2474_v62 = vpop.f32.mrf.mxu0 }
 0x21b   : > { %v3379_v7 = vpack.c.bf16 %v2622_v36, %v2622_v36  ;;  %v2473_v23 = vadd.f32 %v2472_v47, %v2184_v33  ;;  %v1924_v47 = vadd.f32 %v4338_v19, %v4205_v21 }
 0x21c   : > { %v2188_v41 = vpop.f32.mrf.mxu1  ;;  %v2477_v49 = vpop.f32.mrf.mxu0 }
 0x21d   : > { %2943 = vst.msk [vmem:[%s4352_s23 + $0x88] sm:$0xf] %vm2908_vm0, %v3379_v7  ;;  %v2623_v40 = vmax.f32 %v2473_v23, 0.0  ;;  %v2189_v37 = vadd.f32 %v2188_v41, %v1900_v17  ;;  %v1927_v41 = vadd.f32 %v4338_v19, %v4209_v27 }
 0x21e   : > { %v2190_v61 = vpop.f32.mrf.mxu1  ;;  %v2479_v2 = vpop.f32.mrf.mxu0 }
 0x21f   : > { %v3380_v12 = vpack.c.bf16 %v2623_v40, %v2623_v40  ;;  %v2478_v11 = vadd.f32 %v2477_v49, %v2189_v37 }
 0x220   : > { %v2191_v50 = vpop.f32.mrf.mxu1  ;;  %v2480_v42 = vpop.f32.mrf.mxu0 }
 0x221   : > { %2944 = vst.msk [vmem:[%s4352_s23 + $0x8c] sm:$0xf] %vm2908_vm0, %v3380_v12  ;;  %v2624_v48 = vmax.f32 %v2478_v11, 0.0  ;;  %v2192_v15 = vadd.f32 %v2191_v50, %v1903_v24  ;;  %v1932_v11 = vadd.f32 %v4338_v19, %v4217_v38 }
 0x222   : > { %v2193_v56 = vpop.f32.mrf.mxu1  ;;  %v2482_v57 = vpop.f32.mrf.mxu0 }
 0x223   : > { %v3381_v14 = vpack.c.bf16 %v2624_v48, %v2624_v48  ;;  %v2481_v63 = vadd.f32 %v2480_v42, %v2192_v15 }
 0x224   : > { %v2196_v10 = vpop.f32.mrf.mxu1  ;;  %v2485_v20 = vpop.f32.mrf.mxu0 }
 0x225   : > { %2945 = vst.msk [vmem:[%s4352_s23 + $0x90] sm:$0xf] %vm2908_vm0, %v3381_v14  ;;  %v2625_v52 = vmax.f32 %v2481_v63, 0.0  ;;  %v2197_v1 = vadd.f32 %v2196_v10, %v1908_v58  ;;  %v4659_v14 = vld [vmem:[#allocation2_spill] sm:$0xff] }
 0x226   : > { %v2198_v29 = vpop.f32.mrf.mxu1  ;;  %v2487_v44 = vpop.f32.mrf.mxu0  ;;  %v1935_v63 = vadd.f32 %v4338_v19, %v4659_v14 }
 0x227   : > { %v3382_v51 = vpack.c.bf16 %v2625_v52, %v2625_v52  ;;  %v2486_v4 = vadd.f32 %v2485_v20, %v2197_v1 }
 0x228   : > { %v2199_v45 = vpop.f32.mrf.mxu1  ;;  %v2488_v43 = vpop.f32.mrf.mxu0 }
 0x229   : > { %2946 = vst.msk [vmem:[%s4352_s23 + $0x94] sm:$0xf] %vm2908_vm0, %v3382_v51  ;;  %v2626_v60 = vmax.f32 %v2486_v4, 0.0  ;;  %v2200_v30 = vadd.f32 %v2199_v45, %v1911_v3  ;;  %v4555_v51 = vld [vmem:[%s4638_s2] ss:$0 sm:$0xff]  ;;  %v4660_v4 = vld [vmem:[#allocation3_spill] sm:$0xff] }
 0x22a   : > { %v2201_v39 = vpop.f32.mrf.mxu1  ;;  %v2490_v25 = vpop.f32.mrf.mxu0  ;;  %v1940_v19 = vadd.f32 %v4555_v51, %v4660_v4 }
 0x22b   : > { %v3383_v8 = vpack.c.bf16 %v2626_v60, %v2626_v60  ;;  %v2489_v5 = vadd.f32 %v2488_v43, %v2200_v30 }
 0x22c   : > { %v2204_v32 = vpop.f32.mrf.mxu1  ;;  %v2493_v34 = vpop.f32.mrf.mxu0 }
 0x22d   : > { %2947 = vst.msk [vmem:[%s4352_s23 + $0x98] sm:$0xf] %vm2908_vm0, %v3383_v8  ;;  %v2627_v0 = vmax.f32 %v2489_v5, 0.0  ;;  %v2205_v6 = vadd.f32 %v2204_v32, %v1916_v16  ;;  %v4661_v5 = vld [vmem:[#allocation4_spill] sm:$0xff] }
 0x22e   : > { %v2206_v22 = vpop.f32.mrf.mxu1  ;;  %v2495_v46 = vpop.f32.mrf.mxu0  ;;  %v1943_v32 = vadd.f32 %v4555_v51, %v4661_v5 }
 0x22f   : > { %v3384_v59 = vpack.c.bf16 %v2627_v0, %v2627_v0  ;;  %v2494_v55 = vadd.f32 %v2493_v34, %v2205_v6 }
 0x230   : > { %v2207_v53 = vpop.f32.mrf.mxu1  ;;  %v2496_v31 = vpop.f32.mrf.mxu0 }
 0x231   : > { %2948 = vst.msk [vmem:[%s4352_s23 + $0x9c] sm:$0xf] %vm2908_vm0, %v3384_v59  ;;  %v2628_v9 = vmax.f32 %v2494_v55, 0.0  ;;  %v2208_v54 = vadd.f32 %v2207_v53, %v1919_v28  ;;  %v4662_v53 = vld [vmem:[#allocation5_spill] sm:$0xff] }
 0x232   : > { %v2209_v26 = vpop.f32.mrf.mxu1  ;;  %v2498_v18 = vpop.f32.mrf.mxu0 }
 0x233   : > { %v3385_v36 = vpack.c.bf16 %v2628_v9, %v2628_v9  ;;  %v2497_v33 = vadd.f32 %v2496_v31, %v2208_v54  ;;  %v1948_v31 = vadd.f32 %v4555_v51, %v4662_v53 }
 0x234   : > { %v2212_v35 = vpop.f32.mrf.mxu1  ;;  %v2501_v62 = vpop.f32.mrf.mxu0 }
 0x235   : > { %2949 = vst.msk [vmem:[%s4352_s23 + $0xa0] sm:$0xf] %vm2908_vm0, %v3385_v36  ;;  %v2629_v13 = vmax.f32 %v2497_v33, 0.0  ;;  %v2213_v17 = vadd.f32 %v2212_v35, %v1924_v47 }
 0x236   : > { %v2214_v7 = vpop.f32.mrf.mxu1  ;;  %v2503_v23 = vpop.f32.mrf.mxu0 }
 0x237   : > { %v3386_v49 = vpack.c.bf16 %v2629_v13, %v2629_v13  ;;  %v2502_v40 = vadd.f32 %v2501_v62, %v2213_v17  ;;  %v4663_v62 = vld [vmem:[#allocation6_spill] sm:$0xff] }
 0x238   : > { %v2215_v37 = vpop.f32.mrf.mxu1  ;;  %v2504_v61 = vpop.f32.mrf.mxu0  ;;  %v1951_v13 = vadd.f32 %v4555_v51, %v4663_v62 }
 0x239   : > { %2950 = vst.msk [vmem:[%s4352_s23 + $0xa4] sm:$0xf] %vm2908_vm0, %v3386_v49  ;;  %v2630_v21 = vmax.f32 %v2502_v40, 0.0  ;;  %v2216_v2 = vadd.f32 %v2215_v37, %v1927_v41 }
 0x23a   : > { %v2217_v24 = vpop.f32.mrf.mxu1  ;;  %v2506_v12 = vpop.f32.mrf.mxu0 }
 0x23b   : > { %v3387_v50 = vpack.c.bf16 %v2630_v21, %v2630_v21  ;;  %v2505_v42 = vadd.f32 %v2504_v61, %v2216_v2  ;;  %v4664_v21 = vld [vmem:[#allocation7_spill] sm:$0xff] }
 0x23c   : > { %v2220_v48 = vpop.f32.mrf.mxu1  ;;  %v2509_v15 = vpop.f32.mrf.mxu0  ;;  %v1956_v2 = vadd.f32 %v4555_v51, %v4664_v21 }
 0x23d   : > { %2951 = vst.msk [vmem:[%s4352_s23 + $0xa8] sm:$0xf] %vm2908_vm0, %v3387_v50  ;;  %v2631_v27 = vmax.f32 %v2505_v42, 0.0  ;;  %v2221_v56 = vadd.f32 %v2220_v48, %v1932_v11 }
 0x23e   : > { %v2222_v57 = vpop.f32.mrf.mxu1  ;;  %v2511_v58 = vpop.f32.mrf.mxu0 }
 0x23f   : > { %v3388_v10 = vpack.c.bf16 %v2631_v27, %v2631_v27  ;;  %v2510_v20 = vadd.f32 %v2509_v15, %v2221_v56  ;;  %v4665_v56 = vld [vmem:[#allocation8_spill] sm:$0xff] }
 0x240   : > { %v2223_v52 = vpop.f32.mrf.mxu1  ;;  %v2512_v1 = vpop.f32.mrf.mxu0  ;;  %v1959_v57 = vadd.f32 %v4555_v51, %v4665_v56 }
 0x241   : > { %2952 = vst.msk [vmem:[%s4352_s23 + $0xac] sm:$0xf] %vm2908_vm0, %v3388_v10  ;;  %v2632_v38 = vmax.f32 %v2510_v20, 0.0  ;;  %v2224_v29 = vadd.f32 %v2223_v52, %v1935_v63 }
 0x242   : > { %v2225_v44 = vpop.f32.mrf.mxu1  ;;  %v2514_v3 = vpop.f32.mrf.mxu0 }
 0x243   : > { %v3389_v45 = vpack.c.bf16 %v2632_v38, %v2632_v38  ;;  %v2513_v43 = vadd.f32 %v2512_v1, %v2224_v29  ;;  %v4666_v29 = vld [vmem:[#allocation9_spill] sm:$0xff] }
 0x244   : > { %v2228_v60 = vpop.f32.mrf.mxu1  ;;  %v2517_v30 = vpop.f32.mrf.mxu0  ;;  %v1964_v44 = vadd.f32 %v4555_v51, %v4666_v29 }
 0x245   : > { %2953 = vst.msk [vmem:[%s4352_s23 + $0xb0] sm:$0xf] %vm2908_vm0, %v3389_v45  ;;  %v2633_v39 = vmax.f32 %v2513_v43, 0.0  ;;  %v2229_v25 = vadd.f32 %v2228_v60, %v1940_v19 }
 0x246   : > { %v2230_v16 = vpop.f32.mrf.mxu1  ;;  %v2519_v8 = vpop.f32.mrf.mxu0 }
 0x247   : > { %v3390_v34 = vpack.c.bf16 %v2633_v39, %v2633_v39  ;;  %v2518_v0 = vadd.f32 %v2517_v30, %v2229_v25  ;;  %v4667_v25 = vld [vmem:[#allocation10_spill] sm:$0xff] }
 0x248   : > { %v2231_v6 = vpop.f32.mrf.mxu1  ;;  %v2520_v22 = vpop.f32.mrf.mxu0  ;;  %v1967_v16 = vadd.f32 %v4555_v51, %v4667_v25 }
 0x249   : > { %2954 = vst.msk [vmem:[%s4352_s23 + $0xb4] sm:$0xf] %vm2908_vm0, %v3390_v34  ;;  %v2634_v46 = vmax.f32 %v2518_v0, 0.0  ;;  %v2232_v28 = vadd.f32 %v2231_v6, %v1943_v32 }
 0x24a   : > { %v2233_v59 = vpop.f32.mrf.mxu1  ;;  %v2522_v55 = vpop.f32.mrf.mxu0 }
 0x24b   : > { %v3391_v9 = vpack.c.bf16 %v2634_v46, %v2634_v46  ;;  %v2521_v54 = vadd.f32 %v2520_v22, %v2232_v28  ;;  %v4668_v28 = vld [vmem:[#allocation11_spill] sm:$0xff] }
 0x24c   : > { %v2236_v26 = vpop.f32.mrf.mxu1  ;;  %v2525_v18 = vpop.f32.mrf.mxu0  ;;  %v1972_v59 = vadd.f32 %v4555_v51, %v4668_v28 }
 0x24d   : > { %2955 = vst.msk [vmem:[%s4352_s23 + $0xb8] sm:$0xf] %vm2908_vm0, %v3391_v9  ;;  %v2635_v47 = vmax.f32 %v2521_v54, 0.0  ;;  %v2237_v36 = vadd.f32 %v2236_v26, %v1948_v31 }
 0x24e   : > { %v2238_v33 = vpop.f32.mrf.mxu1  ;;  %v2527_v35 = vpop.f32.mrf.mxu0 }
 0x24f   : > { %v3392_v17 = vpack.c.bf16 %v2635_v47, %v2635_v47  ;;  %v2526_v7 = vadd.f32 %v2525_v18, %v2237_v36  ;;  %v4669_v36 = vld [vmem:[#allocation12_spill] sm:$0xff] }
 0x250   : > { %v2239_v23 = vpop.f32.mrf.mxu1  ;;  %v2528_v41 = vpop.f32.mrf.mxu0  ;;  %v1975_v33 = vadd.f32 %v4555_v51, %v4669_v36 }
 0x251   : > { %2956 = vst.msk [vmem:[%s4352_s23 + $0xbc] sm:$0xf] %vm2908_vm0, %v3392_v17  ;;  %v2636_v49 = vmax.f32 %v2526_v7, 0.0  ;;  %v2240_v40 = vadd.f32 %v2239_v23, %v1951_v13 }
 0x252   : > { %v2241_v37 = vpop.f32.mrf.mxu1  ;;  %v2530_v61 = vpop.f32.mrf.mxu0 }
 0x253   : > { %v3393_v24 = vpack.c.bf16 %v2636_v49, %v2636_v49  ;;  %v2529_v12 = vadd.f32 %v2528_v41, %v2240_v40  ;;  %v4670_v40 = vld [vmem:[#allocation13_spill] sm:$0xff] }
 0x254   : > { %v2244_v11 = vpop.f32.mrf.mxu1  ;;  %v2533_v50 = vpop.f32.mrf.mxu0  ;;  %v1980_v37 = vadd.f32 %v4555_v51, %v4670_v40 }
 0x255   : > { %2957 = vst.msk [vmem:[%s4352_s23 + $0xc0] sm:$0xf] %vm2908_vm0, %v3393_v24  ;;  %v2637_v42 = vmax.f32 %v2529_v12, 0.0  ;;  %v2245_v48 = vadd.f32 %v2244_v11, %v1956_v2 }
 0x256   : > { %v2246_v15 = vpop.f32.mrf.mxu1  ;;  %v2535_v27 = vpop.f32.mrf.mxu0 }
 0x257   : > { %v3394_v58 = vpack.c.bf16 %v2637_v42, %v2637_v42  ;;  %v2534_v14 = vadd.f32 %v2533_v50, %v2245_v48  ;;  %v4671_v48 = vld [vmem:[#allocation14_spill] sm:$0xff] }
 0x258   : > { %v2247_v63 = vpop.f32.mrf.mxu1  ;;  %v2536_v10 = vpop.f32.mrf.mxu0  ;;  %v1983_v15 = vadd.f32 %v4555_v51, %v4671_v48 }
 0x259   : > { %2958 = vst.msk [vmem:[%s4352_s23 + $0xc4] sm:$0xf] %vm2908_vm0, %v3394_v58  ;;  %v2638_v20 = vmax.f32 %v2534_v14, 0.0  ;;  %v2248_v52 = vadd.f32 %v2247_v63, %v1959_v57 }
 0x25a   : > { %v2249_v1 = vpop.f32.mrf.mxu1  ;;  %v2538_v38 = vpop.f32.mrf.mxu0 }
 0x25b   : > { %v3395_v3 = vpack.c.bf16 %v2638_v20, %v2638_v20  ;;  %v2537_v4 = vadd.f32 %v2536_v10, %v2248_v52  ;;  %v4672_v52 = vld [vmem:[#allocation15_spill] sm:$0xff] }
 0x25c   : > { %v2252_v19 = vpop.f32.mrf.mxu1  ;;  %v2541_v45 = vpop.f32.mrf.mxu0  ;;  %v1988_v1 = vadd.f32 %v4555_v51, %v4672_v52 }
 0x25d   : > { %2959 = vst.msk [vmem:[%s4352_s23 + $0xc8] sm:$0xf] %vm2908_vm0, %v3395_v3  ;;  %v2639_v43 = vmax.f32 %v2537_v4, 0.0  ;;  %v2253_v60 = vadd.f32 %v2252_v19, %v1964_v44 }
 0x25e   : > { %v2254_v30 = vpop.f32.mrf.mxu1  ;;  %v2543_v39 = vpop.f32.mrf.mxu0 }
 0x25f   : > { %v3396_v8 = vpack.c.bf16 %v2639_v43, %v2639_v43  ;;  %v2542_v5 = vadd.f32 %v2541_v45, %v2253_v60  ;;  %v4673_v60 = vld [vmem:[#allocation16_spill] sm:$0xff] }
 0x260   : > { %v2255_v32 = vpop.f32.mrf.mxu1  ;;  %v2544_v34 = vpop.f32.mrf.mxu0  ;;  %v1991_v30 = vadd.f32 %v4555_v51, %v4673_v60 }
 0x261   : > { %2960 = vst.msk [vmem:[%s4352_s23 + $0xcc] sm:$0xf] %vm2908_vm0, %v3396_v8  ;;  %v2640_v0 = vmax.f32 %v2542_v5, 0.0  ;;  %v2256_v6 = vadd.f32 %v2255_v32, %v1967_v16 }
 0x262   : > { %v2257_v22 = vpop.f32.mrf.mxu1  ;;  %v2546_v46 = vpop.f32.mrf.mxu0 }
 0x263   : > { %v3397_v55 = vpack.c.bf16 %v2640_v0, %v2640_v0  ;;  %v2545_v53 = vadd.f32 %v2544_v34, %v2256_v6  ;;  %v4674_v6 = vld [vmem:[#allocation17_spill] sm:$0xff] }
 0x264   : > { %v2260_v31 = vpop.f32.mrf.mxu1  ;;  %v2549_v9 = vpop.f32.mrf.mxu0  ;;  %v1996_v22 = vadd.f32 %v4555_v51, %v4674_v6 }
 0x265   : > { %2961 = vst.msk [vmem:[%s4352_s23 + $0xd0] sm:$0xf] %vm2908_vm0, %v3397_v55  ;;  %v2641_v54 = vmax.f32 %v2545_v53, 0.0  ;;  %v2261_v26 = vadd.f32 %v2260_v31, %v1972_v59 }
 0x266   : > { %v2262_v18 = vpop.f32.mrf.mxu1  ;;  %v2551_v47 = vpop.f32.mrf.mxu0 }
 0x267   : > { %v3398_v35 = vpack.c.bf16 %v2641_v54, %v2641_v54  ;;  %v2550_v62 = vadd.f32 %v2549_v9, %v2261_v26  ;;  %v4675_v26 = vld [vmem:[#allocation18_spill] sm:$0xff] }
 0x268   : > { %v2263_v13 = vpop.f32.mrf.mxu1  ;;  %v2552_v17 = vpop.f32.mrf.mxu0  ;;  %v1999_v18 = vadd.f32 %v4555_v51, %v4675_v26 }
 0x269   : > { %2962 = vst.msk [vmem:[%s4352_s23 + $0xd4] sm:$0xf] %vm2908_vm0, %v3398_v35  ;;  %v2642_v7 = vmax.f32 %v2550_v62, 0.0  ;;  %v2264_v23 = vadd.f32 %v2263_v13, %v1975_v33 }
 0x26a   : > { %v2265_v41 = vpop.f32.mrf.mxu1  ;;  %v2554_v49 = vpop.f32.mrf.mxu0 }
 0x26b   : > { %v3399_v61 = vpack.c.bf16 %v2642_v7, %v2642_v7  ;;  %v2553_v21 = vadd.f32 %v2552_v17, %v2264_v23  ;;  %v4676_v23 = vld [vmem:[#allocation19_spill] sm:$0xff] }
 0x26c   : > { %v2268_v2 = vpop.f32.mrf.mxu1  ;;  %v2557_v24 = vpop.f32.mrf.mxu0  ;;  %v2004_v41 = vadd.f32 %v4555_v51, %v4676_v23 }
 0x26d   : > { %2963 = vst.msk [vmem:[%s4352_s23 + $0xd8] sm:$0xf] %vm2908_vm0, %v3399_v61  ;;  %v2643_v12 = vmax.f32 %v2553_v21, 0.0  ;;  %v2269_v11 = vadd.f32 %v2268_v2, %v1980_v37 }
 0x26e   : > { %v2270_v50 = vpop.f32.mrf.mxu1  ;;  %v2559_v42 = vpop.f32.mrf.mxu0 }
 0x26f   : > { %v3400_v27 = vpack.c.bf16 %v2643_v12, %v2643_v12  ;;  %v2558_v56 = vadd.f32 %v2557_v24, %v2269_v11  ;;  %v4677_v11 = vld [vmem:[#allocation20_spill] sm:$0xff] }
 0x270   : > { %v2271_v57 = vpop.f32.mrf.mxu1  ;;  %v2560_v58 = vpop.f32.mrf.mxu0  ;;  %v2007_v50 = vadd.f32 %v4555_v51, %v4677_v11 }
 0x271   : > { %2964 = vst.msk [vmem:[%s4352_s23 + $0xdc] sm:$0xf] %vm2908_vm0, %v3400_v27  ;;  %v2644_v14 = vmax.f32 %v2558_v56, 0.0  ;;  %v2272_v63 = vadd.f32 %v2271_v57, %v1983_v15 }
 0x272   : > { %v2273_v10 = vpop.f32.mrf.mxu1  ;;  %v2562_v20 = vpop.f32.mrf.mxu0 }
 0x273   : > { %v3401_v38 = vpack.c.bf16 %v2644_v14, %v2644_v14  ;;  %v2561_v29 = vadd.f32 %v2560_v58, %v2272_v63 }
 0x274   : > { %v2276_v44 = vpop.f32.mrf.mxu1  ;;  %v2565_v3 = vpop.f32.mrf.mxu0 }
 0x275   : > { %2965 = vst.msk [vmem:[%s4352_s23 + $0xe0] sm:$0xf] %vm2908_vm0, %v3401_v38  ;;  %v2645_v4 = vmax.f32 %v2561_v29, 0.0  ;;  %v2277_v19 = vadd.f32 %v2276_v44, %v1988_v1 }
 0x276   : > { %v2278_v45 = vpop.f32.mrf.mxu1  ;;  %v2567_v43 = vpop.f32.mrf.mxu0 }
 0x277   : > { %v3402_v39 = vpack.c.bf16 %v2645_v4, %v2645_v4  ;;  %v2566_v25 = vadd.f32 %v2565_v3, %v2277_v19 }
 0x278   : > { %v2279_v16 = vpop.f32.mrf.mxu1  ;;  %v2568_v8 = vpop.f32.mrf.mxu0 }
 0x279   : > { %2966 = vst.msk [vmem:[%s4352_s23 + $0xe4] sm:$0xf] %vm2908_vm0, %v3402_v39  ;;  %v2646_v5 = vmax.f32 %v2566_v25, 0.0  ;;  %v2280_v32 = vadd.f32 %v2279_v16, %v1991_v30 }
 0x27a   : > { %v2281_v34 = vpop.f32.mrf.mxu1  ;;  %v2570_v0 = vpop.f32.mrf.mxu0 }
 0x27b   : > { %v3403_v46 = vpack.c.bf16 %v2646_v5, %v2646_v5  ;;  %v2569_v28 = vadd.f32 %v2568_v8, %v2280_v32 }
 0x27c   : > { %v2284_v59 = vpop.f32.mrf.mxu1  ;;  %v2573_v55 = vpop.f32.mrf.mxu0 }
 0x27d   : > { %2967 = vst.msk [vmem:[%s4352_s23 + $0xe8] sm:$0xf] %vm2908_vm0, %v3403_v46  ;;  %v2647_v53 = vmax.f32 %v2569_v28, 0.0  ;;  %v2285_v31 = vadd.f32 %v2284_v59, %v1996_v22 }
 0x27e   : > { %v2286_v9 = vpop.f32.mrf.mxu1  ;;  %v2575_v54 = vpop.f32.mrf.mxu0 }
 0x27f   : > { %v3404_v47 = vpack.c.bf16 %v2647_v53, %v2647_v53  ;;  %v2574_v36 = vadd.f32 %v2573_v55, %v2285_v31 }
 0x280   : > { %v2287_v33 = vpop.f32.mrf.mxu1  ;;  %v2576_v35 = vpop.f32.mrf.mxu0 }
 0x281   : > { %2968 = vst.msk [vmem:[%s4352_s23 + $0xec] sm:$0xf] %vm2908_vm0, %v3404_v47  ;;  %v2648_v62 = vmax.f32 %v2574_v36, 0.0  ;;  %v2288_v13 = vadd.f32 %v2287_v33, %v1999_v18 }
 0x282   : > { %v2289_v17 = vpop.f32.mrf.mxu1  ;;  %v2578_v7 = vpop.f32.mrf.mxu0 }
 0x283   : > { %v3405_v49 = vpack.c.bf16 %v2648_v62, %v2648_v62  ;;  %v2577_v40 = vadd.f32 %v2576_v35, %v2288_v13 }
 0x284   : > { %v2292_v37 = vpop.f32.mrf.mxu1  ;;  %v2581_v61 = vpop.f32.mrf.mxu0 }
 0x285   : > { %2969 = vst.msk [vmem:[%s4352_s23 + $0xf0] sm:$0xf] %vm2908_vm0, %v3405_v49  ;;  %v2649_v21 = vmax.f32 %v2577_v40, 0.0  ;;  %v2293_v2 = vadd.f32 %v2292_v37, %v2004_v41 }
 0x286   : > { %v2294_v24 = vpop.f32.mrf.mxu1  ;;  %v2583_v12 = vpop.f32.mrf.mxu0 }
 0x287   : > { %v3406_v42 = vpack.c.bf16 %v2649_v21, %v2649_v21  ;;  %v2582_v48 = vadd.f32 %v2581_v61, %v2293_v2 }
 0x288   : > { %v2295_v15 = vpop.f32.mrf.mxu1  ;;  %v2584_v27 = vpop.f32.mrf.mxu0 }
 0x289   : > { %2970 = vst.msk [vmem:[%s4352_s23 + $0xf4] sm:$0xf] %vm2908_vm0, %v3406_v42  ;;  %v2650_v56 = vmax.f32 %v2582_v48, 0.0  ;;  %v2296_v57 = vadd.f32 %v2295_v15, %v2007_v50 }
 0x28a   : > { %v2297_v58 = vpop.f32.mrf.mxu1  ;;  %v2586_v14 = vpop.f32.mrf.mxu0 }
 0x28b   : > { %v3407_v63 = vpack.c.bf16 %v2650_v56, %v2650_v56  ;;  %v2585_v10 = vadd.f32 %v2584_v27, %v2296_v57 }
 0x28d   : > { %2971 = vst.msk [vmem:[%s4352_s23 + $0xf8] sm:$0xf] %vm2908_vm0, %v3407_v63  ;;  %v2651_v20 = vmax.f32 %v2585_v10, 0.0 }
 0x28f   : > { %v3408_v52 = vpack.c.bf16 %v2651_v20, %v2651_v20 }
 0x291   : > { %2972 = vst.msk [vmem:[%s4352_s23 + $0xfc] sm:$0xf] %vm2908_vm0, %v3408_v52 }
 0x292 PF: > { %s13_s12 = sadd.s32 1, %s3794_s12  }
 0x293   : > { %p10_p4 = scmp.ge.s32.totalorder %s13_s12, 4  }
 0x295   :  { %12 = sbr.rel (!%p10_p4) target bundleno = 1 (0x1), region = 62 }

// kernel: model_forward.3
= control target key start
LH: loop header
LB: loop body
LE: loop exit
PB: predicated region body
PF: predicated region fallthrough
CT: control target
= control target key end

     0   :  { %s14025_s12 = smov 0   ;;  %s14027_s13 = smov 0   ;;  %s16564_s0 = inlined_call_operand.vmem [shape: bf16[2,8192], index: 0, kind: input, shape index: {}]   ;;  %s16565_s1 = inlined_call_operand.vmem [shape: bf16[8192,1024], index: 1, kind: input, shape index: {}]   ;;  %s16566_s2 = inlined_call_operand.vmem [shape: f32[1,1024], index: 2, kind: input, shape index: {}]   ;;  %s16567_s3 = inlined_call_operand.vmem [shape: f32[2,1024], index: 3, kind: output, shape index: {}]  }
   0x1   :  { %s14029_s14 = smov 0   ;;  %s14031_s15 = smov 0  }
   0x2   :  { %s14033_s16 = smov 0   ;;  %s14035_s17 = smov 0  }
   0x3   :  { %s14037_s18 = smov 0  }
   0x4 LB: > { %s22_s19 = sadd.s32 1, %s13976_s16  ;;  %s25_s20 = sadd.s32 1, %s13980_s17  ;;  %s13984_s18 = sphi %s14037_s18, %s13_s18   ;;  %s13980_s17 = sphi %s14035_s17, %s16578_s17   ;;  %s13976_s16 = sphi %s14033_s16, %s16577_s16   ;;  %s13972_s15 = sphi %s14031_s15, %s16576_s15   ;;  %s13968_s14 = sphi %s14029_s14, %s16575_s14   ;;  %s13964_s13 = sphi %s14027_s13, %s16574_s13   ;;  %s13960_s12 = sphi %s14025_s12, %s16573_s12  }
   0x5   : > { %p23_p0 = scmp.ge.s32.totalorder %s22_s19, 2  ;;  %p67_p1 = scmp.ne.s32.totalorder %s13964_s13, %s13960_s12 }
   0x6   : > { %p68_p2 = scmp.eq.s32.totalorder %s13984_s18, 0  ;;  %s60_s24 = sadd.s32 1, %s13964_s13 }
   0x7   : > { %s16580_s19 = smov (%p23_p0, %s22_s19), 0  ;;  %s16582_s20 = smov (!%p23_p0, %s25_s20), %s13980_s17 }
   0x8   : > { %p69_p3 = por %p68_p2, %p67_p1  ;;  %p27_p4 = scmp.ge.s32.totalorder %s16582_s20, 2 }
   0x9   : > { %s55_s21 = ssub.s32 %s13976_s16, %s16580_s19  ;;  %p11240_p6 = scmp.ge.s32.totalorder %s13984_s18, 4 }
   0xa   : > { %s16584_s20 = smov (%p27_p4, %s16582_s20), 0 }
   0xb   : > { %s56_s22 = ssub.s32 %s13980_s17, %s16584_s20  ;;  %145 = sbr.rel (%p11240_p6) target bundleno = 536 (0x218), region = 16 }
   0xc   : > { %s57_s23 = sor.u32 %s56_s22, %s55_s21 }
   0xd   : > { %p58_p5 = scmp.eq.s32.totalorder %s57_s23, 0 }
   0xf   : > { %s14076_s25 = scalar_select %p58_p5, %s13964_s13, %s60_s24  }
  0x10   : > { %156 = sbr.rel (!%p69_p3) target bundleno = 536 (0x218), region = 24  ;;  %s158_s26 = sand.u32 (%p69_p3), 1, %s13964_s13  }
  0x11   : > { %s11243_s27 = sshll.u32 (%p69_p3), %s13980_s17, 2  ;;  %s14081_s28 = sshll.u32 (%p69_p3), %s158_s26, 13 }
  0x12   : > { %s12282_s29 = sshll.u32 (%p69_p3), %s13976_s16, 12  ;;  %s160_s8 = scalar_lea.vmem (%p69_p3), [#allocation2], %s14081_s28  }
  0x13   : > { %s164_s30 = sadd.s32 (%p69_p3), %s12282_s29, %s11243_s27  ;;  %s16568_s9 = smov (%p69_p3), %s160_s8 }
  0x14   : > { %s11245_s4 = sshll.u32 (%p69_p3), %s164_s30, 2  ;;  %s14097_s11 = smov (%p69_p3), 0  }
  0x15   : > { %s14087_s7 = scalar_lea.vmem %s16565_s1, %s11245_s4   ;;  %s14099_s21 = smov 0  }
  0x16   : > { %s16569_s10 = smov %s14087_s7 }
  0x17 LB: >> { %v182_v0 = vld [vmem:[%s13992_s10] sm:$0xff]  ;;  %s1206_s22 = sadd.s32 1, %s13996_s11  ;;  %s178_s21 = sadd.s32 1, %s14000_s21   ;;  %s14000_s21 = sphi %s14099_s21, %s178_s21   ;;  %s13996_s11 = sphi %s14097_s11, %s16572_s11   ;;  %s13992_s10 = sphi %s16569_s10, %s16571_s10   ;;  %s13988_s9 = sphi %s16568_s9, %s16570_s9  }
  0x18   : >> { %v184_v1 = vld [vmem:[%s13992_s10 + $0x20] sm:$0xff]  ;;  %183 = vst [vmem:[%s13988_s9] sm:$0xff] %v182_v0  ;;  %p1207_p7 = scmp.ge.s32.totalorder %s1206_s22, 2  ;;  %p175_p8 = scmp.ge.s32.totalorder %s178_s21, 2  }
  0x19   : >> { %v186_v2 = vld [vmem:[%s13992_s10 + $0x40] sm:$0xff]  ;;  %185 = vst [vmem:[%s13988_s9 + $0x10] sm:$0xff] %v184_v1 }
  0x1a   : >> { %187 = vst [vmem:[%s13988_s9 + $0x20] sm:$0xff] %v186_v2  ;;  %v188_v3 = vld [vmem:[%s13992_s10 + $0x60] sm:$0xff]  ;;  %s16586_s22 = smov (%p1207_p7, %s1206_s22), 0 }
  0x1b   : >> { %v190_v4 = vld [vmem:[%s13992_s10 + $0x80] sm:$0xff]  ;;  %189 = vst [vmem:[%s13988_s9 + $0x30] sm:$0xff] %v188_v3  ;;  %s11246_s23 = sshll.u32 %s16586_s22, 3  ;;  %s16572_s11 = smov %s16586_s22 }
  0x1c   : >> { %v192_v5 = vld [vmem:[%s13992_s10 + $0xa0] sm:$0xff]  ;;  %191 = vst [vmem:[%s13988_s9 + $0x40] sm:$0xff] %v190_v4  ;;  %s14379_s24 = scalar_lea.vmem %s14087_s7, %s11246_s23   ;;  %s14383_s26 = scalar_lea.vmem %s160_s8, %s11246_s23 [#allocation2]  }
  0x1d   : >> { %193 = vst [vmem:[%s13988_s9 + $0x50] sm:$0xff] %v192_v5  ;;  %v194_v6 = vld [vmem:[%s13992_s10 + $0xc0] sm:$0xff] }
  0x1e   : >> { %v196_v7 = vld [vmem:[%s13992_s10 + $0xe0] sm:$0xff]  ;;  %195 = vst [vmem:[%s13988_s9 + $0x60] sm:$0xff] %v194_v6 }
  0x1f   : >> { %v198_v8 = vld [vmem:[%s13992_s10 + $0x100] sm:$0xff]  ;;  %197 = vst [vmem:[%s13988_s9 + $0x70] sm:$0xff] %v196_v7 }
  0x20   : >> { %199 = vst [vmem:[%s13988_s9 + $0x80] sm:$0xff] %v198_v8  ;;  %v200_v9 = vld [vmem:[%s13992_s10 + $0x120] sm:$0xff] }
  0x21   : >> { %v202_v10 = vld [vmem:[%s13992_s10 + $0x140] sm:$0xff]  ;;  %201 = vst [vmem:[%s13988_s9 + $0x90] sm:$0xff] %v200_v9 }
  0x22   : >> { %v204_v11 = vld [vmem:[%s13992_s10 + $0x160] sm:$0xff]  ;;  %203 = vst [vmem:[%s13988_s9 + $0xa0] sm:$0xff] %v202_v10 }
  0x23   : >> { %205 = vst [vmem:[%s13988_s9 + $0xb0] sm:$0xff] %v204_v11  ;;  %v206_v12 = vld [vmem:[%s13992_s10 + $0x180] sm:$0xff] }
  0x24   : >> { %v208_v13 = vld [vmem:[%s13992_s10 + $0x1a0] sm:$0xff]  ;;  %207 = vst [vmem:[%s13988_s9 + $0xc0] sm:$0xff] %v206_v12 }
  0x25   : >> { %v210_v14 = vld [vmem:[%s13992_s10 + $0x1c0] sm:$0xff]  ;;  %209 = vst [vmem:[%s13988_s9 + $0xd0] sm:$0xff] %v208_v13 }
  0x26   : >> { %211 = vst [vmem:[%s13988_s9 + $0xe0] sm:$0xff] %v210_v14  ;;  %v212_v15 = vld [vmem:[%s13992_s10 + $0x1e0] sm:$0xff] }
  0x27   : >> { %v214_v16 = vld [vmem:[%s13992_s10 + $0x200] sm:$0xff]  ;;  %213 = vst [vmem:[%s13988_s9 + $0xf0] sm:$0xff] %v212_v15 }
  0x28   : >> { %v216_v17 = vld [vmem:[%s13992_s10 + $0x220] sm:$0xff]  ;;  %215 = vst [vmem:[%s13988_s9 + $0x100] sm:$0xff] %v214_v16 }
  0x29   : >> { %217 = vst [vmem:[%s13988_s9 + $0x110] sm:$0xff] %v216_v17  ;;  %v218_v18 = vld [vmem:[%s13992_s10 + $0x240] sm:$0xff] }
  0x2a   : >> { %v220_v19 = vld [vmem:[%s13992_s10 + $0x260] sm:$0xff]  ;;  %219 = vst [vmem:[%s13988_s9 + $0x120] sm:$0xff] %v218_v18 }
  0x2b   : >> { %v222_v20 = vld [vmem:[%s13992_s10 + $0x280] sm:$0xff]  ;;  %221 = vst [vmem:[%s13988_s9 + $0x130] sm:$0xff] %v220_v19 }
  0x2c   : >> { %223 = vst [vmem:[%s13988_s9 + $0x140] sm:$0xff] %v222_v20  ;;  %v224_v21 = vld [vmem:[%s13992_s10 + $0x2a0] sm:$0xff] }
  0x2d   : >> { %v226_v22 = vld [vmem:[%s13992_s10 + $0x2c0] sm:$0xff]  ;;  %225 = vst [vmem:[%s13988_s9 + $0x150] sm:$0xff] %v224_v21 }
  0x2e   : >> { %v228_v23 = vld [vmem:[%s13992_s10 + $0x2e0] sm:$0xff]  ;;  %227 = vst [vmem:[%s13988_s9 + $0x160] sm:$0xff] %v226_v22 }
  0x2f   : >> { %229 = vst [vmem:[%s13988_s9 + $0x170] sm:$0xff] %v228_v23  ;;  %v230_v24 = vld [vmem:[%s13992_s10 + $0x300] sm:$0xff] }
  0x30   : >> { %v232_v25 = vld [vmem:[%s13992_s10 + $0x320] sm:$0xff]  ;;  %231 = vst [vmem:[%s13988_s9 + $0x180] sm:$0xff] %v230_v24 }
  0x31   : >> { %v234_v26 = vld [vmem:[%s13992_s10 + $0x340] sm:$0xff]  ;;  %233 = vst [vmem:[%s13988_s9 + $0x190] sm:$0xff] %v232_v25 }
  0x32   : >> { %235 = vst [vmem:[%s13988_s9 + $0x1a0] sm:$0xff] %v234_v26  ;;  %v236_v27 = vld [vmem:[%s13992_s10 + $0x360] sm:$0xff] }
  0x33   : >> { %v238_v28 = vld [vmem:[%s13992_s10 + $0x380] sm:$0xff]  ;;  %237 = vst [vmem:[%s13988_s9 + $0x1b0] sm:$0xff] %v236_v27 }
  0x34   : >> { %v240_v29 = vld [vmem:[%s13992_s10 + $0x3a0] sm:$0xff]  ;;  %239 = vst [vmem:[%s13988_s9 + $0x1c0] sm:$0xff] %v238_v28 }
  0x35   : >> { %241 = vst [vmem:[%s13988_s9 + $0x1d0] sm:$0xff] %v240_v29  ;;  %v242_v30 = vld [vmem:[%s13992_s10 + $0x3c0] sm:$0xff] }
  0x36   : >> { %v244_v31 = vld [vmem:[%s13992_s10 + $0x3e0] sm:$0xff]  ;;  %243 = vst [vmem:[%s13988_s9 + $0x1e0] sm:$0xff] %v242_v30 }
  0x37   : >> { %v246_v32 = vld [vmem:[%s13992_s10 + $0x400] sm:$0xff]  ;;  %245 = vst [vmem:[%s13988_s9 + $0x1f0] sm:$0xff] %v244_v31 }
  0x38   : >> { %247 = vst [vmem:[%s13988_s9 + $0x200] sm:$0xff] %v246_v32  ;;  %v248_v33 = vld [vmem:[%s13992_s10 + $0x420] sm:$0xff] }
  0x39   : >> { %v250_v34 = vld [vmem:[%s13992_s10 + $0x440] sm:$0xff]  ;;  %249 = vst [vmem:[%s13988_s9 + $0x210] sm:$0xff] %v248_v33 }
  0x3a   : >> { %v252_v35 = vld [vmem:[%s13992_s10 + $0x460] sm:$0xff]  ;;  %251 = vst [vmem:[%s13988_s9 + $0x220] sm:$0xff] %v250_v34 }
  0x3b   : >> { %253 = vst [vmem:[%s13988_s9 + $0x230] sm:$0xff] %v252_v35  ;;  %v254_v36 = vld [vmem:[%s13992_s10 + $0x480] sm:$0xff] }
  0x3c   : >> { %v256_v37 = vld [vmem:[%s13992_s10 + $0x4a0] sm:$0xff]  ;;  %255 = vst [vmem:[%s13988_s9 + $0x240] sm:$0xff] %v254_v36 }
  0x3d   : >> { %v258_v38 = vld [vmem:[%s13992_s10 + $0x4c0] sm:$0xff]  ;;  %257 = vst [vmem:[%s13988_s9 + $0x250] sm:$0xff] %v256_v37 }
  0x3e   : >> { %259 = vst [vmem:[%s13988_s9 + $0x260] sm:$0xff] %v258_v38  ;;  %v260_v39 = vld [vmem:[%s13992_s10 + $0x4e0] sm:$0xff] }
  0x3f   : >> { %v262_v40 = vld [vmem:[%s13992_s10 + $0x500] sm:$0xff]  ;;  %261 = vst [vmem:[%s13988_s9 + $0x270] sm:$0xff] %v260_v39 }
  0x40   : >> { %v264_v41 = vld [vmem:[%s13992_s10 + $0x520] sm:$0xff]  ;;  %263 = vst [vmem:[%s13988_s9 + $0x280] sm:$0xff] %v262_v40 }
  0x41   : >> { %265 = vst [vmem:[%s13988_s9 + $0x290] sm:$0xff] %v264_v41  ;;  %v266_v42 = vld [vmem:[%s13992_s10 + $0x540] sm:$0xff] }
  0x42   : >> { %v268_v43 = vld [vmem:[%s13992_s10 + $0x560] sm:$0xff]  ;;  %267 = vst [vmem:[%s13988_s9 + $0x2a0] sm:$0xff] %v266_v42 }
  0x43   : >> { %v270_v44 = vld [vmem:[%s13992_s10 + $0x580] sm:$0xff]  ;;  %269 = vst [vmem:[%s13988_s9 + $0x2b0] sm:$0xff] %v268_v43 }
  0x44   : >> { %271 = vst [vmem:[%s13988_s9 + $0x2c0] sm:$0xff] %v270_v44  ;;  %v272_v45 = vld [vmem:[%s13992_s10 + $0x5a0] sm:$0xff] }
  0x45   : >> { %v274_v46 = vld [vmem:[%s13992_s10 + $0x5c0] sm:$0xff]  ;;  %273 = vst [vmem:[%s13988_s9 + $0x2d0] sm:$0xff] %v272_v45 }
  0x46   : >> { %v276_v47 = vld [vmem:[%s13992_s10 + $0x5e0] sm:$0xff]  ;;  %275 = vst [vmem:[%s13988_s9 + $0x2e0] sm:$0xff] %v274_v46 }
  0x47   : >> { %277 = vst [vmem:[%s13988_s9 + $0x2f0] sm:$0xff] %v276_v47  ;;  %v278_v48 = vld [vmem:[%s13992_s10 + $0x600] sm:$0xff] }
  0x48   : >> { %v280_v49 = vld [vmem:[%s13992_s10 + $0x620] sm:$0xff]  ;;  %279 = vst [vmem:[%s13988_s9 + $0x300] sm:$0xff] %v278_v48 }
  0x49   : >> { %v282_v50 = vld [vmem:[%s13992_s10 + $0x640] sm:$0xff]  ;;  %281 = vst [vmem:[%s13988_s9 + $0x310] sm:$0xff] %v280_v49 }
  0x4a   : >> { %283 = vst [vmem:[%s13988_s9 + $0x320] sm:$0xff] %v282_v50  ;;  %v284_v51 = vld [vmem:[%s13992_s10 + $0x660] sm:$0xff] }
  0x4b   : >> { %v286_v52 = vld [vmem:[%s13992_s10 + $0x680] sm:$0xff]  ;;  %285 = vst [vmem:[%s13988_s9 + $0x330] sm:$0xff] %v284_v51 }
  0x4c   : >> { %v288_v53 = vld [vmem:[%s13992_s10 + $0x6a0] sm:$0xff]  ;;  %287 = vst [vmem:[%s13988_s9 + $0x340] sm:$0xff] %v286_v52 }
  0x4d   : >> { %289 = vst [vmem:[%s13988_s9 + $0x350] sm:$0xff] %v288_v53  ;;  %v290_v54 = vld [vmem:[%s13992_s10 + $0x6c0] sm:$0xff] }
  0x4e   : >> { %v292_v55 = vld [vmem:[%s13992_s10 + $0x6e0] sm:$0xff]  ;;  %291 = vst [vmem:[%s13988_s9 + $0x360] sm:$0xff] %v290_v54 }
  0x4f   : >> { %v294_v56 = vld [vmem:[%s13992_s10 + $0x700] sm:$0xff]  ;;  %293 = vst [vmem:[%s13988_s9 + $0x370] sm:$0xff] %v292_v55 }
  0x50   : >> { %295 = vst [vmem:[%s13988_s9 + $0x380] sm:$0xff] %v294_v56  ;;  %v296_v57 = vld [vmem:[%s13992_s10 + $0x720] sm:$0xff] }
  0x51   : >> { %v298_v58 = vld [vmem:[%s13992_s10 + $0x740] sm:$0xff]  ;;  %297 = vst [vmem:[%s13988_s9 + $0x390] sm:$0xff] %v296_v57 }
  0x52   : >> { %v300_v59 = vld [vmem:[%s13992_s10 + $0x760] sm:$0xff]  ;;  %299 = vst [vmem:[%s13988_s9 + $0x3a0] sm:$0xff] %v298_v58 }
  0x53   : >> { %301 = vst [vmem:[%s13988_s9 + $0x3b0] sm:$0xff] %v300_v59  ;;  %v302_v60 = vld [vmem:[%s13992_s10 + $0x780] sm:$0xff] }
  0x54   : >> { %v304_v61 = vld [vmem:[%s13992_s10 + $0x7a0] sm:$0xff]  ;;  %303 = vst [vmem:[%s13988_s9 + $0x3c0] sm:$0xff] %v302_v60 }
  0x55   : >> { %v306_v62 = vld [vmem:[%s13992_s10 + $0x7c0] sm:$0xff]  ;;  %305 = vst [vmem:[%s13988_s9 + $0x3d0] sm:$0xff] %v304_v61 }
  0x56   : >> { %307 = vst [vmem:[%s13988_s9 + $0x3e0] sm:$0xff] %v306_v62  ;;  %v308_v63 = vld [vmem:[%s13992_s10 + $0x7e0] sm:$0xff] }
  0x57   : >> { %v310_v0 = vld [vmem:[%s13992_s10 + $0x800] sm:$0xff]  ;;  %309 = vst [vmem:[%s13988_s9 + $0x3f0] sm:$0xff] %v308_v63 }
  0x58   : >> { %v312_v1 = vld [vmem:[%s13992_s10 + $0x820] sm:$0xff]  ;;  %311 = vst [vmem:[%s13988_s9 + $0x400] sm:$0xff] %v310_v0 }
  0x59   : >> { %313 = vst [vmem:[%s13988_s9 + $0x410] sm:$0xff] %v312_v1  ;;  %v314_v2 = vld [vmem:[%s13992_s10 + $0x840] sm:$0xff] }
  0x5a   : >> { %v316_v3 = vld [vmem:[%s13992_s10 + $0x860] sm:$0xff]  ;;  %315 = vst [vmem:[%s13988_s9 + $0x420] sm:$0xff] %v314_v2 }
  0x5b   : >> { %v318_v4 = vld [vmem:[%s13992_s10 + $0x880] sm:$0xff]  ;;  %317 = vst [vmem:[%s13988_s9 + $0x430] sm:$0xff] %v316_v3 }
  0x5c   : >> { %319 = vst [vmem:[%s13988_s9 + $0x440] sm:$0xff] %v318_v4  ;;  %v320_v5 = vld [vmem:[%s13992_s10 + $0x8a0] sm:$0xff] }
  0x5d   : >> { %v322_v6 = vld [vmem:[%s13992_s10 + $0x8c0] sm:$0xff]  ;;  %321 = vst [vmem:[%s13988_s9 + $0x450] sm:$0xff] %v320_v5 }
  0x5e   : >> { %v324_v7 = vld [vmem:[%s13992_s10 + $0x8e0] sm:$0xff]  ;;  %323 = vst [vmem:[%s13988_s9 + $0x460] sm:$0xff] %v322_v6 }
  0x5f   : >> { %325 = vst [vmem:[%s13988_s9 + $0x470] sm:$0xff] %v324_v7  ;;  %v326_v8 = vld [vmem:[%s13992_s10 + $0x900] sm:$0xff] }
  0x60   : >> { %v328_v9 = vld [vmem:[%s13992_s10 + $0x920] sm:$0xff]  ;;  %327 = vst [vmem:[%s13988_s9 + $0x480] sm:$0xff] %v326_v8 }
  0x61   : >> { %v330_v10 = vld [vmem:[%s13992_s10 + $0x940] sm:$0xff]  ;;  %329 = vst [vmem:[%s13988_s9 + $0x490] sm:$0xff] %v328_v9 }
  0x62   : >> { %331 = vst [vmem:[%s13988_s9 + $0x4a0] sm:$0xff] %v330_v10  ;;  %v332_v11 = vld [vmem:[%s13992_s10 + $0x960] sm:$0xff] }
  0x63   : >> { %v334_v12 = vld [vmem:[%s13992_s10 + $0x980] sm:$0xff]  ;;  %333 = vst [vmem:[%s13988_s9 + $0x4b0] sm:$0xff] %v332_v11 }
  0x64   : >> { %v336_v13 = vld [vmem:[%s13992_s10 + $0x9a0] sm:$0xff]  ;;  %335 = vst [vmem:[%s13988_s9 + $0x4c0] sm:$0xff] %v334_v12 }
  0x65   : >> { %337 = vst [vmem:[%s13988_s9 + $0x4d0] sm:$0xff] %v336_v13  ;;  %v338_v14 = vld [vmem:[%s13992_s10 + $0x9c0] sm:$0xff] }
  0x66   : >> { %v340_v15 = vld [vmem:[%s13992_s10 + $0x9e0] sm:$0xff]  ;;  %339 = vst [vmem:[%s13988_s9 + $0x4e0] sm:$0xff] %v338_v14 }
  0x67   : >> { %v342_v16 = vld [vmem:[%s13992_s10 + $0xa00] sm:$0xff]  ;;  %341 = vst [vmem:[%s13988_s9 + $0x4f0] sm:$0xff] %v340_v15 }
  0x68   : >> { %343 = vst [vmem:[%s13988_s9 + $0x500] sm:$0xff] %v342_v16  ;;  %v344_v17 = vld [vmem:[%s13992_s10 + $0xa20] sm:$0xff] }
  0x69   : >> { %v346_v18 = vld [vmem:[%s13992_s10 + $0xa40] sm:$0xff]  ;;  %345 = vst [vmem:[%s13988_s9 + $0x510] sm:$0xff] %v344_v17 }
  0x6a   : >> { %v348_v19 = vld [vmem:[%s13992_s10 + $0xa60] sm:$0xff]  ;;  %347 = vst [vmem:[%s13988_s9 + $0x520] sm:$0xff] %v346_v18 }
  0x6b   : >> { %349 = vst [vmem:[%s13988_s9 + $0x530] sm:$0xff] %v348_v19  ;;  %v350_v20 = vld [vmem:[%s13992_s10 + $0xa80] sm:$0xff] }
  0x6c   : >> { %v352_v21 = vld [vmem:[%s13992_s10 + $0xaa0] sm:$0xff]  ;;  %351 = vst [vmem:[%s13988_s9 + $0x540] sm:$0xff] %v350_v20 }
  0x6d   : >> { %v354_v22 = vld [vmem:[%s13992_s10 + $0xac0] sm:$0xff]  ;;  %353 = vst [vmem:[%s13988_s9 + $0x550] sm:$0xff] %v352_v21 }
  0x6e   : >> { %355 = vst [vmem:[%s13988_s9 + $0x560] sm:$0xff] %v354_v22  ;;  %v356_v23 = vld [vmem:[%s13992_s10 + $0xae0] sm:$0xff] }
  0x6f   : >> { %v358_v24 = vld [vmem:[%s13992_s10 + $0xb00] sm:$0xff]  ;;  %357 = vst [vmem:[%s13988_s9 + $0x570] sm:$0xff] %v356_v23 }
  0x70   : >> { %v360_v25 = vld [vmem:[%s13992_s10 + $0xb20] sm:$0xff]  ;;  %359 = vst [vmem:[%s13988_s9 + $0x580] sm:$0xff] %v358_v24 }
  0x71   : >> { %361 = vst [vmem:[%s13988_s9 + $0x590] sm:$0xff] %v360_v25  ;;  %v362_v26 = vld [vmem:[%s13992_s10 + $0xb40] sm:$0xff] }
  0x72   : >> { %v364_v27 = vld [vmem:[%s13992_s10 + $0xb60] sm:$0xff]  ;;  %363 = vst [vmem:[%s13988_s9 + $0x5a0] sm:$0xff] %v362_v26 }
  0x73   : >> { %v366_v28 = vld [vmem:[%s13992_s10 + $0xb80] sm:$0xff]  ;;  %365 = vst [vmem:[%s13988_s9 + $0x5b0] sm:$0xff] %v364_v27 }
  0x74   : >> { %367 = vst [vmem:[%s13988_s9 + $0x5c0] sm:$0xff] %v366_v28  ;;  %v368_v29 = vld [vmem:[%s13992_s10 + $0xba0] sm:$0xff] }
  0x75   : >> { %v370_v30 = vld [vmem:[%s13992_s10 + $0xbc0] sm:$0xff]  ;;  %369 = vst [vmem:[%s13988_s9 + $0x5d0] sm:$0xff] %v368_v29 }
  0x76   : >> { %v372_v31 = vld [vmem:[%s13992_s10 + $0xbe0] sm:$0xff]  ;;  %371 = vst [vmem:[%s13988_s9 + $0x5e0] sm:$0xff] %v370_v30 }
  0x77   : >> { %373 = vst [vmem:[%s13988_s9 + $0x5f0] sm:$0xff] %v372_v31  ;;  %v374_v32 = vld [vmem:[%s13992_s10 + $0xc00] sm:$0xff] }
  0x78   : >> { %v376_v33 = vld [vmem:[%s13992_s10 + $0xc20] sm:$0xff]  ;;  %375 = vst [vmem:[%s13988_s9 + $0x600] sm:$0xff] %v374_v32 }
  0x79   : >> { %v378_v34 = vld [vmem:[%s13992_s10 + $0xc40] sm:$0xff]  ;;  %377 = vst [vmem:[%s13988_s9 + $0x610] sm:$0xff] %v376_v33 }
  0x7a   : >> { %379 = vst [vmem:[%s13988_s9 + $0x620] sm:$0xff] %v378_v34  ;;  %v380_v35 = vld [vmem:[%s13992_s10 + $0xc60] sm:$0xff] }
  0x7b   : >> { %v382_v36 = vld [vmem:[%s13992_s10 + $0xc80] sm:$0xff]  ;;  %381 = vst [vmem:[%s13988_s9 + $0x630] sm:$0xff] %v380_v35 }
  0x7c   : >> { %v384_v37 = vld [vmem:[%s13992_s10 + $0xca0] sm:$0xff]  ;;  %383 = vst [vmem:[%s13988_s9 + $0x640] sm:$0xff] %v382_v36 }
  0x7d   : >> { %385 = vst [vmem:[%s13988_s9 + $0x650] sm:$0xff] %v384_v37  ;;  %v386_v38 = vld [vmem:[%s13992_s10 + $0xcc0] sm:$0xff] }
  0x7e   : >> { %v388_v39 = vld [vmem:[%s13992_s10 + $0xce0] sm:$0xff]  ;;  %387 = vst [vmem:[%s13988_s9 + $0x660] sm:$0xff] %v386_v38 }
  0x7f   : >> { %v390_v40 = vld [vmem:[%s13992_s10 + $0xd00] sm:$0xff]  ;;  %389 = vst [vmem:[%s13988_s9 + $0x670] sm:$0xff] %v388_v39 }
  0x80   : >> { %391 = vst [vmem:[%s13988_s9 + $0x680] sm:$0xff] %v390_v40  ;;  %v392_v41 = vld [vmem:[%s13992_s10 + $0xd20] sm:$0xff] }
  0x81   : >> { %v394_v42 = vld [vmem:[%s13992_s10 + $0xd40] sm:$0xff]  ;;  %393 = vst [vmem:[%s13988_s9 + $0x690] sm:$0xff] %v392_v41 }
  0x82   : >> { %v396_v43 = vld [vmem:[%s13992_s10 + $0xd60] sm:$0xff]  ;;  %395 = vst [vmem:[%s13988_s9 + $0x6a0] sm:$0xff] %v394_v42 }
  0x83   : >> { %397 = vst [vmem:[%s13988_s9 + $0x6b0] sm:$0xff] %v396_v43  ;;  %v398_v44 = vld [vmem:[%s13992_s10 + $0xd80] sm:$0xff] }
  0x84   : >> { %v400_v45 = vld [vmem:[%s13992_s10 + $0xda0] sm:$0xff]  ;;  %399 = vst [vmem:[%s13988_s9 + $0x6c0] sm:$0xff] %v398_v44 }
  0x85   : >> { %v402_v46 = vld [vmem:[%s13992_s10 + $0xdc0] sm:$0xff]  ;;  %401 = vst [vmem:[%s13988_s9 + $0x6d0] sm:$0xff] %v400_v45 }
  0x86   : >> { %403 = vst [vmem:[%s13988_s9 + $0x6e0] sm:$0xff] %v402_v46  ;;  %v404_v47 = vld [vmem:[%s13992_s10 + $0xde0] sm:$0xff] }
  0x87   : >> { %v406_v48 = vld [vmem:[%s13992_s10 + $0xe00] sm:$0xff]  ;;  %405 = vst [vmem:[%s13988_s9 + $0x6f0] sm:$0xff] %v404_v47 }
  0x88   : >> { %v408_v49 = vld [vmem:[%s13992_s10 + $0xe20] sm:$0xff]  ;;  %407 = vst [vmem:[%s13988_s9 + $0x700] sm:$0xff] %v406_v48 }
  0x89   : >> { %409 = vst [vmem:[%s13988_s9 + $0x710] sm:$0xff] %v408_v49  ;;  %v410_v50 = vld [vmem:[%s13992_s10 + $0xe40] sm:$0xff] }
  0x8a   : >> { %v412_v51 = vld [vmem:[%s13992_s10 + $0xe60] sm:$0xff]  ;;  %411 = vst [vmem:[%s13988_s9 + $0x720] sm:$0xff] %v410_v50 }
  0x8b   : >> { %v414_v52 = vld [vmem:[%s13992_s10 + $0xe80] sm:$0xff]  ;;  %413 = vst [vmem:[%s13988_s9 + $0x730] sm:$0xff] %v412_v51 }
  0x8c   : >> { %415 = vst [vmem:[%s13988_s9 + $0x740] sm:$0xff] %v414_v52  ;;  %v416_v53 = vld [vmem:[%s13992_s10 + $0xea0] sm:$0xff] }
  0x8d   : >> { %v418_v54 = vld [vmem:[%s13992_s10 + $0xec0] sm:$0xff]  ;;  %417 = vst [vmem:[%s13988_s9 + $0x750] sm:$0xff] %v416_v53 }
  0x8e   : >> { %v420_v55 = vld [vmem:[%s13992_s10 + $0xee0] sm:$0xff]  ;;  %419 = vst [vmem:[%s13988_s9 + $0x760] sm:$0xff] %v418_v54 }
  0x8f   : >> { %421 = vst [vmem:[%s13988_s9 + $0x770] sm:$0xff] %v420_v55  ;;  %v422_v56 = vld [vmem:[%s13992_s10 + $0xf00] sm:$0xff] }
  0x90   : >> { %v424_v57 = vld [vmem:[%s13992_s10 + $0xf20] sm:$0xff]  ;;  %423 = vst [vmem:[%s13988_s9 + $0x780] sm:$0xff] %v422_v56 }
  0x91   : >> { %v426_v58 = vld [vmem:[%s13992_s10 + $0xf40] sm:$0xff]  ;;  %425 = vst [vmem:[%s13988_s9 + $0x790] sm:$0xff] %v424_v57 }
  0x92   : >> { %427 = vst [vmem:[%s13988_s9 + $0x7a0] sm:$0xff] %v426_v58  ;;  %v428_v59 = vld [vmem:[%s13992_s10 + $0xf60] sm:$0xff] }
  0x93   : >> { %v430_v60 = vld [vmem:[%s13992_s10 + $0xf80] sm:$0xff]  ;;  %429 = vst [vmem:[%s13988_s9 + $0x7b0] sm:$0xff] %v428_v59 }
  0x94   : >> { %v432_v61 = vld [vmem:[%s13992_s10 + $0xfa0] sm:$0xff]  ;;  %431 = vst [vmem:[%s13988_s9 + $0x7c0] sm:$0xff] %v430_v60 }
  0x95   : >> { %433 = vst [vmem:[%s13988_s9 + $0x7d0] sm:$0xff] %v432_v61  ;;  %v434_v62 = vld [vmem:[%s13992_s10 + $0xfc0] sm:$0xff] }
  0x96   : >> { %v436_v63 = vld [vmem:[%s13992_s10 + $0xfe0] sm:$0xff]  ;;  %435 = vst [vmem:[%s13988_s9 + $0x7e0] sm:$0xff] %v434_v62 }
  0x97   : >> { %v438_v0 = vld [vmem:[%s13992_s10 + $0x1000] sm:$0xff]  ;;  %437 = vst [vmem:[%s13988_s9 + $0x7f0] sm:$0xff] %v436_v63 }
  0x98   : >> { %439 = vst [vmem:[%s13988_s9 + $0x800] sm:$0xff] %v438_v0  ;;  %v440_v1 = vld [vmem:[%s13992_s10 + $0x1020] sm:$0xff] }
  0x99   : >> { %v442_v2 = vld [vmem:[%s13992_s10 + $0x1040] sm:$0xff]  ;;  %441 = vst [vmem:[%s13988_s9 + $0x810] sm:$0xff] %v440_v1 }
  0x9a   : >> { %v444_v3 = vld [vmem:[%s13992_s10 + $0x1060] sm:$0xff]  ;;  %443 = vst [vmem:[%s13988_s9 + $0x820] sm:$0xff] %v442_v2 }
  0x9b   : >> { %445 = vst [vmem:[%s13988_s9 + $0x830] sm:$0xff] %v444_v3  ;;  %v446_v4 = vld [vmem:[%s13992_s10 + $0x1080] sm:$0xff] }
  0x9c   : >> { %v448_v5 = vld [vmem:[%s13992_s10 + $0x10a0] sm:$0xff]  ;;  %447 = vst [vmem:[%s13988_s9 + $0x840] sm:$0xff] %v446_v4 }
  0x9d   : >> { %v450_v6 = vld [vmem:[%s13992_s10 + $0x10c0] sm:$0xff]  ;;  %449 = vst [vmem:[%s13988_s9 + $0x850] sm:$0xff] %v448_v5 }
  0x9e   : >> { %451 = vst [vmem:[%s13988_s9 + $0x860] sm:$0xff] %v450_v6  ;;  %v452_v7 = vld [vmem:[%s13992_s10 + $0x10e0] sm:$0xff] }
  0x9f   : >> { %v454_v8 = vld [vmem:[%s13992_s10 + $0x1100] sm:$0xff]  ;;  %453 = vst [vmem:[%s13988_s9 + $0x870] sm:$0xff] %v452_v7 }
  0xa0   : >> { %v456_v9 = vld [vmem:[%s13992_s10 + $0x1120] sm:$0xff]  ;;  %455 = vst [vmem:[%s13988_s9 + $0x880] sm:$0xff] %v454_v8 }
  0xa1   : >> { %457 = vst [vmem:[%s13988_s9 + $0x890] sm:$0xff] %v456_v9  ;;  %v458_v10 = vld [vmem:[%s13992_s10 + $0x1140] sm:$0xff] }
  0xa2   : >> { %v460_v11 = vld [vmem:[%s13992_s10 + $0x1160] sm:$0xff]  ;;  %459 = vst [vmem:[%s13988_s9 + $0x8a0] sm:$0xff] %v458_v10 }
  0xa3   : >> { %v462_v12 = vld [vmem:[%s13992_s10 + $0x1180] sm:$0xff]  ;;  %461 = vst [vmem:[%s13988_s9 + $0x8b0] sm:$0xff] %v460_v11 }
  0xa4   : >> { %463 = vst [vmem:[%s13988_s9 + $0x8c0] sm:$0xff] %v462_v12  ;;  %v464_v13 = vld [vmem:[%s13992_s10 + $0x11a0] sm:$0xff] }
  0xa5   : >> { %v466_v14 = vld [vmem:[%s13992_s10 + $0x11c0] sm:$0xff]  ;;  %465 = vst [vmem:[%s13988_s9 + $0x8d0] sm:$0xff] %v464_v13 }
  0xa6   : >> { %v468_v15 = vld [vmem:[%s13992_s10 + $0x11e0] sm:$0xff]  ;;  %467 = vst [vmem:[%s13988_s9 + $0x8e0] sm:$0xff] %v466_v14 }
  0xa7   : >> { %469 = vst [vmem:[%s13988_s9 + $0x8f0] sm:$0xff] %v468_v15  ;;  %v470_v16 = vld [vmem:[%s13992_s10 + $0x1200] sm:$0xff] }
  0xa8   : >> { %v472_v17 = vld [vmem:[%s13992_s10 + $0x1220] sm:$0xff]  ;;  %471 = vst [vmem:[%s13988_s9 + $0x900] sm:$0xff] %v470_v16 }
  0xa9   : >> { %v474_v18 = vld [vmem:[%s13992_s10 + $0x1240] sm:$0xff]  ;;  %473 = vst [vmem:[%s13988_s9 + $0x910] sm:$0xff] %v472_v17 }
  0xaa   : >> { %475 = vst [vmem:[%s13988_s9 + $0x920] sm:$0xff] %v474_v18  ;;  %v476_v19 = vld [vmem:[%s13992_s10 + $0x1260] sm:$0xff] }
  0xab   : >> { %v478_v20 = vld [vmem:[%s13992_s10 + $0x1280] sm:$0xff]  ;;  %477 = vst [vmem:[%s13988_s9 + $0x930] sm:$0xff] %v476_v19 }
  0xac   : >> { %v480_v21 = vld [vmem:[%s13992_s10 + $0x12a0] sm:$0xff]  ;;  %479 = vst [vmem:[%s13988_s9 + $0x940] sm:$0xff] %v478_v20 }
  0xad   : >> { %481 = vst [vmem:[%s13988_s9 + $0x950] sm:$0xff] %v480_v21  ;;  %v482_v22 = vld [vmem:[%s13992_s10 + $0x12c0] sm:$0xff] }
  0xae   : >> { %v484_v23 = vld [vmem:[%s13992_s10 + $0x12e0] sm:$0xff]  ;;  %483 = vst [vmem:[%s13988_s9 + $0x960] sm:$0xff] %v482_v22 }
  0xaf   : >> { %v486_v24 = vld [vmem:[%s13992_s10 + $0x1300] sm:$0xff]  ;;  %485 = vst [vmem:[%s13988_s9 + $0x970] sm:$0xff] %v484_v23 }
  0xb0   : >> { %487 = vst [vmem:[%s13988_s9 + $0x980] sm:$0xff] %v486_v24  ;;  %v488_v25 = vld [vmem:[%s13992_s10 + $0x1320] sm:$0xff] }
  0xb1   : >> { %v490_v26 = vld [vmem:[%s13992_s10 + $0x1340] sm:$0xff]  ;;  %489 = vst [vmem:[%s13988_s9 + $0x990] sm:$0xff] %v488_v25 }
  0xb2   : >> { %v492_v27 = vld [vmem:[%s13992_s10 + $0x1360] sm:$0xff]  ;;  %491 = vst [vmem:[%s13988_s9 + $0x9a0] sm:$0xff] %v490_v26 }
  0xb3   : >> { %493 = vst [vmem:[%s13988_s9 + $0x9b0] sm:$0xff] %v492_v27  ;;  %v494_v28 = vld [vmem:[%s13992_s10 + $0x1380] sm:$0xff] }
  0xb4   : >> { %v496_v29 = vld [vmem:[%s13992_s10 + $0x13a0] sm:$0xff]  ;;  %495 = vst [vmem:[%s13988_s9 + $0x9c0] sm:$0xff] %v494_v28 }
  0xb5   : >> { %v498_v30 = vld [vmem:[%s13992_s10 + $0x13c0] sm:$0xff]  ;;  %497 = vst [vmem:[%s13988_s9 + $0x9d0] sm:$0xff] %v496_v29 }
  0xb6   : >> { %499 = vst [vmem:[%s13988_s9 + $0x9e0] sm:$0xff] %v498_v30  ;;  %v500_v31 = vld [vmem:[%s13992_s10 + $0x13e0] sm:$0xff] }
  0xb7   : >> { %v502_v32 = vld [vmem:[%s13992_s10 + $0x1400] sm:$0xff]  ;;  %501 = vst [vmem:[%s13988_s9 + $0x9f0] sm:$0xff] %v500_v31 }
  0xb8   : >> { %v504_v33 = vld [vmem:[%s13992_s10 + $0x1420] sm:$0xff]  ;;  %503 = vst [vmem:[%s13988_s9 + $0xa00] sm:$0xff] %v502_v32 }
  0xb9   : >> { %505 = vst [vmem:[%s13988_s9 + $0xa10] sm:$0xff] %v504_v33  ;;  %v506_v34 = vld [vmem:[%s13992_s10 + $0x1440] sm:$0xff] }
  0xba   : >> { %v508_v35 = vld [vmem:[%s13992_s10 + $0x1460] sm:$0xff]  ;;  %507 = vst [vmem:[%s13988_s9 + $0xa20] sm:$0xff] %v506_v34 }
  0xbb   : >> { %v510_v36 = vld [vmem:[%s13992_s10 + $0x1480] sm:$0xff]  ;;  %509 = vst [vmem:[%s13988_s9 + $0xa30] sm:$0xff] %v508_v35 }
  0xbc   : >> { %511 = vst [vmem:[%s13988_s9 + $0xa40] sm:$0xff] %v510_v36  ;;  %v512_v37 = vld [vmem:[%s13992_s10 + $0x14a0] sm:$0xff] }
  0xbd   : >> { %v514_v38 = vld [vmem:[%s13992_s10 + $0x14c0] sm:$0xff]  ;;  %513 = vst [vmem:[%s13988_s9 + $0xa50] sm:$0xff] %v512_v37 }
  0xbe   : >> { %v516_v39 = vld [vmem:[%s13992_s10 + $0x14e0] sm:$0xff]  ;;  %515 = vst [vmem:[%s13988_s9 + $0xa60] sm:$0xff] %v514_v38 }
  0xbf   : >> { %517 = vst [vmem:[%s13988_s9 + $0xa70] sm:$0xff] %v516_v39  ;;  %v518_v40 = vld [vmem:[%s13992_s10 + $0x1500] sm:$0xff] }
  0xc0   : >> { %v520_v41 = vld [vmem:[%s13992_s10 + $0x1520] sm:$0xff]  ;;  %519 = vst [vmem:[%s13988_s9 + $0xa80] sm:$0xff] %v518_v40 }
  0xc1   : >> { %v522_v42 = vld [vmem:[%s13992_s10 + $0x1540] sm:$0xff]  ;;  %521 = vst [vmem:[%s13988_s9 + $0xa90] sm:$0xff] %v520_v41 }
  0xc2   : >> { %523 = vst [vmem:[%s13988_s9 + $0xaa0] sm:$0xff] %v522_v42  ;;  %v524_v43 = vld [vmem:[%s13992_s10 + $0x1560] sm:$0xff] }
  0xc3   : >> { %v526_v44 = vld [vmem:[%s13992_s10 + $0x1580] sm:$0xff]  ;;  %525 = vst [vmem:[%s13988_s9 + $0xab0] sm:$0xff] %v524_v43 }
  0xc4   : >> { %v528_v45 = vld [vmem:[%s13992_s10 + $0x15a0] sm:$0xff]  ;;  %527 = vst [vmem:[%s13988_s9 + $0xac0] sm:$0xff] %v526_v44 }
  0xc5   : >> { %529 = vst [vmem:[%s13988_s9 + $0xad0] sm:$0xff] %v528_v45  ;;  %v530_v46 = vld [vmem:[%s13992_s10 + $0x15c0] sm:$0xff] }
  0xc6   : >> { %v532_v47 = vld [vmem:[%s13992_s10 + $0x15e0] sm:$0xff]  ;;  %531 = vst [vmem:[%s13988_s9 + $0xae0] sm:$0xff] %v530_v46 }
  0xc7   : >> { %v534_v48 = vld [vmem:[%s13992_s10 + $0x1600] sm:$0xff]  ;;  %533 = vst [vmem:[%s13988_s9 + $0xaf0] sm:$0xff] %v532_v47 }
  0xc8   : >> { %535 = vst [vmem:[%s13988_s9 + $0xb00] sm:$0xff] %v534_v48  ;;  %v536_v49 = vld [vmem:[%s13992_s10 + $0x1620] sm:$0xff] }
  0xc9   : >> { %v538_v50 = vld [vmem:[%s13992_s10 + $0x1640] sm:$0xff]  ;;  %537 = vst [vmem:[%s13988_s9 + $0xb10] sm:$0xff] %v536_v49 }
  0xca   : >> { %v540_v51 = vld [vmem:[%s13992_s10 + $0x1660] sm:$0xff]  ;;  %539 = vst [vmem:[%s13988_s9 + $0xb20] sm:$0xff] %v538_v50 }
  0xcb   : >> { %541 = vst [vmem:[%s13988_s9 + $0xb30] sm:$0xff] %v540_v51  ;;  %v542_v52 = vld [vmem:[%s13992_s10 + $0x1680] sm:$0xff] }
  0xcc   : >> { %v544_v53 = vld [vmem:[%s13992_s10 + $0x16a0] sm:$0xff]  ;;  %543 = vst [vmem:[%s13988_s9 + $0xb40] sm:$0xff] %v542_v52 }
  0xcd   : >> { %v546_v54 = vld [vmem:[%s13992_s10 + $0x16c0] sm:$0xff]  ;;  %545 = vst [vmem:[%s13988_s9 + $0xb50] sm:$0xff] %v544_v53 }
  0xce   : >> { %547 = vst [vmem:[%s13988_s9 + $0xb60] sm:$0xff] %v546_v54  ;;  %v548_v55 = vld [vmem:[%s13992_s10 + $0x16e0] sm:$0xff] }
  0xcf   : >> { %v550_v56 = vld [vmem:[%s13992_s10 + $0x1700] sm:$0xff]  ;;  %549 = vst [vmem:[%s13988_s9 + $0xb70] sm:$0xff] %v548_v55 }
  0xd0   : >> { %v552_v57 = vld [vmem:[%s13992_s10 + $0x1720] sm:$0xff]  ;;  %551 = vst [vmem:[%s13988_s9 + $0xb80] sm:$0xff] %v550_v56 }
  0xd1   : >> { %553 = vst [vmem:[%s13988_s9 + $0xb90] sm:$0xff] %v552_v57  ;;  %v554_v58 = vld [vmem:[%s13992_s10 + $0x1740] sm:$0xff] }
  0xd2   : >> { %v556_v59 = vld [vmem:[%s13992_s10 + $0x1760] sm:$0xff]  ;;  %555 = vst [vmem:[%s13988_s9 + $0xba0] sm:$0xff] %v554_v58 }
  0xd3   : >> { %v558_v60 = vld [vmem:[%s13992_s10 + $0x1780] sm:$0xff]  ;;  %557 = vst [vmem:[%s13988_s9 + $0xbb0] sm:$0xff] %v556_v59 }
  0xd4   : >> { %559 = vst [vmem:[%s13988_s9 + $0xbc0] sm:$0xff] %v558_v60  ;;  %v560_v61 = vld [vmem:[%s13992_s10 + $0x17a0] sm:$0xff] }
  0xd5   : >> { %v562_v62 = vld [vmem:[%s13992_s10 + $0x17c0] sm:$0xff]  ;;  %561 = vst [vmem:[%s13988_s9 + $0xbd0] sm:$0xff] %v560_v61 }
  0xd6   : >> { %v564_v63 = vld [vmem:[%s13992_s10 + $0x17e0] sm:$0xff]  ;;  %563 = vst [vmem:[%s13988_s9 + $0xbe0] sm:$0xff] %v562_v62 }
  0xd7   : >> { %565 = vst [vmem:[%s13988_s9 + $0xbf0] sm:$0xff] %v564_v63  ;;  %v566_v0 = vld [vmem:[%s13992_s10 + $0x1800] sm:$0xff] }
  0xd8   : >> { %v568_v1 = vld [vmem:[%s13992_s10 + $0x1820] sm:$0xff]  ;;  %567 = vst [vmem:[%s13988_s9 + $0xc00] sm:$0xff] %v566_v0 }
  0xd9   : >> { %v570_v2 = vld [vmem:[%s13992_s10 + $0x1840] sm:$0xff]  ;;  %569 = vst [vmem:[%s13988_s9 + $0xc10] sm:$0xff] %v568_v1 }
  0xda   : >> { %571 = vst [vmem:[%s13988_s9 + $0xc20] sm:$0xff] %v570_v2  ;;  %v572_v3 = vld [vmem:[%s13992_s10 + $0x1860] sm:$0xff] }
  0xdb   : >> { %v574_v4 = vld [vmem:[%s13992_s10 + $0x1880] sm:$0xff]  ;;  %573 = vst [vmem:[%s13988_s9 + $0xc30] sm:$0xff] %v572_v3 }
  0xdc   : >> { %v576_v5 = vld [vmem:[%s13992_s10 + $0x18a0] sm:$0xff]  ;;  %575 = vst [vmem:[%s13988_s9 + $0xc40] sm:$0xff] %v574_v4 }
  0xdd   : >> { %577 = vst [vmem:[%s13988_s9 + $0xc50] sm:$0xff] %v576_v5  ;;  %v578_v6 = vld [vmem:[%s13992_s10 + $0x18c0] sm:$0xff] }
  0xde   : >> { %v580_v7 = vld [vmem:[%s13992_s10 + $0x18e0] sm:$0xff]  ;;  %579 = vst [vmem:[%s13988_s9 + $0xc60] sm:$0xff] %v578_v6 }
  0xdf   : >> { %v582_v8 = vld [vmem:[%s13992_s10 + $0x1900] sm:$0xff]  ;;  %581 = vst [vmem:[%s13988_s9 + $0xc70] sm:$0xff] %v580_v7 }
  0xe0   : >> { %583 = vst [vmem:[%s13988_s9 + $0xc80] sm:$0xff] %v582_v8  ;;  %v584_v9 = vld [vmem:[%s13992_s10 + $0x1920] sm:$0xff] }
  0xe1   : >> { %v586_v10 = vld [vmem:[%s13992_s10 + $0x1940] sm:$0xff]  ;;  %585 = vst [vmem:[%s13988_s9 + $0xc90] sm:$0xff] %v584_v9 }
  0xe2   : >> { %v588_v11 = vld [vmem:[%s13992_s10 + $0x1960] sm:$0xff]  ;;  %587 = vst [vmem:[%s13988_s9 + $0xca0] sm:$0xff] %v586_v10 }
  0xe3   : >> { %589 = vst [vmem:[%s13988_s9 + $0xcb0] sm:$0xff] %v588_v11  ;;  %v590_v12 = vld [vmem:[%s13992_s10 + $0x1980] sm:$0xff] }
  0xe4   : >> { %v592_v13 = vld [vmem:[%s13992_s10 + $0x19a0] sm:$0xff]  ;;  %591 = vst [vmem:[%s13988_s9 + $0xcc0] sm:$0xff] %v590_v12 }
  0xe5   : >> { %v594_v14 = vld [vmem:[%s13992_s10 + $0x19c0] sm:$0xff]  ;;  %593 = vst [vmem:[%s13988_s9 + $0xcd0] sm:$0xff] %v592_v13 }
  0xe6   : >> { %595 = vst [vmem:[%s13988_s9 + $0xce0] sm:$0xff] %v594_v14  ;;  %v596_v15 = vld [vmem:[%s13992_s10 + $0x19e0] sm:$0xff] }
  0xe7   : >> { %v598_v16 = vld [vmem:[%s13992_s10 + $0x1a00] sm:$0xff]  ;;  %597 = vst [vmem:[%s13988_s9 + $0xcf0] sm:$0xff] %v596_v15 }
  0xe8   : >> { %v600_v17 = vld [vmem:[%s13992_s10 + $0x1a20] sm:$0xff]  ;;  %599 = vst [vmem:[%s13988_s9 + $0xd00] sm:$0xff] %v598_v16 }
  0xe9   : >> { %601 = vst [vmem:[%s13988_s9 + $0xd10] sm:$0xff] %v600_v17  ;;  %v602_v18 = vld [vmem:[%s13992_s10 + $0x1a40] sm:$0xff] }
  0xea   : >> { %v604_v19 = vld [vmem:[%s13992_s10 + $0x1a60] sm:$0xff]  ;;  %603 = vst [vmem:[%s13988_s9 + $0xd20] sm:$0xff] %v602_v18 }
  0xeb   : >> { %v606_v20 = vld [vmem:[%s13992_s10 + $0x1a80] sm:$0xff]  ;;  %605 = vst [vmem:[%s13988_s9 + $0xd30] sm:$0xff] %v604_v19 }
  0xec   : >> { %607 = vst [vmem:[%s13988_s9 + $0xd40] sm:$0xff] %v606_v20  ;;  %v608_v21 = vld [vmem:[%s13992_s10 + $0x1aa0] sm:$0xff] }
  0xed   : >> { %v610_v22 = vld [vmem:[%s13992_s10 + $0x1ac0] sm:$0xff]  ;;  %609 = vst [vmem:[%s13988_s9 + $0xd50] sm:$0xff] %v608_v21 }
  0xee   : >> { %v612_v23 = vld [vmem:[%s13992_s10 + $0x1ae0] sm:$0xff]  ;;  %611 = vst [vmem:[%s13988_s9 + $0xd60] sm:$0xff] %v610_v22 }
  0xef   : >> { %613 = vst [vmem:[%s13988_s9 + $0xd70] sm:$0xff] %v612_v23  ;;  %v614_v24 = vld [vmem:[%s13992_s10 + $0x1b00] sm:$0xff] }
  0xf0   : >> { %v616_v25 = vld [vmem:[%s13992_s10 + $0x1b20] sm:$0xff]  ;;  %615 = vst [vmem:[%s13988_s9 + $0xd80] sm:$0xff] %v614_v24 }
  0xf1   : >> { %v618_v26 = vld [vmem:[%s13992_s10 + $0x1b40] sm:$0xff]  ;;  %617 = vst [vmem:[%s13988_s9 + $0xd90] sm:$0xff] %v616_v25 }
  0xf2   : >> { %619 = vst [vmem:[%s13988_s9 + $0xda0] sm:$0xff] %v618_v26  ;;  %v620_v27 = vld [vmem:[%s13992_s10 + $0x1b60] sm:$0xff] }
  0xf3   : >> { %v622_v28 = vld [vmem:[%s13992_s10 + $0x1b80] sm:$0xff]  ;;  %621 = vst [vmem:[%s13988_s9 + $0xdb0] sm:$0xff] %v620_v27 }
  0xf4   : >> { %v624_v29 = vld [vmem:[%s13992_s10 + $0x1ba0] sm:$0xff]  ;;  %623 = vst [vmem:[%s13988_s9 + $0xdc0] sm:$0xff] %v622_v28 }
  0xf5   : >> { %625 = vst [vmem:[%s13988_s9 + $0xdd0] sm:$0xff] %v624_v29  ;;  %v626_v30 = vld [vmem:[%s13992_s10 + $0x1bc0] sm:$0xff] }
  0xf6   : >> { %v628_v31 = vld [vmem:[%s13992_s10 + $0x1be0] sm:$0xff]  ;;  %627 = vst [vmem:[%s13988_s9 + $0xde0] sm:$0xff] %v626_v30 }
  0xf7   : >> { %v630_v32 = vld [vmem:[%s13992_s10 + $0x1c00] sm:$0xff]  ;;  %629 = vst [vmem:[%s13988_s9 + $0xdf0] sm:$0xff] %v628_v31 }
  0xf8   : >> { %631 = vst [vmem:[%s13988_s9 + $0xe00] sm:$0xff] %v630_v32  ;;  %v632_v33 = vld [vmem:[%s13992_s10 + $0x1c20] sm:$0xff] }
  0xf9   : >> { %v634_v34 = vld [vmem:[%s13992_s10 + $0x1c40] sm:$0xff]  ;;  %633 = vst [vmem:[%s13988_s9 + $0xe10] sm:$0xff] %v632_v33 }
  0xfa   : >> { %v636_v35 = vld [vmem:[%s13992_s10 + $0x1c60] sm:$0xff]  ;;  %635 = vst [vmem:[%s13988_s9 + $0xe20] sm:$0xff] %v634_v34 }
  0xfb   : >> { %637 = vst [vmem:[%s13988_s9 + $0xe30] sm:$0xff] %v636_v35  ;;  %v638_v36 = vld [vmem:[%s13992_s10 + $0x1c80] sm:$0xff] }
  0xfc   : >> { %v640_v37 = vld [vmem:[%s13992_s10 + $0x1ca0] sm:$0xff]  ;;  %639 = vst [vmem:[%s13988_s9 + $0xe40] sm:$0xff] %v638_v36 }
  0xfd   : >> { %v642_v38 = vld [vmem:[%s13992_s10 + $0x1cc0] sm:$0xff]  ;;  %641 = vst [vmem:[%s13988_s9 + $0xe50] sm:$0xff] %v640_v37 }
  0xfe   : >> { %643 = vst [vmem:[%s13988_s9 + $0xe60] sm:$0xff] %v642_v38  ;;  %v644_v39 = vld [vmem:[%s13992_s10 + $0x1ce0] sm:$0xff] }
  0xff   : >> { %v646_v40 = vld [vmem:[%s13992_s10 + $0x1d00] sm:$0xff]  ;;  %645 = vst [vmem:[%s13988_s9 + $0xe70] sm:$0xff] %v644_v39 }
 0x100   : >> { %v648_v41 = vld [vmem:[%s13992_s10 + $0x1d20] sm:$0xff]  ;;  %647 = vst [vmem:[%s13988_s9 + $0xe80] sm:$0xff] %v646_v40 }
 0x101   : >> { %649 = vst [vmem:[%s13988_s9 + $0xe90] sm:$0xff] %v648_v41  ;;  %v650_v42 = vld [vmem:[%s13992_s10 + $0x1d40] sm:$0xff] }
 0x102   : >> { %v652_v43 = vld [vmem:[%s13992_s10 + $0x1d60] sm:$0xff]  ;;  %651 = vst [vmem:[%s13988_s9 + $0xea0] sm:$0xff] %v650_v42 }
 0x103   : >> { %v654_v44 = vld [vmem:[%s13992_s10 + $0x1d80] sm:$0xff]  ;;  %653 = vst [vmem:[%s13988_s9 + $0xeb0] sm:$0xff] %v652_v43 }
 0x104   : >> { %655 = vst [vmem:[%s13988_s9 + $0xec0] sm:$0xff] %v654_v44  ;;  %v656_v45 = vld [vmem:[%s13992_s10 + $0x1da0] sm:$0xff] }
 0x105   : >> { %v658_v46 = vld [vmem:[%s13992_s10 + $0x1dc0] sm:$0xff]  ;;  %657 = vst [vmem:[%s13988_s9 + $0xed0] sm:$0xff] %v656_v45 }
 0x106   : >> { %v660_v47 = vld [vmem:[%s13992_s10 + $0x1de0] sm:$0xff]  ;;  %659 = vst [vmem:[%s13988_s9 + $0xee0] sm:$0xff] %v658_v46 }
 0x107   : >> { %661 = vst [vmem:[%s13988_s9 + $0xef0] sm:$0xff] %v660_v47  ;;  %v662_v48 = vld [vmem:[%s13992_s10 + $0x1e00] sm:$0xff] }
 0x108   : >> { %v664_v49 = vld [vmem:[%s13992_s10 + $0x1e20] sm:$0xff]  ;;  %663 = vst [vmem:[%s13988_s9 + $0xf00] sm:$0xff] %v662_v48 }
 0x109   : >> { %v666_v50 = vld [vmem:[%s13992_s10 + $0x1e40] sm:$0xff]  ;;  %665 = vst [vmem:[%s13988_s9 + $0xf10] sm:$0xff] %v664_v49 }
 0x10a   : >> { %667 = vst [vmem:[%s13988_s9 + $0xf20] sm:$0xff] %v666_v50  ;;  %v668_v51 = vld [vmem:[%s13992_s10 + $0x1e60] sm:$0xff] }
 0x10b   : >> { %v670_v52 = vld [vmem:[%s13992_s10 + $0x1e80] sm:$0xff]  ;;  %669 = vst [vmem:[%s13988_s9 + $0xf30] sm:$0xff] %v668_v51 }
 0x10c   : >> { %v672_v53 = vld [vmem:[%s13992_s10 + $0x1ea0] sm:$0xff]  ;;  %671 = vst [vmem:[%s13988_s9 + $0xf40] sm:$0xff] %v670_v52 }
 0x10d   : >> { %673 = vst [vmem:[%s13988_s9 + $0xf50] sm:$0xff] %v672_v53  ;;  %v674_v54 = vld [vmem:[%s13992_s10 + $0x1ec0] sm:$0xff] }
 0x10e   : >> { %v676_v55 = vld [vmem:[%s13992_s10 + $0x1ee0] sm:$0xff]  ;;  %675 = vst [vmem:[%s13988_s9 + $0xf60] sm:$0xff] %v674_v54 }
 0x10f   : >> { %v678_v56 = vld [vmem:[%s13992_s10 + $0x1f00] sm:$0xff]  ;;  %677 = vst [vmem:[%s13988_s9 + $0xf70] sm:$0xff] %v676_v55 }
 0x110   : >> { %679 = vst [vmem:[%s13988_s9 + $0xf80] sm:$0xff] %v678_v56  ;;  %v680_v57 = vld [vmem:[%s13992_s10 + $0x1f20] sm:$0xff] }
 0x111   : >> { %v682_v58 = vld [vmem:[%s13992_s10 + $0x1f40] sm:$0xff]  ;;  %681 = vst [vmem:[%s13988_s9 + $0xf90] sm:$0xff] %v680_v57 }
 0x112   : >> { %v684_v59 = vld [vmem:[%s13992_s10 + $0x1f60] sm:$0xff]  ;;  %683 = vst [vmem:[%s13988_s9 + $0xfa0] sm:$0xff] %v682_v58 }
 0x113   : >> { %685 = vst [vmem:[%s13988_s9 + $0xfb0] sm:$0xff] %v684_v59  ;;  %v686_v60 = vld [vmem:[%s13992_s10 + $0x1f80] sm:$0xff] }
 0x114   : >> { %v688_v61 = vld [vmem:[%s13992_s10 + $0x1fa0] sm:$0xff]  ;;  %687 = vst [vmem:[%s13988_s9 + $0xfc0] sm:$0xff] %v686_v60 }
 0x115   : >> { %v690_v62 = vld [vmem:[%s13992_s10 + $0x1fc0] sm:$0xff]  ;;  %689 = vst [vmem:[%s13988_s9 + $0xfd0] sm:$0xff] %v688_v61 }
 0x116   : >> { %691 = vst [vmem:[%s13988_s9 + $0xfe0] sm:$0xff] %v690_v62  ;;  %v692_v63 = vld [vmem:[%s13992_s10 + $0x1fe0] sm:$0xff] }
 0x117   : >> { %v694_v0 = vld [vmem:[%s13992_s10 + $0x2000] sm:$0xff]  ;;  %693 = vst [vmem:[%s13988_s9 + $0xff0] sm:$0xff] %v692_v63 }
 0x118   : >> { %v696_v1 = vld [vmem:[%s13992_s10 + $0x2020] sm:$0xff]  ;;  %695 = vst [vmem:[%s13988_s9 + $0x1000] sm:$0xff] %v694_v0 }
 0x119   : >> { %697 = vst [vmem:[%s13988_s9 + $0x1010] sm:$0xff] %v696_v1  ;;  %v698_v2 = vld [vmem:[%s13992_s10 + $0x2040] sm:$0xff] }
 0x11a   : >> { %v700_v3 = vld [vmem:[%s13992_s10 + $0x2060] sm:$0xff]  ;;  %699 = vst [vmem:[%s13988_s9 + $0x1020] sm:$0xff] %v698_v2 }
 0x11b   : >> { %v702_v4 = vld [vmem:[%s13992_s10 + $0x2080] sm:$0xff]  ;;  %701 = vst [vmem:[%s13988_s9 + $0x1030] sm:$0xff] %v700_v3 }
 0x11c   : >> { %703 = vst [vmem:[%s13988_s9 + $0x1040] sm:$0xff] %v702_v4  ;;  %v704_v5 = vld [vmem:[%s13992_s10 + $0x20a0] sm:$0xff] }
 0x11d   : >> { %v706_v6 = vld [vmem:[%s13992_s10 + $0x20c0] sm:$0xff]  ;;  %705 = vst [vmem:[%s13988_s9 + $0x1050] sm:$0xff] %v704_v5 }
 0x11e   : >> { %v708_v7 = vld [vmem:[%s13992_s10 + $0x20e0] sm:$0xff]  ;;  %707 = vst [vmem:[%s13988_s9 + $0x1060] sm:$0xff] %v706_v6 }
 0x11f   : >> { %709 = vst [vmem:[%s13988_s9 + $0x1070] sm:$0xff] %v708_v7  ;;  %v710_v8 = vld [vmem:[%s13992_s10 + $0x2100] sm:$0xff] }
 0x120   : >> { %v712_v9 = vld [vmem:[%s13992_s10 + $0x2120] sm:$0xff]  ;;  %711 = vst [vmem:[%s13988_s9 + $0x1080] sm:$0xff] %v710_v8 }
 0x121   : >> { %v714_v10 = vld [vmem:[%s13992_s10 + $0x2140] sm:$0xff]  ;;  %713 = vst [vmem:[%s13988_s9 + $0x1090] sm:$0xff] %v712_v9 }
 0x122   : >> { %715 = vst [vmem:[%s13988_s9 + $0x10a0] sm:$0xff] %v714_v10  ;;  %v716_v11 = vld [vmem:[%s13992_s10 + $0x2160] sm:$0xff] }
 0x123   : >> { %v718_v12 = vld [vmem:[%s13992_s10 + $0x2180] sm:$0xff]  ;;  %717 = vst [vmem:[%s13988_s9 + $0x10b0] sm:$0xff] %v716_v11 }
 0x124   : >> { %v720_v13 = vld [vmem:[%s13992_s10 + $0x21a0] sm:$0xff]  ;;  %719 = vst [vmem:[%s13988_s9 + $0x10c0] sm:$0xff] %v718_v12 }
 0x125   : >> { %721 = vst [vmem:[%s13988_s9 + $0x10d0] sm:$0xff] %v720_v13  ;;  %v722_v14 = vld [vmem:[%s13992_s10 + $0x21c0] sm:$0xff] }
 0x126   : >> { %v724_v15 = vld [vmem:[%s13992_s10 + $0x21e0] sm:$0xff]  ;;  %723 = vst [vmem:[%s13988_s9 + $0x10e0] sm:$0xff] %v722_v14 }
 0x127   : >> { %v726_v16 = vld [vmem:[%s13992_s10 + $0x2200] sm:$0xff]  ;;  %725 = vst [vmem:[%s13988_s9 + $0x10f0] sm:$0xff] %v724_v15 }
 0x128   : >> { %727 = vst [vmem:[%s13988_s9 + $0x1100] sm:$0xff] %v726_v16  ;;  %v728_v17 = vld [vmem:[%s13992_s10 + $0x2220] sm:$0xff] }
 0x129   : >> { %v730_v18 = vld [vmem:[%s13992_s10 + $0x2240] sm:$0xff]  ;;  %729 = vst [vmem:[%s13988_s9 + $0x1110] sm:$0xff] %v728_v17 }
 0x12a   : >> { %v732_v19 = vld [vmem:[%s13992_s10 + $0x2260] sm:$0xff]  ;;  %731 = vst [vmem:[%s13988_s9 + $0x1120] sm:$0xff] %v730_v18 }
 0x12b   : >> { %733 = vst [vmem:[%s13988_s9 + $0x1130] sm:$0xff] %v732_v19  ;;  %v734_v20 = vld [vmem:[%s13992_s10 + $0x2280] sm:$0xff] }
 0x12c   : >> { %v736_v21 = vld [vmem:[%s13992_s10 + $0x22a0] sm:$0xff]  ;;  %735 = vst [vmem:[%s13988_s9 + $0x1140] sm:$0xff] %v734_v20 }
 0x12d   : >> { %v738_v22 = vld [vmem:[%s13992_s10 + $0x22c0] sm:$0xff]  ;;  %737 = vst [vmem:[%s13988_s9 + $0x1150] sm:$0xff] %v736_v21 }
 0x12e   : >> { %739 = vst [vmem:[%s13988_s9 + $0x1160] sm:$0xff] %v738_v22  ;;  %v740_v23 = vld [vmem:[%s13992_s10 + $0x22e0] sm:$0xff] }
 0x12f   : >> { %v742_v24 = vld [vmem:[%s13992_s10 + $0x2300] sm:$0xff]  ;;  %741 = vst [vmem:[%s13988_s9 + $0x1170] sm:$0xff] %v740_v23 }
 0x130   : >> { %v744_v25 = vld [vmem:[%s13992_s10 + $0x2320] sm:$0xff]  ;;  %743 = vst [vmem:[%s13988_s9 + $0x1180] sm:$0xff] %v742_v24 }
 0x131   : >> { %745 = vst [vmem:[%s13988_s9 + $0x1190] sm:$0xff] %v744_v25  ;;  %v746_v26 = vld [vmem:[%s13992_s10 + $0x2340] sm:$0xff] }
 0x132   : >> { %v748_v27 = vld [vmem:[%s13992_s10 + $0x2360] sm:$0xff]  ;;  %747 = vst [vmem:[%s13988_s9 + $0x11a0] sm:$0xff] %v746_v26 }
 0x133   : >> { %v750_v28 = vld [vmem:[%s13992_s10 + $0x2380] sm:$0xff]  ;;  %749 = vst [vmem:[%s13988_s9 + $0x11b0] sm:$0xff] %v748_v27 }
 0x134   : >> { %751 = vst [vmem:[%s13988_s9 + $0x11c0] sm:$0xff] %v750_v28  ;;  %v752_v29 = vld [vmem:[%s13992_s10 + $0x23a0] sm:$0xff] }
 0x135   : >> { %v754_v30 = vld [vmem:[%s13992_s10 + $0x23c0] sm:$0xff]  ;;  %753 = vst [vmem:[%s13988_s9 + $0x11d0] sm:$0xff] %v752_v29 }
 0x136   : >> { %v756_v31 = vld [vmem:[%s13992_s10 + $0x23e0] sm:$0xff]  ;;  %755 = vst [vmem:[%s13988_s9 + $0x11e0] sm:$0xff] %v754_v30 }
 0x137   : >> { %757 = vst [vmem:[%s13988_s9 + $0x11f0] sm:$0xff] %v756_v31  ;;  %v758_v32 = vld [vmem:[%s13992_s10 + $0x2400] sm:$0xff] }
 0x138   : >> { %v760_v33 = vld [vmem:[%s13992_s10 + $0x2420] sm:$0xff]  ;;  %759 = vst [vmem:[%s13988_s9 + $0x1200] sm:$0xff] %v758_v32 }
 0x139   : >> { %v762_v34 = vld [vmem:[%s13992_s10 + $0x2440] sm:$0xff]  ;;  %761 = vst [vmem:[%s13988_s9 + $0x1210] sm:$0xff] %v760_v33 }
 0x13a   : >> { %763 = vst [vmem:[%s13988_s9 + $0x1220] sm:$0xff] %v762_v34  ;;  %v764_v35 = vld [vmem:[%s13992_s10 + $0x2460] sm:$0xff] }
 0x13b   : >> { %v766_v36 = vld [vmem:[%s13992_s10 + $0x2480] sm:$0xff]  ;;  %765 = vst [vmem:[%s13988_s9 + $0x1230] sm:$0xff] %v764_v35 }
 0x13c   : >> { %v768_v37 = vld [vmem:[%s13992_s10 + $0x24a0] sm:$0xff]  ;;  %767 = vst [vmem:[%s13988_s9 + $0x1240] sm:$0xff] %v766_v36 }
 0x13d   : >> { %769 = vst [vmem:[%s13988_s9 + $0x1250] sm:$0xff] %v768_v37  ;;  %v770_v38 = vld [vmem:[%s13992_s10 + $0x24c0] sm:$0xff] }
 0x13e   : >> { %v772_v39 = vld [vmem:[%s13992_s10 + $0x24e0] sm:$0xff]  ;;  %771 = vst [vmem:[%s13988_s9 + $0x1260] sm:$0xff] %v770_v38 }
 0x13f   : >> { %v774_v40 = vld [vmem:[%s13992_s10 + $0x2500] sm:$0xff]  ;;  %773 = vst [vmem:[%s13988_s9 + $0x1270] sm:$0xff] %v772_v39 }
 0x140   : >> { %775 = vst [vmem:[%s13988_s9 + $0x1280] sm:$0xff] %v774_v40  ;;  %v776_v41 = vld [vmem:[%s13992_s10 + $0x2520] sm:$0xff] }
 0x141   : >> { %v778_v42 = vld [vmem:[%s13992_s10 + $0x2540] sm:$0xff]  ;;  %777 = vst [vmem:[%s13988_s9 + $0x1290] sm:$0xff] %v776_v41 }
 0x142   : >> { %v780_v43 = vld [vmem:[%s13992_s10 + $0x2560] sm:$0xff]  ;;  %779 = vst [vmem:[%s13988_s9 + $0x12a0] sm:$0xff] %v778_v42 }
 0x143   : >> { %781 = vst [vmem:[%s13988_s9 + $0x12b0] sm:$0xff] %v780_v43  ;;  %v782_v44 = vld [vmem:[%s13992_s10 + $0x2580] sm:$0xff] }
 0x144   : >> { %v784_v45 = vld [vmem:[%s13992_s10 + $0x25a0] sm:$0xff]  ;;  %783 = vst [vmem:[%s13988_s9 + $0x12c0] sm:$0xff] %v782_v44 }
 0x145   : >> { %v786_v46 = vld [vmem:[%s13992_s10 + $0x25c0] sm:$0xff]  ;;  %785 = vst [vmem:[%s13988_s9 + $0x12d0] sm:$0xff] %v784_v45 }
 0x146   : >> { %787 = vst [vmem:[%s13988_s9 + $0x12e0] sm:$0xff] %v786_v46  ;;  %v788_v47 = vld [vmem:[%s13992_s10 + $0x25e0] sm:$0xff] }
 0x147   : >> { %v790_v48 = vld [vmem:[%s13992_s10 + $0x2600] sm:$0xff]  ;;  %789 = vst [vmem:[%s13988_s9 + $0x12f0] sm:$0xff] %v788_v47 }
 0x148   : >> { %v792_v49 = vld [vmem:[%s13992_s10 + $0x2620] sm:$0xff]  ;;  %791 = vst [vmem:[%s13988_s9 + $0x1300] sm:$0xff] %v790_v48 }
 0x149   : >> { %793 = vst [vmem:[%s13988_s9 + $0x1310] sm:$0xff] %v792_v49  ;;  %v794_v50 = vld [vmem:[%s13992_s10 + $0x2640] sm:$0xff] }
 0x14a   : >> { %v796_v51 = vld [vmem:[%s13992_s10 + $0x2660] sm:$0xff]  ;;  %795 = vst [vmem:[%s13988_s9 + $0x1320] sm:$0xff] %v794_v50 }
 0x14b   : >> { %v798_v52 = vld [vmem:[%s13992_s10 + $0x2680] sm:$0xff]  ;;  %797 = vst [vmem:[%s13988_s9 + $0x1330] sm:$0xff] %v796_v51 }
 0x14c   : >> { %799 = vst [vmem:[%s13988_s9 + $0x1340] sm:$0xff] %v798_v52  ;;  %v800_v53 = vld [vmem:[%s13992_s10 + $0x26a0] sm:$0xff] }
 0x14d   : >> { %v802_v54 = vld [vmem:[%s13992_s10 + $0x26c0] sm:$0xff]  ;;  %801 = vst [vmem:[%s13988_s9 + $0x1350] sm:$0xff] %v800_v53 }
 0x14e   : >> { %v804_v55 = vld [vmem:[%s13992_s10 + $0x26e0] sm:$0xff]  ;;  %803 = vst [vmem:[%s13988_s9 + $0x1360] sm:$0xff] %v802_v54 }
 0x14f   : >> { %805 = vst [vmem:[%s13988_s9 + $0x1370] sm:$0xff] %v804_v55  ;;  %v806_v56 = vld [vmem:[%s13992_s10 + $0x2700] sm:$0xff] }
 0x150   : >> { %v808_v57 = vld [vmem:[%s13992_s10 + $0x2720] sm:$0xff]  ;;  %807 = vst [vmem:[%s13988_s9 + $0x1380] sm:$0xff] %v806_v56 }
 0x151   : >> { %v810_v58 = vld [vmem:[%s13992_s10 + $0x2740] sm:$0xff]  ;;  %809 = vst [vmem:[%s13988_s9 + $0x1390] sm:$0xff] %v808_v57 }
 0x152   : >> { %811 = vst [vmem:[%s13988_s9 + $0x13a0] sm:$0xff] %v810_v58  ;;  %v812_v59 = vld [vmem:[%s13992_s10 + $0x2760] sm:$0xff] }
 0x153   : >> { %v814_v60 = vld [vmem:[%s13992_s10 + $0x2780] sm:$0xff]  ;;  %813 = vst [vmem:[%s13988_s9 + $0x13b0] sm:$0xff] %v812_v59 }
 0x154   : >> { %v816_v61 = vld [vmem:[%s13992_s10 + $0x27a0] sm:$0xff]  ;;  %815 = vst [vmem:[%s13988_s9 + $0x13c0] sm:$0xff] %v814_v60 }
 0x155   : >> { %817 = vst [vmem:[%s13988_s9 + $0x13d0] sm:$0xff] %v816_v61  ;;  %v818_v62 = vld [vmem:[%s13992_s10 + $0x27c0] sm:$0xff] }
 0x156   : >> { %v820_v63 = vld [vmem:[%s13992_s10 + $0x27e0] sm:$0xff]  ;;  %819 = vst [vmem:[%s13988_s9 + $0x13e0] sm:$0xff] %v818_v62 }
 0x157   : >> { %v822_v0 = vld [vmem:[%s13992_s10 + $0x2800] sm:$0xff]  ;;  %821 = vst [vmem:[%s13988_s9 + $0x13f0] sm:$0xff] %v820_v63 }
 0x158   : >> { %823 = vst [vmem:[%s13988_s9 + $0x1400] sm:$0xff] %v822_v0  ;;  %v824_v1 = vld [vmem:[%s13992_s10 + $0x2820] sm:$0xff] }
 0x159   : >> { %v826_v2 = vld [vmem:[%s13992_s10 + $0x2840] sm:$0xff]  ;;  %825 = vst [vmem:[%s13988_s9 + $0x1410] sm:$0xff] %v824_v1 }
 0x15a   : >> { %v828_v3 = vld [vmem:[%s13992_s10 + $0x2860] sm:$0xff]  ;;  %827 = vst [vmem:[%s13988_s9 + $0x1420] sm:$0xff] %v826_v2 }
 0x15b   : >> { %829 = vst [vmem:[%s13988_s9 + $0x1430] sm:$0xff] %v828_v3  ;;  %v830_v4 = vld [vmem:[%s13992_s10 + $0x2880] sm:$0xff] }
 0x15c   : >> { %v832_v5 = vld [vmem:[%s13992_s10 + $0x28a0] sm:$0xff]  ;;  %831 = vst [vmem:[%s13988_s9 + $0x1440] sm:$0xff] %v830_v4 }
 0x15d   : >> { %v834_v6 = vld [vmem:[%s13992_s10 + $0x28c0] sm:$0xff]  ;;  %833 = vst [vmem:[%s13988_s9 + $0x1450] sm:$0xff] %v832_v5 }
 0x15e   : >> { %835 = vst [vmem:[%s13988_s9 + $0x1460] sm:$0xff] %v834_v6  ;;  %v836_v7 = vld [vmem:[%s13992_s10 + $0x28e0] sm:$0xff] }
 0x15f   : >> { %v838_v8 = vld [vmem:[%s13992_s10 + $0x2900] sm:$0xff]  ;;  %837 = vst [vmem:[%s13988_s9 + $0x1470] sm:$0xff] %v836_v7 }
 0x160   : >> { %v840_v9 = vld [vmem:[%s13992_s10 + $0x2920] sm:$0xff]  ;;  %839 = vst [vmem:[%s13988_s9 + $0x1480] sm:$0xff] %v838_v8 }
 0x161   : >> { %841 = vst [vmem:[%s13988_s9 + $0x1490] sm:$0xff] %v840_v9  ;;  %v842_v10 = vld [vmem:[%s13992_s10 + $0x2940] sm:$0xff] }
 0x162   : >> { %v844_v11 = vld [vmem:[%s13992_s10 + $0x2960] sm:$0xff]  ;;  %843 = vst [vmem:[%s13988_s9 + $0x14a0] sm:$0xff] %v842_v10 }
 0x163   : >> { %v846_v12 = vld [vmem:[%s13992_s10 + $0x2980] sm:$0xff]  ;;  %845 = vst [vmem:[%s13988_s9 + $0x14b0] sm:$0xff] %v844_v11 }
 0x164   : >> { %847 = vst [vmem:[%s13988_s9 + $0x14c0] sm:$0xff] %v846_v12  ;;  %v848_v13 = vld [vmem:[%s13992_s10 + $0x29a0] sm:$0xff] }
 0x165   : >> { %v850_v14 = vld [vmem:[%s13992_s10 + $0x29c0] sm:$0xff]  ;;  %849 = vst [vmem:[%s13988_s9 + $0x14d0] sm:$0xff] %v848_v13 }
 0x166   : >> { %v852_v15 = vld [vmem:[%s13992_s10 + $0x29e0] sm:$0xff]  ;;  %851 = vst [vmem:[%s13988_s9 + $0x14e0] sm:$0xff] %v850_v14 }
 0x167   : >> { %853 = vst [vmem:[%s13988_s9 + $0x14f0] sm:$0xff] %v852_v15  ;;  %v854_v16 = vld [vmem:[%s13992_s10 + $0x2a00] sm:$0xff] }
 0x168   : >> { %v856_v17 = vld [vmem:[%s13992_s10 + $0x2a20] sm:$0xff]  ;;  %855 = vst [vmem:[%s13988_s9 + $0x1500] sm:$0xff] %v854_v16 }
 0x169   : >> { %v858_v18 = vld [vmem:[%s13992_s10 + $0x2a40] sm:$0xff]  ;;  %857 = vst [vmem:[%s13988_s9 + $0x1510] sm:$0xff] %v856_v17 }
 0x16a   : >> { %859 = vst [vmem:[%s13988_s9 + $0x1520] sm:$0xff] %v858_v18  ;;  %v860_v19 = vld [vmem:[%s13992_s10 + $0x2a60] sm:$0xff] }
 0x16b   : >> { %v862_v20 = vld [vmem:[%s13992_s10 + $0x2a80] sm:$0xff]  ;;  %861 = vst [vmem:[%s13988_s9 + $0x1530] sm:$0xff] %v860_v19 }
 0x16c   : >> { %v864_v21 = vld [vmem:[%s13992_s10 + $0x2aa0] sm:$0xff]  ;;  %863 = vst [vmem:[%s13988_s9 + $0x1540] sm:$0xff] %v862_v20 }
 0x16d   : >> { %865 = vst [vmem:[%s13988_s9 + $0x1550] sm:$0xff] %v864_v21  ;;  %v866_v22 = vld [vmem:[%s13992_s10 + $0x2ac0] sm:$0xff] }
 0x16e   : >> { %v868_v23 = vld [vmem:[%s13992_s10 + $0x2ae0] sm:$0xff]  ;;  %867 = vst [vmem:[%s13988_s9 + $0x1560] sm:$0xff] %v866_v22 }
 0x16f   : >> { %v870_v24 = vld [vmem:[%s13992_s10 + $0x2b00] sm:$0xff]  ;;  %869 = vst [vmem:[%s13988_s9 + $0x1570] sm:$0xff] %v868_v23 }
 0x170   : >> { %871 = vst [vmem:[%s13988_s9 + $0x1580] sm:$0xff] %v870_v24  ;;  %v872_v25 = vld [vmem:[%s13992_s10 + $0x2b20] sm:$0xff] }
 0x171   : >> { %v874_v26 = vld [vmem:[%s13992_s10 + $0x2b40] sm:$0xff]  ;;  %873 = vst [vmem:[%s13988_s9 + $0x1590] sm:$0xff] %v872_v25 }
 0x172   : >> { %v876_v27 = vld [vmem:[%s13992_s10 + $0x2b60] sm:$0xff]  ;;  %875 = vst [vmem:[%s13988_s9 + $0x15a0] sm:$0xff] %v874_v26 }
 0x173   : >> { %877 = vst [vmem:[%s13988_s9 + $0x15b0] sm:$0xff] %v876_v27  ;;  %v878_v28 = vld [vmem:[%s13992_s10 + $0x2b80] sm:$0xff] }
 0x174   : >> { %v880_v29 = vld [vmem:[%s13992_s10 + $0x2ba0] sm:$0xff]  ;;  %879 = vst [vmem:[%s13988_s9 + $0x15c0] sm:$0xff] %v878_v28 }
 0x175   : >> { %v882_v30 = vld [vmem:[%s13992_s10 + $0x2bc0] sm:$0xff]  ;;  %881 = vst [vmem:[%s13988_s9 + $0x15d0] sm:$0xff] %v880_v29 }
 0x176   : >> { %883 = vst [vmem:[%s13988_s9 + $0x15e0] sm:$0xff] %v882_v30  ;;  %v884_v31 = vld [vmem:[%s13992_s10 + $0x2be0] sm:$0xff] }
 0x177   : >> { %v886_v32 = vld [vmem:[%s13992_s10 + $0x2c00] sm:$0xff]  ;;  %885 = vst [vmem:[%s13988_s9 + $0x15f0] sm:$0xff] %v884_v31 }
 0x178   : >> { %v888_v33 = vld [vmem:[%s13992_s10 + $0x2c20] sm:$0xff]  ;;  %887 = vst [vmem:[%s13988_s9 + $0x1600] sm:$0xff] %v886_v32 }
 0x179   : >> { %889 = vst [vmem:[%s13988_s9 + $0x1610] sm:$0xff] %v888_v33  ;;  %v890_v34 = vld [vmem:[%s13992_s10 + $0x2c40] sm:$0xff] }
 0x17a   : >> { %v892_v35 = vld [vmem:[%s13992_s10 + $0x2c60] sm:$0xff]  ;;  %891 = vst [vmem:[%s13988_s9 + $0x1620] sm:$0xff] %v890_v34 }
 0x17b   : >> { %v894_v36 = vld [vmem:[%s13992_s10 + $0x2c80] sm:$0xff]  ;;  %893 = vst [vmem:[%s13988_s9 + $0x1630] sm:$0xff] %v892_v35 }
 0x17c   : >> { %895 = vst [vmem:[%s13988_s9 + $0x1640] sm:$0xff] %v894_v36  ;;  %v896_v37 = vld [vmem:[%s13992_s10 + $0x2ca0] sm:$0xff] }
 0x17d   : >> { %v898_v38 = vld [vmem:[%s13992_s10 + $0x2cc0] sm:$0xff]  ;;  %897 = vst [vmem:[%s13988_s9 + $0x1650] sm:$0xff] %v896_v37 }
 0x17e   : >> { %v900_v39 = vld [vmem:[%s13992_s10 + $0x2ce0] sm:$0xff]  ;;  %899 = vst [vmem:[%s13988_s9 + $0x1660] sm:$0xff] %v898_v38 }
 0x17f   : >> { %901 = vst [vmem:[%s13988_s9 + $0x1670] sm:$0xff] %v900_v39  ;;  %v902_v40 = vld [vmem:[%s13992_s10 + $0x2d00] sm:$0xff] }
 0x180   : >> { %v904_v41 = vld [vmem:[%s13992_s10 + $0x2d20] sm:$0xff]  ;;  %903 = vst [vmem:[%s13988_s9 + $0x1680] sm:$0xff] %v902_v40 }
 0x181   : >> { %v906_v42 = vld [vmem:[%s13992_s10 + $0x2d40] sm:$0xff]  ;;  %905 = vst [vmem:[%s13988_s9 + $0x1690] sm:$0xff] %v904_v41 }
 0x182   : >> { %907 = vst [vmem:[%s13988_s9 + $0x16a0] sm:$0xff] %v906_v42  ;;  %v908_v43 = vld [vmem:[%s13992_s10 + $0x2d60] sm:$0xff] }
 0x183   : >> { %v910_v44 = vld [vmem:[%s13992_s10 + $0x2d80] sm:$0xff]  ;;  %909 = vst [vmem:[%s13988_s9 + $0x16b0] sm:$0xff] %v908_v43 }
 0x184   : >> { %v912_v45 = vld [vmem:[%s13992_s10 + $0x2da0] sm:$0xff]  ;;  %911 = vst [vmem:[%s13988_s9 + $0x16c0] sm:$0xff] %v910_v44 }
 0x185   : >> { %913 = vst [vmem:[%s13988_s9 + $0x16d0] sm:$0xff] %v912_v45  ;;  %v914_v46 = vld [vmem:[%s13992_s10 + $0x2dc0] sm:$0xff] }
 0x186   : >> { %v916_v47 = vld [vmem:[%s13992_s10 + $0x2de0] sm:$0xff]  ;;  %915 = vst [vmem:[%s13988_s9 + $0x16e0] sm:$0xff] %v914_v46 }
 0x187   : >> { %v918_v48 = vld [vmem:[%s13992_s10 + $0x2e00] sm:$0xff]  ;;  %917 = vst [vmem:[%s13988_s9 + $0x16f0] sm:$0xff] %v916_v47 }
 0x188   : >> { %919 = vst [vmem:[%s13988_s9 + $0x1700] sm:$0xff] %v918_v48  ;;  %v920_v49 = vld [vmem:[%s13992_s10 + $0x2e20] sm:$0xff] }
 0x189   : >> { %v922_v50 = vld [vmem:[%s13992_s10 + $0x2e40] sm:$0xff]  ;;  %921 = vst [vmem:[%s13988_s9 + $0x1710] sm:$0xff] %v920_v49 }
 0x18a   : >> { %v924_v51 = vld [vmem:[%s13992_s10 + $0x2e60] sm:$0xff]  ;;  %923 = vst [vmem:[%s13988_s9 + $0x1720] sm:$0xff] %v922_v50 }
 0x18b   : >> { %925 = vst [vmem:[%s13988_s9 + $0x1730] sm:$0xff] %v924_v51  ;;  %v926_v52 = vld [vmem:[%s13992_s10 + $0x2e80] sm:$0xff] }
 0x18c   : >> { %v928_v53 = vld [vmem:[%s13992_s10 + $0x2ea0] sm:$0xff]  ;;  %927 = vst [vmem:[%s13988_s9 + $0x1740] sm:$0xff] %v926_v52 }
 0x18d   : >> { %v930_v54 = vld [vmem:[%s13992_s10 + $0x2ec0] sm:$0xff]  ;;  %929 = vst [vmem:[%s13988_s9 + $0x1750] sm:$0xff] %v928_v53 }
 0x18e   : >> { %931 = vst [vmem:[%s13988_s9 + $0x1760] sm:$0xff] %v930_v54  ;;  %v932_v55 = vld [vmem:[%s13992_s10 + $0x2ee0] sm:$0xff] }
 0x18f   : >> { %v934_v56 = vld [vmem:[%s13992_s10 + $0x2f00] sm:$0xff]  ;;  %933 = vst [vmem:[%s13988_s9 + $0x1770] sm:$0xff] %v932_v55 }
 0x190   : >> { %v936_v57 = vld [vmem:[%s13992_s10 + $0x2f20] sm:$0xff]  ;;  %935 = vst [vmem:[%s13988_s9 + $0x1780] sm:$0xff] %v934_v56 }
 0x191   : >> { %937 = vst [vmem:[%s13988_s9 + $0x1790] sm:$0xff] %v936_v57  ;;  %v938_v58 = vld [vmem:[%s13992_s10 + $0x2f40] sm:$0xff] }
 0x192   : >> { %v940_v59 = vld [vmem:[%s13992_s10 + $0x2f60] sm:$0xff]  ;;  %939 = vst [vmem:[%s13988_s9 + $0x17a0] sm:$0xff] %v938_v58 }
 0x193   : >> { %v942_v60 = vld [vmem:[%s13992_s10 + $0x2f80] sm:$0xff]  ;;  %941 = vst [vmem:[%s13988_s9 + $0x17b0] sm:$0xff] %v940_v59 }
 0x194   : >> { %943 = vst [vmem:[%s13988_s9 + $0x17c0] sm:$0xff] %v942_v60  ;;  %v944_v61 = vld [vmem:[%s13992_s10 + $0x2fa0] sm:$0xff] }
 0x195   : >> { %v946_v62 = vld [vmem:[%s13992_s10 + $0x2fc0] sm:$0xff]  ;;  %945 = vst [vmem:[%s13988_s9 + $0x17d0] sm:$0xff] %v944_v61 }
 0x196   : >> { %v948_v63 = vld [vmem:[%s13992_s10 + $0x2fe0] sm:$0xff]  ;;  %947 = vst [vmem:[%s13988_s9 + $0x17e0] sm:$0xff] %v946_v62 }
 0x197   : >> { %949 = vst [vmem:[%s13988_s9 + $0x17f0] sm:$0xff] %v948_v63  ;;  %v950_v0 = vld [vmem:[%s13992_s10 + $0x3000] sm:$0xff] }
 0x198   : >> { %v952_v1 = vld [vmem:[%s13992_s10 + $0x3020] sm:$0xff]  ;;  %951 = vst [vmem:[%s13988_s9 + $0x1800] sm:$0xff] %v950_v0 }
 0x199   : >> { %v954_v2 = vld [vmem:[%s13992_s10 + $0x3040] sm:$0xff]  ;;  %953 = vst [vmem:[%s13988_s9 + $0x1810] sm:$0xff] %v952_v1 }
 0x19a   : >> { %955 = vst [vmem:[%s13988_s9 + $0x1820] sm:$0xff] %v954_v2  ;;  %v956_v3 = vld [vmem:[%s13992_s10 + $0x3060] sm:$0xff] }
 0x19b   : >> { %v958_v4 = vld [vmem:[%s13992_s10 + $0x3080] sm:$0xff]  ;;  %957 = vst [vmem:[%s13988_s9 + $0x1830] sm:$0xff] %v956_v3 }
 0x19c   : >> { %v960_v5 = vld [vmem:[%s13992_s10 + $0x30a0] sm:$0xff]  ;;  %959 = vst [vmem:[%s13988_s9 + $0x1840] sm:$0xff] %v958_v4 }
 0x19d   : >> { %961 = vst [vmem:[%s13988_s9 + $0x1850] sm:$0xff] %v960_v5  ;;  %v962_v6 = vld [vmem:[%s13992_s10 + $0x30c0] sm:$0xff] }
 0x19e   : >> { %v964_v7 = vld [vmem:[%s13992_s10 + $0x30e0] sm:$0xff]  ;;  %963 = vst [vmem:[%s13988_s9 + $0x1860] sm:$0xff] %v962_v6 }
 0x19f   : >> { %v966_v8 = vld [vmem:[%s13992_s10 + $0x3100] sm:$0xff]  ;;  %965 = vst [vmem:[%s13988_s9 + $0x1870] sm:$0xff] %v964_v7 }
 0x1a0   : >> { %967 = vst [vmem:[%s13988_s9 + $0x1880] sm:$0xff] %v966_v8  ;;  %v968_v9 = vld [vmem:[%s13992_s10 + $0x3120] sm:$0xff] }
 0x1a1   : >> { %v970_v10 = vld [vmem:[%s13992_s10 + $0x3140] sm:$0xff]  ;;  %969 = vst [vmem:[%s13988_s9 + $0x1890] sm:$0xff] %v968_v9 }
 0x1a2   : >> { %v972_v11 = vld [vmem:[%s13992_s10 + $0x3160] sm:$0xff]  ;;  %971 = vst [vmem:[%s13988_s9 + $0x18a0] sm:$0xff] %v970_v10 }
 0x1a3   : >> { %973 = vst [vmem:[%s13988_s9 + $0x18b0] sm:$0xff] %v972_v11  ;;  %v974_v12 = vld [vmem:[%s13992_s10 + $0x3180] sm:$0xff] }
 0x1a4   : >> { %v976_v13 = vld [vmem:[%s13992_s10 + $0x31a0] sm:$0xff]  ;;  %975 = vst [vmem:[%s13988_s9 + $0x18c0] sm:$0xff] %v974_v12 }
 0x1a5   : >> { %v978_v14 = vld [vmem:[%s13992_s10 + $0x31c0] sm:$0xff]  ;;  %977 = vst [vmem:[%s13988_s9 + $0x18d0] sm:$0xff] %v976_v13 }
 0x1a6   : >> { %979 = vst [vmem:[%s13988_s9 + $0x18e0] sm:$0xff] %v978_v14  ;;  %v980_v15 = vld [vmem:[%s13992_s10 + $0x31e0] sm:$0xff] }
 0x1a7   : >> { %v982_v16 = vld [vmem:[%s13992_s10 + $0x3200] sm:$0xff]  ;;  %981 = vst [vmem:[%s13988_s9 + $0x18f0] sm:$0xff] %v980_v15 }
 0x1a8   : >> { %v984_v17 = vld [vmem:[%s13992_s10 + $0x3220] sm:$0xff]  ;;  %983 = vst [vmem:[%s13988_s9 + $0x1900] sm:$0xff] %v982_v16 }
 0x1a9   : >> { %985 = vst [vmem:[%s13988_s9 + $0x1910] sm:$0xff] %v984_v17  ;;  %v986_v18 = vld [vmem:[%s13992_s10 + $0x3240] sm:$0xff] }
 0x1aa   : >> { %v988_v19 = vld [vmem:[%s13992_s10 + $0x3260] sm:$0xff]  ;;  %987 = vst [vmem:[%s13988_s9 + $0x1920] sm:$0xff] %v986_v18 }
 0x1ab   : >> { %v990_v20 = vld [vmem:[%s13992_s10 + $0x3280] sm:$0xff]  ;;  %989 = vst [vmem:[%s13988_s9 + $0x1930] sm:$0xff] %v988_v19 }
 0x1ac   : >> { %991 = vst [vmem:[%s13988_s9 + $0x1940] sm:$0xff] %v990_v20  ;;  %v992_v21 = vld [vmem:[%s13992_s10 + $0x32a0] sm:$0xff] }
 0x1ad   : >> { %v994_v22 = vld [vmem:[%s13992_s10 + $0x32c0] sm:$0xff]  ;;  %993 = vst [vmem:[%s13988_s9 + $0x1950] sm:$0xff] %v992_v21 }
 0x1ae   : >> { %v996_v23 = vld [vmem:[%s13992_s10 + $0x32e0] sm:$0xff]  ;;  %995 = vst [vmem:[%s13988_s9 + $0x1960] sm:$0xff] %v994_v22 }
 0x1af   : >> { %997 = vst [vmem:[%s13988_s9 + $0x1970] sm:$0xff] %v996_v23  ;;  %v998_v24 = vld [vmem:[%s13992_s10 + $0x3300] sm:$0xff] }
 0x1b0   : >> { %v1000_v25 = vld [vmem:[%s13992_s10 + $0x3320] sm:$0xff]  ;;  %999 = vst [vmem:[%s13988_s9 + $0x1980] sm:$0xff] %v998_v24 }
 0x1b1   : >> { %v1002_v26 = vld [vmem:[%s13992_s10 + $0x3340] sm:$0xff]  ;;  %1001 = vst [vmem:[%s13988_s9 + $0x1990] sm:$0xff] %v1000_v25 }
 0x1b2   : >> { %1003 = vst [vmem:[%s13988_s9 + $0x19a0] sm:$0xff] %v1002_v26  ;;  %v1004_v27 = vld [vmem:[%s13992_s10 + $0x3360] sm:$0xff] }
 0x1b3   : >> { %v1006_v28 = vld [vmem:[%s13992_s10 + $0x3380] sm:$0xff]  ;;  %1005 = vst [vmem:[%s13988_s9 + $0x19b0] sm:$0xff] %v1004_v27 }
 0x1b4   : >> { %v1008_v29 = vld [vmem:[%s13992_s10 + $0x33a0] sm:$0xff]  ;;  %1007 = vst [vmem:[%s13988_s9 + $0x19c0] sm:$0xff] %v1006_v28 }
 0x1b5   : >> { %1009 = vst [vmem:[%s13988_s9 + $0x19d0] sm:$0xff] %v1008_v29  ;;  %v1010_v30 = vld [vmem:[%s13992_s10 + $0x33c0] sm:$0xff] }
 0x1b6   : >> { %v1012_v31 = vld [vmem:[%s13992_s10 + $0x33e0] sm:$0xff]  ;;  %1011 = vst [vmem:[%s13988_s9 + $0x19e0] sm:$0xff] %v1010_v30 }
 0x1b7   : >> { %v1014_v32 = vld [vmem:[%s13992_s10 + $0x3400] sm:$0xff]  ;;  %1013 = vst [vmem:[%s13988_s9 + $0x19f0] sm:$0xff] %v1012_v31 }
 0x1b8   : >> { %1015 = vst [vmem:[%s13988_s9 + $0x1a00] sm:$0xff] %v1014_v32  ;;  %v1016_v33 = vld [vmem:[%s13992_s10 + $0x3420] sm:$0xff] }
 0x1b9   : >> { %v1018_v34 = vld [vmem:[%s13992_s10 + $0x3440] sm:$0xff]  ;;  %1017 = vst [vmem:[%s13988_s9 + $0x1a10] sm:$0xff] %v1016_v33 }
 0x1ba   : >> { %v1020_v35 = vld [vmem:[%s13992_s10 + $0x3460] sm:$0xff]  ;;  %1019 = vst [vmem:[%s13988_s9 + $0x1a20] sm:$0xff] %v1018_v34 }
 0x1bb   : >> { %1021 = vst [vmem:[%s13988_s9 + $0x1a30] sm:$0xff] %v1020_v35  ;;  %v1022_v36 = vld [vmem:[%s13992_s10 + $0x3480] sm:$0xff] }
 0x1bc   : >> { %v1024_v37 = vld [vmem:[%s13992_s10 + $0x34a0] sm:$0xff]  ;;  %1023 = vst [vmem:[%s13988_s9 + $0x1a40] sm:$0xff] %v1022_v36 }
 0x1bd   : >> { %v1026_v38 = vld [vmem:[%s13992_s10 + $0x34c0] sm:$0xff]  ;;  %1025 = vst [vmem:[%s13988_s9 + $0x1a50] sm:$0xff] %v1024_v37 }
 0x1be   : >> { %1027 = vst [vmem:[%s13988_s9 + $0x1a60] sm:$0xff] %v1026_v38  ;;  %v1028_v39 = vld [vmem:[%s13992_s10 + $0x34e0] sm:$0xff] }
 0x1bf   : >> { %v1030_v40 = vld [vmem:[%s13992_s10 + $0x3500] sm:$0xff]  ;;  %1029 = vst [vmem:[%s13988_s9 + $0x1a70] sm:$0xff] %v1028_v39 }
 0x1c0   : >> { %v1032_v41 = vld [vmem:[%s13992_s10 + $0x3520] sm:$0xff]  ;;  %1031 = vst [vmem:[%s13988_s9 + $0x1a80] sm:$0xff] %v1030_v40 }
 0x1c1   : >> { %1033 = vst [vmem:[%s13988_s9 + $0x1a90] sm:$0xff] %v1032_v41  ;;  %v1034_v42 = vld [vmem:[%s13992_s10 + $0x3540] sm:$0xff] }
 0x1c2   : >> { %v1036_v43 = vld [vmem:[%s13992_s10 + $0x3560] sm:$0xff]  ;;  %1035 = vst [vmem:[%s13988_s9 + $0x1aa0] sm:$0xff] %v1034_v42 }
 0x1c3   : >> { %v1038_v44 = vld [vmem:[%s13992_s10 + $0x3580] sm:$0xff]  ;;  %1037 = vst [vmem:[%s13988_s9 + $0x1ab0] sm:$0xff] %v1036_v43 }
 0x1c4   : >> { %1039 = vst [vmem:[%s13988_s9 + $0x1ac0] sm:$0xff] %v1038_v44  ;;  %v1040_v45 = vld [vmem:[%s13992_s10 + $0x35a0] sm:$0xff] }
 0x1c5   : >> { %v1042_v46 = vld [vmem:[%s13992_s10 + $0x35c0] sm:$0xff]  ;;  %1041 = vst [vmem:[%s13988_s9 + $0x1ad0] sm:$0xff] %v1040_v45 }
 0x1c6   : >> { %v1044_v47 = vld [vmem:[%s13992_s10 + $0x35e0] sm:$0xff]  ;;  %1043 = vst [vmem:[%s13988_s9 + $0x1ae0] sm:$0xff] %v1042_v46 }
 0x1c7   : >> { %1045 = vst [vmem:[%s13988_s9 + $0x1af0] sm:$0xff] %v1044_v47  ;;  %v1046_v48 = vld [vmem:[%s13992_s10 + $0x3600] sm:$0xff] }
 0x1c8   : >> { %v1048_v49 = vld [vmem:[%s13992_s10 + $0x3620] sm:$0xff]  ;;  %1047 = vst [vmem:[%s13988_s9 + $0x1b00] sm:$0xff] %v1046_v48 }
 0x1c9   : >> { %v1050_v50 = vld [vmem:[%s13992_s10 + $0x3640] sm:$0xff]  ;;  %1049 = vst [vmem:[%s13988_s9 + $0x1b10] sm:$0xff] %v1048_v49 }
 0x1ca   : >> { %1051 = vst [vmem:[%s13988_s9 + $0x1b20] sm:$0xff] %v1050_v50  ;;  %v1052_v51 = vld [vmem:[%s13992_s10 + $0x3660] sm:$0xff] }
 0x1cb   : >> { %v1054_v52 = vld [vmem:[%s13992_s10 + $0x3680] sm:$0xff]  ;;  %1053 = vst [vmem:[%s13988_s9 + $0x1b30] sm:$0xff] %v1052_v51 }
 0x1cc   : >> { %v1056_v53 = vld [vmem:[%s13992_s10 + $0x36a0] sm:$0xff]  ;;  %1055 = vst [vmem:[%s13988_s9 + $0x1b40] sm:$0xff] %v1054_v52 }
 0x1cd   : >> { %1057 = vst [vmem:[%s13988_s9 + $0x1b50] sm:$0xff] %v1056_v53  ;;  %v1058_v54 = vld [vmem:[%s13992_s10 + $0x36c0] sm:$0xff] }
 0x1ce   : >> { %v1060_v55 = vld [vmem:[%s13992_s10 + $0x36e0] sm:$0xff]  ;;  %1059 = vst [vmem:[%s13988_s9 + $0x1b60] sm:$0xff] %v1058_v54 }
 0x1cf   : >> { %v1062_v56 = vld [vmem:[%s13992_s10 + $0x3700] sm:$0xff]  ;;  %1061 = vst [vmem:[%s13988_s9 + $0x1b70] sm:$0xff] %v1060_v55 }
 0x1d0   : >> { %1063 = vst [vmem:[%s13988_s9 + $0x1b80] sm:$0xff] %v1062_v56  ;;  %v1064_v57 = vld [vmem:[%s13992_s10 + $0x3720] sm:$0xff] }
 0x1d1   : >> { %v1066_v58 = vld [vmem:[%s13992_s10 + $0x3740] sm:$0xff]  ;;  %1065 = vst [vmem:[%s13988_s9 + $0x1b90] sm:$0xff] %v1064_v57 }
 0x1d2   : >> { %v1068_v59 = vld [vmem:[%s13992_s10 + $0x3760] sm:$0xff]  ;;  %1067 = vst [vmem:[%s13988_s9 + $0x1ba0] sm:$0xff] %v1066_v58 }
 0x1d3   : >> { %1069 = vst [vmem:[%s13988_s9 + $0x1bb0] sm:$0xff] %v1068_v59  ;;  %v1070_v60 = vld [vmem:[%s13992_s10 + $0x3780] sm:$0xff] }
 0x1d4   : >> { %v1072_v61 = vld [vmem:[%s13992_s10 + $0x37a0] sm:$0xff]  ;;  %1071 = vst [vmem:[%s13988_s9 + $0x1bc0] sm:$0xff] %v1070_v60 }
 0x1d5   : >> { %v1074_v62 = vld [vmem:[%s13992_s10 + $0x37c0] sm:$0xff]  ;;  %1073 = vst [vmem:[%s13988_s9 + $0x1bd0] sm:$0xff] %v1072_v61 }
 0x1d6   : >> { %1075 = vst [vmem:[%s13988_s9 + $0x1be0] sm:$0xff] %v1074_v62  ;;  %v1076_v63 = vld [vmem:[%s13992_s10 + $0x37e0] sm:$0xff] }
 0x1d7   : >> { %v1078_v0 = vld [vmem:[%s13992_s10 + $0x3800] sm:$0xff]  ;;  %1077 = vst [vmem:[%s13988_s9 + $0x1bf0] sm:$0xff] %v1076_v63 }
 0x1d8   : >> { %v1080_v1 = vld [vmem:[%s13992_s10 + $0x3820] sm:$0xff]  ;;  %1079 = vst [vmem:[%s13988_s9 + $0x1c00] sm:$0xff] %v1078_v0 }
 0x1d9   : >> { %1081 = vst [vmem:[%s13988_s9 + $0x1c10] sm:$0xff] %v1080_v1  ;;  %v1082_v2 = vld [vmem:[%s13992_s10 + $0x3840] sm:$0xff] }
 0x1da   : >> { %v1084_v3 = vld [vmem:[%s13992_s10 + $0x3860] sm:$0xff]  ;;  %1083 = vst [vmem:[%s13988_s9 + $0x1c20] sm:$0xff] %v1082_v2 }
 0x1db   : >> { %v1086_v4 = vld [vmem:[%s13992_s10 + $0x3880] sm:$0xff]  ;;  %1085 = vst [vmem:[%s13988_s9 + $0x1c30] sm:$0xff] %v1084_v3 }
 0x1dc   : >> { %1087 = vst [vmem:[%s13988_s9 + $0x1c40] sm:$0xff] %v1086_v4  ;;  %v1088_v5 = vld [vmem:[%s13992_s10 + $0x38a0] sm:$0xff] }
 0x1dd   : >> { %v1090_v6 = vld [vmem:[%s13992_s10 + $0x38c0] sm:$0xff]  ;;  %1089 = vst [vmem:[%s13988_s9 + $0x1c50] sm:$0xff] %v1088_v5 }
 0x1de   : >> { %v1092_v7 = vld [vmem:[%s13992_s10 + $0x38e0] sm:$0xff]  ;;  %1091 = vst [vmem:[%s13988_s9 + $0x1c60] sm:$0xff] %v1090_v6 }
 0x1df   : >> { %1093 = vst [vmem:[%s13988_s9 + $0x1c70] sm:$0xff] %v1092_v7  ;;  %v1094_v8 = vld [vmem:[%s13992_s10 + $0x3900] sm:$0xff] }
 0x1e0   : >> { %v1096_v9 = vld [vmem:[%s13992_s10 + $0x3920] sm:$0xff]  ;;  %1095 = vst [vmem:[%s13988_s9 + $0x1c80] sm:$0xff] %v1094_v8 }
 0x1e1   : >> { %v1098_v10 = vld [vmem:[%s13992_s10 + $0x3940] sm:$0xff]  ;;  %1097 = vst [vmem:[%s13988_s9 + $0x1c90] sm:$0xff] %v1096_v9 }
 0x1e2   : >> { %1099 = vst [vmem:[%s13988_s9 + $0x1ca0] sm:$0xff] %v1098_v10  ;;  %v1100_v11 = vld [vmem:[%s13992_s10 + $0x3960] sm:$0xff] }
 0x1e3   : >> { %v1102_v12 = vld [vmem:[%s13992_s10 + $0x3980] sm:$0xff]  ;;  %1101 = vst [vmem:[%s13988_s9 + $0x1cb0] sm:$0xff] %v1100_v11 }
 0x1e4   : >> { %v1104_v13 = vld [vmem:[%s13992_s10 + $0x39a0] sm:$0xff]  ;;  %1103 = vst [vmem:[%s13988_s9 + $0x1cc0] sm:$0xff] %v1102_v12 }
 0x1e5   : >> { %1105 = vst [vmem:[%s13988_s9 + $0x1cd0] sm:$0xff] %v1104_v13  ;;  %v1106_v14 = vld [vmem:[%s13992_s10 + $0x39c0] sm:$0xff] }
 0x1e6   : >> { %v1108_v15 = vld [vmem:[%s13992_s10 + $0x39e0] sm:$0xff]  ;;  %1107 = vst [vmem:[%s13988_s9 + $0x1ce0] sm:$0xff] %v1106_v14 }
 0x1e7   : >> { %v1110_v16 = vld [vmem:[%s13992_s10 + $0x3a00] sm:$0xff]  ;;  %1109 = vst [vmem:[%s13988_s9 + $0x1cf0] sm:$0xff] %v1108_v15 }
 0x1e8   : >> { %1111 = vst [vmem:[%s13988_s9 + $0x1d00] sm:$0xff] %v1110_v16  ;;  %v1112_v17 = vld [vmem:[%s13992_s10 + $0x3a20] sm:$0xff] }
 0x1e9   : >> { %v1114_v18 = vld [vmem:[%s13992_s10 + $0x3a40] sm:$0xff]  ;;  %1113 = vst [vmem:[%s13988_s9 + $0x1d10] sm:$0xff] %v1112_v17 }
 0x1ea   : >> { %v1116_v19 = vld [vmem:[%s13992_s10 + $0x3a60] sm:$0xff]  ;;  %1115 = vst [vmem:[%s13988_s9 + $0x1d20] sm:$0xff] %v1114_v18 }
 0x1eb   : >> { %1117 = vst [vmem:[%s13988_s9 + $0x1d30] sm:$0xff] %v1116_v19  ;;  %v1118_v20 = vld [vmem:[%s13992_s10 + $0x3a80] sm:$0xff] }
 0x1ec   : >> { %v1120_v21 = vld [vmem:[%s13992_s10 + $0x3aa0] sm:$0xff]  ;;  %1119 = vst [vmem:[%s13988_s9 + $0x1d40] sm:$0xff] %v1118_v20 }
 0x1ed   : >> { %v1122_v22 = vld [vmem:[%s13992_s10 + $0x3ac0] sm:$0xff]  ;;  %1121 = vst [vmem:[%s13988_s9 + $0x1d50] sm:$0xff] %v1120_v21 }
 0x1ee   : >> { %1123 = vst [vmem:[%s13988_s9 + $0x1d60] sm:$0xff] %v1122_v22  ;;  %v1124_v23 = vld [vmem:[%s13992_s10 + $0x3ae0] sm:$0xff] }
 0x1ef   : >> { %v1126_v24 = vld [vmem:[%s13992_s10 + $0x3b00] sm:$0xff]  ;;  %1125 = vst [vmem:[%s13988_s9 + $0x1d70] sm:$0xff] %v1124_v23 }
 0x1f0   : >> { %v1128_v25 = vld [vmem:[%s13992_s10 + $0x3b20] sm:$0xff]  ;;  %1127 = vst [vmem:[%s13988_s9 + $0x1d80] sm:$0xff] %v1126_v24 }
 0x1f1   : >> { %1129 = vst [vmem:[%s13988_s9 + $0x1d90] sm:$0xff] %v1128_v25  ;;  %v1130_v26 = vld [vmem:[%s13992_s10 + $0x3b40] sm:$0xff] }
 0x1f2   : >> { %v1132_v27 = vld [vmem:[%s13992_s10 + $0x3b60] sm:$0xff]  ;;  %1131 = vst [vmem:[%s13988_s9 + $0x1da0] sm:$0xff] %v1130_v26 }
 0x1f3   : >> { %v1134_v28 = vld [vmem:[%s13992_s10 + $0x3b80] sm:$0xff]  ;;  %1133 = vst [vmem:[%s13988_s9 + $0x1db0] sm:$0xff] %v1132_v27 }
 0x1f4   : >> { %1135 = vst [vmem:[%s13988_s9 + $0x1dc0] sm:$0xff] %v1134_v28  ;;  %v1136_v29 = vld [vmem:[%s13992_s10 + $0x3ba0] sm:$0xff] }
 0x1f5   : >> { %v1138_v30 = vld [vmem:[%s13992_s10 + $0x3bc0] sm:$0xff]  ;;  %1137 = vst [vmem:[%s13988_s9 + $0x1dd0] sm:$0xff] %v1136_v29 }
 0x1f6   : >> { %v1140_v31 = vld [vmem:[%s13992_s10 + $0x3be0] sm:$0xff]  ;;  %1139 = vst [vmem:[%s13988_s9 + $0x1de0] sm:$0xff] %v1138_v30 }
 0x1f7   : >> { %1141 = vst [vmem:[%s13988_s9 + $0x1df0] sm:$0xff] %v1140_v31  ;;  %v1142_v32 = vld [vmem:[%s13992_s10 + $0x3c00] sm:$0xff] }
 0x1f8   : >> { %v1144_v33 = vld [vmem:[%s13992_s10 + $0x3c20] sm:$0xff]  ;;  %1143 = vst [vmem:[%s13988_s9 + $0x1e00] sm:$0xff] %v1142_v32 }
 0x1f9   : >> { %v1146_v34 = vld [vmem:[%s13992_s10 + $0x3c40] sm:$0xff]  ;;  %1145 = vst [vmem:[%s13988_s9 + $0x1e10] sm:$0xff] %v1144_v33 }
 0x1fa   : >> { %1147 = vst [vmem:[%s13988_s9 + $0x1e20] sm:$0xff] %v1146_v34  ;;  %v1148_v35 = vld [vmem:[%s13992_s10 + $0x3c60] sm:$0xff] }
 0x1fb   : >> { %v1150_v36 = vld [vmem:[%s13992_s10 + $0x3c80] sm:$0xff]  ;;  %1149 = vst [vmem:[%s13988_s9 + $0x1e30] sm:$0xff] %v1148_v35 }
 0x1fc   : >> { %v1152_v37 = vld [vmem:[%s13992_s10 + $0x3ca0] sm:$0xff]  ;;  %1151 = vst [vmem:[%s13988_s9 + $0x1e40] sm:$0xff] %v1150_v36 }
 0x1fd   : >> { %1153 = vst [vmem:[%s13988_s9 + $0x1e50] sm:$0xff] %v1152_v37  ;;  %v1154_v38 = vld [vmem:[%s13992_s10 + $0x3cc0] sm:$0xff] }
 0x1fe   : >> { %v1156_v39 = vld [vmem:[%s13992_s10 + $0x3ce0] sm:$0xff]  ;;  %1155 = vst [vmem:[%s13988_s9 + $0x1e60] sm:$0xff] %v1154_v38 }
 0x1ff   : >> { %v1158_v40 = vld [vmem:[%s13992_s10 + $0x3d00] sm:$0xff]  ;;  %1157 = vst [vmem:[%s13988_s9 + $0x1e70] sm:$0xff] %v1156_v39 }
 0x200   : >> { %1159 = vst [vmem:[%s13988_s9 + $0x1e80] sm:$0xff] %v1158_v40  ;;  %v1160_v41 = vld [vmem:[%s13992_s10 + $0x3d20] sm:$0xff] }
 0x201   : >> { %v1162_v42 = vld [vmem:[%s13992_s10 + $0x3d40] sm:$0xff]  ;;  %1161 = vst [vmem:[%s13988_s9 + $0x1e90] sm:$0xff] %v1160_v41 }
 0x202   : >> { %v1164_v43 = vld [vmem:[%s13992_s10 + $0x3d60] sm:$0xff]  ;;  %1163 = vst [vmem:[%s13988_s9 + $0x1ea0] sm:$0xff] %v1162_v42 }
 0x203   : >> { %1165 = vst [vmem:[%s13988_s9 + $0x1eb0] sm:$0xff] %v1164_v43  ;;  %v1166_v44 = vld [vmem:[%s13992_s10 + $0x3d80] sm:$0xff] }
 0x204   : >> { %v1168_v45 = vld [vmem:[%s13992_s10 + $0x3da0] sm:$0xff]  ;;  %1167 = vst [vmem:[%s13988_s9 + $0x1ec0] sm:$0xff] %v1166_v44 }
 0x205   : >> { %v1170_v46 = vld [vmem:[%s13992_s10 + $0x3dc0] sm:$0xff]  ;;  %1169 = vst [vmem:[%s13988_s9 + $0x1ed0] sm:$0xff] %v1168_v45 }
 0x206   : >> { %1171 = vst [vmem:[%s13988_s9 + $0x1ee0] sm:$0xff] %v1170_v46  ;;  %v1172_v47 = vld [vmem:[%s13992_s10 + $0x3de0] sm:$0xff] }
 0x207   : >> { %v1174_v48 = vld [vmem:[%s13992_s10 + $0x3e00] sm:$0xff]  ;;  %1173 = vst [vmem:[%s13988_s9 + $0x1ef0] sm:$0xff] %v1172_v47 }
 0x208   : >> { %v1176_v49 = vld [vmem:[%s13992_s10 + $0x3e20] sm:$0xff]  ;;  %1175 = vst [vmem:[%s13988_s9 + $0x1f00] sm:$0xff] %v1174_v48 }
 0x209   : >> { %1177 = vst [vmem:[%s13988_s9 + $0x1f10] sm:$0xff] %v1176_v49  ;;  %v1178_v50 = vld [vmem:[%s13992_s10 + $0x3e40] sm:$0xff] }
 0x20a   : >> { %v1180_v51 = vld [vmem:[%s13992_s10 + $0x3e60] sm:$0xff]  ;;  %1179 = vst [vmem:[%s13988_s9 + $0x1f20] sm:$0xff] %v1178_v50 }
 0x20b   : >> { %v1182_v52 = vld [vmem:[%s13992_s10 + $0x3e80] sm:$0xff]  ;;  %1181 = vst [vmem:[%s13988_s9 + $0x1f30] sm:$0xff] %v1180_v51 }
 0x20c   : >> { %1183 = vst [vmem:[%s13988_s9 + $0x1f40] sm:$0xff] %v1182_v52  ;;  %v1184_v53 = vld [vmem:[%s13992_s10 + $0x3ea0] sm:$0xff] }
 0x20d   : >> { %v1186_v54 = vld [vmem:[%s13992_s10 + $0x3ec0] sm:$0xff]  ;;  %1185 = vst [vmem:[%s13988_s9 + $0x1f50] sm:$0xff] %v1184_v53 }
 0x20e   : >> { %v1188_v55 = vld [vmem:[%s13992_s10 + $0x3ee0] sm:$0xff]  ;;  %1187 = vst [vmem:[%s13988_s9 + $0x1f60] sm:$0xff] %v1186_v54 }
 0x20f   : >> { %1189 = vst [vmem:[%s13988_s9 + $0x1f70] sm:$0xff] %v1188_v55  ;;  %v1190_v56 = vld [vmem:[%s13992_s10 + $0x3f00] sm:$0xff] }
 0x210   : >> { %v1192_v57 = vld [vmem:[%s13992_s10 + $0x3f20] sm:$0xff]  ;;  %1191 = vst [vmem:[%s13988_s9 + $0x1f80] sm:$0xff] %v1190_v56 }
 0x211   : >> { %v1194_v58 = vld [vmem:[%s13992_s10 + $0x3f40] sm:$0xff]  ;;  %1193 = vst [vmem:[%s13988_s9 + $0x1f90] sm:$0xff] %v1192_v57 }
 0x212   : >> { %1195 = vst [vmem:[%s13988_s9 + $0x1fa0] sm:$0xff] %v1194_v58  ;;  %v1196_v59 = vld [vmem:[%s13992_s10 + $0x3f60] sm:$0xff] }
 0x213   : >> { %v1198_v60 = vld [vmem:[%s13992_s10 + $0x3f80] sm:$0xff]  ;;  %1197 = vst [vmem:[%s13988_s9 + $0x1fb0] sm:$0xff] %v1196_v59  ;;  %177 = sbr.rel (!%p175_p8) target bundleno = 23 (0x17), region = 120 }
 0x214   : >> { %v1200_v61 = vld [vmem:[%s13992_s10 + $0x3fa0] sm:$0xff]  ;;  %1199 = vst [vmem:[%s13988_s9 + $0x1fc0] sm:$0xff] %v1198_v60 }
 0x215   : >> { %1201 = vst [vmem:[%s13988_s9 + $0x1fd0] sm:$0xff] %v1200_v61  ;;  %v1202_v62 = vld [vmem:[%s13992_s10 + $0x3fc0] sm:$0xff] }
 0x216   : >> { %v1204_v63 = vld [vmem:[%s13992_s10 + $0x3fe0] sm:$0xff]  ;;  %1203 = vst [vmem:[%s13988_s9 + $0x1fe0] sm:$0xff] %v1202_v62  ;;  %s16571_s10 = smov %s14379_s24 }
 0x217   : >> { %1205 = vst [vmem:[%s13988_s9 + $0x1ff0] sm:$0xff] %v1204_v63  ;;  %s16570_s9 = smov %s14383_s26 }
 0x218 PF: > { %p11248_p9 = scmp.ge.s32.totalorder %s13984_s18, 1  ;;  %p3303_p10 = scmp.lt.s32.totalorder %s13984_s18, 5 }
 0x21a   : > { %p3304_p11 = pnand %p11248_p9, %p3303_p10 }
 0x21b   : > { %s3310_s27 = sand.u32 (!%p3304_p11), 1, %s13960_s12   ;;  %s11250_s29 = sshll.u32 (!%p3304_p11), %s13968_s14, 5 }
 0x21c   : > { %3307 = sbr.rel (%p3304_p11) target bundleno = 1800 (0x708), region = 65  ;;  %s11249_s30 = sshll.u32 (!%p3304_p11), %s3310_s27, 13 }
 0x21d   : > { %p3342_p12 = scmp.lt.s32.totalorder (!%p3304_p11), %s11250_s29, 63  ;;  %s11251_s4 = sshll.u32 (!%p3304_p11), %s13972_s15, 2 }
 0x21e   : > { %p3349_p13 = scmp.lt.s32.totalorder (!%p3304_p11), %s11251_s4, 7  ;;  %s15182_s21 = scalar_lea.vmem (!%p3304_p11), [#allocation2], %s11249_s30 }
 0x21f   : > { %p11254_p0 = scmp.ne.s32.totalorder (!%p3304_p11), %s13968_s14, 0 }
 0x221   : > { %s16588_s29 = smov (!%p3342_p12, %s11250_s29), 63  ;;  %s16590_s4 = smov (!%p3349_p13, %s11251_s4), 7 }
 0x222   : > { %s15168_s28 = scalar_lea.vmem %s16564_s0, %s16588_s29  ;;  %s3351_s9 = scalar_lea.vmem %s16566_s2, %s16590_s4 }
 0x223   : > { %s11253_s12 = sshll.u32 %s16590_s4, 1  ;;  %3362 = sbr.rel (%p11254_p0) target bundleno = 554 (0x22a), region = 73 }
 0x224   : > { %s15180_s15 = scalar_lea.vmem %s16567_s3, %s11253_s12 }
 0x228   : > { %v14002_v0 = vmov 0.0  }
 0x229   : > { %3363 = vst [vmem:[%s15180_s15] sm:$0xff] %v14002_v0 }
 0x22a PF: > { %v12374_v1 = vld [vmem:[%s15182_s21 + $0xe4] ss:$16 sps:$4 sm:$0xff]   ;;  %v12378_v3 = vld [vmem:[%s15182_s21 + $0xe0] ss:$16 sps:$4 sm:$0xff]   ;;  %v14003_v37 = vmov 1966171168   ;;  %v4401_v39 = vlaneseq }
 0x22b   : > { %v12376_v2 = vld [vmem:[%s15182_s21 + $0x2e4] ss:$16 sps:$4 sm:$0xff]   ;;  %9745 = vmatprep.subr.bf16.mxu0 %v12374_v1  ;;  %v12379_v4 = vld [vmem:[%s15182_s21 + $0x2e0] ss:$16 sps:$4 sm:$0xff]   ;;  %v4399_v38 = vunpack.c.l.s4 %v14003_v37  ;;  %p12279_p1 = scmp.ne.s32.totalorder %s13968_s14, 1 }
 0x22c   : > { %9786 = vmatprep.subr.bf16.mxu1 %v12376_v2  ;;  %v12380_v5 = vld [vmem:[%s15182_s21 + $0xc4] ss:$16 sps:$4 sm:$0xff]   ;;  %9746 = vmatpush1.bf16.msra.mxu0 %v12378_v3  ;;  %v12384_v7 = vld [vmem:[%s15182_s21 + $0xc0] ss:$16 sps:$4 sm:$0xff]   ;;  %v15225_v44 = vshrl.u32 %v4401_v39, 7 }
 0x22d   : > { %9787 = vmatpush1.bf16.msra.mxu1 %v12379_v4  ;;  %v12382_v6 = vld [vmem:[%s15182_s21 + $0x2c4] ss:$16 sps:$4 sm:$0xff]   ;;  %9747 = vmatprep.subr.bf16.mxu0 %v12380_v5  ;;  %v12385_v8 = vld [vmem:[%s15182_s21 + $0x2c0] ss:$16 sps:$4 sm:$0xff]   ;;  %v4400_v43 = vunpack.c.0.s8 %v4399_v38 }
 0x22e   : > { %9788 = vmatprep.subr.bf16.mxu1 %v12382_v6  ;;  %v12386_v9 = vld [vmem:[%s15182_s21 + $0xa4] ss:$16 sps:$4 sm:$0xff]   ;;  %v12390_v11 = vld [vmem:[%s15182_s21 + $0xa0] ss:$16 sps:$4 sm:$0xff]  }
 0x22f   : > { %v12388_v10 = vld [vmem:[%s15182_s21 + $0x2a4] ss:$16 sps:$4 sm:$0xff]   ;;  %v12391_v12 = vld [vmem:[%s15182_s21 + $0x2a0] ss:$16 sps:$4 sm:$0xff]   ;;  %v15233_v50 = vsub.s32 %v4400_v43, %v15225_v44 }
 0x230   : > { %9748 = vmatpush1.bf16.msra.mxu0 %v12384_v7  ;;  %v12392_v13 = vld [vmem:[%s15182_s21 + $0x84] ss:$16 sps:$4 sm:$0xff]   ;;  %v12396_v15 = vld [vmem:[%s15182_s21 + $0x80] ss:$16 sps:$4 sm:$0xff]  }
 0x231   : > { %9789 = vmatpush1.bf16.msra.mxu1 %v12385_v8  ;;  %9749 = vmatprep.subr.bf16.mxu0 %v12386_v9  ;;  %v12394_v14 = vld [vmem:[%s15182_s21 + $0x284] ss:$16 sps:$4 sm:$0xff]   ;;  %v12397_v16 = vld [vmem:[%s15182_s21 + $0x280] ss:$16 sps:$4 sm:$0xff]  }
 0x232   : > { %9790 = vmatprep.subr.bf16.mxu1 %v12388_v10  ;;  %v12398_v17 = vld [vmem:[%s15182_s21 + $0x64] ss:$16 sps:$4 sm:$0xff]   ;;  %v12402_v19 = vld [vmem:[%s15182_s21 + $0x60] ss:$16 sps:$4 sm:$0xff]  }
 0x233   : > { %v12400_v18 = vld [vmem:[%s15182_s21 + $0x264] ss:$16 sps:$4 sm:$0xff]   ;;  %v12403_v20 = vld [vmem:[%s15182_s21 + $0x260] ss:$16 sps:$4 sm:$0xff]  }
 0x234   : > { %9750 = vmatpush1.bf16.msra.mxu0 %v12390_v11  ;;  %v12404_v21 = vld [vmem:[%s15182_s21 + $0x44] ss:$16 sps:$4 sm:$0xff]   ;;  %v12408_v23 = vld [vmem:[%s15182_s21 + $0x40] ss:$16 sps:$4 sm:$0xff]  }
 0x235   : > { %9791 = vmatpush1.bf16.msra.mxu1 %v12391_v12  ;;  %9751 = vmatprep.subr.bf16.mxu0 %v12392_v13  ;;  %v12406_v22 = vld [vmem:[%s15182_s21 + $0x244] ss:$16 sps:$4 sm:$0xff]   ;;  %v12409_v24 = vld [vmem:[%s15182_s21 + $0x240] ss:$16 sps:$4 sm:$0xff]  }
 0x236   : > { %9792 = vmatprep.subr.bf16.mxu1 %v12394_v14  ;;  %v12410_v25 = vld [vmem:[%s15182_s21 + $0x24] ss:$16 sps:$4 sm:$0xff]   ;;  %v12414_v27 = vld [vmem:[%s15182_s21 + $0x20] ss:$16 sps:$4 sm:$0xff]  }
 0x237   : > { %v12412_v26 = vld [vmem:[%s15182_s21 + $0x224] ss:$16 sps:$4 sm:$0xff]   ;;  %v12415_v28 = vld [vmem:[%s15182_s21 + $0x220] ss:$16 sps:$4 sm:$0xff]  }
 0x238   : > { %9752 = vmatpush1.bf16.msra.mxu0 %v12396_v15  ;;  %v12416_v29 = vld [vmem:[%s15182_s21 + $0x4] ss:$16 sps:$4 sm:$0xff]   ;;  %v12420_v31 = vld [vmem:[%s15182_s21] ss:$16 sps:$4 sm:$0xff]  }
 0x239   : > { %9793 = vmatpush1.bf16.msra.mxu1 %v12397_v16  ;;  %9753 = vmatprep.subr.bf16.mxu0 %v12398_v17  ;;  %v12418_v30 = vld [vmem:[%s15182_s21 + $0x204] ss:$16 sps:$4 sm:$0xff]   ;;  %v12421_v32 = vld [vmem:[%s15182_s21 + $0x200] ss:$16 sps:$4 sm:$0xff]  }
 0x23a   : > { %9794 = vmatprep.subr.bf16.mxu1 %v12400_v18  ;;  %v12422_v33 = vld [vmem:[%s15182_s21 + $0x1e4] ss:$16 sps:$4 sm:$0xff]   ;;  %v12426_v35 = vld [vmem:[%s15182_s21 + $0x1e0] ss:$16 sps:$4 sm:$0xff]  }
 0x23b   : > { %v12424_v34 = vld [vmem:[%s15182_s21 + $0x3e4] ss:$16 sps:$4 sm:$0xff]   ;;  %v12427_v36 = vld [vmem:[%s15182_s21 + $0x3e0] ss:$16 sps:$4 sm:$0xff]  }
 0x23c   : > { %9754 = vmatpush1.bf16.msra.mxu0 %v12402_v19  ;;  %v12428_v40 = vld [vmem:[%s15182_s21 + $0x1c4] ss:$16 sps:$4 sm:$0xff]   ;;  %v12432_v42 = vld [vmem:[%s15182_s21 + $0x1c0] ss:$16 sps:$4 sm:$0xff]  }
 0x23d   : > { %9795 = vmatpush1.bf16.msra.mxu1 %v12403_v20  ;;  %9755 = vmatprep.subr.bf16.mxu0 %v12404_v21  ;;  %v12430_v41 = vld [vmem:[%s15182_s21 + $0x3c4] ss:$16 sps:$4 sm:$0xff]   ;;  %v12433_v45 = vld [vmem:[%s15182_s21 + $0x3c0] ss:$16 sps:$4 sm:$0xff]  }
 0x23e   : > { %9796 = vmatprep.subr.bf16.mxu1 %v12406_v22  ;;  %v12434_v46 = vld [vmem:[%s15182_s21 + $0x1a4] ss:$16 sps:$4 sm:$0xff]   ;;  %v12438_v48 = vld [vmem:[%s15182_s21 + $0x1a0] ss:$16 sps:$4 sm:$0xff]  }
 0x23f   : > { %v12436_v47 = vld [vmem:[%s15182_s21 + $0x3a4] ss:$16 sps:$4 sm:$0xff]   ;;  %v12439_v49 = vld [vmem:[%s15182_s21 + $0x3a0] ss:$16 sps:$4 sm:$0xff]  }
 0x240   : > { %9756 = vmatpush1.bf16.msra.mxu0 %v12408_v23  ;;  %v12440_v51 = vld [vmem:[%s15182_s21 + $0x184] ss:$16 sps:$4 sm:$0xff]   ;;  %v12444_v54 = vld [vmem:[%s15182_s21 + $0x180] ss:$16 sps:$4 sm:$0xff]  }
 0x241   : > { %9797 = vmatpush1.bf16.msra.mxu1 %v12409_v24  ;;  %9757 = vmatprep.subr.bf16.mxu0 %v12410_v25  ;;  %v12442_v52 = vld [vmem:[%s15182_s21 + $0x384] ss:$16 sps:$4 sm:$0xff]   ;;  %v12445_v56 = vld [vmem:[%s15182_s21 + $0x380] ss:$16 sps:$4 sm:$0xff]  }
 0x242   : > { %9798 = vmatprep.subr.bf16.mxu1 %v12412_v26  ;;  %v3365_v53 = vld [vmem:[%s15168_s28] sm:$0xff] }
 0x243   : > { %v4404_v55 = vrot.slane %v3365_v53, %v15233_v50  ;;  %v12446_v57 = vld [vmem:[%s15182_s21 + $0x164] ss:$16 sps:$4 sm:$0xff]   ;;  %v12450_v60 = vld [vmem:[%s15182_s21 + $0x160] ss:$16 sps:$4 sm:$0xff]   ;;  %v4397_v2 = vcombine.high %v3365_v53, %v3365_v53 }
 0x244   : > { %9758 = vmatpush1.bf16.msra.mxu0 %v12414_v27  ;;  %v12448_v58 = vld [vmem:[%s15182_s21 + $0x364] ss:$16 sps:$4 sm:$0xff]   ;;  %v12451_v62 = vld [vmem:[%s15182_s21 + $0x360] ss:$16 sps:$4 sm:$0xff]  }
 0x245   : > { %9799 = vmatpush1.bf16.msra.mxu1 %v12415_v28  ;;  %9759 = vmatprep.subr.bf16.mxu0 %v12416_v29  ;;  %v4412_v59 = vcombine.high %v4404_v55, %v4404_v55  ;;  %v12452_v63 = vld [vmem:[%s15182_s21 + $0x144] ss:$16 sps:$4 sm:$0xff]   ;;  %v12456_v3 = vld [vmem:[%s15182_s21 + $0x140] ss:$16 sps:$4 sm:$0xff]   ;;  %v15261_v7 = vrot.slane %v4397_v2, %v15233_v50  ;;  %v15271_v14 = vrot.slane %v4404_v55, %v15233_v50 }
 0x246   : > { %9800 = vmatprep.subr.bf16.mxu1 %v12418_v30  ;;  %v12454_v0 = vld [vmem:[%s15182_s21 + $0x344] ss:$16 sps:$4 sm:$0xff]   ;;  %v12457_v4 = vld [vmem:[%s15182_s21 + $0x340] ss:$16 sps:$4 sm:$0xff]  }
 0x247   : > { %v15245_v61 = vrot.slane %v4412_v59, %v15233_v50  ;;  %v12458_v5 = vld [vmem:[%s15182_s21 + $0x124] ss:$16 sps:$4 sm:$0xff]   ;;  %v12462_v8 = vld [vmem:[%s15182_s21 + $0x120] ss:$16 sps:$4 sm:$0xff]   ;;  %v4413_v12 = vcombine.high %v15261_v7, %v15261_v7  ;;  %v15281_v19 = vcombine.high %v15271_v14, %v15271_v14 }
 0x248   : > { %9760 = vmatpush1.bf16.msra.mxu0 %v12420_v31  ;;  %v12460_v6 = vld [vmem:[%s15182_s21 + $0x324] ss:$16 sps:$4 sm:$0xff]   ;;  %v12463_v9 = vld [vmem:[%s15182_s21 + $0x320] ss:$16 sps:$4 sm:$0xff]  }
 0x249   : > { %9801 = vmatpush1.bf16.msra.mxu1 %v12421_v32  ;;  %9761 = vmatprep.subr.bf16.mxu0 %v12422_v33  ;;  %v15252_v1 = vcombine.high %v15245_v61, %v15245_v61  ;;  %v12464_v10 = vld [vmem:[%s15182_s21 + $0x104] ss:$16 sps:$4 sm:$0xff]   ;;  %v12468_v13 = vld [vmem:[%s15182_s21 + $0x100] ss:$16 sps:$4 sm:$0xff]   ;;  %v15277_v18 = vrot.slane %v4413_v12, %v15233_v50 }
 0x24a   : > { %9802 = vmatprep.subr.bf16.mxu1 %v12424_v34  ;;  %9777 = vmatprep.mubr.bf16.mxu0 %v15245_v61  ;;  %v12466_v11 = vld [vmem:[%s15182_s21 + $0x304] ss:$16 sps:$4 sm:$0xff]   ;;  %v12469_v15 = vld [vmem:[%s15182_s21 + $0x300] ss:$16 sps:$4 sm:$0xff]  }
 0x24b   : > { %9818 = vmatprep.mubr.bf16.mxu1 %v15252_v1  ;;  %v12472_v16 = vld [vmem:[%s15182_s21 + $0x4e4] ss:$16 sps:$4 sm:$0xff]   ;;  %v12470_v20 = vld [vmem:[%s15182_s21 + $0x4e0] ss:$16 sps:$4 sm:$0xff]   ;;  %v15289_v24 = vcombine.high %v15277_v18, %v15277_v18 }
 0x24c   : > { %9762 = vmatpush2.bf16.msra.mxu0 %v12426_v35  ;;  %v12475_v17 = vld [vmem:[%s15182_s21 + $0x6e4] ss:$16 sps:$4 sm:$0xff]   ;;  %v12473_v21 = vld [vmem:[%s15182_s21 + $0x6e0] ss:$16 sps:$4 sm:$0xff]  }
 0x24d   : > { %9803 = vmatpush2.bf16.msra.mxu1 %v12427_v36  ;;  %9763 = vmatprep.subr.bf16.mxu0 %v12428_v40  ;;  %v12478_v22 = vld [vmem:[%s15182_s21 + $0x4c4] ss:$16 sps:$4 sm:$0xff]   ;;  %v12476_v25 = vld [vmem:[%s15182_s21 + $0x4c0] ss:$16 sps:$4 sm:$0xff]  }
 0x24e   : > { %9804 = vmatprep.subr.bf16.mxu1 %v12430_v41  ;;  %v12481_v23 = vld [vmem:[%s15182_s21 + $0x6c4] ss:$16 sps:$4 sm:$0xff]   ;;  %v12479_v26 = vld [vmem:[%s15182_s21 + $0x6c0] ss:$16 sps:$4 sm:$0xff]  }
 0x24f   : > { %v12484_v27 = vld [vmem:[%s15182_s21 + $0x4a4] ss:$16 sps:$4 sm:$0xff]   ;;  %v12482_v29 = vld [vmem:[%s15182_s21 + $0x4a0] ss:$16 sps:$4 sm:$0xff]  }
 0x250   : > { %9764 = vmatpush2.bf16.msra.mxu0 %v12432_v42  ;;  %v12487_v28 = vld [vmem:[%s15182_s21 + $0x6a4] ss:$16 sps:$4 sm:$0xff]   ;;  %v12485_v30 = vld [vmem:[%s15182_s21 + $0x6a0] ss:$16 sps:$4 sm:$0xff]  }
 0x251   : > { %9805 = vmatpush2.bf16.msra.mxu1 %v12433_v45  ;;  %9765 = vmatprep.subr.bf16.mxu0 %v12434_v46  ;;  %v12490_v31 = vld [vmem:[%s15182_s21 + $0x484] ss:$16 sps:$4 sm:$0xff]   ;;  %v12488_v33 = vld [vmem:[%s15182_s21 + $0x480] ss:$16 sps:$4 sm:$0xff]  }
 0x252   : > { %9806 = vmatprep.subr.bf16.mxu1 %v12436_v47  ;;  %v12493_v32 = vld [vmem:[%s15182_s21 + $0x684] ss:$16 sps:$4 sm:$0xff]   ;;  %v12491_v34 = vld [vmem:[%s15182_s21 + $0x680] ss:$16 sps:$4 sm:$0xff]  }
 0x253   : > { %v12496_v35 = vld [vmem:[%s15182_s21 + $0x464] ss:$16 sps:$4 sm:$0xff]   ;;  %v12494_v37 = vld [vmem:[%s15182_s21 + $0x460] ss:$16 sps:$4 sm:$0xff]  }
 0x254   : > { %9766 = vmatpush2.bf16.msra.mxu0 %v12438_v48  ;;  %v12499_v36 = vld [vmem:[%s15182_s21 + $0x664] ss:$16 sps:$4 sm:$0xff]   ;;  %v12497_v38 = vld [vmem:[%s15182_s21 + $0x660] ss:$16 sps:$4 sm:$0xff]  }
 0x255   : > { %9807 = vmatpush2.bf16.msra.mxu1 %v12439_v49  ;;  %9767 = vmatprep.subr.bf16.mxu0 %v12440_v51  ;;  %v12502_v39 = vld [vmem:[%s15182_s21 + $0x444] ss:$16 sps:$4 sm:$0xff]   ;;  %v12500_v41 = vld [vmem:[%s15182_s21 + $0x440] ss:$16 sps:$4 sm:$0xff]  }
 0x256   : > { %9808 = vmatprep.subr.bf16.mxu1 %v12442_v52  ;;  %v12505_v40 = vld [vmem:[%s15182_s21 + $0x644] ss:$16 sps:$4 sm:$0xff]   ;;  %v12503_v42 = vld [vmem:[%s15182_s21 + $0x640] ss:$16 sps:$4 sm:$0xff]  }
 0x257   : > { %v12508_v43 = vld [vmem:[%s15182_s21 + $0x424] ss:$16 sps:$4 sm:$0xff]   ;;  %v12506_v46 = vld [vmem:[%s15182_s21 + $0x420] ss:$16 sps:$4 sm:$0xff]  }
 0x258   : > { %9768 = vmatpush2.bf16.msra.mxu0 %v12444_v54  ;;  %v12511_v45 = vld [vmem:[%s15182_s21 + $0x624] ss:$16 sps:$4 sm:$0xff]   ;;  %v12509_v47 = vld [vmem:[%s15182_s21 + $0x620] ss:$16 sps:$4 sm:$0xff]  }
 0x259   : > { %9809 = vmatpush2.bf16.msra.mxu1 %v12445_v56  ;;  %9769 = vmatprep.subr.bf16.mxu0 %v12446_v57  ;;  %v12514_v48 = vld [vmem:[%s15182_s21 + $0x404] ss:$16 sps:$4 sm:$0xff]   ;;  %v12512_v51 = vld [vmem:[%s15182_s21 + $0x400] ss:$16 sps:$4 sm:$0xff]  }
 0x25a   : > { %9810 = vmatprep.subr.bf16.mxu1 %v12448_v58  ;;  %v12517_v49 = vld [vmem:[%s15182_s21 + $0x604] ss:$16 sps:$4 sm:$0xff]   ;;  %v12515_v52 = vld [vmem:[%s15182_s21 + $0x600] ss:$16 sps:$4 sm:$0xff]  }
 0x25b   : > { %v12520_v53 = vld [vmem:[%s15182_s21 + $0x5e4] ss:$16 sps:$4 sm:$0xff]   ;;  %v12518_v55 = vld [vmem:[%s15182_s21 + $0x5e0] ss:$16 sps:$4 sm:$0xff]  }
 0x25c   : > { %9770 = vmatpush2.bf16.msra.mxu0 %v12450_v60  ;;  %v12523_v54 = vld [vmem:[%s15182_s21 + $0x7e4] ss:$16 sps:$4 sm:$0xff]   ;;  %v12521_v56 = vld [vmem:[%s15182_s21 + $0x7e0] ss:$16 sps:$4 sm:$0xff]  }
 0x25d   : > { %9811 = vmatpush2.bf16.msra.mxu1 %v12451_v62  ;;  %9771 = vmatprep.subr.bf16.mxu0 %v12452_v63  ;;  %v12526_v57 = vld [vmem:[%s15182_s21 + $0x5c4] ss:$16 sps:$4 sm:$0xff]   ;;  %v12524_v59 = vld [vmem:[%s15182_s21 + $0x5c0] ss:$16 sps:$4 sm:$0xff]  }
 0x25e   : > { %9812 = vmatprep.subr.bf16.mxu1 %v12454_v0  ;;  %v12529_v58 = vld [vmem:[%s15182_s21 + $0x7c4] ss:$16 sps:$4 sm:$0xff]   ;;  %v12527_v60 = vld [vmem:[%s15182_s21 + $0x7c0] ss:$16 sps:$4 sm:$0xff]  }
 0x25f   : > { %v12532_v62 = vld [vmem:[%s15182_s21 + $0x5a4] ss:$16 sps:$4 sm:$0xff]   ;;  %v12530_v0 = vld [vmem:[%s15182_s21 + $0x5a0] ss:$16 sps:$4 sm:$0xff]  }
 0x260   : > { %9772 = vmatpush2.bf16.msra.mxu0 %v12456_v3  ;;  %v12535_v63 = vld [vmem:[%s15182_s21 + $0x7a4] ss:$16 sps:$4 sm:$0xff]   ;;  %v12533_v2 = vld [vmem:[%s15182_s21 + $0x7a0] ss:$16 sps:$4 sm:$0xff]  }
 0x261   : > { %9813 = vmatpush2.bf16.msra.mxu1 %v12457_v4  ;;  %9773 = vmatprep.subr.bf16.mxu0 %v12458_v5  ;;  %v12538_v3 = vld [vmem:[%s15182_s21 + $0x584] ss:$16 sps:$4 sm:$0xff]   ;;  %v12536_v5 = vld [vmem:[%s15182_s21 + $0x580] ss:$16 sps:$4 sm:$0xff]  }
 0x262   : > { %9814 = vmatprep.subr.bf16.mxu1 %v12460_v6  ;;  %v12541_v4 = vld [vmem:[%s15182_s21 + $0x784] ss:$16 sps:$4 sm:$0xff]   ;;  %v12539_v6 = vld [vmem:[%s15182_s21 + $0x780] ss:$16 sps:$4 sm:$0xff]  }
 0x263   : > { %v12550_v12 = vld [vmem:[%s15182_s21 + $0x544] ss:$16 sps:$4 sm:$0xff]  }
 0x264   : > { %9774 = vmatpush2.bf16.msra.mxu0 %v12462_v8  ;;  %v12544_v8 = vld [vmem:[%s15182_s21 + $0x564] ss:$16 sps:$4 sm:$0xff]  }
 0x265   : > { %9815 = vmatpush2.bf16.msra.mxu1 %v12463_v9  ;;  %9775 = vmatprep.subr.bf16.mxu0 %v12464_v10  ;;  %v12547_v9 = vld [vmem:[%s15182_s21 + $0x764] ss:$16 sps:$4 sm:$0xff]   ;;  %v12542_v10 = vld [vmem:[%s15182_s21 + $0x560] ss:$16 sps:$4 sm:$0xff]  }
 0x266   : > { %9816 = vmatprep.subr.bf16.mxu1 %v12466_v11  ;;  %v12545_v11 = vld [vmem:[%s15182_s21 + $0x760] ss:$16 sps:$4 sm:$0xff]  }
 0x268   : > { %9776 = vmatpush2.bf16.msra.mxu0 %v12468_v13  ;;  %v12553_v13 = vld [vmem:[%s15182_s21 + $0x744] ss:$16 sps:$4 sm:$0xff]  }
 0x269   : > { %9817 = vmatpush2.bf16.msra.mxu1 %v12469_v15  ;;  %9827 = vmatprep.subr.bf16.mxu0 %v12472_v16  ;;  %v12548_v15 = vld [vmem:[%s15182_s21 + $0x540] ss:$16 sps:$4 sm:$0xff]  }
 0x26a   : > { %9868 = vmatprep.subr.bf16.mxu1 %v12475_v17  ;;  %v12551_v16 = vld [vmem:[%s15182_s21 + $0x740] ss:$16 sps:$4 sm:$0xff]   ;;  %v12556_v17 = vld [vmem:[%s15182_s21 + $0x524] ss:$16 sps:$4 sm:$0xff]  }
 0x26b   : > { %9778 = vmatmul.mubr.bf16.vlgmr.msra.gmra.mxu0 %v15271_v14 }
 0x26c   : > { %9819 = vmatmul.mubr.bf16.vlgmr.msra.gmra.mxu1 %v15281_v19  ;;  %9828 = vmatpush1.bf16.msra.mxu0 %v12470_v20  ;;  %v12559_v20 = vld [vmem:[%s15182_s21 + $0x724] ss:$16 sps:$4 sm:$0xff]  }
 0x26d   : > { %9869 = vmatpush1.bf16.msra.mxu1 %v12473_v21  ;;  %9829 = vmatprep.subr.bf16.mxu0 %v12478_v22  ;;  %v12554_v21 = vld [vmem:[%s15182_s21 + $0x520] ss:$16 sps:$4 sm:$0xff]  }
 0x26e   : > { %9870 = vmatprep.subr.bf16.mxu1 %v12481_v23  ;;  %9859 = vmatprep.mubr.bf16.mxu0 %v15277_v18  ;;  %v12557_v22 = vld [vmem:[%s15182_s21 + $0x720] ss:$16 sps:$4 sm:$0xff]   ;;  %v12562_v23 = vld [vmem:[%s15182_s21 + $0x504] ss:$16 sps:$4 sm:$0xff]  }
 0x26f   : > { %9900 = vmatprep.mubr.bf16.mxu1 %v15289_v24 }
 0x270   : > { %9830 = vmatpush1.bf16.msra.mxu0 %v12476_v25  ;;  %v12565_v25 = vld [vmem:[%s15182_s21 + $0x704] ss:$16 sps:$4 sm:$0xff]  }
 0x271   : > { %9871 = vmatpush1.bf16.msra.mxu1 %v12479_v26  ;;  %9831 = vmatprep.subr.bf16.mxu0 %v12484_v27  ;;  %v12560_v26 = vld [vmem:[%s15182_s21 + $0x500] ss:$16 sps:$4 sm:$0xff]   ;;  %v15354_v27 = vrot.slane %v15261_v7, %v15233_v50 }
 0x272   : > { %9872 = vmatprep.subr.bf16.mxu1 %v12487_v28  ;;  %v12563_v28 = vld [vmem:[%s15182_s21 + $0x700] ss:$16 sps:$4 sm:$0xff]  }
 0x273   : > { %v12570_v7 = vld [vmem:[%s15182_s21 + $0xae0] ss:$16 sps:$4 sm:$0xff]  }
 0x274   : > { %9832 = vmatpush1.bf16.msra.mxu0 %v12482_v29  ;;  %v12569_v29 = vld [vmem:[%s15182_s21 + $0x8e4] ss:$16 sps:$4 sm:$0xff]  }
 0x275   : > { %9873 = vmatpush1.bf16.msra.mxu1 %v12485_v30  ;;  %9833 = vmatprep.subr.bf16.mxu0 %v12490_v31  ;;  %v12572_v30 = vld [vmem:[%s15182_s21 + $0xae4] ss:$16 sps:$4 sm:$0xff]   ;;  %v15361_v31 = vcombine.high %v15354_v27, %v15354_v27 }
 0x276   : > { %9874 = vmatprep.subr.bf16.mxu1 %v12493_v32  ;;  %v12567_v32 = vld [vmem:[%s15182_s21 + $0x8e0] ss:$16 sps:$4 sm:$0xff]  }
 0x278   : > { %9834 = vmatpush1.bf16.msra.mxu0 %v12488_v33  ;;  %v15366_v33 = vld [vmem:[%s15168_s28 + $0x8] sm:$0xff] }
 0x279   : > { %9875 = vmatpush1.bf16.msra.mxu1 %v12491_v34  ;;  %9835 = vmatprep.subr.bf16.mxu0 %v12496_v35  ;;  %v12575_v34 = vld [vmem:[%s15182_s21 + $0x8c4] ss:$16 sps:$4 sm:$0xff]  }
 0x27a   : > { %9876 = vmatprep.subr.bf16.mxu1 %v12499_v36  ;;  %v12578_v35 = vld [vmem:[%s15182_s21 + $0xac4] ss:$16 sps:$4 sm:$0xff]   ;;  %v15372_v36 = vrot.slane %v15366_v33, %v15233_v50 }
 0x27c   : > { %9836 = vmatpush1.bf16.msra.mxu0 %v12494_v37  ;;  %v4461_v37 = vcombine.high %v15372_v36, %v15372_v36 }
 0x27d   : > { %9877 = vmatpush1.bf16.msra.mxu1 %v12497_v38  ;;  %9837 = vmatprep.subr.bf16.mxu0 %v12502_v39  ;;  %v12573_v38 = vld [vmem:[%s15182_s21 + $0x8c0] ss:$16 sps:$4 sm:$0xff]  }
 0x27e   : > { %9878 = vmatprep.subr.bf16.mxu1 %v12505_v40  ;;  %v12576_v39 = vld [vmem:[%s15182_s21 + $0xac0] ss:$16 sps:$4 sm:$0xff]   ;;  %v12581_v40 = vld [vmem:[%s15182_s21 + $0x8a4] ss:$16 sps:$4 sm:$0xff]  }
 0x280   : > { %9838 = vmatpush1.bf16.msra.mxu0 %v12500_v41  ;;  %v12584_v41 = vld [vmem:[%s15182_s21 + $0xaa4] ss:$16 sps:$4 sm:$0xff]  }
 0x281   : > { %9879 = vmatpush1.bf16.msra.mxu1 %v12503_v42  ;;  %9839 = vmatprep.subr.bf16.mxu0 %v12508_v43  ;;  %v15383_v42 = vrot.slane %v4461_v37, %v15233_v50  ;;  %v12645_v37 = vld [vmem:[%s15182_s21 + $0x940] ss:$16 sps:$4 sm:$0xff]  }
 0x282   : > { %9880 = vmatprep.subr.bf16.mxu1 %v12511_v45  ;;  %v12579_v45 = vld [vmem:[%s15182_s21 + $0x8a0] ss:$16 sps:$4 sm:$0xff]  }
 0x283   : > { %v15388_v43 = vcombine.high %v15383_v42, %v15383_v42 }
 0x284   : > { %9840 = vmatpush1.bf16.msra.mxu0 %v12506_v46  ;;  %v12582_v46 = vld [vmem:[%s15182_s21 + $0xaa0] ss:$16 sps:$4 sm:$0xff]  }
 0x285   : > { %9881 = vmatpush1.bf16.msra.mxu1 %v12509_v47  ;;  %9841 = vmatprep.subr.bf16.mxu0 %v12514_v48  ;;  %v12587_v47 = vld [vmem:[%s15182_s21 + $0x884] ss:$16 sps:$4 sm:$0xff]  }
 0x286   : > { %9882 = vmatprep.subr.bf16.mxu1 %v12517_v49  ;;  %v12590_v48 = vld [vmem:[%s15182_s21 + $0xa84] ss:$16 sps:$4 sm:$0xff]   ;;  %v12585_v49 = vld [vmem:[%s15182_s21 + $0x880] ss:$16 sps:$4 sm:$0xff]  }
 0x288   : > { %9842 = vmatpush1.bf16.msra.mxu0 %v12512_v51  ;;  %v12588_v51 = vld [vmem:[%s15182_s21 + $0xa80] ss:$16 sps:$4 sm:$0xff]  }
 0x289   : > { %9883 = vmatpush1.bf16.msra.mxu1 %v12515_v52  ;;  %9843 = vmatprep.subr.bf16.mxu0 %v12520_v53  ;;  %v12593_v52 = vld [vmem:[%s15182_s21 + $0x864] ss:$16 sps:$4 sm:$0xff]  }
 0x28a   : > { %9884 = vmatprep.subr.bf16.mxu1 %v12523_v54  ;;  %v12596_v53 = vld [vmem:[%s15182_s21 + $0xa64] ss:$16 sps:$4 sm:$0xff]   ;;  %v12591_v54 = vld [vmem:[%s15182_s21 + $0x860] ss:$16 sps:$4 sm:$0xff]  }
 0x28c   : > { %9844 = vmatpush2.bf16.msra.mxu0 %v12518_v55  ;;  %v12594_v55 = vld [vmem:[%s15182_s21 + $0xa60] ss:$16 sps:$4 sm:$0xff]  }
 0x28d   : > { %9885 = vmatpush2.bf16.msra.mxu1 %v12521_v56  ;;  %9845 = vmatprep.subr.bf16.mxu0 %v12526_v57  ;;  %v12599_v56 = vld [vmem:[%s15182_s21 + $0x844] ss:$16 sps:$4 sm:$0xff]  }
 0x28e   : > { %9886 = vmatprep.subr.bf16.mxu1 %v12529_v58  ;;  %v12602_v57 = vld [vmem:[%s15182_s21 + $0xa44] ss:$16 sps:$4 sm:$0xff]   ;;  %v12597_v58 = vld [vmem:[%s15182_s21 + $0x840] ss:$16 sps:$4 sm:$0xff]  }
 0x290   : > { %9846 = vmatpush2.bf16.msra.mxu0 %v12524_v59  ;;  %v12600_v59 = vld [vmem:[%s15182_s21 + $0xa40] ss:$16 sps:$4 sm:$0xff]  }
 0x291   : > { %9887 = vmatpush2.bf16.msra.mxu1 %v12527_v60  ;;  %9847 = vmatprep.subr.bf16.mxu0 %v12532_v62  ;;  %v12605_v60 = vld [vmem:[%s15182_s21 + $0x824] ss:$16 sps:$4 sm:$0xff]  }
 0x292   : > { %9888 = vmatprep.subr.bf16.mxu1 %v12535_v63  ;;  %v12608_v62 = vld [vmem:[%s15182_s21 + $0xa24] ss:$16 sps:$4 sm:$0xff]   ;;  %v12603_v63 = vld [vmem:[%s15182_s21 + $0x820] ss:$16 sps:$4 sm:$0xff]  }
 0x294   : > { %9848 = vmatpush2.bf16.msra.mxu0 %v12530_v0  ;;  %v12606_v0 = vld [vmem:[%s15182_s21 + $0xa20] ss:$16 sps:$4 sm:$0xff]  }
 0x295   : > { %9889 = vmatpush2.bf16.msra.mxu1 %v12533_v2  ;;  %9849 = vmatprep.subr.bf16.mxu0 %v12538_v3  ;;  %v12611_v2 = vld [vmem:[%s15182_s21 + $0x804] ss:$16 sps:$4 sm:$0xff]  }
 0x296   : > { %9890 = vmatprep.subr.bf16.mxu1 %v12541_v4  ;;  %v12614_v3 = vld [vmem:[%s15182_s21 + $0xa04] ss:$16 sps:$4 sm:$0xff]   ;;  %v12609_v4 = vld [vmem:[%s15182_s21 + $0x800] ss:$16 sps:$4 sm:$0xff]  }
 0x298   : > { %9850 = vmatpush2.bf16.msra.mxu0 %v12536_v5  ;;  %v12612_v5 = vld [vmem:[%s15182_s21 + $0xa00] ss:$16 sps:$4 sm:$0xff]  }
 0x299   : > { %9891 = vmatpush2.bf16.msra.mxu1 %v12539_v6  ;;  %9851 = vmatprep.subr.bf16.mxu0 %v12544_v8  ;;  %v12617_v6 = vld [vmem:[%s15182_s21 + $0x9e4] ss:$16 sps:$4 sm:$0xff]  }
 0x29a   : > { %9892 = vmatprep.subr.bf16.mxu1 %v12547_v9  ;;  %v12620_v8 = vld [vmem:[%s15182_s21 + $0xbe4] ss:$16 sps:$4 sm:$0xff]   ;;  %v12615_v9 = vld [vmem:[%s15182_s21 + $0x9e0] ss:$16 sps:$4 sm:$0xff]  }
 0x29c   : > { %9852 = vmatpush2.bf16.msra.mxu0 %v12542_v10  ;;  %v12618_v10 = vld [vmem:[%s15182_s21 + $0xbe0] ss:$16 sps:$4 sm:$0xff]  }
 0x29d   : > { %9893 = vmatpush2.bf16.msra.mxu1 %v12545_v11  ;;  %9853 = vmatprep.subr.bf16.mxu0 %v12550_v12  ;;  %v12623_v11 = vld [vmem:[%s15182_s21 + $0x9c4] ss:$16 sps:$4 sm:$0xff]  }
 0x29e   : > { %9894 = vmatprep.subr.bf16.mxu1 %v12553_v13  ;;  %v12626_v12 = vld [vmem:[%s15182_s21 + $0xbc4] ss:$16 sps:$4 sm:$0xff]   ;;  %v12621_v13 = vld [vmem:[%s15182_s21 + $0x9c0] ss:$16 sps:$4 sm:$0xff]  }
 0x2a0   : > { %9854 = vmatpush2.bf16.msra.mxu0 %v12548_v15  ;;  %v12624_v15 = vld [vmem:[%s15182_s21 + $0xbc0] ss:$16 sps:$4 sm:$0xff]  }
 0x2a1   : > { %9895 = vmatpush2.bf16.msra.mxu1 %v12551_v16  ;;  %9855 = vmatprep.subr.bf16.mxu0 %v12556_v17  ;;  %v12629_v16 = vld [vmem:[%s15182_s21 + $0x9a4] ss:$16 sps:$4 sm:$0xff]  }
 0x2a2   : > { %9896 = vmatprep.subr.bf16.mxu1 %v12559_v20  ;;  %v12632_v17 = vld [vmem:[%s15182_s21 + $0xba4] ss:$16 sps:$4 sm:$0xff]   ;;  %v12627_v20 = vld [vmem:[%s15182_s21 + $0x9a0] ss:$16 sps:$4 sm:$0xff]  }
 0x2a4   : > { %9856 = vmatpush2.bf16.msra.mxu0 %v12554_v21  ;;  %v12630_v21 = vld [vmem:[%s15182_s21 + $0xba0] ss:$16 sps:$4 sm:$0xff]  }
 0x2a5   : > { %9897 = vmatpush2.bf16.msra.mxu1 %v12557_v22  ;;  %9857 = vmatprep.subr.bf16.mxu0 %v12562_v23  ;;  %v12635_v22 = vld [vmem:[%s15182_s21 + $0x984] ss:$16 sps:$4 sm:$0xff]  }
 0x2a6   : > { %9898 = vmatprep.subr.bf16.mxu1 %v12565_v25  ;;  %v12638_v23 = vld [vmem:[%s15182_s21 + $0xb84] ss:$16 sps:$4 sm:$0xff]   ;;  %v12633_v25 = vld [vmem:[%s15182_s21 + $0x980] ss:$16 sps:$4 sm:$0xff]  }
 0x2a8   : > { %9858 = vmatpush2.bf16.msra.mxu0 %v12560_v26  ;;  %v12636_v26 = vld [vmem:[%s15182_s21 + $0xb80] ss:$16 sps:$4 sm:$0xff]  }
 0x2a9   : > { %9899 = vmatpush2.bf16.msra.mxu1 %v12563_v28  ;;  %9909 = vmatprep.subr.bf16.mxu0 %v12569_v29  ;;  %v12641_v28 = vld [vmem:[%s15182_s21 + $0x964] ss:$16 sps:$4 sm:$0xff]  }
 0x2aa   : > { %9950 = vmatprep.subr.bf16.mxu1 %v12572_v30  ;;  %v12644_v29 = vld [vmem:[%s15182_s21 + $0xb64] ss:$16 sps:$4 sm:$0xff]   ;;  %v12639_v30 = vld [vmem:[%s15182_s21 + $0x960] ss:$16 sps:$4 sm:$0xff]  }
 0x2ab   : > { %9860 = vmatmul.mubr.bf16.vlgmr.msra.gmra.mxu0 %v15354_v27 }
 0x2ac   : > { %9901 = vmatmul.mubr.bf16.vlgmr.msra.gmra.mxu1 %v15361_v31  ;;  %9910 = vmatpush1.bf16.msra.mxu0 %v12567_v32  ;;  %v12642_v32 = vld [vmem:[%s15182_s21 + $0xb60] ss:$16 sps:$4 sm:$0xff]  }
 0x2ad   : > { %9951 = vmatpush1.bf16.msra.mxu1 %v12570_v7  ;;  %9911 = vmatprep.subr.bf16.mxu0 %v12575_v34  ;;  %v12647_v7 = vld [vmem:[%s15182_s21 + $0x944] ss:$16 sps:$4 sm:$0xff]  }
 0x2ae   : > { %9952 = vmatprep.subr.bf16.mxu1 %v12578_v35  ;;  %9941 = vmatprep.mubr.bf16.mxu0 %v15383_v42  ;;  %v12650_v34 = vld [vmem:[%s15182_s21 + $0xb44] ss:$16 sps:$4 sm:$0xff]   ;;  %v4446_v35 = vcombine.high %v15366_v33, %v15366_v33  ;;  %v12651_v33 = vld [vmem:[%s15182_s21 + $0x920] ss:$16 sps:$4 sm:$0xff]  }
 0x2af   : > { %9982 = vmatprep.mubr.bf16.mxu1 %v15388_v43 }
 0x2b0   : > { %9912 = vmatpush1.bf16.msra.mxu0 %v12573_v38  ;;  %v12648_v38 = vld [vmem:[%s15182_s21 + $0xb40] ss:$16 sps:$4 sm:$0xff]  }
 0x2b1   : > { %9953 = vmatpush1.bf16.msra.mxu1 %v12576_v39  ;;  %9913 = vmatprep.subr.bf16.mxu0 %v12581_v40  ;;  %v12653_v39 = vld [vmem:[%s15182_s21 + $0x924] ss:$16 sps:$4 sm:$0xff]  }
 0x2b2   : > { %9954 = vmatprep.subr.bf16.mxu1 %v12584_v41  ;;  %v12656_v40 = vld [vmem:[%s15182_s21 + $0xb24] ss:$16 sps:$4 sm:$0xff]   ;;  %v15442_v41 = vrot.slane %v4446_v35, %v15233_v50  ;;  %v12714_v35 = vld [vmem:[%s15182_s21 + $0xfe0] ss:$16 sps:$4 sm:$0xff]  }
 0x2b4   : > { %9914 = vmatpush1.bf16.msra.mxu0 %v12579_v45  ;;  %v12654_v45 = vld [vmem:[%s15182_s21 + $0xb20] ss:$16 sps:$4 sm:$0xff]  }
 0x2b5   : > { %9955 = vmatpush1.bf16.msra.mxu1 %v12582_v46  ;;  %9915 = vmatprep.subr.bf16.mxu0 %v12587_v47  ;;  %v12659_v46 = vld [vmem:[%s15182_s21 + $0x904] ss:$16 sps:$4 sm:$0xff]  }
 0x2b6   : > { %9956 = vmatprep.subr.bf16.mxu1 %v12590_v48  ;;  %v12662_v47 = vld [vmem:[%s15182_s21 + $0xb04] ss:$16 sps:$4 sm:$0xff]   ;;  %v4462_v48 = vcombine.high %v15442_v41, %v15442_v41 }
 0x2b8   : > { %9916 = vmatpush1.bf16.msra.mxu0 %v12585_v49  ;;  %v15452_v49 = vrot.slane %v15372_v36, %v15233_v50  ;;  %v12663_v36 = vld [vmem:[%s15182_s21 + $0xce0] ss:$16 sps:$4 sm:$0xff]  }
 0x2b9   : > { %9957 = vmatpush1.bf16.msra.mxu1 %v12588_v51  ;;  %9917 = vmatprep.subr.bf16.mxu0 %v12593_v52  ;;  %v12657_v51 = vld [vmem:[%s15182_s21 + $0x900] ss:$16 sps:$4 sm:$0xff]  }
 0x2ba   : > { %9958 = vmatprep.subr.bf16.mxu1 %v12596_v53  ;;  %v12660_v52 = vld [vmem:[%s15182_s21 + $0xb00] ss:$16 sps:$4 sm:$0xff]   ;;  %v12665_v53 = vld [vmem:[%s15182_s21 + $0xce4] ss:$16 sps:$4 sm:$0xff]  }
 0x2bc   : > { %9918 = vmatpush1.bf16.msra.mxu0 %v12591_v54  ;;  %v12668_v54 = vld [vmem:[%s15182_s21 + $0xee4] ss:$16 sps:$4 sm:$0xff]  }
 0x2bd   : > { %9959 = vmatpush1.bf16.msra.mxu1 %v12594_v55  ;;  %9919 = vmatprep.subr.bf16.mxu0 %v12599_v56  ;;  %v15459_v55 = vrot.slane %v4462_v48, %v15233_v50  ;;  %v15463_v56 = vcombine.high %v15452_v49, %v15452_v49  ;;  %v12731_v48 = vld [vmem:[%s15182_s21 + $0xd84] ss:$16 sps:$4 sm:$0xff]  }
 0x2be   : > { %9960 = vmatprep.subr.bf16.mxu1 %v12602_v57  ;;  %v12666_v57 = vld [vmem:[%s15182_s21 + $0xee0] ss:$16 sps:$4 sm:$0xff]  }
 0x2c0   : > { %9920 = vmatpush1.bf16.msra.mxu0 %v12597_v58  ;;  %v12671_v58 = vld [vmem:[%s15182_s21 + $0xcc4] ss:$16 sps:$4 sm:$0xff]  }
 0x2c1   : > { %9961 = vmatpush1.bf16.msra.mxu1 %v12600_v59  ;;  %9921 = vmatprep.subr.bf16.mxu0 %v12605_v60  ;;  %v12674_v59 = vld [vmem:[%s15182_s21 + $0xec4] ss:$16 sps:$4 sm:$0xff]   ;;  %v15471_v60 = vcombine.high %v15459_v55, %v15459_v55 }
 0x2c2   : > { %9962 = vmatprep.subr.bf16.mxu1 %v12608_v62  ;;  %v12669_v62 = vld [vmem:[%s15182_s21 + $0xcc0] ss:$16 sps:$4 sm:$0xff]  }
 0x2c4   : > { %9922 = vmatpush1.bf16.msra.mxu0 %v12603_v63  ;;  %v12672_v63 = vld [vmem:[%s15182_s21 + $0xec0] ss:$16 sps:$4 sm:$0xff]  }
 0x2c5   : > { %9963 = vmatpush1.bf16.msra.mxu1 %v12606_v0  ;;  %9923 = vmatprep.subr.bf16.mxu0 %v12611_v2  ;;  %v12677_v0 = vld [vmem:[%s15182_s21 + $0xca4] ss:$16 sps:$4 sm:$0xff]  }
 0x2c6   : > { %9964 = vmatprep.subr.bf16.mxu1 %v12614_v3  ;;  %v12680_v2 = vld [vmem:[%s15182_s21 + $0xea4] ss:$16 sps:$4 sm:$0xff]   ;;  %v12675_v3 = vld [vmem:[%s15182_s21 + $0xca0] ss:$16 sps:$4 sm:$0xff]  }
 0x2c8   : > { %9924 = vmatpush1.bf16.msra.mxu0 %v12609_v4  ;;  %v12678_v4 = vld [vmem:[%s15182_s21 + $0xea0] ss:$16 sps:$4 sm:$0xff]  }
 0x2c9   : > { %9965 = vmatpush1.bf16.msra.mxu1 %v12612_v5  ;;  %9925 = vmatprep.subr.bf16.mxu0 %v12617_v6  ;;  %v12683_v5 = vld [vmem:[%s15182_s21 + $0xc84] ss:$16 sps:$4 sm:$0xff]  }
 0x2ca   : > { %9966 = vmatprep.subr.bf16.mxu1 %v12620_v8  ;;  %v12686_v6 = vld [vmem:[%s15182_s21 + $0xe84] ss:$16 sps:$4 sm:$0xff]   ;;  %v12681_v8 = vld [vmem:[%s15182_s21 + $0xc80] ss:$16 sps:$4 sm:$0xff]  }
 0x2cc   : > { %9926 = vmatpush2.bf16.msra.mxu0 %v12615_v9  ;;  %v12684_v9 = vld [vmem:[%s15182_s21 + $0xe80] ss:$16 sps:$4 sm:$0xff]  }
 0x2cd   : > { %9967 = vmatpush2.bf16.msra.mxu1 %v12618_v10  ;;  %9927 = vmatprep.subr.bf16.mxu0 %v12623_v11  ;;  %v12689_v10 = vld [vmem:[%s15182_s21 + $0xc64] ss:$16 sps:$4 sm:$0xff]  }
 0x2ce   : > { %9968 = vmatprep.subr.bf16.mxu1 %v12626_v12  ;;  %v12692_v11 = vld [vmem:[%s15182_s21 + $0xe64] ss:$16 sps:$4 sm:$0xff]   ;;  %v12687_v12 = vld [vmem:[%s15182_s21 + $0xc60] ss:$16 sps:$4 sm:$0xff]  }
 0x2d0   : > { %9928 = vmatpush2.bf16.msra.mxu0 %v12621_v13  ;;  %v12690_v13 = vld [vmem:[%s15182_s21 + $0xe60] ss:$16 sps:$4 sm:$0xff]  }
 0x2d1   : > { %9969 = vmatpush2.bf16.msra.mxu1 %v12624_v15  ;;  %9929 = vmatprep.subr.bf16.mxu0 %v12629_v16  ;;  %v12695_v15 = vld [vmem:[%s15182_s21 + $0xc44] ss:$16 sps:$4 sm:$0xff]  }
 0x2d2   : > { %9970 = vmatprep.subr.bf16.mxu1 %v12632_v17  ;;  %v12698_v16 = vld [vmem:[%s15182_s21 + $0xe44] ss:$16 sps:$4 sm:$0xff]   ;;  %v12693_v17 = vld [vmem:[%s15182_s21 + $0xc40] ss:$16 sps:$4 sm:$0xff]  }
 0x2d4   : > { %9930 = vmatpush2.bf16.msra.mxu0 %v12627_v20  ;;  %v12696_v20 = vld [vmem:[%s15182_s21 + $0xe40] ss:$16 sps:$4 sm:$0xff]  }
 0x2d5   : > { %9971 = vmatpush2.bf16.msra.mxu1 %v12630_v21  ;;  %9931 = vmatprep.subr.bf16.mxu0 %v12635_v22  ;;  %v12701_v21 = vld [vmem:[%s15182_s21 + $0xc24] ss:$16 sps:$4 sm:$0xff]  }
 0x2d6   : > { %9972 = vmatprep.subr.bf16.mxu1 %v12638_v23  ;;  %v12704_v22 = vld [vmem:[%s15182_s21 + $0xe24] ss:$16 sps:$4 sm:$0xff]   ;;  %v12699_v23 = vld [vmem:[%s15182_s21 + $0xc20] ss:$16 sps:$4 sm:$0xff]  }
 0x2d8   : > { %9932 = vmatpush2.bf16.msra.mxu0 %v12633_v25  ;;  %v12702_v25 = vld [vmem:[%s15182_s21 + $0xe20] ss:$16 sps:$4 sm:$0xff]  }
 0x2d9   : > { %9973 = vmatpush2.bf16.msra.mxu1 %v12636_v26  ;;  %9933 = vmatprep.subr.bf16.mxu0 %v12641_v28  ;;  %v12707_v26 = vld [vmem:[%s15182_s21 + $0xc04] ss:$16 sps:$4 sm:$0xff]  }
 0x2da   : > { %9974 = vmatprep.subr.bf16.mxu1 %v12644_v29  ;;  %v12710_v28 = vld [vmem:[%s15182_s21 + $0xe04] ss:$16 sps:$4 sm:$0xff]   ;;  %v12705_v29 = vld [vmem:[%s15182_s21 + $0xc00] ss:$16 sps:$4 sm:$0xff]  }
 0x2dc   : > { %9934 = vmatpush2.bf16.msra.mxu0 %v12639_v30  ;;  %v12708_v30 = vld [vmem:[%s15182_s21 + $0xe00] ss:$16 sps:$4 sm:$0xff]  }
 0x2dd   : > { %9975 = vmatpush2.bf16.msra.mxu1 %v12642_v32  ;;  %9935 = vmatprep.subr.bf16.mxu0 %v12647_v7  ;;  %v12713_v32 = vld [vmem:[%s15182_s21 + $0xde4] ss:$16 sps:$4 sm:$0xff]  }
 0x2de   : > { %9976 = vmatprep.subr.bf16.mxu1 %v12650_v34  ;;  %v12716_v7 = vld [vmem:[%s15182_s21 + $0xfe4] ss:$16 sps:$4 sm:$0xff]   ;;  %v12711_v34 = vld [vmem:[%s15182_s21 + $0xde0] ss:$16 sps:$4 sm:$0xff]  }
 0x2e0   : > { %9936 = vmatpush2.bf16.msra.mxu0 %v12645_v37  ;;  %v12719_v37 = vld [vmem:[%s15182_s21 + $0xdc4] ss:$16 sps:$4 sm:$0xff]  }
 0x2e1   : > { %9977 = vmatpush2.bf16.msra.mxu1 %v12648_v38  ;;  %9937 = vmatprep.subr.bf16.mxu0 %v12653_v39  ;;  %v12722_v38 = vld [vmem:[%s15182_s21 + $0xfc4] ss:$16 sps:$4 sm:$0xff]   ;;  %v12717_v39 = vld [vmem:[%s15182_s21 + $0xdc0] ss:$16 sps:$4 sm:$0xff]  }
 0x2e2   : > { %9978 = vmatprep.subr.bf16.mxu1 %v12656_v40  ;;  %v12720_v40 = vld [vmem:[%s15182_s21 + $0xfc0] ss:$16 sps:$4 sm:$0xff]  }
 0x2e4   : > { %9938 = vmatpush2.bf16.msra.mxu0 %v12651_v33  ;;  %v12725_v33 = vld [vmem:[%s15182_s21 + $0xda4] ss:$16 sps:$4 sm:$0xff]  }
 0x2e5   : > { %9979 = vmatpush2.bf16.msra.mxu1 %v12654_v45  ;;  %9939 = vmatprep.subr.bf16.mxu0 %v12659_v46  ;;  %v12728_v45 = vld [vmem:[%s15182_s21 + $0xfa4] ss:$16 sps:$4 sm:$0xff]   ;;  %v12723_v46 = vld [vmem:[%s15182_s21 + $0xda0] ss:$16 sps:$4 sm:$0xff]  }
 0x2e6   : > { %9980 = vmatprep.subr.bf16.mxu1 %v12662_v47  ;;  %v12726_v47 = vld [vmem:[%s15182_s21 + $0xfa0] ss:$16 sps:$4 sm:$0xff]  }
 0x2e8   : > { %9940 = vmatpush2.bf16.msra.mxu0 %v12657_v51  ;;  %v12734_v51 = vld [vmem:[%s15182_s21 + $0xf84] ss:$16 sps:$4 sm:$0xff]  }
 0x2e9   : > { %9981 = vmatpush2.bf16.msra.mxu1 %v12660_v52  ;;  %9991 = vmatprep.subr.bf16.mxu0 %v12665_v53  ;;  %v12729_v52 = vld [vmem:[%s15182_s21 + $0xd80] ss:$16 sps:$4 sm:$0xff]  }
 0x2ea   : > { %10032 = vmatprep.subr.bf16.mxu1 %v12668_v54  ;;  %v12732_v53 = vld [vmem:[%s15182_s21 + $0xf80] ss:$16 sps:$4 sm:$0xff]   ;;  %v12737_v54 = vld [vmem:[%s15182_s21 + $0xd64] ss:$16 sps:$4 sm:$0xff]  }
 0x2eb   : > { %9942 = vmatmul.mubr.bf16.vlgmr.msra.gmra.mxu0 %v15452_v49 }
 0x2ec   : > { %9983 = vmatmul.mubr.bf16.vlgmr.msra.gmra.mxu1 %v15463_v56  ;;  %9992 = vmatpush1.bf16.msra.mxu0 %v12663_v36  ;;  %v12740_v36 = vld [vmem:[%s15182_s21 + $0xf64] ss:$16 sps:$4 sm:$0xff]  }
 0x2ed   : > { %10033 = vmatpush1.bf16.msra.mxu1 %v12666_v57  ;;  %9993 = vmatprep.subr.bf16.mxu0 %v12671_v58  ;;  %v12735_v57 = vld [vmem:[%s15182_s21 + $0xd60] ss:$16 sps:$4 sm:$0xff]  }
 0x2ee   : > { %10034 = vmatprep.subr.bf16.mxu1 %v12674_v59  ;;  %10023 = vmatprep.mubr.bf16.mxu0 %v15459_v55  ;;  %v12738_v58 = vld [vmem:[%s15182_s21 + $0xf60] ss:$16 sps:$4 sm:$0xff]   ;;  %v12743_v59 = vld [vmem:[%s15182_s21 + $0xd44] ss:$16 sps:$4 sm:$0xff]  }
 0x2ef   : > { %10064 = vmatprep.mubr.bf16.mxu1 %v15471_v60 }
 0x2f0   : > { %9994 = vmatpush1.bf16.msra.mxu0 %v12669_v62  ;;  %v12746_v62 = vld [vmem:[%s15182_s21 + $0xf44] ss:$16 sps:$4 sm:$0xff]  }
 0x2f1   : > { %10035 = vmatpush1.bf16.msra.mxu1 %v12672_v63  ;;  %9995 = vmatprep.subr.bf16.mxu0 %v12677_v0  ;;  %v12741_v63 = vld [vmem:[%s15182_s21 + $0xd40] ss:$16 sps:$4 sm:$0xff]  }
 0x2f2   : > { %10036 = vmatprep.subr.bf16.mxu1 %v12680_v2  ;;  %v15527_v0 = vld [vmem:[%s15168_s28 + $0x10] sm:$0xff] }
 0x2f3   : > { %v12744_v2 = vld [vmem:[%s15182_s21 + $0xf40] ss:$16 sps:$4 sm:$0xff]  }
 0x2f4   : > { %9996 = vmatpush1.bf16.msra.mxu0 %v12675_v3  ;;  %v12749_v3 = vld [vmem:[%s15182_s21 + $0xd24] ss:$16 sps:$4 sm:$0xff]  }
 0x2f5   : > { %10037 = vmatpush1.bf16.msra.mxu1 %v12678_v4  ;;  %9997 = vmatprep.subr.bf16.mxu0 %v12683_v5  ;;  %v12752_v4 = vld [vmem:[%s15182_s21 + $0xf24] ss:$16 sps:$4 sm:$0xff]   ;;  %v15534_v5 = vrot.slane %v15527_v0, %v15233_v50 }
 0x2f6   : > { %10038 = vmatprep.subr.bf16.mxu1 %v12686_v6  ;;  %v12747_v6 = vld [vmem:[%s15182_s21 + $0xd20] ss:$16 sps:$4 sm:$0xff]  }
 0x2f8   : > { %9998 = vmatpush1.bf16.msra.mxu0 %v12681_v8  ;;  %v12750_v8 = vld [vmem:[%s15182_s21 + $0xf20] ss:$16 sps:$4 sm:$0xff]  }
 0x2f9   : > { %10039 = vmatpush1.bf16.msra.mxu1 %v12684_v9  ;;  %9999 = vmatprep.subr.bf16.mxu0 %v12689_v10  ;;  %v12755_v9 = vld [vmem:[%s15182_s21 + $0xd04] ss:$16 sps:$4 sm:$0xff]  }
 0x2fa   : > { %10040 = vmatprep.subr.bf16.mxu1 %v12692_v11  ;;  %v12758_v10 = vld [vmem:[%s15182_s21 + $0xf04] ss:$16 sps:$4 sm:$0xff]   ;;  %v4510_v11 = vcombine.high %v15534_v5, %v15534_v5 }
 0x2fc   : > { %10000 = vmatpush1.bf16.msra.mxu0 %v12687_v12  ;;  %v12753_v12 = vld [vmem:[%s15182_s21 + $0xd00] ss:$16 sps:$4 sm:$0xff]  }
 0x2fd   : > { %10041 = vmatpush1.bf16.msra.mxu1 %v12690_v13  ;;  %10001 = vmatprep.subr.bf16.mxu0 %v12695_v15  ;;  %v15545_v13 = vrot.slane %v15442_v41, %v15233_v50  ;;  %v12756_v15 = vld [vmem:[%s15182_s21 + $0xf00] ss:$16 sps:$4 sm:$0xff]  }
 0x2fe   : > { %10042 = vmatprep.subr.bf16.mxu1 %v12698_v16  ;;  %v12762_v16 = vld [vmem:[%s15182_s21 + $0x10e4] ss:$16 sps:$4 sm:$0xff]   ;;  %v12763_v41 = vld [vmem:[%s15182_s21 + $0x12e0] ss:$16 sps:$4 sm:$0xff]  }
 0x300   : > { %10002 = vmatpush1.bf16.msra.mxu0 %v12693_v17  ;;  %v12765_v17 = vld [vmem:[%s15182_s21 + $0x12e4] ss:$16 sps:$4 sm:$0xff]  }
 0x301   : > { %10043 = vmatpush1.bf16.msra.mxu1 %v12696_v20  ;;  %10003 = vmatprep.subr.bf16.mxu0 %v12701_v21  ;;  %v15551_v20 = vrot.slane %v4510_v11, %v15233_v50  ;;  %v15555_v21 = vcombine.high %v15545_v13, %v15545_v13  ;;  %v12807_v11 = vld [vmem:[%s15182_s21 + $0x1204] ss:$16 sps:$4 sm:$0xff]  }
 0x302   : > { %10044 = vmatprep.subr.bf16.mxu1 %v12704_v22  ;;  %v12760_v22 = vld [vmem:[%s15182_s21 + $0x10e0] ss:$16 sps:$4 sm:$0xff]  }
 0x304   : > { %10004 = vmatpush1.bf16.msra.mxu0 %v12699_v23  ;;  %v12768_v23 = vld [vmem:[%s15182_s21 + $0x10c4] ss:$16 sps:$4 sm:$0xff]  }
 0x305   : > { %10045 = vmatpush1.bf16.msra.mxu1 %v12702_v25  ;;  %10005 = vmatprep.subr.bf16.mxu0 %v12707_v26  ;;  %v12771_v25 = vld [vmem:[%s15182_s21 + $0x12c4] ss:$16 sps:$4 sm:$0xff]   ;;  %v15563_v26 = vcombine.high %v15551_v20, %v15551_v20 }
 0x306   : > { %10046 = vmatprep.subr.bf16.mxu1 %v12710_v28 }
 0x308   : > { %10006 = vmatpush1.bf16.msra.mxu0 %v12705_v29 }
 0x309   : > { %10047 = vmatpush1.bf16.msra.mxu1 %v12708_v30  ;;  %10007 = vmatprep.subr.bf16.mxu0 %v12713_v32  ;;  %v12766_v30 = vld [vmem:[%s15182_s21 + $0x10c0] ss:$16 sps:$4 sm:$0xff]  }
 0x30a   : > { %10048 = vmatprep.subr.bf16.mxu1 %v12716_v7  ;;  %v12769_v32 = vld [vmem:[%s15182_s21 + $0x12c0] ss:$16 sps:$4 sm:$0xff]  }
 0x30c   : > { %10008 = vmatpush2.bf16.msra.mxu0 %v12711_v34 }
 0x30d   : > { %10049 = vmatpush2.bf16.msra.mxu1 %v12714_v35  ;;  %10009 = vmatprep.subr.bf16.mxu0 %v12719_v37  ;;  %v12774_v37 = vld [vmem:[%s15182_s21 + $0x10a4] ss:$16 sps:$4 sm:$0xff]  }
 0x30e   : > { %10050 = vmatprep.subr.bf16.mxu1 %v12722_v38  ;;  %v12777_v38 = vld [vmem:[%s15182_s21 + $0x12a4] ss:$16 sps:$4 sm:$0xff]  }
 0x310   : > { %10010 = vmatpush2.bf16.msra.mxu0 %v12717_v39 }
 0x311   : > { %10051 = vmatpush2.bf16.msra.mxu1 %v12720_v40  ;;  %10011 = vmatprep.subr.bf16.mxu0 %v12725_v33  ;;  %v12772_v40 = vld [vmem:[%s15182_s21 + $0x10a0] ss:$16 sps:$4 sm:$0xff]  }
 0x312   : > { %10052 = vmatprep.subr.bf16.mxu1 %v12728_v45  ;;  %v12775_v33 = vld [vmem:[%s15182_s21 + $0x12a0] ss:$16 sps:$4 sm:$0xff]  }
 0x314   : > { %10012 = vmatpush2.bf16.msra.mxu0 %v12723_v46 }
 0x315   : > { %10053 = vmatpush2.bf16.msra.mxu1 %v12726_v47  ;;  %10013 = vmatprep.subr.bf16.mxu0 %v12731_v48 }
 0x316   : > { %10054 = vmatprep.subr.bf16.mxu1 %v12734_v51  ;;  %v12780_v51 = vld [vmem:[%s15182_s21 + $0x1084] ss:$16 sps:$4 sm:$0xff]  }
 0x318   : > { %10014 = vmatpush2.bf16.msra.mxu0 %v12729_v52  ;;  %v12783_v52 = vld [vmem:[%s15182_s21 + $0x1284] ss:$16 sps:$4 sm:$0xff]  }
 0x319   : > { %10055 = vmatpush2.bf16.msra.mxu1 %v12732_v53  ;;  %10015 = vmatprep.subr.bf16.mxu0 %v12737_v54  ;;  %v12778_v53 = vld [vmem:[%s15182_s21 + $0x1080] ss:$16 sps:$4 sm:$0xff]  }
 0x31a   : > { %10056 = vmatprep.subr.bf16.mxu1 %v12740_v36  ;;  %v12781_v54 = vld [vmem:[%s15182_s21 + $0x1280] ss:$16 sps:$4 sm:$0xff]   ;;  %v12786_v36 = vld [vmem:[%s15182_s21 + $0x1064] ss:$16 sps:$4 sm:$0xff]  }
 0x31c   : > { %10016 = vmatpush2.bf16.msra.mxu0 %v12735_v57  ;;  %v12789_v57 = vld [vmem:[%s15182_s21 + $0x1264] ss:$16 sps:$4 sm:$0xff]  }
 0x31d   : > { %10057 = vmatpush2.bf16.msra.mxu1 %v12738_v58  ;;  %10017 = vmatprep.subr.bf16.mxu0 %v12743_v59  ;;  %v12784_v58 = vld [vmem:[%s15182_s21 + $0x1060] ss:$16 sps:$4 sm:$0xff]  }
 0x31e   : > { %10058 = vmatprep.subr.bf16.mxu1 %v12746_v62  ;;  %v12787_v59 = vld [vmem:[%s15182_s21 + $0x1260] ss:$16 sps:$4 sm:$0xff]   ;;  %v12792_v62 = vld [vmem:[%s15182_s21 + $0x1044] ss:$16 sps:$4 sm:$0xff]  }
 0x320   : > { %10018 = vmatpush2.bf16.msra.mxu0 %v12741_v63  ;;  %v12795_v63 = vld [vmem:[%s15182_s21 + $0x1244] ss:$16 sps:$4 sm:$0xff]  }
 0x321   : > { %10059 = vmatpush2.bf16.msra.mxu1 %v12744_v2  ;;  %10019 = vmatprep.subr.bf16.mxu0 %v12749_v3  ;;  %v12790_v2 = vld [vmem:[%s15182_s21 + $0x1040] ss:$16 sps:$4 sm:$0xff]  }
 0x322   : > { %10060 = vmatprep.subr.bf16.mxu1 %v12752_v4  ;;  %v12793_v3 = vld [vmem:[%s15182_s21 + $0x1240] ss:$16 sps:$4 sm:$0xff]   ;;  %v12798_v4 = vld [vmem:[%s15182_s21 + $0x1024] ss:$16 sps:$4 sm:$0xff]  }
 0x324   : > { %10020 = vmatpush2.bf16.msra.mxu0 %v12747_v6  ;;  %v12801_v6 = vld [vmem:[%s15182_s21 + $0x1224] ss:$16 sps:$4 sm:$0xff]  }
 0x325   : > { %10061 = vmatpush2.bf16.msra.mxu1 %v12750_v8  ;;  %10021 = vmatprep.subr.bf16.mxu0 %v12755_v9  ;;  %v12796_v8 = vld [vmem:[%s15182_s21 + $0x1020] ss:$16 sps:$4 sm:$0xff]  }
 0x326   : > { %10062 = vmatprep.subr.bf16.mxu1 %v12758_v10  ;;  %v12799_v9 = vld [vmem:[%s15182_s21 + $0x1220] ss:$16 sps:$4 sm:$0xff]   ;;  %v12804_v10 = vld [vmem:[%s15182_s21 + $0x1004] ss:$16 sps:$4 sm:$0xff]  }
 0x328   : > { %10022 = vmatpush2.bf16.msra.mxu0 %v12753_v12  ;;  %v12802_v12 = vld [vmem:[%s15182_s21 + $0x1000] ss:$16 sps:$4 sm:$0xff]  }
 0x329   : > { %10063 = vmatpush2.bf16.msra.mxu1 %v12756_v15  ;;  %10073 = vmatprep.subr.bf16.mxu0 %v12762_v16  ;;  %v12805_v15 = vld [vmem:[%s15182_s21 + $0x1200] ss:$16 sps:$4 sm:$0xff]   ;;  %v12810_v16 = vld [vmem:[%s15182_s21 + $0x11e4] ss:$16 sps:$4 sm:$0xff]  }
 0x32a   : > { %10114 = vmatprep.subr.bf16.mxu1 %v12765_v17  ;;  %v12813_v17 = vld [vmem:[%s15182_s21 + $0x13e4] ss:$16 sps:$4 sm:$0xff]  }
 0x32b   : > { %v9779_v28 = vpop.f32.mrf.mxu0  ;;  %10024 = vmatmul.mubr.bf16.vlgmr.msra.gmra.mxu0 %v15545_v13 }
 0x32c   : > { %v9820_v29 = vpop.f32.mrf.mxu1  ;;  %10065 = vmatmul.mubr.bf16.vlgmr.msra.gmra.mxu1 %v15555_v21  ;;  %10074 = vmatpush1.bf16.msra.mxu0 %v12760_v22  ;;  %v12808_v22 = vld [vmem:[%s15182_s21 + $0x11e0] ss:$16 sps:$4 sm:$0xff]  }
 0x32d   : > { %v15569_v7 = vadd.f32 %v9820_v29, %v9779_v28  ;;  %10115 = vmatpush1.bf16.msra.mxu1 %v12763_v41  ;;  %v9781_v34 = vpop.f32.mrf.mxu0  ;;  %10075 = vmatprep.subr.bf16.mxu0 %v12768_v23  ;;  %v12811_v41 = vld [vmem:[%s15182_s21 + $0x13e0] ss:$16 sps:$4 sm:$0xff]   ;;  %v12816_v23 = vld [vmem:[%s15182_s21 + $0x11c4] ss:$16 sps:$4 sm:$0xff]  }
 0x32e   : > { %v9822_v35 = vpop.f32.mrf.mxu1  ;;  %10116 = vmatprep.subr.bf16.mxu1 %v12771_v25  ;;  %10105 = vmatprep.mubr.bf16.mxu0 %v15551_v20  ;;  %v12819_v25 = vld [vmem:[%s15182_s21 + $0x13c4] ss:$16 sps:$4 sm:$0xff]   ;;  %v12814_v28 = vld [vmem:[%s15182_s21 + $0x11c0] ss:$16 sps:$4 sm:$0xff]  }
 0x32f   : > { %v15573_v39 = vadd.f32 %v9822_v35, %v9781_v34  ;;  %10146 = vmatprep.mubr.bf16.mxu1 %v15563_v26  ;;  %v9783_v45 = vpop.f32.mrf.mxu0  ;;  %v12817_v29 = vld [vmem:[%s15182_s21 + $0x13c0] ss:$16 sps:$4 sm:$0xff]  }
 0x330   : > { %v9824_v46 = vpop.f32.mrf.mxu1  ;;  %10076 = vmatpush1.bf16.msra.mxu0 %v12766_v30  ;;  %v12822_v30 = vld [vmem:[%s15182_s21 + $0x11a4] ss:$16 sps:$4 sm:$0xff]   ;;  %v12820_v34 = vld [vmem:[%s15182_s21 + $0x11a0] ss:$16 sps:$4 sm:$0xff]  }
 0x331   : > { %10117 = vmatpush1.bf16.msra.mxu1 %v12769_v32  ;;  %v9784_v47 = vpop.f32.mrf.mxu0  ;;  %10077 = vmatprep.subr.bf16.mxu0 %v12774_v37  ;;  %v12825_v32 = vld [vmem:[%s15182_s21 + $0x13a4] ss:$16 sps:$4 sm:$0xff]   ;;  %v12823_v35 = vld [vmem:[%s15182_s21 + $0x13a0] ss:$16 sps:$4 sm:$0xff]  }
 0x332   : > { %v9825_v48 = vpop.f32.mrf.mxu1  ;;  %10118 = vmatprep.subr.bf16.mxu1 %v12777_v38  ;;  %v12828_v37 = vld [vmem:[%s15182_s21 + $0x1184] ss:$16 sps:$4 sm:$0xff]   ;;  %v12832_v47 = vld [vmem:[%s15182_s21 + $0x1160] ss:$16 sps:$4 sm:$0xff]  }
 0x333   : > { %v12831_v38 = vld [vmem:[%s15182_s21 + $0x1384] ss:$16 sps:$4 sm:$0xff]   ;;  %v12835_v48 = vld [vmem:[%s15182_s21 + $0x1360] ss:$16 sps:$4 sm:$0xff]  }
 0x334   : > { %10078 = vmatpush1.bf16.msra.mxu0 %v12772_v40  ;;  %v12826_v40 = vld [vmem:[%s15182_s21 + $0x1180] ss:$16 sps:$4 sm:$0xff]   ;;  %v12834_v45 = vld [vmem:[%s15182_s21 + $0x1164] ss:$16 sps:$4 sm:$0xff]  }
 0x335   : > { %10119 = vmatpush1.bf16.msra.mxu1 %v12775_v33  ;;  %10079 = vmatprep.subr.bf16.mxu0 %v12780_v51  ;;  %v12829_v33 = vld [vmem:[%s15182_s21 + $0x1380] ss:$16 sps:$4 sm:$0xff]   ;;  %v12837_v46 = vld [vmem:[%s15182_s21 + $0x1364] ss:$16 sps:$4 sm:$0xff]  }
 0x336   : > { %10120 = vmatprep.subr.bf16.mxu1 %v12783_v52  ;;  %v12840_v51 = vld [vmem:[%s15182_s21 + $0x1144] ss:$16 sps:$4 sm:$0xff]  }
 0x337   : > { %v12843_v52 = vld [vmem:[%s15182_s21 + $0x1344] ss:$16 sps:$4 sm:$0xff]  }
 0x338   : > { %10080 = vmatpush1.bf16.msra.mxu0 %v12778_v53  ;;  %v4495_v53 = vcombine.high %v15527_v0, %v15527_v0  ;;  %v12844_v0 = vld [vmem:[%s15182_s21 + $0x1120] ss:$16 sps:$4 sm:$0xff]  }
 0x339   : > { %10121 = vmatpush1.bf16.msra.mxu1 %v12781_v54  ;;  %10081 = vmatprep.subr.bf16.mxu0 %v12786_v36  ;;  %v12838_v54 = vld [vmem:[%s15182_s21 + $0x1140] ss:$16 sps:$4 sm:$0xff]  }
 0x33a   : > { %10122 = vmatprep.subr.bf16.mxu1 %v12789_v57  ;;  %v12841_v36 = vld [vmem:[%s15182_s21 + $0x1340] ss:$16 sps:$4 sm:$0xff]   ;;  %v12846_v57 = vld [vmem:[%s15182_s21 + $0x1124] ss:$16 sps:$4 sm:$0xff]  }
 0x33c   : > { %10082 = vmatpush1.bf16.msra.mxu0 %v12784_v58  ;;  %v12849_v58 = vld [vmem:[%s15182_s21 + $0x1324] ss:$16 sps:$4 sm:$0xff]  }
 0x33d   : > { %10123 = vmatpush1.bf16.msra.mxu1 %v12787_v59  ;;  %10083 = vmatprep.subr.bf16.mxu0 %v12792_v62  ;;  %v15628_v59 = vrot.slane %v4495_v53, %v15233_v50  ;;  %v12847_v62 = vld [vmem:[%s15182_s21 + $0x1320] ss:$16 sps:$4 sm:$0xff]  }
 0x33e   : > { %10124 = vmatprep.subr.bf16.mxu1 %v12795_v63  ;;  %v12852_v63 = vld [vmem:[%s15182_s21 + $0x1104] ss:$16 sps:$4 sm:$0xff]   ;;  %v12877_v53 = vld [vmem:[%s15182_s21 + $0x1680] ss:$16 sps:$4 sm:$0xff]  }
 0x340   : > { %10084 = vmatpush1.bf16.msra.mxu0 %v12790_v2  ;;  %v12855_v2 = vld [vmem:[%s15182_s21 + $0x1304] ss:$16 sps:$4 sm:$0xff]  }
 0x341   : > { %10125 = vmatpush1.bf16.msra.mxu1 %v12793_v3  ;;  %10085 = vmatprep.subr.bf16.mxu0 %v12798_v4  ;;  %v4511_v3 = vcombine.high %v15628_v59, %v15628_v59  ;;  %v15638_v4 = vrot.slane %v15534_v5, %v15233_v50 }
 0x342   : > { %10126 = vmatprep.subr.bf16.mxu1 %v12801_v6  ;;  %v12850_v6 = vld [vmem:[%s15182_s21 + $0x1100] ss:$16 sps:$4 sm:$0xff]  }
 0x343   : > { %v15651_v5 = vcombine.high %v15638_v4, %v15638_v4 }
 0x344   : > { %10086 = vmatpush1.bf16.msra.mxu0 %v12796_v8  ;;  %v12853_v8 = vld [vmem:[%s15182_s21 + $0x1300] ss:$16 sps:$4 sm:$0xff]  }
 0x345   : > { %10127 = vmatpush1.bf16.msra.mxu1 %v12799_v9  ;;  %10087 = vmatprep.subr.bf16.mxu0 %v12804_v10  ;;  %v12858_v9 = vld [vmem:[%s15182_s21 + $0x14e4] ss:$16 sps:$4 sm:$0xff]  }
 0x346   : > { %10128 = vmatprep.subr.bf16.mxu1 %v12807_v11  ;;  %v12861_v10 = vld [vmem:[%s15182_s21 + $0x16e4] ss:$16 sps:$4 sm:$0xff]   ;;  %v12856_v11 = vld [vmem:[%s15182_s21 + $0x14e0] ss:$16 sps:$4 sm:$0xff]  }
 0x348   : > { %10088 = vmatpush1.bf16.msra.mxu0 %v12802_v12  ;;  %v12859_v12 = vld [vmem:[%s15182_s21 + $0x16e0] ss:$16 sps:$4 sm:$0xff]  }
 0x349   : > { %10129 = vmatpush1.bf16.msra.mxu1 %v12805_v15  ;;  %10089 = vmatprep.subr.bf16.mxu0 %v12810_v16  ;;  %v15647_v15 = vrot.slane %v4511_v3, %v15233_v50  ;;  %v12864_v16 = vld [vmem:[%s15182_s21 + $0x14c4] ss:$16 sps:$4 sm:$0xff]  }
 0x34a   : > { %10130 = vmatprep.subr.bf16.mxu1 %v12813_v17  ;;  %v12867_v17 = vld [vmem:[%s15182_s21 + $0x16c4] ss:$16 sps:$4 sm:$0xff]  }
 0x34b   : > { %v12894_v3 = vld [vmem:[%s15182_s21 + $0x1424] ss:$16 sps:$4 sm:$0xff]  }
 0x34c   : > { %10090 = vmatpush2.bf16.msra.mxu0 %v12808_v22  ;;  %v12862_v22 = vld [vmem:[%s15182_s21 + $0x14c0] ss:$16 sps:$4 sm:$0xff]  }
 0x34d   : > { %10131 = vmatpush2.bf16.msra.mxu1 %v12811_v41  ;;  %10091 = vmatprep.subr.bf16.mxu0 %v12816_v23  ;;  %v12865_v41 = vld [vmem:[%s15182_s21 + $0x16c0] ss:$16 sps:$4 sm:$0xff]   ;;  %v15659_v23 = vcombine.high %v15647_v15, %v15647_v15 }
 0x34e   : > { %10132 = vmatprep.subr.bf16.mxu1 %v12819_v25 }
 0x350   : > { %10092 = vmatpush2.bf16.msra.mxu0 %v12814_v28 }
 0x351   : > { %10133 = vmatpush2.bf16.msra.mxu1 %v12817_v29  ;;  %10093 = vmatprep.subr.bf16.mxu0 %v12822_v30 }
 0x352   : > { %10134 = vmatprep.subr.bf16.mxu1 %v12825_v32 }
 0x354   : > { %10094 = vmatpush2.bf16.msra.mxu0 %v12820_v34  ;;  %v12870_v34 = vld [vmem:[%s15182_s21 + $0x14a4] ss:$16 sps:$4 sm:$0xff]  }
 0x355   : > { %10135 = vmatpush2.bf16.msra.mxu1 %v12823_v35  ;;  %10095 = vmatprep.subr.bf16.mxu0 %v12828_v37  ;;  %v12873_v35 = vld [vmem:[%s15182_s21 + $0x16a4] ss:$16 sps:$4 sm:$0xff]  }
 0x356   : > { %10136 = vmatprep.subr.bf16.mxu1 %v12831_v38 }
 0x358   : > { %10096 = vmatpush2.bf16.msra.mxu0 %v12826_v40  ;;  %v12868_v40 = vld [vmem:[%s15182_s21 + $0x14a0] ss:$16 sps:$4 sm:$0xff]  }
 0x359   : > { %10137 = vmatpush2.bf16.msra.mxu1 %v12829_v33  ;;  %10097 = vmatprep.subr.bf16.mxu0 %v12834_v45  ;;  %v12871_v33 = vld [vmem:[%s15182_s21 + $0x16a0] ss:$16 sps:$4 sm:$0xff]  }
 0x35a   : > { %10138 = vmatprep.subr.bf16.mxu1 %v12837_v46 }
 0x35c   : > { %10098 = vmatpush2.bf16.msra.mxu0 %v12832_v47 }
 0x35d   : > { %10139 = vmatpush2.bf16.msra.mxu1 %v12835_v48  ;;  %10099 = vmatprep.subr.bf16.mxu0 %v12840_v51  ;;  %v12879_v51 = vld [vmem:[%s15182_s21 + $0x1684] ss:$16 sps:$4 sm:$0xff]  }
 0x35e   : > { %10140 = vmatprep.subr.bf16.mxu1 %v12843_v52  ;;  %v12874_v52 = vld [vmem:[%s15182_s21 + $0x1480] ss:$16 sps:$4 sm:$0xff]  }
 0x360   : > { %10100 = vmatpush2.bf16.msra.mxu0 %v12838_v54  ;;  %v12882_v54 = vld [vmem:[%s15182_s21 + $0x1464] ss:$16 sps:$4 sm:$0xff]  }
 0x361   : > { %10141 = vmatpush2.bf16.msra.mxu1 %v12841_v36  ;;  %10101 = vmatprep.subr.bf16.mxu0 %v12846_v57  ;;  %v12885_v36 = vld [vmem:[%s15182_s21 + $0x1664] ss:$16 sps:$4 sm:$0xff]   ;;  %v12880_v57 = vld [vmem:[%s15182_s21 + $0x1460] ss:$16 sps:$4 sm:$0xff]  }
 0x362   : > { %10142 = vmatprep.subr.bf16.mxu1 %v12849_v58  ;;  %v12883_v58 = vld [vmem:[%s15182_s21 + $0x1660] ss:$16 sps:$4 sm:$0xff]  }
 0x364   : > { %10102 = vmatpush2.bf16.msra.mxu0 %v12844_v0  ;;  %v12888_v0 = vld [vmem:[%s15182_s21 + $0x1444] ss:$16 sps:$4 sm:$0xff]  }
 0x365   : > { %10143 = vmatpush2.bf16.msra.mxu1 %v12847_v62  ;;  %10103 = vmatprep.subr.bf16.mxu0 %v12852_v63  ;;  %v12891_v62 = vld [vmem:[%s15182_s21 + $0x1644] ss:$16 sps:$4 sm:$0xff]   ;;  %v12886_v63 = vld [vmem:[%s15182_s21 + $0x1440] ss:$16 sps:$4 sm:$0xff]  }
 0x366   : > { %10144 = vmatprep.subr.bf16.mxu1 %v12855_v2  ;;  %v12889_v2 = vld [vmem:[%s15182_s21 + $0x1640] ss:$16 sps:$4 sm:$0xff]  }
 0x368   : > { %10104 = vmatpush2.bf16.msra.mxu0 %v12850_v6  ;;  %v12897_v6 = vld [vmem:[%s15182_s21 + $0x1624] ss:$16 sps:$4 sm:$0xff]  }
 0x369   : > { %10145 = vmatpush2.bf16.msra.mxu1 %v12853_v8  ;;  %10155 = vmatprep.subr.bf16.mxu0 %v12858_v9  ;;  %v12892_v8 = vld [vmem:[%s15182_s21 + $0x1420] ss:$16 sps:$4 sm:$0xff]  }
 0x36a   : > { %10196 = vmatprep.subr.bf16.mxu1 %v12861_v10  ;;  %v12895_v9 = vld [vmem:[%s15182_s21 + $0x1620] ss:$16 sps:$4 sm:$0xff]   ;;  %v12900_v10 = vld [vmem:[%s15182_s21 + $0x1404] ss:$16 sps:$4 sm:$0xff]  }
 0x36b   : > { %v9861_v25 = vpop.f32.mrf.mxu0  ;;  %10106 = vmatmul.mubr.bf16.vlgmr.msra.gmra.mxu0 %v15638_v4 }
 0x36c   : > { %v9902_v28 = vpop.f32.mrf.mxu1  ;;  %10147 = vmatmul.mubr.bf16.vlgmr.msra.gmra.mxu1 %v15651_v5  ;;  %v9862_v29 = vadd.f32 %v9861_v25, %v15569_v7  ;;  %10156 = vmatpush1.bf16.msra.mxu0 %v12856_v11  ;;  %v12903_v11 = vld [vmem:[%s15182_s21 + $0x1604] ss:$16 sps:$4 sm:$0xff]   ;;  %v12907_v25 = vld [vmem:[%s15182_s21 + $0x17e0] ss:$16 sps:$4 sm:$0xff]  }
 0x36d   : > { %10197 = vmatpush1.bf16.msra.mxu1 %v12859_v12  ;;  %v9863_v30 = vpop.f32.mrf.mxu0  ;;  %10157 = vmatprep.subr.bf16.mxu0 %v12864_v16  ;;  %v12898_v12 = vld [vmem:[%s15182_s21 + $0x1400] ss:$16 sps:$4 sm:$0xff]  }
 0x36e   : > { %v9904_v32 = vpop.f32.mrf.mxu1  ;;  %10198 = vmatprep.subr.bf16.mxu1 %v12867_v17  ;;  %v15666_v37 = vadd.f32 %v9902_v28, %v9862_v29  ;;  %v9864_v38 = vadd.f32 %v9863_v30, %v15573_v39  ;;  %10187 = vmatprep.mubr.bf16.mxu0 %v15647_v15  ;;  %v12876_v39 = vld [vmem:[%s15182_s21 + $0x1484] ss:$16 sps:$4 sm:$0xff]   ;;  %v12901_v16 = vld [vmem:[%s15182_s21 + $0x1600] ss:$16 sps:$4 sm:$0xff]  }
 0x36f   : > { %10228 = vmatprep.mubr.bf16.mxu1 %v15659_v23  ;;  %v9865_v7 = vpop.f32.mrf.mxu0  ;;  %v12906_v17 = vld [vmem:[%s15182_s21 + $0x15e4] ss:$16 sps:$4 sm:$0xff]   ;;  %v12910_v30 = vld [vmem:[%s15182_s21 + $0x15c0] ss:$16 sps:$4 sm:$0xff]  }
 0x370   : > { %v9906_v45 = vpop.f32.mrf.mxu1  ;;  %v15673_v46 = vadd.f32 %v9904_v32, %v9864_v38  ;;  %10158 = vmatpush1.bf16.msra.mxu0 %v12862_v22  ;;  %v12909_v22 = vld [vmem:[%s15182_s21 + $0x17e4] ss:$16 sps:$4 sm:$0xff]   ;;  %v12913_v32 = vld [vmem:[%s15182_s21 + $0x17c0] ss:$16 sps:$4 sm:$0xff]  }
 0x371   : > { %10199 = vmatpush1.bf16.msra.mxu1 %v12865_v41  ;;  %v9866_v47 = vpop.f32.mrf.mxu0  ;;  %10159 = vmatprep.subr.bf16.mxu0 %v12870_v34  ;;  %v12904_v41 = vld [vmem:[%s15182_s21 + $0x15e0] ss:$16 sps:$4 sm:$0xff]   ;;  %v12912_v28 = vld [vmem:[%s15182_s21 + $0x15c4] ss:$16 sps:$4 sm:$0xff]  }
 0x372   : > { %v9907_v48 = vpop.f32.mrf.mxu1  ;;  %10200 = vmatprep.subr.bf16.mxu1 %v12873_v35  ;;  %v12915_v29 = vld [vmem:[%s15182_s21 + $0x17c4] ss:$16 sps:$4 sm:$0xff]   ;;  %v12916_v38 = vld [vmem:[%s15182_s21 + $0x15a0] ss:$16 sps:$4 sm:$0xff]  }
 0x373   : > { %v12918_v34 = vld [vmem:[%s15182_s21 + $0x15a4] ss:$16 sps:$4 sm:$0xff]   ;;  %v12922_v45 = vld [vmem:[%s15182_s21 + $0x1580] ss:$16 sps:$4 sm:$0xff]  }
 0x374   : > { %10160 = vmatpush1.bf16.msra.mxu0 %v12868_v40  ;;  %v12921_v35 = vld [vmem:[%s15182_s21 + $0x17a4] ss:$16 sps:$4 sm:$0xff]   ;;  %v12919_v40 = vld [vmem:[%s15182_s21 + $0x17a0] ss:$16 sps:$4 sm:$0xff]  }
 0x375   : > { %10201 = vmatpush1.bf16.msra.mxu1 %v12871_v33  ;;  %10161 = vmatprep.subr.bf16.mxu0 %v12876_v39  ;;  %v12924_v33 = vld [vmem:[%s15182_s21 + $0x1584] ss:$16 sps:$4 sm:$0xff]   ;;  %v12925_v47 = vld [vmem:[%s15182_s21 + $0x1780] ss:$16 sps:$4 sm:$0xff]  }
 0x376   : > { %10202 = vmatprep.subr.bf16.mxu1 %v12879_v51  ;;  %v12927_v7 = vld [vmem:[%s15182_s21 + $0x1784] ss:$16 sps:$4 sm:$0xff]   ;;  %v12928_v51 = vld [vmem:[%s15182_s21 + $0x1560] ss:$16 sps:$4 sm:$0xff]  }
 0x377   : > { %v12930_v48 = vld [vmem:[%s15182_s21 + $0x1564] ss:$16 sps:$4 sm:$0xff]  }
 0x378   : > { %10162 = vmatpush1.bf16.msra.mxu0 %v12874_v52  ;;  %v12933_v39 = vld [vmem:[%s15182_s21 + $0x1764] ss:$16 sps:$4 sm:$0xff]   ;;  %v12931_v52 = vld [vmem:[%s15182_s21 + $0x1760] ss:$16 sps:$4 sm:$0xff]  }
 0x379   : > { %10203 = vmatpush1.bf16.msra.mxu1 %v12877_v53  ;;  %10163 = vmatprep.subr.bf16.mxu0 %v12882_v54  ;;  %v12936_v53 = vld [vmem:[%s15182_s21 + $0x1544] ss:$16 sps:$4 sm:$0xff]  }
 0x37a   : > { %10204 = vmatprep.subr.bf16.mxu1 %v12885_v36  ;;  %v12939_v54 = vld [vmem:[%s15182_s21 + $0x1744] ss:$16 sps:$4 sm:$0xff]   ;;  %v15718_v36 = vld [vmem:[%s15168_s28 + $0x18] sm:$0xff] }
 0x37c   : > { %10164 = vmatpush1.bf16.msra.mxu0 %v12880_v57  ;;  %v12934_v57 = vld [vmem:[%s15182_s21 + $0x1540] ss:$16 sps:$4 sm:$0xff]  }
 0x37d   : > { %10205 = vmatpush1.bf16.msra.mxu1 %v12883_v58  ;;  %10165 = vmatprep.subr.bf16.mxu0 %v12888_v0  ;;  %v12937_v58 = vld [vmem:[%s15182_s21 + $0x1740] ss:$16 sps:$4 sm:$0xff]   ;;  %v12942_v0 = vld [vmem:[%s15182_s21 + $0x1524] ss:$16 sps:$4 sm:$0xff]  }
 0x37e   : > { %10206 = vmatprep.subr.bf16.mxu1 %v12891_v62  ;;  %v12945_v62 = vld [vmem:[%s15182_s21 + $0x1724] ss:$16 sps:$4 sm:$0xff]  }
 0x380   : > { %10166 = vmatpush1.bf16.msra.mxu0 %v12886_v63  ;;  %v15726_v63 = vrot.slane %v15718_v36, %v15233_v50 }
 0x381   : > { %10207 = vmatpush1.bf16.msra.mxu1 %v12889_v2  ;;  %10167 = vmatprep.subr.bf16.mxu0 %v12894_v3  ;;  %v12940_v2 = vld [vmem:[%s15182_s21 + $0x1520] ss:$16 sps:$4 sm:$0xff]  }
 0x382   : > { %10208 = vmatprep.subr.bf16.mxu1 %v12897_v6  ;;  %v12943_v3 = vld [vmem:[%s15182_s21 + $0x1720] ss:$16 sps:$4 sm:$0xff]   ;;  %v12948_v6 = vld [vmem:[%s15182_s21 + $0x1504] ss:$16 sps:$4 sm:$0xff]  }
 0x384   : > { %10168 = vmatpush1.bf16.msra.mxu0 %v12892_v8  ;;  %v12951_v8 = vld [vmem:[%s15182_s21 + $0x1704] ss:$16 sps:$4 sm:$0xff]  }
 0x385   : > { %10209 = vmatpush1.bf16.msra.mxu1 %v12895_v9  ;;  %10169 = vmatprep.subr.bf16.mxu0 %v12900_v10  ;;  %v4559_v9 = vcombine.high %v15726_v63, %v15726_v63  ;;  %v15736_v10 = vrot.slane %v15628_v59, %v15233_v50 }
 0x386   : > { %10210 = vmatprep.subr.bf16.mxu1 %v12903_v11  ;;  %v12946_v11 = vld [vmem:[%s15182_s21 + $0x1500] ss:$16 sps:$4 sm:$0xff]  }
 0x387   : > { %v15749_v59 = vcombine.high %v15736_v10, %v15736_v10 }
 0x388   : > { %10170 = vmatpush1.bf16.msra.mxu0 %v12898_v12  ;;  %v12949_v12 = vld [vmem:[%s15182_s21 + $0x1700] ss:$16 sps:$4 sm:$0xff]  }
 0x389   : > { %10211 = vmatpush1.bf16.msra.mxu1 %v12901_v16  ;;  %10171 = vmatprep.subr.bf16.mxu0 %v12906_v17  ;;  %v12955_v16 = vld [vmem:[%s15182_s21 + $0x18e4] ss:$16 sps:$4 sm:$0xff]  }
 0x38a   : > { %10212 = vmatprep.subr.bf16.mxu1 %v12909_v22  ;;  %v12958_v17 = vld [vmem:[%s15182_s21 + $0x1ae4] ss:$16 sps:$4 sm:$0xff]   ;;  %v12953_v22 = vld [vmem:[%s15182_s21 + $0x18e0] ss:$16 sps:$4 sm:$0xff]  }
 0x38c   : > { %10172 = vmatpush2.bf16.msra.mxu0 %v12904_v41  ;;  %v12956_v41 = vld [vmem:[%s15182_s21 + $0x1ae0] ss:$16 sps:$4 sm:$0xff]  }
 0x38d   : > { %10213 = vmatpush2.bf16.msra.mxu1 %v12907_v25  ;;  %10173 = vmatprep.subr.bf16.mxu0 %v12912_v28  ;;  %v15745_v25 = vrot.slane %v4559_v9, %v15233_v50  ;;  %v12961_v28 = vld [vmem:[%s15182_s21 + $0x18c4] ss:$16 sps:$4 sm:$0xff]   ;;  %v12980_v9 = vld [vmem:[%s15182_s21 + $0x1a60] ss:$16 sps:$4 sm:$0xff]  }
 0x38e   : > { %10214 = vmatprep.subr.bf16.mxu1 %v12915_v29  ;;  %v12964_v29 = vld [vmem:[%s15182_s21 + $0x1ac4] ss:$16 sps:$4 sm:$0xff]  }
 0x390   : > { %10174 = vmatpush2.bf16.msra.mxu0 %v12910_v30  ;;  %v12959_v30 = vld [vmem:[%s15182_s21 + $0x18c0] ss:$16 sps:$4 sm:$0xff]  }
 0x391   : > { %10215 = vmatpush2.bf16.msra.mxu1 %v12913_v32  ;;  %10175 = vmatprep.subr.bf16.mxu0 %v12918_v34  ;;  %v12962_v32 = vld [vmem:[%s15182_s21 + $0x1ac0] ss:$16 sps:$4 sm:$0xff]   ;;  %v15757_v34 = vcombine.high %v15745_v25, %v15745_v25 }
 0x392   : > { %10216 = vmatprep.subr.bf16.mxu1 %v12921_v35 }
 0x394   : > { %10176 = vmatpush2.bf16.msra.mxu0 %v12916_v38 }
 0x395   : > { %10217 = vmatpush2.bf16.msra.mxu1 %v12919_v40  ;;  %10177 = vmatprep.subr.bf16.mxu0 %v12924_v33 }
 0x396   : > { %10218 = vmatprep.subr.bf16.mxu1 %v12927_v7 }
 0x398   : > { %10178 = vmatpush2.bf16.msra.mxu0 %v12922_v45  ;;  %v12967_v45 = vld [vmem:[%s15182_s21 + $0x18a4] ss:$16 sps:$4 sm:$0xff]  }
 0x399   : > { %10219 = vmatpush2.bf16.msra.mxu1 %v12925_v47  ;;  %10179 = vmatprep.subr.bf16.mxu0 %v12930_v48  ;;  %v12970_v47 = vld [vmem:[%s15182_s21 + $0x1aa4] ss:$16 sps:$4 sm:$0xff]  }
 0x39a   : > { %10220 = vmatprep.subr.bf16.mxu1 %v12933_v39 }
 0x39c   : > { %10180 = vmatpush2.bf16.msra.mxu0 %v12928_v51  ;;  %v12965_v51 = vld [vmem:[%s15182_s21 + $0x18a0] ss:$16 sps:$4 sm:$0xff]  }
 0x39d   : > { %10221 = vmatpush2.bf16.msra.mxu1 %v12931_v52  ;;  %10181 = vmatprep.subr.bf16.mxu0 %v12936_v53  ;;  %v12968_v52 = vld [vmem:[%s15182_s21 + $0x1aa0] ss:$16 sps:$4 sm:$0xff]  }
 0x39e   : > { %10222 = vmatprep.subr.bf16.mxu1 %v12939_v54 }
 0x3a0   : > { %10182 = vmatpush2.bf16.msra.mxu0 %v12934_v57 }
 0x3a1   : > { %10223 = vmatpush2.bf16.msra.mxu1 %v12937_v58  ;;  %10183 = vmatprep.subr.bf16.mxu0 %v12942_v0  ;;  %v12976_v0 = vld [vmem:[%s15182_s21 + $0x1a84] ss:$16 sps:$4 sm:$0xff]  }
 0x3a2   : > { %10224 = vmatprep.subr.bf16.mxu1 %v12945_v62  ;;  %v12971_v62 = vld [vmem:[%s15182_s21 + $0x1880] ss:$16 sps:$4 sm:$0xff]  }
 0x3a4   : > { %10184 = vmatpush2.bf16.msra.mxu0 %v12940_v2  ;;  %v12974_v2 = vld [vmem:[%s15182_s21 + $0x1a80] ss:$16 sps:$4 sm:$0xff]  }
 0x3a5   : > { %10225 = vmatpush2.bf16.msra.mxu1 %v12943_v3  ;;  %10185 = vmatprep.subr.bf16.mxu0 %v12948_v6  ;;  %v12979_v3 = vld [vmem:[%s15182_s21 + $0x1864] ss:$16 sps:$4 sm:$0xff]  }
 0x3a6   : > { %10226 = vmatprep.subr.bf16.mxu1 %v12951_v8  ;;  %v12982_v6 = vld [vmem:[%s15182_s21 + $0x1a64] ss:$16 sps:$4 sm:$0xff]   ;;  %v12977_v8 = vld [vmem:[%s15182_s21 + $0x1860] ss:$16 sps:$4 sm:$0xff]  }
 0x3a8   : > { %10186 = vmatpush2.bf16.msra.mxu0 %v12946_v11  ;;  %v12985_v11 = vld [vmem:[%s15182_s21 + $0x1844] ss:$16 sps:$4 sm:$0xff]  }
 0x3a9   : > { %10227 = vmatpush2.bf16.msra.mxu1 %v12949_v12  ;;  %10237 = vmatprep.subr.bf16.mxu0 %v12955_v16  ;;  %v12988_v12 = vld [vmem:[%s15182_s21 + $0x1a44] ss:$16 sps:$4 sm:$0xff]   ;;  %v12983_v16 = vld [vmem:[%s15182_s21 + $0x1840] ss:$16 sps:$4 sm:$0xff]  }
 0x3aa   : > { %10278 = vmatprep.subr.bf16.mxu1 %v12958_v17  ;;  %v12986_v17 = vld [vmem:[%s15182_s21 + $0x1a40] ss:$16 sps:$4 sm:$0xff]  }
 0x3ab   : > { %v9943_v35 = vpop.f32.mrf.mxu0  ;;  %10188 = vmatmul.mubr.bf16.vlgmr.msra.gmra.mxu0 %v15736_v10 }
 0x3ac   : > { %v9984_v38 = vpop.f32.mrf.mxu1  ;;  %10229 = vmatmul.mubr.bf16.vlgmr.msra.gmra.mxu1 %v15749_v59  ;;  %v9944_v40 = vadd.f32 %v9943_v35, %v15666_v37  ;;  %10238 = vmatpush1.bf16.msra.mxu0 %v12953_v22  ;;  %v12991_v22 = vld [vmem:[%s15182_s21 + $0x1824] ss:$16 sps:$4 sm:$0xff]   ;;  %v12995_v35 = vld [vmem:[%s15182_s21 + $0x1800] ss:$16 sps:$4 sm:$0xff]  }
 0x3ad   : > { %10279 = vmatpush1.bf16.msra.mxu1 %v12956_v41  ;;  %v9945_v33 = vpop.f32.mrf.mxu0  ;;  %10239 = vmatprep.subr.bf16.mxu0 %v12961_v28  ;;  %v12994_v41 = vld [vmem:[%s15182_s21 + $0x1a24] ss:$16 sps:$4 sm:$0xff]   ;;  %v12989_v28 = vld [vmem:[%s15182_s21 + $0x1820] ss:$16 sps:$4 sm:$0xff]  }
 0x3ae   : > { %v9986_v7 = vpop.f32.mrf.mxu1  ;;  %10280 = vmatprep.subr.bf16.mxu1 %v12964_v29  ;;  %v15764_v48 = vadd.f32 %v9984_v38, %v9944_v40  ;;  %v9946_v39 = vadd.f32 %v9945_v33, %v15673_v46  ;;  %10269 = vmatprep.mubr.bf16.mxu0 %v15745_v25  ;;  %v12973_v46 = vld [vmem:[%s15182_s21 + $0x1884] ss:$16 sps:$4 sm:$0xff]   ;;  %v12992_v29 = vld [vmem:[%s15182_s21 + $0x1a20] ss:$16 sps:$4 sm:$0xff]  }
 0x3af   : > { %10310 = vmatprep.mubr.bf16.mxu1 %v15757_v34  ;;  %v9947_v37 = vpop.f32.mrf.mxu0  ;;  %v12998_v38 = vld [vmem:[%s15182_s21 + $0x1a00] ss:$16 sps:$4 sm:$0xff]   ;;  %v13003_v40 = vld [vmem:[%s15182_s21 + $0x19e4] ss:$16 sps:$4 sm:$0xff]  }
 0x3b0   : > { %v9988_v53 = vpop.f32.mrf.mxu1  ;;  %v15771_v54 = vadd.f32 %v9986_v7, %v9946_v39  ;;  %10240 = vmatpush1.bf16.msra.mxu0 %v12959_v30  ;;  %v12997_v30 = vld [vmem:[%s15182_s21 + $0x1804] ss:$16 sps:$4 sm:$0xff]   ;;  %v13001_v7 = vld [vmem:[%s15182_s21 + $0x19e0] ss:$16 sps:$4 sm:$0xff]  }
 0x3b1   : > { %10281 = vmatpush1.bf16.msra.mxu1 %v12962_v32  ;;  %v9948_v57 = vpop.f32.mrf.mxu0  ;;  %10241 = vmatprep.subr.bf16.mxu0 %v12967_v45  ;;  %v13000_v32 = vld [vmem:[%s15182_s21 + $0x1a04] ss:$16 sps:$4 sm:$0xff]   ;;  %v13004_v45 = vld [vmem:[%s15182_s21 + $0x1be0] ss:$16 sps:$4 sm:$0xff]  }
 0x3b2   : > { %v9989_v58 = vpop.f32.mrf.mxu1  ;;  %10282 = vmatprep.subr.bf16.mxu1 %v12970_v47  ;;  %v13006_v33 = vld [vmem:[%s15182_s21 + $0x1be4] ss:$16 sps:$4 sm:$0xff]   ;;  %v13013_v57 = vld [vmem:[%s15182_s21 + $0x19a0] ss:$16 sps:$4 sm:$0xff]  }
 0x3b3   : > { %v13009_v47 = vld [vmem:[%s15182_s21 + $0x19c4] ss:$16 sps:$4 sm:$0xff]   ;;  %v13016_v58 = vld [vmem:[%s15182_s21 + $0x1ba0] ss:$16 sps:$4 sm:$0xff]  }
 0x3b4   : > { %10242 = vmatpush1.bf16.msra.mxu0 %v12965_v51  ;;  %v13012_v39 = vld [vmem:[%s15182_s21 + $0x1bc4] ss:$16 sps:$4 sm:$0xff]   ;;  %v13007_v51 = vld [vmem:[%s15182_s21 + $0x19c0] ss:$16 sps:$4 sm:$0xff]  }
 0x3b5   : > { %10283 = vmatpush1.bf16.msra.mxu1 %v12968_v52  ;;  %10243 = vmatprep.subr.bf16.mxu0 %v12973_v46  ;;  %v13010_v52 = vld [vmem:[%s15182_s21 + $0x1bc0] ss:$16 sps:$4 sm:$0xff]   ;;  %v13015_v37 = vld [vmem:[%s15182_s21 + $0x19a4] ss:$16 sps:$4 sm:$0xff]  }
 0x3b6   : > { %10284 = vmatprep.subr.bf16.mxu1 %v12976_v0  ;;  %v13018_v53 = vld [vmem:[%s15182_s21 + $0x1ba4] ss:$16 sps:$4 sm:$0xff]  }
 0x3b7   : > { %v13021_v46 = vld [vmem:[%s15182_s21 + $0x1984] ss:$16 sps:$4 sm:$0xff]  }
 0x3b8   : > { %10244 = vmatpush1.bf16.msra.mxu0 %v12971_v62  ;;  %v13024_v0 = vld [vmem:[%s15182_s21 + $0x1b84] ss:$16 sps:$4 sm:$0xff]   ;;  %v13019_v62 = vld [vmem:[%s15182_s21 + $0x1980] ss:$16 sps:$4 sm:$0xff]  }
 0x3b9   : > { %10285 = vmatpush1.bf16.msra.mxu1 %v12974_v2  ;;  %10245 = vmatprep.subr.bf16.mxu0 %v12979_v3  ;;  %v13022_v2 = vld [vmem:[%s15182_s21 + $0x1b80] ss:$16 sps:$4 sm:$0xff]   ;;  %v13027_v3 = vld [vmem:[%s15182_s21 + $0x1964] ss:$16 sps:$4 sm:$0xff]  }
 0x3ba   : > { %10286 = vmatprep.subr.bf16.mxu1 %v12982_v6  ;;  %v13030_v6 = vld [vmem:[%s15182_s21 + $0x1b64] ss:$16 sps:$4 sm:$0xff]  }
 0x3bc   : > { %10246 = vmatpush1.bf16.msra.mxu0 %v12977_v8  ;;  %v13025_v8 = vld [vmem:[%s15182_s21 + $0x1960] ss:$16 sps:$4 sm:$0xff]  }
 0x3bd   : > { %10287 = vmatpush1.bf16.msra.mxu1 %v12980_v9  ;;  %10247 = vmatprep.subr.bf16.mxu0 %v12985_v11  ;;  %v13028_v9 = vld [vmem:[%s15182_s21 + $0x1b60] ss:$16 sps:$4 sm:$0xff]   ;;  %v13033_v11 = vld [vmem:[%s15182_s21 + $0x1944] ss:$16 sps:$4 sm:$0xff]  }
 0x3be   : > { %10288 = vmatprep.subr.bf16.mxu1 %v12988_v12  ;;  %v13036_v12 = vld [vmem:[%s15182_s21 + $0x1b44] ss:$16 sps:$4 sm:$0xff]  }
 0x3c0   : > { %10248 = vmatpush1.bf16.msra.mxu0 %v12983_v16  ;;  %v4544_v16 = vcombine.high %v15718_v36, %v15718_v36  ;;  %v13037_v36 = vld [vmem:[%s15182_s21 + $0x1920] ss:$16 sps:$4 sm:$0xff]  }
 0x3c1   : > { %10289 = vmatpush1.bf16.msra.mxu1 %v12986_v17  ;;  %10249 = vmatprep.subr.bf16.mxu0 %v12991_v22  ;;  %v13031_v17 = vld [vmem:[%s15182_s21 + $0x1940] ss:$16 sps:$4 sm:$0xff]  }
 0x3c2   : > { %10290 = vmatprep.subr.bf16.mxu1 %v12994_v41  ;;  %v13034_v22 = vld [vmem:[%s15182_s21 + $0x1b40] ss:$16 sps:$4 sm:$0xff]   ;;  %v13039_v41 = vld [vmem:[%s15182_s21 + $0x1924] ss:$16 sps:$4 sm:$0xff]  }
 0x3c4   : > { %10250 = vmatpush1.bf16.msra.mxu0 %v12989_v28  ;;  %v13042_v28 = vld [vmem:[%s15182_s21 + $0x1b24] ss:$16 sps:$4 sm:$0xff]  }
 0x3c5   : > { %10291 = vmatpush1.bf16.msra.mxu1 %v12992_v29  ;;  %10251 = vmatprep.subr.bf16.mxu0 %v12997_v30  ;;  %v15822_v29 = vrot.slane %v4544_v16, %v15233_v50  ;;  %v13040_v30 = vld [vmem:[%s15182_s21 + $0x1b20] ss:$16 sps:$4 sm:$0xff]  }
 0x3c6   : > { %10292 = vmatprep.subr.bf16.mxu1 %v13000_v32  ;;  %v13045_v32 = vld [vmem:[%s15182_s21 + $0x1904] ss:$16 sps:$4 sm:$0xff]   ;;  %v13061_v16 = vld [vmem:[%s15182_s21 + $0x1ca0] ss:$16 sps:$4 sm:$0xff]  }
 0x3c8   : > { %10252 = vmatpush1.bf16.msra.mxu0 %v12995_v35  ;;  %v13048_v35 = vld [vmem:[%s15182_s21 + $0x1b04] ss:$16 sps:$4 sm:$0xff]  }
 0x3c9   : > { %10293 = vmatpush1.bf16.msra.mxu1 %v12998_v38  ;;  %10253 = vmatprep.subr.bf16.mxu0 %v13003_v40  ;;  %v4560_v38 = vcombine.high %v15822_v29, %v15822_v29  ;;  %v15832_v40 = vrot.slane %v15726_v63, %v15233_v50 }
 0x3ca   : > { %10294 = vmatprep.subr.bf16.mxu1 %v13006_v33  ;;  %v13043_v33 = vld [vmem:[%s15182_s21 + $0x1900] ss:$16 sps:$4 sm:$0xff]  }
 0x3cb   : > { %v15845_v63 = vcombine.high %v15832_v40, %v15832_v40 }
 0x3cc   : > { %10254 = vmatpush2.bf16.msra.mxu0 %v13001_v7  ;;  %v13046_v7 = vld [vmem:[%s15182_s21 + $0x1b00] ss:$16 sps:$4 sm:$0xff]  }
 0x3cd   : > { %10295 = vmatpush2.bf16.msra.mxu1 %v13004_v45  ;;  %10255 = vmatprep.subr.bf16.mxu0 %v13009_v47  ;;  %v13051_v45 = vld [vmem:[%s15182_s21 + $0x1ce4] ss:$16 sps:$4 sm:$0xff]  }
 0x3ce   : > { %10296 = vmatprep.subr.bf16.mxu1 %v13012_v39  ;;  %v13054_v47 = vld [vmem:[%s15182_s21 + $0x1ee4] ss:$16 sps:$4 sm:$0xff]   ;;  %v13049_v39 = vld [vmem:[%s15182_s21 + $0x1ce0] ss:$16 sps:$4 sm:$0xff]  }
 0x3d0   : > { %10256 = vmatpush2.bf16.msra.mxu0 %v13007_v51  ;;  %v13052_v51 = vld [vmem:[%s15182_s21 + $0x1ee0] ss:$16 sps:$4 sm:$0xff]  }
 0x3d1   : > { %10297 = vmatpush2.bf16.msra.mxu1 %v13010_v52  ;;  %10257 = vmatprep.subr.bf16.mxu0 %v13015_v37  ;;  %v15841_v52 = vrot.slane %v4560_v38, %v15233_v50  ;;  %v13057_v37 = vld [vmem:[%s15182_s21 + $0x1cc4] ss:$16 sps:$4 sm:$0xff]  }
 0x3d2   : > { %10298 = vmatprep.subr.bf16.mxu1 %v13018_v53  ;;  %v13060_v53 = vld [vmem:[%s15182_s21 + $0x1ec4] ss:$16 sps:$4 sm:$0xff]  }
 0x3d3   : > { %v13075_v38 = vld [vmem:[%s15182_s21 + $0x1c64] ss:$16 sps:$4 sm:$0xff]  }
 0x3d4   : > { %10258 = vmatpush2.bf16.msra.mxu0 %v13013_v57  ;;  %v13055_v57 = vld [vmem:[%s15182_s21 + $0x1cc0] ss:$16 sps:$4 sm:$0xff]  }
 0x3d5   : > { %10299 = vmatpush2.bf16.msra.mxu1 %v13016_v58  ;;  %10259 = vmatprep.subr.bf16.mxu0 %v13021_v46  ;;  %v13058_v58 = vld [vmem:[%s15182_s21 + $0x1ec0] ss:$16 sps:$4 sm:$0xff]   ;;  %v15853_v46 = vcombine.high %v15841_v52, %v15841_v52 }
 0x3d6   : > { %10300 = vmatprep.subr.bf16.mxu1 %v13024_v0 }
 0x3d8   : > { %10260 = vmatpush2.bf16.msra.mxu0 %v13019_v62 }
 0x3d9   : > { %10301 = vmatpush2.bf16.msra.mxu1 %v13022_v2  ;;  %10261 = vmatprep.subr.bf16.mxu0 %v13027_v3 }
 0x3da   : > { %10302 = vmatprep.subr.bf16.mxu1 %v13030_v6 }
 0x3dc   : > { %10262 = vmatpush2.bf16.msra.mxu0 %v13025_v8  ;;  %v13063_v8 = vld [vmem:[%s15182_s21 + $0x1ca4] ss:$16 sps:$4 sm:$0xff]  }
 0x3dd   : > { %10303 = vmatpush2.bf16.msra.mxu1 %v13028_v9  ;;  %10263 = vmatprep.subr.bf16.mxu0 %v13033_v11  ;;  %v13066_v9 = vld [vmem:[%s15182_s21 + $0x1ea4] ss:$16 sps:$4 sm:$0xff]  }
 0x3de   : > { %10304 = vmatprep.subr.bf16.mxu1 %v13036_v12 }
 0x3e0   : > { %10264 = vmatpush2.bf16.msra.mxu0 %v13031_v17  ;;  %v13064_v17 = vld [vmem:[%s15182_s21 + $0x1ea0] ss:$16 sps:$4 sm:$0xff]  }
 0x3e1   : > { %10305 = vmatpush2.bf16.msra.mxu1 %v13034_v22  ;;  %10265 = vmatprep.subr.bf16.mxu0 %v13039_v41 }
 0x3e2   : > { %10306 = vmatprep.subr.bf16.mxu1 %v13042_v28 }
 0x3e4   : > { %10266 = vmatpush2.bf16.msra.mxu0 %v13037_v36 }
 0x3e5   : > { %10307 = vmatpush2.bf16.msra.mxu1 %v13040_v30  ;;  %10267 = vmatprep.subr.bf16.mxu0 %v13045_v32  ;;  %v13072_v30 = vld [vmem:[%s15182_s21 + $0x1e84] ss:$16 sps:$4 sm:$0xff]   ;;  %v13067_v32 = vld [vmem:[%s15182_s21 + $0x1c80] ss:$16 sps:$4 sm:$0xff]  }
 0x3e6   : > { %10308 = vmatprep.subr.bf16.mxu1 %v13048_v35  ;;  %v13070_v35 = vld [vmem:[%s15182_s21 + $0x1e80] ss:$16 sps:$4 sm:$0xff]  }
 0x3e8   : > { %10268 = vmatpush2.bf16.msra.mxu0 %v13043_v33  ;;  %v13078_v33 = vld [vmem:[%s15182_s21 + $0x1e64] ss:$16 sps:$4 sm:$0xff]  }
 0x3e9   : > { %10309 = vmatpush2.bf16.msra.mxu1 %v13046_v7  ;;  %10319 = vmatprep.subr.bf16.mxu0 %v13051_v45  ;;  %v13073_v7 = vld [vmem:[%s15182_s21 + $0x1c60] ss:$16 sps:$4 sm:$0xff]  }
 0x3ea   : > { %10360 = vmatprep.subr.bf16.mxu1 %v13054_v47  ;;  %v13076_v45 = vld [vmem:[%s15182_s21 + $0x1e60] ss:$16 sps:$4 sm:$0xff]   ;;  %v13081_v47 = vld [vmem:[%s15182_s21 + $0x1c44] ss:$16 sps:$4 sm:$0xff]  }
 0x3eb   : > { %v10025_v0 = vpop.f32.mrf.mxu0  ;;  %10270 = vmatmul.mubr.bf16.vlgmr.msra.gmra.mxu0 %v15832_v40 }
 0x3ec   : > { %v10066_v62 = vpop.f32.mrf.mxu1  ;;  %10311 = vmatmul.mubr.bf16.vlgmr.msra.gmra.mxu1 %v15845_v63  ;;  %v10026_v2 = vadd.f32 %v10025_v0, %v15764_v48  ;;  %10320 = vmatpush1.bf16.msra.mxu0 %v13049_v39  ;;  %v13084_v39 = vld [vmem:[%s15182_s21 + $0x1e44] ss:$16 sps:$4 sm:$0xff]   ;;  %v13088_v0 = vld [vmem:[%s15182_s21 + $0x1e20] ss:$16 sps:$4 sm:$0xff]  }
 0x3ed   : > { %10361 = vmatpush1.bf16.msra.mxu1 %v13052_v51  ;;  %v10027_v3 = vpop.f32.mrf.mxu0  ;;  %10321 = vmatprep.subr.bf16.mxu0 %v13057_v37  ;;  %v13079_v51 = vld [vmem:[%s15182_s21 + $0x1c40] ss:$16 sps:$4 sm:$0xff]  }
 0x3ee   : > { %v10068_v6 = vpop.f32.mrf.mxu1  ;;  %10362 = vmatprep.subr.bf16.mxu1 %v13060_v53  ;;  %v15860_v11 = vadd.f32 %v10066_v62, %v10026_v2  ;;  %v10028_v12 = vadd.f32 %v10027_v3, %v15771_v54  ;;  %10351 = vmatprep.mubr.bf16.mxu0 %v15841_v52  ;;  %v13069_v54 = vld [vmem:[%s15182_s21 + $0x1c84] ss:$16 sps:$4 sm:$0xff]   ;;  %v13082_v37 = vld [vmem:[%s15182_s21 + $0x1e40] ss:$16 sps:$4 sm:$0xff]  }
 0x3ef   : > { %10392 = vmatprep.mubr.bf16.mxu1 %v15853_v46  ;;  %v10029_v48 = vpop.f32.mrf.mxu0  ;;  %v13087_v53 = vld [vmem:[%s15182_s21 + $0x1c24] ss:$16 sps:$4 sm:$0xff]   ;;  %v13091_v3 = vld [vmem:[%s15182_s21 + $0x1c00] ss:$16 sps:$4 sm:$0xff]  }
 0x3f0   : > { %v10070_v22 = vpop.f32.mrf.mxu1  ;;  %v15867_v41 = vadd.f32 %v10068_v6, %v10028_v12  ;;  %10322 = vmatpush1.bf16.msra.mxu0 %v13055_v57  ;;  %v13090_v57 = vld [vmem:[%s15182_s21 + $0x1e24] ss:$16 sps:$4 sm:$0xff]   ;;  %v13094_v6 = vld [vmem:[%s15182_s21 + $0x1e00] ss:$16 sps:$4 sm:$0xff]  }
 0x3f1   : > { %10363 = vmatpush1.bf16.msra.mxu1 %v13058_v58  ;;  %v10030_v28 = vpop.f32.mrf.mxu0  ;;  %10323 = vmatprep.subr.bf16.mxu0 %v13063_v8  ;;  %v13085_v58 = vld [vmem:[%s15182_s21 + $0x1c20] ss:$16 sps:$4 sm:$0xff]   ;;  %v13093_v62 = vld [vmem:[%s15182_s21 + $0x1c04] ss:$16 sps:$4 sm:$0xff]  }
 0x3f2   : > { %v10071_v36 = vpop.f32.mrf.mxu1  ;;  %10364 = vmatprep.subr.bf16.mxu1 %v13066_v9  ;;  %v13096_v2 = vld [vmem:[%s15182_s21 + $0x1e04] ss:$16 sps:$4 sm:$0xff]   ;;  %v13097_v12 = vld [vmem:[%s15182_s21 + $0x1de0] ss:$16 sps:$4 sm:$0xff]  }
 0x3f3   : > { %v13099_v8 = vld [vmem:[%s15182_s21 + $0x1de4] ss:$16 sps:$4 sm:$0xff]   ;;  %v13103_v22 = vld [vmem:[%s15182_s21 + $0x1dc0] ss:$16 sps:$4 sm:$0xff]  }
 0x3f4   : > { %10324 = vmatpush1.bf16.msra.mxu0 %v13061_v16  ;;  %v13102_v9 = vld [vmem:[%s15182_s21 + $0x1fe4] ss:$16 sps:$4 sm:$0xff]   ;;  %v13100_v16 = vld [vmem:[%s15182_s21 + $0x1fe0] ss:$16 sps:$4 sm:$0xff]  }
 0x3f5   : > { %10365 = vmatpush1.bf16.msra.mxu1 %v13064_v17  ;;  %10325 = vmatprep.subr.bf16.mxu0 %v13069_v54  ;;  %v13105_v17 = vld [vmem:[%s15182_s21 + $0x1dc4] ss:$16 sps:$4 sm:$0xff]   ;;  %v13106_v28 = vld [vmem:[%s15182_s21 + $0x1fc0] ss:$16 sps:$4 sm:$0xff]  }
 0x3f6   : > { %10366 = vmatprep.subr.bf16.mxu1 %v13072_v30  ;;  %v13108_v48 = vld [vmem:[%s15182_s21 + $0x1fc4] ss:$16 sps:$4 sm:$0xff]   ;;  %v13109_v30 = vld [vmem:[%s15182_s21 + $0x1da0] ss:$16 sps:$4 sm:$0xff]  }
 0x3f7   : > { %v13111_v36 = vld [vmem:[%s15182_s21 + $0x1da4] ss:$16 sps:$4 sm:$0xff]  }
 0x3f8   : > { %10326 = vmatpush1.bf16.msra.mxu0 %v13067_v32  ;;  %v13114_v54 = vld [vmem:[%s15182_s21 + $0x1fa4] ss:$16 sps:$4 sm:$0xff]   ;;  %v13112_v32 = vld [vmem:[%s15182_s21 + $0x1fa0] ss:$16 sps:$4 sm:$0xff]  }
 0x3f9   : > { %10367 = vmatpush1.bf16.msra.mxu1 %v13070_v35  ;;  %10327 = vmatprep.subr.bf16.mxu0 %v13075_v38  ;;  %v13117_v35 = vld [vmem:[%s15182_s21 + $0x1d84] ss:$16 sps:$4 sm:$0xff]  }
 0x3fa   : > { %10368 = vmatprep.subr.bf16.mxu1 %v13078_v33  ;;  %v13120_v38 = vld [vmem:[%s15182_s21 + $0x1f84] ss:$16 sps:$4 sm:$0xff]   ;;  %v13115_v33 = vld [vmem:[%s15182_s21 + $0x1d80] ss:$16 sps:$4 sm:$0xff]  }
 0x3fc   : > { %10328 = vmatpush1.bf16.msra.mxu0 %v13073_v7  ;;  %v13118_v7 = vld [vmem:[%s15182_s21 + $0x1f80] ss:$16 sps:$4 sm:$0xff]  }
 0x3fd   : > { %10369 = vmatpush1.bf16.msra.mxu1 %v13076_v45  ;;  %10329 = vmatprep.subr.bf16.mxu0 %v13081_v47  ;;  %v13123_v45 = vld [vmem:[%s15182_s21 + $0x1d64] ss:$16 sps:$4 sm:$0xff]  }
 0x3fe   : > { %10370 = vmatprep.subr.bf16.mxu1 %v13084_v39  ;;  %v13126_v47 = vld [vmem:[%s15182_s21 + $0x1f64] ss:$16 sps:$4 sm:$0xff]   ;;  %v13121_v39 = vld [vmem:[%s15182_s21 + $0x1d60] ss:$16 sps:$4 sm:$0xff]  }
 0x400   : > { %10330 = vmatpush1.bf16.msra.mxu0 %v13079_v51  ;;  %v13124_v51 = vld [vmem:[%s15182_s21 + $0x1f60] ss:$16 sps:$4 sm:$0xff]  }
 0x401   : > { %10371 = vmatpush1.bf16.msra.mxu1 %v13082_v37  ;;  %10331 = vmatprep.subr.bf16.mxu0 %v13087_v53  ;;  %v13129_v37 = vld [vmem:[%s15182_s21 + $0x1d44] ss:$16 sps:$4 sm:$0xff]  }
 0x402   : > { %10372 = vmatprep.subr.bf16.mxu1 %v13090_v57  ;;  %v13132_v53 = vld [vmem:[%s15182_s21 + $0x1f44] ss:$16 sps:$4 sm:$0xff]   ;;  %v13127_v57 = vld [vmem:[%s15182_s21 + $0x1d40] ss:$16 sps:$4 sm:$0xff]  }
 0x404   : > { %10332 = vmatpush1.bf16.msra.mxu0 %v13085_v58  ;;  %v13130_v58 = vld [vmem:[%s15182_s21 + $0x1f40] ss:$16 sps:$4 sm:$0xff]  }
 0x405   : > { %10373 = vmatpush1.bf16.msra.mxu1 %v13088_v0  ;;  %10333 = vmatprep.subr.bf16.mxu0 %v13093_v62  ;;  %v13135_v0 = vld [vmem:[%s15182_s21 + $0x1d24] ss:$16 sps:$4 sm:$0xff]  }
 0x406   : > { %10374 = vmatprep.subr.bf16.mxu1 %v13096_v2  ;;  %v13138_v62 = vld [vmem:[%s15182_s21 + $0x1f24] ss:$16 sps:$4 sm:$0xff]   ;;  %v13133_v2 = vld [vmem:[%s15182_s21 + $0x1d20] ss:$16 sps:$4 sm:$0xff]  }
 0x408   : > { %10334 = vmatpush1.bf16.msra.mxu0 %v13091_v3  ;;  %v13136_v3 = vld [vmem:[%s15182_s21 + $0x1f20] ss:$16 sps:$4 sm:$0xff]  }
 0x409   : > { %10375 = vmatpush1.bf16.msra.mxu1 %v13094_v6  ;;  %10335 = vmatprep.subr.bf16.mxu0 %v13099_v8  ;;  %v13141_v6 = vld [vmem:[%s15182_s21 + $0x1d04] ss:$16 sps:$4 sm:$0xff]  }
 0x40a   : > { %10376 = vmatprep.subr.bf16.mxu1 %v13102_v9  ;;  %v13144_v8 = vld [vmem:[%s15182_s21 + $0x1f04] ss:$16 sps:$4 sm:$0xff]   ;;  %v15921_v9 = vrot.slane %v15822_v29, %v15233_v50  ;;  %v13154_v50 = vld [vmem:[%s15182_s21 + $0xcc] ss:$16 sps:$4 sm:$0xff]  }
 0x40b   : > { %v13157_v29 = vld [vmem:[%s15182_s21 + $0x2cc] ss:$16 sps:$4 sm:$0xff]  }
 0x40c   : > { %10336 = vmatpush2.bf16.msra.mxu0 %v13097_v12  ;;  %v13139_v12 = vld [vmem:[%s15182_s21 + $0x1d00] ss:$16 sps:$4 sm:$0xff]  }
 0x40d   : > { %10377 = vmatpush2.bf16.msra.mxu1 %v13100_v16  ;;  %10337 = vmatprep.subr.bf16.mxu0 %v13105_v17  ;;  %v13142_v16 = vld [vmem:[%s15182_s21 + $0x1f00] ss:$16 sps:$4 sm:$0xff]   ;;  %v13148_v17 = vld [vmem:[%s15182_s21 + $0xec] ss:$16 sps:$4 sm:$0xff]  }
 0x40e   : > { %10378 = vmatprep.subr.bf16.mxu1 %v13108_v48  ;;  %v13151_v48 = vld [vmem:[%s15182_s21 + $0x2ec] ss:$16 sps:$4 sm:$0xff]  }
 0x410   : > { %10338 = vmatpush2.bf16.msra.mxu0 %v13103_v22  ;;  %v13146_v22 = vld [vmem:[%s15182_s21 + $0xe8] ss:$16 sps:$4 sm:$0xff]  }
 0x411   : > { %10379 = vmatpush2.bf16.msra.mxu1 %v13106_v28  ;;  %10339 = vmatprep.subr.bf16.mxu0 %v13111_v36  ;;  %v13149_v28 = vld [vmem:[%s15182_s21 + $0x2e8] ss:$16 sps:$4 sm:$0xff]   ;;  %v15931_v36 = vcombine.high %v15921_v9, %v15921_v9 }
 0x412   : > { %10380 = vmatprep.subr.bf16.mxu1 %v13114_v54  ;;  %v13152_v54 = vld [vmem:[%s15182_s21 + $0xc8] ss:$16 sps:$4 sm:$0xff]  }
 0x414   : > { %10340 = vmatpush2.bf16.msra.mxu0 %v13109_v30  ;;  %v13155_v30 = vld [vmem:[%s15182_s21 + $0x2c8] ss:$16 sps:$4 sm:$0xff]  }
 0x415   : > { %10381 = vmatpush2.bf16.msra.mxu1 %v13112_v32  ;;  %10341 = vmatprep.subr.bf16.mxu0 %v13117_v35 }
 0x416   : > { %10382 = vmatprep.subr.bf16.mxu1 %v13120_v38 }
 0x418   : > { %10342 = vmatpush2.bf16.msra.mxu0 %v13115_v33 }
 0x419   : > { %10383 = vmatpush2.bf16.msra.mxu1 %v13118_v7  ;;  %10343 = vmatprep.subr.bf16.mxu0 %v13123_v45  ;;  %v13160_v45 = vld [vmem:[%s15182_s21 + $0xac] ss:$16 sps:$4 sm:$0xff]  }
 0x41a   : > { %10384 = vmatprep.subr.bf16.mxu1 %v13126_v47  ;;  %v13163_v47 = vld [vmem:[%s15182_s21 + $0x2ac] ss:$16 sps:$4 sm:$0xff]  }
 0x41c   : > { %10344 = vmatpush2.bf16.msra.mxu0 %v13121_v39 }
 0x41d   : > { %10385 = vmatpush2.bf16.msra.mxu1 %v13124_v51  ;;  %10345 = vmatprep.subr.bf16.mxu0 %v13129_v37  ;;  %v13158_v37 = vld [vmem:[%s15182_s21 + $0xa8] ss:$16 sps:$4 sm:$0xff]  }
 0x41e   : > { %10386 = vmatprep.subr.bf16.mxu1 %v13132_v53  ;;  %v13161_v53 = vld [vmem:[%s15182_s21 + $0x2a8] ss:$16 sps:$4 sm:$0xff]  }
 0x420   : > { %10346 = vmatpush2.bf16.msra.mxu0 %v13127_v57 }
 0x421   : > { %10387 = vmatpush2.bf16.msra.mxu1 %v13130_v58  ;;  %10347 = vmatprep.subr.bf16.mxu0 %v13135_v0 }
 0x422   : > { %10388 = vmatprep.subr.bf16.mxu1 %v13138_v62 }
 0x424   : > { %10348 = vmatpush2.bf16.msra.mxu0 %v13133_v2  ;;  %v13167_v2 = vld [vmem:[%s15182_s21 + $0x288] ss:$16 sps:$4 sm:$0xff]  }
 0x425   : > { %10389 = vmatpush2.bf16.msra.mxu1 %v13136_v3  ;;  %10349 = vmatprep.subr.bf16.mxu0 %v13141_v6  ;;  %v13172_v3 = vld [vmem:[%s15182_s21 + $0x6c] ss:$16 sps:$4 sm:$0xff]  }
 0x426   : > { %10390 = vmatprep.subr.bf16.mxu1 %v13144_v8  ;;  %v13175_v6 = vld [vmem:[%s15182_s21 + $0x26c] ss:$16 sps:$4 sm:$0xff]   ;;  %v13170_v8 = vld [vmem:[%s15182_s21 + $0x68] ss:$16 sps:$4 sm:$0xff]  }
 0x428   : > { %10350 = vmatpush2.bf16.msra.mxu0 %v13139_v12  ;;  %v13173_v12 = vld [vmem:[%s15182_s21 + $0x268] ss:$16 sps:$4 sm:$0xff]  }
 0x429   : > { %10391 = vmatpush2.bf16.msra.mxu1 %v13142_v16  ;;  %10401 = vmatprep.subr.bf16.mxu0 %v13148_v17  ;;  %v13178_v16 = vld [vmem:[%s15182_s21 + $0x4c] ss:$16 sps:$4 sm:$0xff]  }
 0x42a   : > { %10442 = vmatprep.subr.bf16.mxu1 %v13151_v48  ;;  %v13181_v17 = vld [vmem:[%s15182_s21 + $0x24c] ss:$16 sps:$4 sm:$0xff]   ;;  %v13176_v48 = vld [vmem:[%s15182_s21 + $0x48] ss:$16 sps:$4 sm:$0xff]  }
 0x42b   : > { %v10107_v32 = vpop.f32.mrf.mxu0  ;;  %10352 = vmatmul.mubr.bf16.vlgmr.msra.gmra.mxu0 %v15921_v9 }
 0x42c   : > { %v10148_v35 = vpop.f32.mrf.mxu1  ;;  %10393 = vmatmul.mubr.bf16.vlgmr.msra.gmra.mxu1 %v15931_v36  ;;  %v10108_v38 = vadd.f32 %v10107_v32, %v15860_v11  ;;  %10402 = vmatpush1.bf16.msra.mxu0 %v13146_v22  ;;  %v13179_v22 = vld [vmem:[%s15182_s21 + $0x248] ss:$16 sps:$4 sm:$0xff]   ;;  %v13193_v32 = vld [vmem:[%s15182_s21 + $0x20c] ss:$16 sps:$4 sm:$0xff]  }
 0x42d   : > { %10443 = vmatpush1.bf16.msra.mxu1 %v13149_v28  ;;  %v10109_v33 = vpop.f32.mrf.mxu0  ;;  %10403 = vmatprep.subr.bf16.mxu0 %v13154_v50  ;;  %v13184_v28 = vld [vmem:[%s15182_s21 + $0x2c] ss:$16 sps:$4 sm:$0xff]  }
 0x42e   : > { %v10150_v7 = vpop.f32.mrf.mxu1  ;;  %10444 = vmatprep.subr.bf16.mxu1 %v13157_v29  ;;  %v15942_v39 = vadd.f32 %v10148_v35, %v10108_v38  ;;  %v10110_v51 = vadd.f32 %v10109_v33, %v15867_v41  ;;  %10433 = vmatprep.mubr.bf16.mxu0 %v15245_v61  ;;  %v13166_v41 = vld [vmem:[%s15182_s21 + $0x8c] ss:$16 sps:$4 sm:$0xff]   ;;  %v13182_v29 = vld [vmem:[%s15182_s21 + $0x28] ss:$16 sps:$4 sm:$0xff]  }
 0x42f   : > { %10474 = vmatprep.mubr.bf16.mxu1 %v15252_v1  ;;  %v10111_v11 = vpop.f32.mrf.mxu0  ;;  %v13169_v61 = vld [vmem:[%s15182_s21 + $0x28c] ss:$16 sps:$4 sm:$0xff]   ;;  %v13164_v1 = vld [vmem:[%s15182_s21 + $0x88] ss:$16 sps:$4 sm:$0xff]  }
 0x430   : > { %v10152_v57 = vpop.f32.mrf.mxu1  ;;  %v15949_v58 = vadd.f32 %v10150_v7, %v10110_v51  ;;  %10404 = vmatpush1.bf16.msra.mxu0 %v13152_v54  ;;  %v13187_v50 = vld [vmem:[%s15182_s21 + $0x22c] ss:$16 sps:$4 sm:$0xff]   ;;  %v13185_v54 = vld [vmem:[%s15182_s21 + $0x228] ss:$16 sps:$4 sm:$0xff]  }
 0x431   : > { %10445 = vmatpush1.bf16.msra.mxu1 %v13155_v30  ;;  %v10112_v0 = vpop.f32.mrf.mxu0  ;;  %10405 = vmatprep.subr.bf16.mxu0 %v13160_v45  ;;  %v13190_v30 = vld [vmem:[%s15182_s21 + $0xc] ss:$16 sps:$4 sm:$0xff]   ;;  %v13188_v35 = vld [vmem:[%s15182_s21 + $0x8] ss:$16 sps:$4 sm:$0xff]  }
 0x432   : > { %v10153_v62 = vpop.f32.mrf.mxu1  ;;  %10446 = vmatprep.subr.bf16.mxu1 %v13163_v47  ;;  %v13191_v38 = vld [vmem:[%s15182_s21 + $0x208] ss:$16 sps:$4 sm:$0xff]   ;;  %v13196_v33 = vld [vmem:[%s15182_s21 + $0x1ec] ss:$16 sps:$4 sm:$0xff]  }
 0x433   : > { %v13199_v7 = vld [vmem:[%s15182_s21 + $0x3ec] ss:$16 sps:$4 sm:$0xff]   ;;  %v13194_v45 = vld [vmem:[%s15182_s21 + $0x1e8] ss:$16 sps:$4 sm:$0xff]  }
 0x434   : > { %10406 = vmatpush1.bf16.msra.mxu0 %v13158_v37  ;;  %v13197_v47 = vld [vmem:[%s15182_s21 + $0x3e8] ss:$16 sps:$4 sm:$0xff]   ;;  %v13202_v51 = vld [vmem:[%s15182_s21 + $0x1cc] ss:$16 sps:$4 sm:$0xff]  }
 0x435   : > { %10447 = vmatpush1.bf16.msra.mxu1 %v13161_v53  ;;  %10407 = vmatprep.subr.bf16.mxu0 %v13166_v41  ;;  %v13205_v37 = vld [vmem:[%s15182_s21 + $0x3cc] ss:$16 sps:$4 sm:$0xff]   ;;  %v13200_v53 = vld [vmem:[%s15182_s21 + $0x1c8] ss:$16 sps:$4 sm:$0xff]  }
 0x436   : > { %10448 = vmatprep.subr.bf16.mxu1 %v13169_v61  ;;  %v13203_v11 = vld [vmem:[%s15182_s21 + $0x3c8] ss:$16 sps:$4 sm:$0xff]   ;;  %v13208_v57 = vld [vmem:[%s15182_s21 + $0x1ac] ss:$16 sps:$4 sm:$0xff]  }
 0x437   : > { %v13211_v0 = vld [vmem:[%s15182_s21 + $0x3ac] ss:$16 sps:$4 sm:$0xff]   ;;  %v13206_v62 = vld [vmem:[%s15182_s21 + $0x1a8] ss:$16 sps:$4 sm:$0xff]  }
 0x438   : > { %10408 = vmatpush1.bf16.msra.mxu0 %v13164_v1  ;;  %v13209_v41 = vld [vmem:[%s15182_s21 + $0x3a8] ss:$16 sps:$4 sm:$0xff]   ;;  %v13214_v61 = vld [vmem:[%s15182_s21 + $0x18c] ss:$16 sps:$4 sm:$0xff]  }
 0x439   : > { %10449 = vmatpush1.bf16.msra.mxu1 %v13167_v2  ;;  %10409 = vmatprep.subr.bf16.mxu0 %v13172_v3  ;;  %v13217_v1 = vld [vmem:[%s15182_s21 + $0x38c] ss:$16 sps:$4 sm:$0xff]   ;;  %v13212_v2 = vld [vmem:[%s15182_s21 + $0x188] ss:$16 sps:$4 sm:$0xff]  }
 0x43a   : > { %10450 = vmatprep.subr.bf16.mxu1 %v13175_v6  ;;  %v13215_v3 = vld [vmem:[%s15182_s21 + $0x388] ss:$16 sps:$4 sm:$0xff]   ;;  %v13220_v6 = vld [vmem:[%s15182_s21 + $0x16c] ss:$16 sps:$4 sm:$0xff]  }
 0x43c   : > { %10410 = vmatpush1.bf16.msra.mxu0 %v13170_v8  ;;  %v13223_v8 = vld [vmem:[%s15182_s21 + $0x36c] ss:$16 sps:$4 sm:$0xff]  }
 0x43d   : > { %10451 = vmatpush1.bf16.msra.mxu1 %v13173_v12  ;;  %10411 = vmatprep.subr.bf16.mxu0 %v13178_v16  ;;  %v13218_v12 = vld [vmem:[%s15182_s21 + $0x168] ss:$16 sps:$4 sm:$0xff]  }
 0x43e   : > { %10452 = vmatprep.subr.bf16.mxu1 %v13181_v17  ;;  %v13221_v16 = vld [vmem:[%s15182_s21 + $0x368] ss:$16 sps:$4 sm:$0xff]   ;;  %v13226_v17 = vld [vmem:[%s15182_s21 + $0x14c] ss:$16 sps:$4 sm:$0xff]  }
 0x440   : > { %10412 = vmatpush1.bf16.msra.mxu0 %v13176_v48  ;;  %v13229_v48 = vld [vmem:[%s15182_s21 + $0x34c] ss:$16 sps:$4 sm:$0xff]  }
 0x441   : > { %10453 = vmatpush1.bf16.msra.mxu1 %v13179_v22  ;;  %10413 = vmatprep.subr.bf16.mxu0 %v13184_v28  ;;  %v13224_v22 = vld [vmem:[%s15182_s21 + $0x148] ss:$16 sps:$4 sm:$0xff]  }
 0x442   : > { %10454 = vmatprep.subr.bf16.mxu1 %v13187_v50  ;;  %v13227_v28 = vld [vmem:[%s15182_s21 + $0x348] ss:$16 sps:$4 sm:$0xff]   ;;  %v13232_v50 = vld [vmem:[%s15182_s21 + $0x12c] ss:$16 sps:$4 sm:$0xff]  }
 0x444   : > { %10414 = vmatpush1.bf16.msra.mxu0 %v13182_v29  ;;  %v13235_v29 = vld [vmem:[%s15182_s21 + $0x32c] ss:$16 sps:$4 sm:$0xff]  }
 0x445   : > { %10455 = vmatpush1.bf16.msra.mxu1 %v13185_v54  ;;  %10415 = vmatprep.subr.bf16.mxu0 %v13190_v30  ;;  %v13230_v54 = vld [vmem:[%s15182_s21 + $0x128] ss:$16 sps:$4 sm:$0xff]  }
 0x446   : > { %10456 = vmatprep.subr.bf16.mxu1 %v13193_v32  ;;  %v13233_v30 = vld [vmem:[%s15182_s21 + $0x328] ss:$16 sps:$4 sm:$0xff]   ;;  %v13238_v32 = vld [vmem:[%s15182_s21 + $0x10c] ss:$16 sps:$4 sm:$0xff]  }
 0x448   : > { %10416 = vmatpush1.bf16.msra.mxu0 %v13188_v35  ;;  %v13241_v35 = vld [vmem:[%s15182_s21 + $0x30c] ss:$16 sps:$4 sm:$0xff]  }
 0x449   : > { %10457 = vmatpush1.bf16.msra.mxu1 %v13191_v38  ;;  %10417 = vmatprep.subr.bf16.mxu0 %v13196_v33  ;;  %v13236_v38 = vld [vmem:[%s15182_s21 + $0x108] ss:$16 sps:$4 sm:$0xff]  }
 0x44a   : > { %10458 = vmatprep.subr.bf16.mxu1 %v13199_v7  ;;  %v13239_v33 = vld [vmem:[%s15182_s21 + $0x308] ss:$16 sps:$4 sm:$0xff]   ;;  %v13244_v7 = vld [vmem:[%s15182_s21 + $0x4ec] ss:$16 sps:$4 sm:$0xff]  }
 0x44c   : > { %10418 = vmatpush2.bf16.msra.mxu0 %v13194_v45  ;;  %v13247_v45 = vld [vmem:[%s15182_s21 + $0x6ec] ss:$16 sps:$4 sm:$0xff]  }
 0x44d   : > { %10459 = vmatpush2.bf16.msra.mxu1 %v13197_v47  ;;  %10419 = vmatprep.subr.bf16.mxu0 %v13202_v51  ;;  %v13242_v47 = vld [vmem:[%s15182_s21 + $0x4e8] ss:$16 sps:$4 sm:$0xff]  }
 0x44e   : > { %10460 = vmatprep.subr.bf16.mxu1 %v13205_v37  ;;  %v13245_v51 = vld [vmem:[%s15182_s21 + $0x6e8] ss:$16 sps:$4 sm:$0xff]   ;;  %v13250_v37 = vld [vmem:[%s15182_s21 + $0x4cc] ss:$16 sps:$4 sm:$0xff]  }
 0x450   : > { %10420 = vmatpush2.bf16.msra.mxu0 %v13200_v53  ;;  %v13253_v53 = vld [vmem:[%s15182_s21 + $0x6cc] ss:$16 sps:$4 sm:$0xff]  }
 0x451   : > { %10461 = vmatpush2.bf16.msra.mxu1 %v13203_v11  ;;  %10421 = vmatprep.subr.bf16.mxu0 %v13208_v57 }
 0x452   : > { %10462 = vmatprep.subr.bf16.mxu1 %v13211_v0 }
 0x454   : > { %10422 = vmatpush2.bf16.msra.mxu0 %v13206_v62  ;;  %v13248_v62 = vld [vmem:[%s15182_s21 + $0x4c8] ss:$16 sps:$4 sm:$0xff]  }
 0x455   : > { %10463 = vmatpush2.bf16.msra.mxu1 %v13209_v41  ;;  %10423 = vmatprep.subr.bf16.mxu0 %v13214_v61  ;;  %v13251_v41 = vld [vmem:[%s15182_s21 + $0x6c8] ss:$16 sps:$4 sm:$0xff]  }
 0x456   : > { %10464 = vmatprep.subr.bf16.mxu1 %v13217_v1 }
 0x458   : > { %10424 = vmatpush2.bf16.msra.mxu0 %v13212_v2  ;;  %v13256_v2 = vld [vmem:[%s15182_s21 + $0x4ac] ss:$16 sps:$4 sm:$0xff]  }
 0x459   : > { %10465 = vmatpush2.bf16.msra.mxu1 %v13215_v3  ;;  %10425 = vmatprep.subr.bf16.mxu0 %v13220_v6  ;;  %v13259_v3 = vld [vmem:[%s15182_s21 + $0x6ac] ss:$16 sps:$4 sm:$0xff]  }
 0x45a   : > { %10466 = vmatprep.subr.bf16.mxu1 %v13223_v8 }
 0x45c   : > { %10426 = vmatpush2.bf16.msra.mxu0 %v13218_v12  ;;  %v13254_v12 = vld [vmem:[%s15182_s21 + $0x4a8] ss:$16 sps:$4 sm:$0xff]  }
 0x45d   : > { %10467 = vmatpush2.bf16.msra.mxu1 %v13221_v16  ;;  %10427 = vmatprep.subr.bf16.mxu0 %v13226_v17  ;;  %v13257_v16 = vld [vmem:[%s15182_s21 + $0x6a8] ss:$16 sps:$4 sm:$0xff]  }
 0x45e   : > { %10468 = vmatprep.subr.bf16.mxu1 %v13229_v48 }
 0x460   : > { %10428 = vmatpush2.bf16.msra.mxu0 %v13224_v22  ;;  %v13263_v22 = vld [vmem:[%s15182_s21 + $0x688] ss:$16 sps:$4 sm:$0xff]  }
 0x461   : > { %10469 = vmatpush2.bf16.msra.mxu1 %v13227_v28  ;;  %10429 = vmatprep.subr.bf16.mxu0 %v13232_v50  ;;  %v13268_v28 = vld [vmem:[%s15182_s21 + $0x46c] ss:$16 sps:$4 sm:$0xff]  }
 0x462   : > { %10470 = vmatprep.subr.bf16.mxu1 %v13235_v29  ;;  %v13271_v50 = vld [vmem:[%s15182_s21 + $0x66c] ss:$16 sps:$4 sm:$0xff]   ;;  %v13266_v29 = vld [vmem:[%s15182_s21 + $0x468] ss:$16 sps:$4 sm:$0xff]  }
 0x464   : > { %10430 = vmatpush2.bf16.msra.mxu0 %v13230_v54  ;;  %v13269_v54 = vld [vmem:[%s15182_s21 + $0x668] ss:$16 sps:$4 sm:$0xff]  }
 0x465   : > { %10471 = vmatpush2.bf16.msra.mxu1 %v13233_v30  ;;  %10431 = vmatprep.subr.bf16.mxu0 %v13238_v32  ;;  %v13274_v30 = vld [vmem:[%s15182_s21 + $0x44c] ss:$16 sps:$4 sm:$0xff]  }
 0x466   : > { %10472 = vmatprep.subr.bf16.mxu1 %v13241_v35  ;;  %v13277_v32 = vld [vmem:[%s15182_s21 + $0x64c] ss:$16 sps:$4 sm:$0xff]   ;;  %v13272_v35 = vld [vmem:[%s15182_s21 + $0x448] ss:$16 sps:$4 sm:$0xff]  }
 0x468   : > { %10432 = vmatpush2.bf16.msra.mxu0 %v13236_v38  ;;  %v13275_v38 = vld [vmem:[%s15182_s21 + $0x648] ss:$16 sps:$4 sm:$0xff]  }
 0x469   : > { %10473 = vmatpush2.bf16.msra.mxu1 %v13239_v33  ;;  %10483 = vmatprep.subr.bf16.mxu0 %v13244_v7  ;;  %v13280_v33 = vld [vmem:[%s15182_s21 + $0x42c] ss:$16 sps:$4 sm:$0xff]  }
 0x46a   : > { %10524 = vmatprep.subr.bf16.mxu1 %v13247_v45  ;;  %v13283_v7 = vld [vmem:[%s15182_s21 + $0x62c] ss:$16 sps:$4 sm:$0xff]   ;;  %v13278_v45 = vld [vmem:[%s15182_s21 + $0x428] ss:$16 sps:$4 sm:$0xff]  }
 0x46b   : > { %v10189_v11 = vpop.f32.mrf.mxu0  ;;  %10434 = vmatmul.mubr.bf16.vlgmr.msra.gmra.mxu0 %v15271_v14 }
 0x46c   : > { %v10230_v57 = vpop.f32.mrf.mxu1  ;;  %10475 = vmatmul.mubr.bf16.vlgmr.msra.gmra.mxu1 %v15281_v19  ;;  %v10190_v0 = vadd.f32 %v10189_v11, %v15942_v39  ;;  %10484 = vmatpush1.bf16.msra.mxu0 %v13242_v47  ;;  %v13281_v47 = vld [vmem:[%s15182_s21 + $0x628] ss:$16 sps:$4 sm:$0xff]  }
 0x46d   : > { %10525 = vmatpush1.bf16.msra.mxu1 %v13245_v51  ;;  %v10191_v61 = vpop.f32.mrf.mxu0  ;;  %10485 = vmatprep.subr.bf16.mxu0 %v13250_v37  ;;  %v13286_v51 = vld [vmem:[%s15182_s21 + $0x40c] ss:$16 sps:$4 sm:$0xff]   ;;  %v13287_v11 = vld [vmem:[%s15182_s21 + $0x608] ss:$16 sps:$4 sm:$0xff]  }
 0x46e   : > { %v10232_v1 = vpop.f32.mrf.mxu1  ;;  %10526 = vmatprep.subr.bf16.mxu1 %v13253_v53  ;;  %v16016_v6 = vadd.f32 %v10230_v57, %v10190_v0  ;;  %v10192_v14 = vadd.f32 %v10191_v61, %v15949_v58  ;;  %10515 = vmatprep.mubr.bf16.mxu0 %v15277_v18  ;;  %v13262_v18 = vld [vmem:[%s15182_s21 + $0x48c] ss:$16 sps:$4 sm:$0xff]   ;;  %v13260_v58 = vld [vmem:[%s15182_s21 + $0x488] ss:$16 sps:$4 sm:$0xff]  }
 0x46f   : > { %10556 = vmatprep.mubr.bf16.mxu1 %v15289_v24  ;;  %v10193_v19 = vpop.f32.mrf.mxu0  ;;  %v13265_v24 = vld [vmem:[%s15182_s21 + $0x68c] ss:$16 sps:$4 sm:$0xff]   ;;  %v13284_v53 = vld [vmem:[%s15182_s21 + $0x408] ss:$16 sps:$4 sm:$0xff]  }
 0x470   : > { %v10234_v39 = vpop.f32.mrf.mxu1  ;;  %v16021_v8 = vadd.f32 %v10232_v1, %v10192_v14  ;;  %10486 = vmatpush1.bf16.msra.mxu0 %v13248_v62  ;;  %v13289_v37 = vld [vmem:[%s15182_s21 + $0x60c] ss:$16 sps:$4 sm:$0xff]   ;;  %v13290_v62 = vld [vmem:[%s15182_s21 + $0x5e8] ss:$16 sps:$4 sm:$0xff]  }
 0x471   : > { %10527 = vmatpush1.bf16.msra.mxu1 %v13251_v41  ;;  %v10194_v17 = vpop.f32.mrf.mxu0  ;;  %10487 = vmatprep.subr.bf16.mxu0 %v13256_v2  ;;  %v13292_v57 = vld [vmem:[%s15182_s21 + $0x5ec] ss:$16 sps:$4 sm:$0xff]   ;;  %v13293_v41 = vld [vmem:[%s15182_s21 + $0x7e8] ss:$16 sps:$4 sm:$0xff]  }
 0x472   : > { %v10235_v48 = vpop.f32.mrf.mxu1  ;;  %10528 = vmatprep.subr.bf16.mxu1 %v13259_v3  ;;  %v13295_v0 = vld [vmem:[%s15182_s21 + $0x7ec] ss:$16 sps:$4 sm:$0xff]   ;;  %v13296_v2 = vld [vmem:[%s15182_s21 + $0x5c8] ss:$16 sps:$4 sm:$0xff]  }
 0x473   : > { %v13298_v61 = vld [vmem:[%s15182_s21 + $0x5cc] ss:$16 sps:$4 sm:$0xff]   ;;  %v13299_v3 = vld [vmem:[%s15182_s21 + $0x7c8] ss:$16 sps:$4 sm:$0xff]  }
 0x474   : > { %10488 = vmatpush1.bf16.msra.mxu0 %v13254_v12  ;;  %v13301_v1 = vld [vmem:[%s15182_s21 + $0x7cc] ss:$16 sps:$4 sm:$0xff]   ;;  %v13302_v39 = vld [vmem:[%s15182_s21 + $0x5a8] ss:$16 sps:$4 sm:$0xff]  }
 0x475   : > { %10529 = vmatpush1.bf16.msra.mxu1 %v13257_v16  ;;  %10489 = vmatprep.subr.bf16.mxu0 %v13262_v18  ;;  %v13304_v14 = vld [vmem:[%s15182_s21 + $0x5ac] ss:$16 sps:$4 sm:$0xff]   ;;  %v13305_v12 = vld [vmem:[%s15182_s21 + $0x7a8] ss:$16 sps:$4 sm:$0xff]  }
 0x476   : > { %10530 = vmatprep.subr.bf16.mxu1 %v13265_v24  ;;  %v13307_v19 = vld [vmem:[%s15182_s21 + $0x7ac] ss:$16 sps:$4 sm:$0xff]   ;;  %v13308_v48 = vld [vmem:[%s15182_s21 + $0x588] ss:$16 sps:$4 sm:$0xff]  }
 0x477   : > { %v13310_v16 = vld [vmem:[%s15182_s21 + $0x58c] ss:$16 sps:$4 sm:$0xff]   ;;  %v13311_v18 = vld [vmem:[%s15182_s21 + $0x788] ss:$16 sps:$4 sm:$0xff]  }
 0x478   : > { %10490 = vmatpush1.bf16.msra.mxu0 %v13260_v58  ;;  %v13313_v17 = vld [vmem:[%s15182_s21 + $0x78c] ss:$16 sps:$4 sm:$0xff]  }
 0x479   : > { %10531 = vmatpush1.bf16.msra.mxu1 %v13263_v22  ;;  %10491 = vmatprep.subr.bf16.mxu0 %v13268_v28  ;;  %v13316_v24 = vld [vmem:[%s15182_s21 + $0x56c] ss:$16 sps:$4 sm:$0xff]   ;;  %v13314_v22 = vld [vmem:[%s15182_s21 + $0x568] ss:$16 sps:$4 sm:$0xff]  }
 0x47a   : > { %10532 = vmatprep.subr.bf16.mxu1 %v13271_v50  ;;  %v13319_v58 = vld [vmem:[%s15182_s21 + $0x76c] ss:$16 sps:$4 sm:$0xff]   ;;  %v13317_v28 = vld [vmem:[%s15182_s21 + $0x768] ss:$16 sps:$4 sm:$0xff]  }
 0x47b   : > { %v13322_v50 = vld [vmem:[%s15182_s21 + $0x54c] ss:$16 sps:$4 sm:$0xff]  }
 0x47c   : > { %10492 = vmatpush1.bf16.msra.mxu0 %v13266_v29  ;;  %v13325_v29 = vld [vmem:[%s15182_s21 + $0x74c] ss:$16 sps:$4 sm:$0xff]  }
 0x47d   : > { %10533 = vmatpush1.bf16.msra.mxu1 %v13269_v54  ;;  %10493 = vmatprep.subr.bf16.mxu0 %v13274_v30  ;;  %v13320_v54 = vld [vmem:[%s15182_s21 + $0x548] ss:$16 sps:$4 sm:$0xff]  }
 0x47e   : > { %10534 = vmatprep.subr.bf16.mxu1 %v13277_v32  ;;  %v13323_v30 = vld [vmem:[%s15182_s21 + $0x748] ss:$16 sps:$4 sm:$0xff]   ;;  %v13328_v32 = vld [vmem:[%s15182_s21 + $0x52c] ss:$16 sps:$4 sm:$0xff]  }
 0x480   : > { %10494 = vmatpush1.bf16.msra.mxu0 %v13272_v35  ;;  %v13331_v35 = vld [vmem:[%s15182_s21 + $0x72c] ss:$16 sps:$4 sm:$0xff]  }
 0x481   : > { %10535 = vmatpush1.bf16.msra.mxu1 %v13275_v38  ;;  %10495 = vmatprep.subr.bf16.mxu0 %v13280_v33  ;;  %v13326_v38 = vld [vmem:[%s15182_s21 + $0x528] ss:$16 sps:$4 sm:$0xff]  }
 0x482   : > { %10536 = vmatprep.subr.bf16.mxu1 %v13283_v7  ;;  %v13329_v33 = vld [vmem:[%s15182_s21 + $0x728] ss:$16 sps:$4 sm:$0xff]   ;;  %v13334_v7 = vld [vmem:[%s15182_s21 + $0x50c] ss:$16 sps:$4 sm:$0xff]  }
 0x484   : > { %10496 = vmatpush1.bf16.msra.mxu0 %v13278_v45  ;;  %v13337_v45 = vld [vmem:[%s15182_s21 + $0x70c] ss:$16 sps:$4 sm:$0xff]  }
 0x485   : > { %10537 = vmatpush1.bf16.msra.mxu1 %v13281_v47  ;;  %10497 = vmatprep.subr.bf16.mxu0 %v13286_v51  ;;  %v13332_v47 = vld [vmem:[%s15182_s21 + $0x508] ss:$16 sps:$4 sm:$0xff]  }
 0x486   : > { %10538 = vmatprep.subr.bf16.mxu1 %v13289_v37  ;;  %v13335_v51 = vld [vmem:[%s15182_s21 + $0x708] ss:$16 sps:$4 sm:$0xff]   ;;  %v13340_v37 = vld [vmem:[%s15182_s21 + $0x8ec] ss:$16 sps:$4 sm:$0xff]  }
 0x488   : > { %10498 = vmatpush1.bf16.msra.mxu0 %v13284_v53  ;;  %v13343_v53 = vld [vmem:[%s15182_s21 + $0xaec] ss:$16 sps:$4 sm:$0xff]  }
 0x489   : > { %10539 = vmatpush1.bf16.msra.mxu1 %v13287_v11  ;;  %10499 = vmatprep.subr.bf16.mxu0 %v13292_v57  ;;  %v13338_v11 = vld [vmem:[%s15182_s21 + $0x8e8] ss:$16 sps:$4 sm:$0xff]  }
 0x48a   : > { %10540 = vmatprep.subr.bf16.mxu1 %v13295_v0  ;;  %v13341_v57 = vld [vmem:[%s15182_s21 + $0xae8] ss:$16 sps:$4 sm:$0xff]   ;;  %v13346_v0 = vld [vmem:[%s15182_s21 + $0x8cc] ss:$16 sps:$4 sm:$0xff]  }
 0x48c   : > { %10500 = vmatpush2.bf16.msra.mxu0 %v13290_v62  ;;  %v13349_v62 = vld [vmem:[%s15182_s21 + $0xacc] ss:$16 sps:$4 sm:$0xff]  }
 0x48d   : > { %10541 = vmatpush2.bf16.msra.mxu1 %v13293_v41  ;;  %10501 = vmatprep.subr.bf16.mxu0 %v13298_v61 }
 0x48e   : > { %10542 = vmatprep.subr.bf16.mxu1 %v13301_v1 }
 0x490   : > { %10502 = vmatpush2.bf16.msra.mxu0 %v13296_v2  ;;  %v13344_v2 = vld [vmem:[%s15182_s21 + $0x8c8] ss:$16 sps:$4 sm:$0xff]  }
 0x491   : > { %10543 = vmatpush2.bf16.msra.mxu1 %v13299_v3  ;;  %10503 = vmatprep.subr.bf16.mxu0 %v13304_v14  ;;  %v13347_v3 = vld [vmem:[%s15182_s21 + $0xac8] ss:$16 sps:$4 sm:$0xff]  }
 0x492   : > { %10544 = vmatprep.subr.bf16.mxu1 %v13307_v19 }
 0x494   : > { %10504 = vmatpush2.bf16.msra.mxu0 %v13302_v39  ;;  %v13352_v39 = vld [vmem:[%s15182_s21 + $0x8ac] ss:$16 sps:$4 sm:$0xff]  }
 0x495   : > { %10545 = vmatpush2.bf16.msra.mxu1 %v13305_v12  ;;  %10505 = vmatprep.subr.bf16.mxu0 %v13310_v16  ;;  %v13355_v12 = vld [vmem:[%s15182_s21 + $0xaac] ss:$16 sps:$4 sm:$0xff]  }
 0x496   : > { %10546 = vmatprep.subr.bf16.mxu1 %v13313_v17 }
 0x498   : > { %10506 = vmatpush2.bf16.msra.mxu0 %v13308_v48  ;;  %v13350_v48 = vld [vmem:[%s15182_s21 + $0x8a8] ss:$16 sps:$4 sm:$0xff]  }
 0x499   : > { %10547 = vmatpush2.bf16.msra.mxu1 %v13311_v18  ;;  %10507 = vmatprep.subr.bf16.mxu0 %v13316_v24  ;;  %v13353_v18 = vld [vmem:[%s15182_s21 + $0xaa8] ss:$16 sps:$4 sm:$0xff]  }
 0x49a   : > { %10548 = vmatprep.subr.bf16.mxu1 %v13319_v58 }
 0x49c   : > { %10508 = vmatpush2.bf16.msra.mxu0 %v13314_v22  ;;  %v13359_v22 = vld [vmem:[%s15182_s21 + $0xa88] ss:$16 sps:$4 sm:$0xff]  }
 0x49d   : > { %10549 = vmatpush2.bf16.msra.mxu1 %v13317_v28  ;;  %10509 = vmatprep.subr.bf16.mxu0 %v13322_v50  ;;  %v13364_v28 = vld [vmem:[%s15182_s21 + $0x86c] ss:$16 sps:$4 sm:$0xff]  }
 0x49e   : > { %10550 = vmatprep.subr.bf16.mxu1 %v13325_v29  ;;  %v13367_v50 = vld [vmem:[%s15182_s21 + $0xa6c] ss:$16 sps:$4 sm:$0xff]   ;;  %v13362_v29 = vld [vmem:[%s15182_s21 + $0x868] ss:$16 sps:$4 sm:$0xff]  }
 0x4a0   : > { %10510 = vmatpush2.bf16.msra.mxu0 %v13320_v54  ;;  %v13365_v54 = vld [vmem:[%s15182_s21 + $0xa68] ss:$16 sps:$4 sm:$0xff]  }
 0x4a1   : > { %10551 = vmatpush2.bf16.msra.mxu1 %v13323_v30  ;;  %10511 = vmatprep.subr.bf16.mxu0 %v13328_v32  ;;  %v13370_v30 = vld [vmem:[%s15182_s21 + $0x84c] ss:$16 sps:$4 sm:$0xff]  }
 0x4a2   : > { %10552 = vmatprep.subr.bf16.mxu1 %v13331_v35  ;;  %v13373_v32 = vld [vmem:[%s15182_s21 + $0xa4c] ss:$16 sps:$4 sm:$0xff]   ;;  %v13368_v35 = vld [vmem:[%s15182_s21 + $0x848] ss:$16 sps:$4 sm:$0xff]  }
 0x4a4   : > { %10512 = vmatpush2.bf16.msra.mxu0 %v13326_v38  ;;  %v13371_v38 = vld [vmem:[%s15182_s21 + $0xa48] ss:$16 sps:$4 sm:$0xff]  }
 0x4a5   : > { %10553 = vmatpush2.bf16.msra.mxu1 %v13329_v33  ;;  %10513 = vmatprep.subr.bf16.mxu0 %v13334_v7  ;;  %v13376_v33 = vld [vmem:[%s15182_s21 + $0x82c] ss:$16 sps:$4 sm:$0xff]  }
 0x4a6   : > { %10554 = vmatprep.subr.bf16.mxu1 %v13337_v45  ;;  %v13379_v7 = vld [vmem:[%s15182_s21 + $0xa2c] ss:$16 sps:$4 sm:$0xff]   ;;  %v13374_v45 = vld [vmem:[%s15182_s21 + $0x828] ss:$16 sps:$4 sm:$0xff]  }
 0x4a8   : > { %10514 = vmatpush2.bf16.msra.mxu0 %v13332_v47  ;;  %v13377_v47 = vld [vmem:[%s15182_s21 + $0xa28] ss:$16 sps:$4 sm:$0xff]  }
 0x4a9   : > { %10555 = vmatpush2.bf16.msra.mxu1 %v13335_v51  ;;  %10565 = vmatprep.subr.bf16.mxu0 %v13340_v37  ;;  %v13382_v51 = vld [vmem:[%s15182_s21 + $0x80c] ss:$16 sps:$4 sm:$0xff]  }
 0x4aa   : > { %10606 = vmatprep.subr.bf16.mxu1 %v13343_v53  ;;  %v13385_v37 = vld [vmem:[%s15182_s21 + $0xa0c] ss:$16 sps:$4 sm:$0xff]   ;;  %v13380_v53 = vld [vmem:[%s15182_s21 + $0x808] ss:$16 sps:$4 sm:$0xff]  }
 0x4ab   : > { %v10271_v41 = vpop.f32.mrf.mxu0  ;;  %10516 = vmatmul.mubr.bf16.vlgmr.msra.gmra.mxu0 %v15354_v27 }
 0x4ac   : > { %v10312_v61 = vpop.f32.mrf.mxu1  ;;  %10557 = vmatmul.mubr.bf16.vlgmr.msra.gmra.mxu1 %v15361_v31  ;;  %v10272_v1 = vadd.f32 %v10271_v41, %v16016_v6  ;;  %10566 = vmatpush1.bf16.msra.mxu0 %v13338_v11  ;;  %v13383_v11 = vld [vmem:[%s15182_s21 + $0xa08] ss:$16 sps:$4 sm:$0xff]  }
 0x4ad   : > { %10607 = vmatpush1.bf16.msra.mxu1 %v13341_v57  ;;  %v10273_v14 = vpop.f32.mrf.mxu0  ;;  %10567 = vmatprep.subr.bf16.mxu0 %v13346_v0  ;;  %v13388_v57 = vld [vmem:[%s15182_s21 + $0x9ec] ss:$16 sps:$4 sm:$0xff]   ;;  %v13389_v41 = vld [vmem:[%s15182_s21 + $0xbe8] ss:$16 sps:$4 sm:$0xff]  }
 0x4ae   : > { %v10314_v19 = vpop.f32.mrf.mxu1  ;;  %10608 = vmatprep.subr.bf16.mxu1 %v13349_v62  ;;  %v16090_v16 = vadd.f32 %v10312_v61, %v10272_v1  ;;  %v10274_v27 = vadd.f32 %v10273_v14, %v16021_v8  ;;  %10597 = vmatprep.mubr.bf16.mxu0 %v15383_v42  ;;  %v13358_v42 = vld [vmem:[%s15182_s21 + $0x88c] ss:$16 sps:$4 sm:$0xff]   ;;  %v13356_v8 = vld [vmem:[%s15182_s21 + $0x888] ss:$16 sps:$4 sm:$0xff]  }
 0x4af   : > { %10638 = vmatprep.mubr.bf16.mxu1 %v15388_v43  ;;  %v10275_v31 = vpop.f32.mrf.mxu0  ;;  %v13361_v43 = vld [vmem:[%s15182_s21 + $0xa8c] ss:$16 sps:$4 sm:$0xff]   ;;  %v13386_v62 = vld [vmem:[%s15182_s21 + $0x9e8] ss:$16 sps:$4 sm:$0xff]  }
 0x4b0   : > { %v10316_v6 = vpop.f32.mrf.mxu1  ;;  %v16095_v17 = vadd.f32 %v10314_v19, %v10274_v27  ;;  %10568 = vmatpush1.bf16.msra.mxu0 %v13344_v2  ;;  %v13391_v0 = vld [vmem:[%s15182_s21 + $0xbec] ss:$16 sps:$4 sm:$0xff]   ;;  %v13392_v2 = vld [vmem:[%s15182_s21 + $0x9c8] ss:$16 sps:$4 sm:$0xff]  }
 0x4b1   : > { %10609 = vmatpush1.bf16.msra.mxu1 %v13347_v3  ;;  %v10276_v24 = vpop.f32.mrf.mxu0  ;;  %10569 = vmatprep.subr.bf16.mxu0 %v13352_v39  ;;  %v13394_v61 = vld [vmem:[%s15182_s21 + $0x9cc] ss:$16 sps:$4 sm:$0xff]   ;;  %v13395_v3 = vld [vmem:[%s15182_s21 + $0xbc8] ss:$16 sps:$4 sm:$0xff]  }
 0x4b2   : > { %v10317_v58 = vpop.f32.mrf.mxu1  ;;  %10610 = vmatprep.subr.bf16.mxu1 %v13355_v12  ;;  %v13397_v1 = vld [vmem:[%s15182_s21 + $0xbcc] ss:$16 sps:$4 sm:$0xff]   ;;  %v13398_v39 = vld [vmem:[%s15182_s21 + $0x9a8] ss:$16 sps:$4 sm:$0xff]  }
 0x4b3   : > { %v13400_v14 = vld [vmem:[%s15182_s21 + $0x9ac] ss:$16 sps:$4 sm:$0xff]   ;;  %v13401_v12 = vld [vmem:[%s15182_s21 + $0xba8] ss:$16 sps:$4 sm:$0xff]  }
 0x4b4   : > { %10570 = vmatpush1.bf16.msra.mxu0 %v13350_v48  ;;  %v13403_v19 = vld [vmem:[%s15182_s21 + $0xbac] ss:$16 sps:$4 sm:$0xff]   ;;  %v13404_v6 = vld [vmem:[%s15182_s21 + $0x988] ss:$16 sps:$4 sm:$0xff]  }
 0x4b5   : > { %10611 = vmatpush1.bf16.msra.mxu1 %v13353_v18  ;;  %10571 = vmatprep.subr.bf16.mxu0 %v13358_v42  ;;  %v13406_v27 = vld [vmem:[%s15182_s21 + $0x98c] ss:$16 sps:$4 sm:$0xff]   ;;  %v13407_v48 = vld [vmem:[%s15182_s21 + $0xb88] ss:$16 sps:$4 sm:$0xff]  }
 0x4b6   : > { %10612 = vmatprep.subr.bf16.mxu1 %v13361_v43  ;;  %v13409_v31 = vld [vmem:[%s15182_s21 + $0xb8c] ss:$16 sps:$4 sm:$0xff]   ;;  %v13410_v58 = vld [vmem:[%s15182_s21 + $0x968] ss:$16 sps:$4 sm:$0xff]  }
 0x4b7   : > { %v13412_v18 = vld [vmem:[%s15182_s21 + $0x96c] ss:$16 sps:$4 sm:$0xff]   ;;  %v13413_v42 = vld [vmem:[%s15182_s21 + $0xb68] ss:$16 sps:$4 sm:$0xff]  }
 0x4b8   : > { %10572 = vmatpush1.bf16.msra.mxu0 %v13356_v8  ;;  %v13415_v24 = vld [vmem:[%s15182_s21 + $0xb6c] ss:$16 sps:$4 sm:$0xff]  }
 0x4b9   : > { %10613 = vmatpush1.bf16.msra.mxu1 %v13359_v22  ;;  %10573 = vmatprep.subr.bf16.mxu0 %v13364_v28  ;;  %v13418_v43 = vld [vmem:[%s15182_s21 + $0x94c] ss:$16 sps:$4 sm:$0xff]   ;;  %v13416_v22 = vld [vmem:[%s15182_s21 + $0x948] ss:$16 sps:$4 sm:$0xff]  }
 0x4ba   : > { %10614 = vmatprep.subr.bf16.mxu1 %v13367_v50  ;;  %v13421_v8 = vld [vmem:[%s15182_s21 + $0xb4c] ss:$16 sps:$4 sm:$0xff]   ;;  %v13419_v28 = vld [vmem:[%s15182_s21 + $0xb48] ss:$16 sps:$4 sm:$0xff]  }
 0x4bb   : > { %v13424_v50 = vld [vmem:[%s15182_s21 + $0x92c] ss:$16 sps:$4 sm:$0xff]  }
 0x4bc   : > { %10574 = vmatpush1.bf16.msra.mxu0 %v13362_v29  ;;  %v13427_v29 = vld [vmem:[%s15182_s21 + $0xb2c] ss:$16 sps:$4 sm:$0xff]  }
 0x4bd   : > { %10615 = vmatpush1.bf16.msra.mxu1 %v13365_v54  ;;  %10575 = vmatprep.subr.bf16.mxu0 %v13370_v30  ;;  %v13422_v54 = vld [vmem:[%s15182_s21 + $0x928] ss:$16 sps:$4 sm:$0xff]  }
 0x4be   : > { %10616 = vmatprep.subr.bf16.mxu1 %v13373_v32  ;;  %v13425_v30 = vld [vmem:[%s15182_s21 + $0xb28] ss:$16 sps:$4 sm:$0xff]   ;;  %v13430_v32 = vld [vmem:[%s15182_s21 + $0x90c] ss:$16 sps:$4 sm:$0xff]  }
 0x4c0   : > { %10576 = vmatpush1.bf16.msra.mxu0 %v13368_v35  ;;  %v13433_v35 = vld [vmem:[%s15182_s21 + $0xb0c] ss:$16 sps:$4 sm:$0xff]  }
 0x4c1   : > { %10617 = vmatpush1.bf16.msra.mxu1 %v13371_v38  ;;  %10577 = vmatprep.subr.bf16.mxu0 %v13376_v33  ;;  %v13428_v38 = vld [vmem:[%s15182_s21 + $0x908] ss:$16 sps:$4 sm:$0xff]  }
 0x4c2   : > { %10618 = vmatprep.subr.bf16.mxu1 %v13379_v7  ;;  %v13431_v33 = vld [vmem:[%s15182_s21 + $0xb08] ss:$16 sps:$4 sm:$0xff]   ;;  %v13436_v7 = vld [vmem:[%s15182_s21 + $0xcec] ss:$16 sps:$4 sm:$0xff]  }
 0x4c4   : > { %10578 = vmatpush1.bf16.msra.mxu0 %v13374_v45  ;;  %v13439_v45 = vld [vmem:[%s15182_s21 + $0xeec] ss:$16 sps:$4 sm:$0xff]  }
 0x4c5   : > { %10619 = vmatpush1.bf16.msra.mxu1 %v13377_v47  ;;  %10579 = vmatprep.subr.bf16.mxu0 %v13382_v51  ;;  %v13434_v47 = vld [vmem:[%s15182_s21 + $0xce8] ss:$16 sps:$4 sm:$0xff]  }
 0x4c6   : > { %10620 = vmatprep.subr.bf16.mxu1 %v13385_v37  ;;  %v13437_v51 = vld [vmem:[%s15182_s21 + $0xee8] ss:$16 sps:$4 sm:$0xff]   ;;  %v13442_v37 = vld [vmem:[%s15182_s21 + $0xccc] ss:$16 sps:$4 sm:$0xff]  }
 0x4c8   : > { %10580 = vmatpush1.bf16.msra.mxu0 %v13380_v53  ;;  %v13445_v53 = vld [vmem:[%s15182_s21 + $0xecc] ss:$16 sps:$4 sm:$0xff]  }
 0x4c9   : > { %10621 = vmatpush1.bf16.msra.mxu1 %v13383_v11  ;;  %10581 = vmatprep.subr.bf16.mxu0 %v13388_v57 }
 0x4ca   : > { %10622 = vmatprep.subr.bf16.mxu1 %v13391_v0 }
 0x4cc   : > { %10582 = vmatpush2.bf16.msra.mxu0 %v13386_v62  ;;  %v13440_v62 = vld [vmem:[%s15182_s21 + $0xcc8] ss:$16 sps:$4 sm:$0xff]  }
 0x4cd   : > { %10623 = vmatpush2.bf16.msra.mxu1 %v13389_v41  ;;  %10583 = vmatprep.subr.bf16.mxu0 %v13394_v61  ;;  %v13443_v41 = vld [vmem:[%s15182_s21 + $0xec8] ss:$16 sps:$4 sm:$0xff]  }
 0x4ce   : > { %10624 = vmatprep.subr.bf16.mxu1 %v13397_v1 }
 0x4d0   : > { %10584 = vmatpush2.bf16.msra.mxu0 %v13392_v2  ;;  %v13448_v2 = vld [vmem:[%s15182_s21 + $0xcac] ss:$16 sps:$4 sm:$0xff]  }
 0x4d1   : > { %10625 = vmatpush2.bf16.msra.mxu1 %v13395_v3  ;;  %10585 = vmatprep.subr.bf16.mxu0 %v13400_v14  ;;  %v13451_v3 = vld [vmem:[%s15182_s21 + $0xeac] ss:$16 sps:$4 sm:$0xff]  }
 0x4d2   : > { %10626 = vmatprep.subr.bf16.mxu1 %v13403_v19 }
 0x4d4   : > { %10586 = vmatpush2.bf16.msra.mxu0 %v13398_v39  ;;  %v13446_v39 = vld [vmem:[%s15182_s21 + $0xca8] ss:$16 sps:$4 sm:$0xff]  }
 0x4d5   : > { %10627 = vmatpush2.bf16.msra.mxu1 %v13401_v12  ;;  %10587 = vmatprep.subr.bf16.mxu0 %v13406_v27  ;;  %v13449_v12 = vld [vmem:[%s15182_s21 + $0xea8] ss:$16 sps:$4 sm:$0xff]  }
 0x4d6   : > { %10628 = vmatprep.subr.bf16.mxu1 %v13409_v31 }
 0x4d8   : > { %10588 = vmatpush2.bf16.msra.mxu0 %v13404_v6  ;;  %v13452_v6 = vld [vmem:[%s15182_s21 + $0xc88] ss:$16 sps:$4 sm:$0xff]  }
 0x4d9   : > { %10629 = vmatpush2.bf16.msra.mxu1 %v13407_v48  ;;  %10589 = vmatprep.subr.bf16.mxu0 %v13412_v18  ;;  %v13455_v48 = vld [vmem:[%s15182_s21 + $0xe88] ss:$16 sps:$4 sm:$0xff]   ;;  %v13460_v18 = vld [vmem:[%s15182_s21 + $0xc6c] ss:$16 sps:$4 sm:$0xff]  }
 0x4da   : > { %10630 = vmatprep.subr.bf16.mxu1 %v13415_v24  ;;  %v13463_v24 = vld [vmem:[%s15182_s21 + $0xe6c] ss:$16 sps:$4 sm:$0xff]  }
 0x4dc   : > { %10590 = vmatpush2.bf16.msra.mxu0 %v13410_v58  ;;  %v13458_v58 = vld [vmem:[%s15182_s21 + $0xc68] ss:$16 sps:$4 sm:$0xff]  }
 0x4dd   : > { %10631 = vmatpush2.bf16.msra.mxu1 %v13413_v42  ;;  %10591 = vmatprep.subr.bf16.mxu0 %v13418_v43  ;;  %v13461_v42 = vld [vmem:[%s15182_s21 + $0xe68] ss:$16 sps:$4 sm:$0xff]   ;;  %v13466_v43 = vld [vmem:[%s15182_s21 + $0xc4c] ss:$16 sps:$4 sm:$0xff]  }
 0x4de   : > { %10632 = vmatprep.subr.bf16.mxu1 %v13421_v8  ;;  %v13469_v8 = vld [vmem:[%s15182_s21 + $0xe4c] ss:$16 sps:$4 sm:$0xff]  }
 0x4e0   : > { %10592 = vmatpush2.bf16.msra.mxu0 %v13416_v22  ;;  %v13464_v22 = vld [vmem:[%s15182_s21 + $0xc48] ss:$16 sps:$4 sm:$0xff]  }
 0x4e1   : > { %10633 = vmatpush2.bf16.msra.mxu1 %v13419_v28  ;;  %10593 = vmatprep.subr.bf16.mxu0 %v13424_v50  ;;  %v13467_v28 = vld [vmem:[%s15182_s21 + $0xe48] ss:$16 sps:$4 sm:$0xff]   ;;  %v13472_v50 = vld [vmem:[%s15182_s21 + $0xc2c] ss:$16 sps:$4 sm:$0xff]  }
 0x4e2   : > { %10634 = vmatprep.subr.bf16.mxu1 %v13427_v29  ;;  %v13475_v29 = vld [vmem:[%s15182_s21 + $0xe2c] ss:$16 sps:$4 sm:$0xff]  }
 0x4e4   : > { %10594 = vmatpush2.bf16.msra.mxu0 %v13422_v54  ;;  %v13470_v54 = vld [vmem:[%s15182_s21 + $0xc28] ss:$16 sps:$4 sm:$0xff]  }
 0x4e5   : > { %10635 = vmatpush2.bf16.msra.mxu1 %v13425_v30  ;;  %10595 = vmatprep.subr.bf16.mxu0 %v13430_v32  ;;  %v13473_v30 = vld [vmem:[%s15182_s21 + $0xe28] ss:$16 sps:$4 sm:$0xff]   ;;  %v13478_v32 = vld [vmem:[%s15182_s21 + $0xc0c] ss:$16 sps:$4 sm:$0xff]  }
 0x4e6   : > { %10636 = vmatprep.subr.bf16.mxu1 %v13433_v35  ;;  %v13481_v35 = vld [vmem:[%s15182_s21 + $0xe0c] ss:$16 sps:$4 sm:$0xff]  }
 0x4e8   : > { %10596 = vmatpush2.bf16.msra.mxu0 %v13428_v38  ;;  %v13476_v38 = vld [vmem:[%s15182_s21 + $0xc08] ss:$16 sps:$4 sm:$0xff]  }
 0x4e9   : > { %10637 = vmatpush2.bf16.msra.mxu1 %v13431_v33  ;;  %10647 = vmatprep.subr.bf16.mxu0 %v13436_v7  ;;  %v13479_v33 = vld [vmem:[%s15182_s21 + $0xe08] ss:$16 sps:$4 sm:$0xff]   ;;  %v13484_v7 = vld [vmem:[%s15182_s21 + $0xdec] ss:$16 sps:$4 sm:$0xff]  }
 0x4ea   : > { %10688 = vmatprep.subr.bf16.mxu1 %v13439_v45  ;;  %v13487_v45 = vld [vmem:[%s15182_s21 + $0xfec] ss:$16 sps:$4 sm:$0xff]  }
 0x4eb   : > { %v10353_v11 = vpop.f32.mrf.mxu0  ;;  %10598 = vmatmul.mubr.bf16.vlgmr.msra.gmra.mxu0 %v15452_v49 }
 0x4ec   : > { %v10394_v57 = vpop.f32.mrf.mxu1  ;;  %10639 = vmatmul.mubr.bf16.vlgmr.msra.gmra.mxu1 %v15463_v56  ;;  %v10354_v0 = vadd.f32 %v10353_v11, %v16090_v16  ;;  %10648 = vmatpush1.bf16.msra.mxu0 %v13434_v47  ;;  %v13482_v47 = vld [vmem:[%s15182_s21 + $0xde8] ss:$16 sps:$4 sm:$0xff]  }
 0x4ed   : > { %10689 = vmatpush1.bf16.msra.mxu1 %v13437_v51  ;;  %v10355_v61 = vpop.f32.mrf.mxu0  ;;  %10649 = vmatprep.subr.bf16.mxu0 %v13442_v37  ;;  %v13485_v51 = vld [vmem:[%s15182_s21 + $0xfe8] ss:$16 sps:$4 sm:$0xff]   ;;  %v13490_v37 = vld [vmem:[%s15182_s21 + $0xdcc] ss:$16 sps:$4 sm:$0xff]  }
 0x4ee   : > { %v10396_v1 = vpop.f32.mrf.mxu1  ;;  %10690 = vmatprep.subr.bf16.mxu1 %v13445_v53  ;;  %v16164_v14 = vadd.f32 %v10394_v57, %v10354_v0  ;;  %v10356_v49 = vadd.f32 %v10355_v61, %v16095_v17  ;;  %10679 = vmatprep.mubr.bf16.mxu0 %v15459_v55  ;;  %v13454_v55 = vld [vmem:[%s15182_s21 + $0xc8c] ss:$16 sps:$4 sm:$0xff]   ;;  %v13488_v11 = vld [vmem:[%s15182_s21 + $0xdc8] ss:$16 sps:$4 sm:$0xff]  }
 0x4ef   : > { %10720 = vmatprep.mubr.bf16.mxu1 %v15471_v60  ;;  %v10357_v56 = vpop.f32.mrf.mxu0  ;;  %v13457_v60 = vld [vmem:[%s15182_s21 + $0xe8c] ss:$16 sps:$4 sm:$0xff]   ;;  %v13491_v57 = vld [vmem:[%s15182_s21 + $0xfc8] ss:$16 sps:$4 sm:$0xff]  }
 0x4f0   : > { %v10398_v16 = vpop.f32.mrf.mxu1  ;;  %v16169_v19 = vadd.f32 %v10396_v1, %v10356_v49  ;;  %10650 = vmatpush1.bf16.msra.mxu0 %v13440_v62  ;;  %v13493_v53 = vld [vmem:[%s15182_s21 + $0xfcc] ss:$16 sps:$4 sm:$0xff]   ;;  %v13497_v61 = vld [vmem:[%s15182_s21 + $0xfa8] ss:$16 sps:$4 sm:$0xff]  }
 0x4f1   : > { %10691 = vmatpush1.bf16.msra.mxu1 %v13443_v41  ;;  %v10358_v27 = vpop.f32.mrf.mxu0  ;;  %10651 = vmatprep.subr.bf16.mxu0 %v13448_v2  ;;  %v13496_v0 = vld [vmem:[%s15182_s21 + $0xdac] ss:$16 sps:$4 sm:$0xff]   ;;  %v13494_v41 = vld [vmem:[%s15182_s21 + $0xda8] ss:$16 sps:$4 sm:$0xff]  }
 0x4f2   : > { %v10399_v31 = vpop.f32.mrf.mxu1  ;;  %10692 = vmatprep.subr.bf16.mxu1 %v13451_v3  ;;  %v11061_v17 = vcombine.low %v16164_v14, %v16169_v19  ;;  %v13499_v62 = vld [vmem:[%s15182_s21 + $0xfac] ss:$16 sps:$4 sm:$0xff]   ;;  %v13500_v3 = vld [vmem:[%s15182_s21 + $0xd88] ss:$16 sps:$4 sm:$0xff]  }
 0x4f3   : > { %v13502_v1 = vld [vmem:[%s15182_s21 + $0xd8c] ss:$16 sps:$4 sm:$0xff]   ;;  %v13503_v49 = vld [vmem:[%s15182_s21 + $0xf88] ss:$16 sps:$4 sm:$0xff]  }
 0x4f4   : > { %10652 = vmatpush1.bf16.msra.mxu0 %v13446_v39  ;;  %v13505_v2 = vld [vmem:[%s15182_s21 + $0xf8c] ss:$16 sps:$4 sm:$0xff]   ;;  %v13506_v39 = vld [vmem:[%s15182_s21 + $0xd68] ss:$16 sps:$4 sm:$0xff]  }
 0x4f5   : > { %10693 = vmatpush1.bf16.msra.mxu1 %v13449_v12  ;;  %10653 = vmatprep.subr.bf16.mxu0 %v13454_v55  ;;  %v13508_v56 = vld [vmem:[%s15182_s21 + $0xd6c] ss:$16 sps:$4 sm:$0xff]   ;;  %v13509_v12 = vld [vmem:[%s15182_s21 + $0xf68] ss:$16 sps:$4 sm:$0xff]  }
 0x4f6   : > { %10694 = vmatprep.subr.bf16.mxu1 %v13457_v60  ;;  %v13511_v16 = vld [vmem:[%s15182_s21 + $0xf6c] ss:$16 sps:$4 sm:$0xff]   ;;  %v13512_v55 = vld [vmem:[%s15182_s21 + $0xd48] ss:$16 sps:$4 sm:$0xff]  }
 0x4f7   : > { %v13514_v27 = vld [vmem:[%s15182_s21 + $0xd4c] ss:$16 sps:$4 sm:$0xff]   ;;  %v13515_v60 = vld [vmem:[%s15182_s21 + $0xf48] ss:$16 sps:$4 sm:$0xff]  }
 0x4f8   : > { %10654 = vmatpush1.bf16.msra.mxu0 %v13452_v6  ;;  %v13517_v31 = vld [vmem:[%s15182_s21 + $0xf4c] ss:$16 sps:$4 sm:$0xff]  }
 0x4f9   : > { %10695 = vmatpush1.bf16.msra.mxu1 %v13455_v48  ;;  %10655 = vmatprep.subr.bf16.mxu0 %v13460_v18  ;;  %v13520_v6 = vld [vmem:[%s15182_s21 + $0xd2c] ss:$16 sps:$4 sm:$0xff]   ;;  %v13518_v18 = vld [vmem:[%s15182_s21 + $0xd28] ss:$16 sps:$4 sm:$0xff]  }
 0x4fa   : > { %10696 = vmatprep.subr.bf16.mxu1 %v13463_v24  ;;  %v13523_v48 = vld [vmem:[%s15182_s21 + $0xf2c] ss:$16 sps:$4 sm:$0xff]   ;;  %v13521_v24 = vld [vmem:[%s15182_s21 + $0xf28] ss:$16 sps:$4 sm:$0xff]  }
 0x4fc   : > { %10656 = vmatpush1.bf16.msra.mxu0 %v13458_v58  ;;  %v13526_v58 = vld [vmem:[%s15182_s21 + $0xd0c] ss:$16 sps:$4 sm:$0xff]  }
 0x4fd   : > { %10697 = vmatpush1.bf16.msra.mxu1 %v13461_v42  ;;  %10657 = vmatprep.subr.bf16.mxu0 %v13466_v43  ;;  %v13529_v42 = vld [vmem:[%s15182_s21 + $0xf0c] ss:$16 sps:$4 sm:$0xff]   ;;  %v13524_v43 = vld [vmem:[%s15182_s21 + $0xd08] ss:$16 sps:$4 sm:$0xff]  }
 0x4fe   : > { %10698 = vmatprep.subr.bf16.mxu1 %v13469_v8  ;;  %v13527_v8 = vld [vmem:[%s15182_s21 + $0xf08] ss:$16 sps:$4 sm:$0xff]  }
 0x500   : > { %10658 = vmatpush1.bf16.msra.mxu0 %v13464_v22  ;;  %v13532_v22 = vld [vmem:[%s15182_s21 + $0x10ec] ss:$16 sps:$4 sm:$0xff]  }
 0x501   : > { %10699 = vmatpush1.bf16.msra.mxu1 %v13467_v28  ;;  %10659 = vmatprep.subr.bf16.mxu0 %v13472_v50  ;;  %v13535_v28 = vld [vmem:[%s15182_s21 + $0x12ec] ss:$16 sps:$4 sm:$0xff]   ;;  %v13530_v50 = vld [vmem:[%s15182_s21 + $0x10e8] ss:$16 sps:$4 sm:$0xff]  }
 0x502   : > { %10700 = vmatprep.subr.bf16.mxu1 %v13475_v29  ;;  %v13533_v29 = vld [vmem:[%s15182_s21 + $0x12e8] ss:$16 sps:$4 sm:$0xff]  }
 0x504   : > { %10660 = vmatpush1.bf16.msra.mxu0 %v13470_v54  ;;  %v13538_v54 = vld [vmem:[%s15182_s21 + $0x10cc] ss:$16 sps:$4 sm:$0xff]  }
 0x505   : > { %10701 = vmatpush1.bf16.msra.mxu1 %v13473_v30  ;;  %10661 = vmatprep.subr.bf16.mxu0 %v13478_v32  ;;  %v13541_v30 = vld [vmem:[%s15182_s21 + $0x12cc] ss:$16 sps:$4 sm:$0xff]  }
 0x506   : > { %10702 = vmatprep.subr.bf16.mxu1 %v13481_v35 }
 0x508   : > { %10662 = vmatpush1.bf16.msra.mxu0 %v13476_v38 }
 0x509   : > { %10703 = vmatpush1.bf16.msra.mxu1 %v13479_v33  ;;  %10663 = vmatprep.subr.bf16.mxu0 %v13484_v7  ;;  %v13536_v33 = vld [vmem:[%s15182_s21 + $0x10c8] ss:$16 sps:$4 sm:$0xff]  }
 0x50a   : > { %10704 = vmatprep.subr.bf16.mxu1 %v13487_v45  ;;  %v13539_v7 = vld [vmem:[%s15182_s21 + $0x12c8] ss:$16 sps:$4 sm:$0xff]  }
 0x50c   : > { %10664 = vmatpush2.bf16.msra.mxu0 %v13482_v47 }
 0x50d   : > { %10705 = vmatpush2.bf16.msra.mxu1 %v13485_v51  ;;  %10665 = vmatprep.subr.bf16.mxu0 %v13490_v37  ;;  %v13544_v51 = vld [vmem:[%s15182_s21 + $0x10ac] ss:$16 sps:$4 sm:$0xff]  }
 0x50e   : > { %10706 = vmatprep.subr.bf16.mxu1 %v13493_v53  ;;  %v13547_v37 = vld [vmem:[%s15182_s21 + $0x12ac] ss:$16 sps:$4 sm:$0xff]  }
 0x510   : > { %10666 = vmatpush2.bf16.msra.mxu0 %v13488_v11  ;;  %v13542_v11 = vld [vmem:[%s15182_s21 + $0x10a8] ss:$16 sps:$4 sm:$0xff]  }
 0x511   : > { %10707 = vmatpush2.bf16.msra.mxu1 %v13491_v57  ;;  %10667 = vmatprep.subr.bf16.mxu0 %v13496_v0  ;;  %v13545_v57 = vld [vmem:[%s15182_s21 + $0x12a8] ss:$16 sps:$4 sm:$0xff]  }
 0x512   : > { %10708 = vmatprep.subr.bf16.mxu1 %v13499_v62 }
 0x514   : > { %10668 = vmatpush2.bf16.msra.mxu0 %v13494_v41  ;;  %v13550_v41 = vld [vmem:[%s15182_s21 + $0x108c] ss:$16 sps:$4 sm:$0xff]  }
 0x515   : > { %10709 = vmatpush2.bf16.msra.mxu1 %v13497_v61  ;;  %10669 = vmatprep.subr.bf16.mxu0 %v13502_v1  ;;  %v13551_v61 = vld [vmem:[%s15182_s21 + $0x1288] ss:$16 sps:$4 sm:$0xff]   ;;  %v13556_v1 = vld [vmem:[%s15182_s21 + $0x106c] ss:$16 sps:$4 sm:$0xff]  }
 0x516   : > { %10710 = vmatprep.subr.bf16.mxu1 %v13505_v2  ;;  %v13559_v2 = vld [vmem:[%s15182_s21 + $0x126c] ss:$16 sps:$4 sm:$0xff]  }
 0x518   : > { %10670 = vmatpush2.bf16.msra.mxu0 %v13500_v3  ;;  %v13554_v3 = vld [vmem:[%s15182_s21 + $0x1068] ss:$16 sps:$4 sm:$0xff]  }
 0x519   : > { %10711 = vmatpush2.bf16.msra.mxu1 %v13503_v49  ;;  %10671 = vmatprep.subr.bf16.mxu0 %v13508_v56  ;;  %v13557_v49 = vld [vmem:[%s15182_s21 + $0x1268] ss:$16 sps:$4 sm:$0xff]   ;;  %v13562_v56 = vld [vmem:[%s15182_s21 + $0x104c] ss:$16 sps:$4 sm:$0xff]  }
 0x51a   : > { %10712 = vmatprep.subr.bf16.mxu1 %v13511_v16  ;;  %v13565_v16 = vld [vmem:[%s15182_s21 + $0x124c] ss:$16 sps:$4 sm:$0xff]  }
 0x51c   : > { %10672 = vmatpush2.bf16.msra.mxu0 %v13506_v39  ;;  %v13560_v39 = vld [vmem:[%s15182_s21 + $0x1048] ss:$16 sps:$4 sm:$0xff]  }
 0x51d   : > { %10713 = vmatpush2.bf16.msra.mxu1 %v13509_v12  ;;  %10673 = vmatprep.subr.bf16.mxu0 %v13514_v27  ;;  %v13563_v12 = vld [vmem:[%s15182_s21 + $0x1248] ss:$16 sps:$4 sm:$0xff]   ;;  %v13568_v27 = vld [vmem:[%s15182_s21 + $0x102c] ss:$16 sps:$4 sm:$0xff]  }
 0x51e   : > { %10714 = vmatprep.subr.bf16.mxu1 %v13517_v31  ;;  %v13571_v31 = vld [vmem:[%s15182_s21 + $0x122c] ss:$16 sps:$4 sm:$0xff]  }
 0x520   : > { %10674 = vmatpush2.bf16.msra.mxu0 %v13512_v55  ;;  %v13566_v55 = vld [vmem:[%s15182_s21 + $0x1028] ss:$16 sps:$4 sm:$0xff]  }
 0x521   : > { %10715 = vmatpush2.bf16.msra.mxu1 %v13515_v60  ;;  %10675 = vmatprep.subr.bf16.mxu0 %v13520_v6  ;;  %v13569_v60 = vld [vmem:[%s15182_s21 + $0x1228] ss:$16 sps:$4 sm:$0xff]   ;;  %v13574_v6 = vld [vmem:[%s15182_s21 + $0x100c] ss:$16 sps:$4 sm:$0xff]  }
 0x522   : > { %10716 = vmatprep.subr.bf16.mxu1 %v13523_v48  ;;  %v13577_v48 = vld [vmem:[%s15182_s21 + $0x120c] ss:$16 sps:$4 sm:$0xff]  }
 0x524   : > { %10676 = vmatpush2.bf16.msra.mxu0 %v13518_v18  ;;  %v13572_v18 = vld [vmem:[%s15182_s21 + $0x1008] ss:$16 sps:$4 sm:$0xff]  }
 0x525   : > { %10717 = vmatpush2.bf16.msra.mxu1 %v13521_v24  ;;  %10677 = vmatprep.subr.bf16.mxu0 %v13526_v58  ;;  %v13575_v24 = vld [vmem:[%s15182_s21 + $0x1208] ss:$16 sps:$4 sm:$0xff]   ;;  %v13580_v58 = vld [vmem:[%s15182_s21 + $0x11ec] ss:$16 sps:$4 sm:$0xff]  }
 0x526   : > { %10718 = vmatprep.subr.bf16.mxu1 %v13529_v42  ;;  %v13583_v42 = vld [vmem:[%s15182_s21 + $0x13ec] ss:$16 sps:$4 sm:$0xff]  }
 0x528   : > { %10678 = vmatpush2.bf16.msra.mxu0 %v13524_v43  ;;  %v13578_v43 = vld [vmem:[%s15182_s21 + $0x11e8] ss:$16 sps:$4 sm:$0xff]  }
 0x529   : > { %10719 = vmatpush2.bf16.msra.mxu1 %v13527_v8  ;;  %10729 = vmatprep.subr.bf16.mxu0 %v13532_v22  ;;  %v13581_v8 = vld [vmem:[%s15182_s21 + $0x13e8] ss:$16 sps:$4 sm:$0xff]   ;;  %v13586_v22 = vld [vmem:[%s15182_s21 + $0x11cc] ss:$16 sps:$4 sm:$0xff]  }
 0x52a   : > { %10770 = vmatprep.subr.bf16.mxu1 %v13535_v28  ;;  %v13589_v28 = vld [vmem:[%s15182_s21 + $0x13cc] ss:$16 sps:$4 sm:$0xff]  }
 0x52b   : > { %v10435_v32 = vpop.f32.mrf.mxu0  ;;  %10680 = vmatmul.mubr.bf16.vlgmr.msra.gmra.mxu0 %v15545_v13 }
 0x52c   : > { %v10476_v35 = vpop.f32.mrf.mxu1  ;;  %10721 = vmatmul.mubr.bf16.vlgmr.msra.gmra.mxu1 %v15555_v21  ;;  %10730 = vmatpush1.bf16.msra.mxu0 %v13530_v50  ;;  %v13584_v50 = vld [vmem:[%s15182_s21 + $0x11c8] ss:$16 sps:$4 sm:$0xff]  }
 0x52d   : > { %v16235_v38 = vadd.f32 %v10476_v35, %v10435_v32  ;;  %10771 = vmatpush1.bf16.msra.mxu1 %v13533_v29  ;;  %v10437_v45 = vpop.f32.mrf.mxu0  ;;  %10731 = vmatprep.subr.bf16.mxu0 %v13538_v54  ;;  %v13587_v29 = vld [vmem:[%s15182_s21 + $0x13c8] ss:$16 sps:$4 sm:$0xff]   ;;  %v13592_v54 = vld [vmem:[%s15182_s21 + $0x11ac] ss:$16 sps:$4 sm:$0xff]  }
 0x52e   : > { %v10478_v47 = vpop.f32.mrf.mxu1  ;;  %10772 = vmatprep.subr.bf16.mxu1 %v13541_v30  ;;  %10761 = vmatprep.mubr.bf16.mxu0 %v15551_v20  ;;  %v13553_v20 = vld [vmem:[%s15182_s21 + $0x128c] ss:$16 sps:$4 sm:$0xff]   ;;  %v13590_v32 = vld [vmem:[%s15182_s21 + $0x11a8] ss:$16 sps:$4 sm:$0xff]  }
 0x52f   : > { %v16241_v53 = vadd.f32 %v10478_v47, %v10437_v45  ;;  %10802 = vmatprep.mubr.bf16.mxu1 %v15563_v26  ;;  %v10439_v13 = vpop.f32.mrf.mxu0  ;;  %v13548_v26 = vld [vmem:[%s15182_s21 + $0x1088] ss:$16 sps:$4 sm:$0xff]   ;;  %v13595_v30 = vld [vmem:[%s15182_s21 + $0x13ac] ss:$16 sps:$4 sm:$0xff]  }
 0x530   : > { %v10480_v21 = vpop.f32.mrf.mxu1  ;;  %10732 = vmatpush1.bf16.msra.mxu0 %v13536_v33  ;;  %v13593_v35 = vld [vmem:[%s15182_s21 + $0x13a8] ss:$16 sps:$4 sm:$0xff]   ;;  %v13598_v33 = vld [vmem:[%s15182_s21 + $0x118c] ss:$16 sps:$4 sm:$0xff]  }
 0x531   : > { %10773 = vmatpush1.bf16.msra.mxu1 %v13539_v7  ;;  %v10440_v0 = vpop.f32.mrf.mxu0  ;;  %10733 = vmatprep.subr.bf16.mxu0 %v13544_v51  ;;  %v13601_v7 = vld [vmem:[%s15182_s21 + $0x138c] ss:$16 sps:$4 sm:$0xff]   ;;  %v13596_v45 = vld [vmem:[%s15182_s21 + $0x1188] ss:$16 sps:$4 sm:$0xff]  }
 0x532   : > { %v10481_v62 = vpop.f32.mrf.mxu1  ;;  %10774 = vmatprep.subr.bf16.mxu1 %v13547_v37  ;;  %v13599_v47 = vld [vmem:[%s15182_s21 + $0x1388] ss:$16 sps:$4 sm:$0xff]   ;;  %v13604_v51 = vld [vmem:[%s15182_s21 + $0x116c] ss:$16 sps:$4 sm:$0xff]  }
 0x533   : > { %v13607_v37 = vld [vmem:[%s15182_s21 + $0x136c] ss:$16 sps:$4 sm:$0xff]   ;;  %v13602_v13 = vld [vmem:[%s15182_s21 + $0x1168] ss:$16 sps:$4 sm:$0xff]  }
 0x534   : > { %10734 = vmatpush1.bf16.msra.mxu0 %v13542_v11  ;;  %v13605_v21 = vld [vmem:[%s15182_s21 + $0x1368] ss:$16 sps:$4 sm:$0xff]   ;;  %v13610_v11 = vld [vmem:[%s15182_s21 + $0x114c] ss:$16 sps:$4 sm:$0xff]  }
 0x535   : > { %10775 = vmatpush1.bf16.msra.mxu1 %v13545_v57  ;;  %10735 = vmatprep.subr.bf16.mxu0 %v13550_v41  ;;  %v13613_v57 = vld [vmem:[%s15182_s21 + $0x134c] ss:$16 sps:$4 sm:$0xff]   ;;  %v13608_v0 = vld [vmem:[%s15182_s21 + $0x1148] ss:$16 sps:$4 sm:$0xff]  }
 0x536   : > { %10776 = vmatprep.subr.bf16.mxu1 %v13553_v20  ;;  %v13611_v62 = vld [vmem:[%s15182_s21 + $0x1348] ss:$16 sps:$4 sm:$0xff]   ;;  %v13616_v41 = vld [vmem:[%s15182_s21 + $0x112c] ss:$16 sps:$4 sm:$0xff]  }
 0x537   : > { %v13619_v20 = vld [vmem:[%s15182_s21 + $0x132c] ss:$16 sps:$4 sm:$0xff]  }
 0x538   : > { %10736 = vmatpush1.bf16.msra.mxu0 %v13548_v26  ;;  %v13614_v26 = vld [vmem:[%s15182_s21 + $0x1128] ss:$16 sps:$4 sm:$0xff]  }
 0x539   : > { %10777 = vmatpush1.bf16.msra.mxu1 %v13551_v61  ;;  %10737 = vmatprep.subr.bf16.mxu0 %v13556_v1  ;;  %v13617_v61 = vld [vmem:[%s15182_s21 + $0x1328] ss:$16 sps:$4 sm:$0xff]   ;;  %v13622_v1 = vld [vmem:[%s15182_s21 + $0x110c] ss:$16 sps:$4 sm:$0xff]  }
 0x53a   : > { %10778 = vmatprep.subr.bf16.mxu1 %v13559_v2  ;;  %v13625_v2 = vld [vmem:[%s15182_s21 + $0x130c] ss:$16 sps:$4 sm:$0xff]  }
 0x53c   : > { %10738 = vmatpush1.bf16.msra.mxu0 %v13554_v3  ;;  %v13620_v3 = vld [vmem:[%s15182_s21 + $0x1108] ss:$16 sps:$4 sm:$0xff]  }
 0x53d   : > { %10779 = vmatpush1.bf16.msra.mxu1 %v13557_v49  ;;  %10739 = vmatprep.subr.bf16.mxu0 %v13562_v56  ;;  %v13623_v49 = vld [vmem:[%s15182_s21 + $0x1308] ss:$16 sps:$4 sm:$0xff]   ;;  %v13628_v56 = vld [vmem:[%s15182_s21 + $0x14ec] ss:$16 sps:$4 sm:$0xff]  }
 0x53e   : > { %10780 = vmatprep.subr.bf16.mxu1 %v13565_v16  ;;  %v13631_v16 = vld [vmem:[%s15182_s21 + $0x16ec] ss:$16 sps:$4 sm:$0xff]  }
 0x540   : > { %10740 = vmatpush1.bf16.msra.mxu0 %v13560_v39  ;;  %v13626_v39 = vld [vmem:[%s15182_s21 + $0x14e8] ss:$16 sps:$4 sm:$0xff]  }
 0x541   : > { %10781 = vmatpush1.bf16.msra.mxu1 %v13563_v12  ;;  %10741 = vmatprep.subr.bf16.mxu0 %v13568_v27  ;;  %v13629_v12 = vld [vmem:[%s15182_s21 + $0x16e8] ss:$16 sps:$4 sm:$0xff]   ;;  %v13634_v27 = vld [vmem:[%s15182_s21 + $0x14cc] ss:$16 sps:$4 sm:$0xff]  }
 0x542   : > { %10782 = vmatprep.subr.bf16.mxu1 %v13571_v31  ;;  %v13637_v31 = vld [vmem:[%s15182_s21 + $0x16cc] ss:$16 sps:$4 sm:$0xff]  }
 0x544   : > { %10742 = vmatpush1.bf16.msra.mxu0 %v13566_v55 }
 0x545   : > { %10783 = vmatpush1.bf16.msra.mxu1 %v13569_v60  ;;  %10743 = vmatprep.subr.bf16.mxu0 %v13574_v6 }
 0x546   : > { %10784 = vmatprep.subr.bf16.mxu1 %v13577_v48  ;;  %v13632_v48 = vld [vmem:[%s15182_s21 + $0x14c8] ss:$16 sps:$4 sm:$0xff]  }
 0x548   : > { %10744 = vmatpush1.bf16.msra.mxu0 %v13572_v18  ;;  %v13635_v18 = vld [vmem:[%s15182_s21 + $0x16c8] ss:$16 sps:$4 sm:$0xff]  }
 0x549   : > { %10785 = vmatpush1.bf16.msra.mxu1 %v13575_v24  ;;  %10745 = vmatprep.subr.bf16.mxu0 %v13580_v58 }
 0x54a   : > { %10786 = vmatprep.subr.bf16.mxu1 %v13583_v42  ;;  %v13640_v42 = vld [vmem:[%s15182_s21 + $0x14ac] ss:$16 sps:$4 sm:$0xff]  }
 0x54c   : > { %10746 = vmatpush2.bf16.msra.mxu0 %v13578_v43  ;;  %v13643_v43 = vld [vmem:[%s15182_s21 + $0x16ac] ss:$16 sps:$4 sm:$0xff]  }
 0x54d   : > { %10787 = vmatpush2.bf16.msra.mxu1 %v13581_v8  ;;  %10747 = vmatprep.subr.bf16.mxu0 %v13586_v22 }
 0x54e   : > { %10788 = vmatprep.subr.bf16.mxu1 %v13589_v28  ;;  %v13638_v28 = vld [vmem:[%s15182_s21 + $0x14a8] ss:$16 sps:$4 sm:$0xff]  }
 0x550   : > { %10748 = vmatpush2.bf16.msra.mxu0 %v13584_v50  ;;  %v13641_v50 = vld [vmem:[%s15182_s21 + $0x16a8] ss:$16 sps:$4 sm:$0xff]  }
 0x551   : > { %10789 = vmatpush2.bf16.msra.mxu1 %v13587_v29  ;;  %10749 = vmatprep.subr.bf16.mxu0 %v13592_v54 }
 0x552   : > { %10790 = vmatprep.subr.bf16.mxu1 %v13595_v30  ;;  %v13647_v30 = vld [vmem:[%s15182_s21 + $0x1688] ss:$16 sps:$4 sm:$0xff]  }
 0x554   : > { %10750 = vmatpush2.bf16.msra.mxu0 %v13590_v32  ;;  %v13652_v32 = vld [vmem:[%s15182_s21 + $0x146c] ss:$16 sps:$4 sm:$0xff]  }
 0x555   : > { %10791 = vmatpush2.bf16.msra.mxu1 %v13593_v35  ;;  %10751 = vmatprep.subr.bf16.mxu0 %v13598_v33  ;;  %v13655_v35 = vld [vmem:[%s15182_s21 + $0x166c] ss:$16 sps:$4 sm:$0xff]   ;;  %v13650_v33 = vld [vmem:[%s15182_s21 + $0x1468] ss:$16 sps:$4 sm:$0xff]  }
 0x556   : > { %10792 = vmatprep.subr.bf16.mxu1 %v13601_v7  ;;  %v13653_v7 = vld [vmem:[%s15182_s21 + $0x1668] ss:$16 sps:$4 sm:$0xff]  }
 0x558   : > { %10752 = vmatpush2.bf16.msra.mxu0 %v13596_v45  ;;  %v13658_v45 = vld [vmem:[%s15182_s21 + $0x144c] ss:$16 sps:$4 sm:$0xff]  }
 0x559   : > { %10793 = vmatpush2.bf16.msra.mxu1 %v13599_v47  ;;  %10753 = vmatprep.subr.bf16.mxu0 %v13604_v51  ;;  %v13661_v47 = vld [vmem:[%s15182_s21 + $0x164c] ss:$16 sps:$4 sm:$0xff]   ;;  %v13656_v51 = vld [vmem:[%s15182_s21 + $0x1448] ss:$16 sps:$4 sm:$0xff]  }
 0x55a   : > { %10794 = vmatprep.subr.bf16.mxu1 %v13607_v37  ;;  %v13659_v37 = vld [vmem:[%s15182_s21 + $0x1648] ss:$16 sps:$4 sm:$0xff]  }
 0x55c   : > { %10754 = vmatpush2.bf16.msra.mxu0 %v13602_v13  ;;  %v13664_v13 = vld [vmem:[%s15182_s21 + $0x142c] ss:$16 sps:$4 sm:$0xff]  }
 0x55d   : > { %10795 = vmatpush2.bf16.msra.mxu1 %v13605_v21  ;;  %10755 = vmatprep.subr.bf16.mxu0 %v13610_v11  ;;  %v13667_v21 = vld [vmem:[%s15182_s21 + $0x162c] ss:$16 sps:$4 sm:$0xff]   ;;  %v13662_v11 = vld [vmem:[%s15182_s21 + $0x1428] ss:$16 sps:$4 sm:$0xff]  }
 0x55e   : > { %10796 = vmatprep.subr.bf16.mxu1 %v13613_v57  ;;  %v13665_v57 = vld [vmem:[%s15182_s21 + $0x1628] ss:$16 sps:$4 sm:$0xff]  }
 0x560   : > { %10756 = vmatpush2.bf16.msra.mxu0 %v13608_v0  ;;  %v13670_v0 = vld [vmem:[%s15182_s21 + $0x140c] ss:$16 sps:$4 sm:$0xff]  }
 0x561   : > { %10797 = vmatpush2.bf16.msra.mxu1 %v13611_v62  ;;  %10757 = vmatprep.subr.bf16.mxu0 %v13616_v41  ;;  %v13673_v62 = vld [vmem:[%s15182_s21 + $0x160c] ss:$16 sps:$4 sm:$0xff]   ;;  %v13668_v41 = vld [vmem:[%s15182_s21 + $0x1408] ss:$16 sps:$4 sm:$0xff]  }
 0x562   : > { %10798 = vmatprep.subr.bf16.mxu1 %v13619_v20  ;;  %v13671_v20 = vld [vmem:[%s15182_s21 + $0x1608] ss:$16 sps:$4 sm:$0xff]  }
 0x564   : > { %10758 = vmatpush2.bf16.msra.mxu0 %v13614_v26  ;;  %v13676_v26 = vld [vmem:[%s15182_s21 + $0x15ec] ss:$16 sps:$4 sm:$0xff]  }
 0x565   : > { %10799 = vmatpush2.bf16.msra.mxu1 %v13617_v61  ;;  %10759 = vmatprep.subr.bf16.mxu0 %v13622_v1  ;;  %v13679_v61 = vld [vmem:[%s15182_s21 + $0x17ec] ss:$16 sps:$4 sm:$0xff]   ;;  %v13674_v1 = vld [vmem:[%s15182_s21 + $0x15e8] ss:$16 sps:$4 sm:$0xff]  }
 0x566   : > { %10800 = vmatprep.subr.bf16.mxu1 %v13625_v2  ;;  %v13677_v2 = vld [vmem:[%s15182_s21 + $0x17e8] ss:$16 sps:$4 sm:$0xff]  }
 0x568   : > { %10760 = vmatpush2.bf16.msra.mxu0 %v13620_v3  ;;  %v13682_v3 = vld [vmem:[%s15182_s21 + $0x15cc] ss:$16 sps:$4 sm:$0xff]  }
 0x569   : > { %10801 = vmatpush2.bf16.msra.mxu1 %v13623_v49  ;;  %10811 = vmatprep.subr.bf16.mxu0 %v13628_v56  ;;  %v13685_v49 = vld [vmem:[%s15182_s21 + $0x17cc] ss:$16 sps:$4 sm:$0xff]   ;;  %v13680_v56 = vld [vmem:[%s15182_s21 + $0x15c8] ss:$16 sps:$4 sm:$0xff]  }
 0x56a   : > { %10852 = vmatprep.subr.bf16.mxu1 %v13631_v16  ;;  %v13683_v16 = vld [vmem:[%s15182_s21 + $0x17c8] ss:$16 sps:$4 sm:$0xff]  }
 0x56b   : > { %v10517_v55 = vpop.f32.mrf.mxu0  ;;  %10762 = vmatmul.mubr.bf16.vlgmr.msra.gmra.mxu0 %v15638_v4 }
 0x56c   : > { %v10558_v60 = vpop.f32.mrf.mxu1  ;;  %10803 = vmatmul.mubr.bf16.vlgmr.msra.gmra.mxu1 %v15651_v5  ;;  %v10518_v6 = vadd.f32 %v10517_v55, %v16235_v38  ;;  %10812 = vmatpush1.bf16.msra.mxu0 %v13626_v39  ;;  %v13688_v39 = vld [vmem:[%s15182_s21 + $0x15ac] ss:$16 sps:$4 sm:$0xff]  }
 0x56d   : > { %10853 = vmatpush1.bf16.msra.mxu1 %v13629_v12  ;;  %v10519_v24 = vpop.f32.mrf.mxu0  ;;  %10813 = vmatprep.subr.bf16.mxu0 %v13634_v27  ;;  %v13691_v12 = vld [vmem:[%s15182_s21 + $0x17ac] ss:$16 sps:$4 sm:$0xff]   ;;  %v13686_v27 = vld [vmem:[%s15182_s21 + $0x15a8] ss:$16 sps:$4 sm:$0xff]  }
 0x56e   : > { %v10560_v58 = vpop.f32.mrf.mxu1  ;;  %10854 = vmatprep.subr.bf16.mxu1 %v13637_v31  ;;  %v16312_v8 = vadd.f32 %v10558_v60, %v10518_v6  ;;  %v10520_v4 = vadd.f32 %v10519_v24, %v16241_v53  ;;  %10843 = vmatprep.mubr.bf16.mxu0 %v15647_v15  ;;  %v13646_v15 = vld [vmem:[%s15182_s21 + $0x148c] ss:$16 sps:$4 sm:$0xff]   ;;  %v13644_v53 = vld [vmem:[%s15182_s21 + $0x1488] ss:$16 sps:$4 sm:$0xff]  }
 0x56f   : > { %10884 = vmatprep.mubr.bf16.mxu1 %v15659_v23  ;;  %v10521_v5 = vpop.f32.mrf.mxu0  ;;  %v13649_v23 = vld [vmem:[%s15182_s21 + $0x168c] ss:$16 sps:$4 sm:$0xff]   ;;  %v13689_v31 = vld [vmem:[%s15182_s21 + $0x17a8] ss:$16 sps:$4 sm:$0xff]  }
 0x570   : > { %v10562_v38 = vpop.f32.mrf.mxu1  ;;  %v16317_v22 = vadd.f32 %v10560_v58, %v10520_v4  ;;  %10814 = vmatpush1.bf16.msra.mxu0 %v13632_v48  ;;  %v13694_v55 = vld [vmem:[%s15182_s21 + $0x158c] ss:$16 sps:$4 sm:$0xff]   ;;  %v13692_v6 = vld [vmem:[%s15182_s21 + $0x1588] ss:$16 sps:$4 sm:$0xff]  }
 0x571   : > { %10855 = vmatpush1.bf16.msra.mxu1 %v13635_v18  ;;  %v10522_v29 = vpop.f32.mrf.mxu0  ;;  %10815 = vmatprep.subr.bf16.mxu0 %v13640_v42  ;;  %v13697_v60 = vld [vmem:[%s15182_s21 + $0x178c] ss:$16 sps:$4 sm:$0xff]   ;;  %v13695_v48 = vld [vmem:[%s15182_s21 + $0x1788] ss:$16 sps:$4 sm:$0xff]  }
 0x572   : > { %v10563_v54 = vpop.f32.mrf.mxu1  ;;  %10856 = vmatprep.subr.bf16.mxu1 %v13643_v43  ;;  %v13700_v18 = vld [vmem:[%s15182_s21 + $0x156c] ss:$16 sps:$4 sm:$0xff]   ;;  %v13698_v58 = vld [vmem:[%s15182_s21 + $0x1568] ss:$16 sps:$4 sm:$0xff]  }
 0x573   : > { %v13703_v24 = vld [vmem:[%s15182_s21 + $0x176c] ss:$16 sps:$4 sm:$0xff]   ;;  %v13701_v42 = vld [vmem:[%s15182_s21 + $0x1768] ss:$16 sps:$4 sm:$0xff]  }
 0x574   : > { %10816 = vmatpush1.bf16.msra.mxu0 %v13638_v28  ;;  %v13706_v43 = vld [vmem:[%s15182_s21 + $0x154c] ss:$16 sps:$4 sm:$0xff]   ;;  %v13704_v5 = vld [vmem:[%s15182_s21 + $0x1548] ss:$16 sps:$4 sm:$0xff]  }
 0x575   : > { %10857 = vmatpush1.bf16.msra.mxu1 %v13641_v50  ;;  %10817 = vmatprep.subr.bf16.mxu0 %v13646_v15  ;;  %v13709_v4 = vld [vmem:[%s15182_s21 + $0x174c] ss:$16 sps:$4 sm:$0xff]   ;;  %v13707_v38 = vld [vmem:[%s15182_s21 + $0x1748] ss:$16 sps:$4 sm:$0xff]  }
 0x576   : > { %10858 = vmatprep.subr.bf16.mxu1 %v13649_v23  ;;  %v13712_v28 = vld [vmem:[%s15182_s21 + $0x152c] ss:$16 sps:$4 sm:$0xff]   ;;  %v13710_v29 = vld [vmem:[%s15182_s21 + $0x1528] ss:$16 sps:$4 sm:$0xff]  }
 0x577   : > { %v13715_v50 = vld [vmem:[%s15182_s21 + $0x172c] ss:$16 sps:$4 sm:$0xff]   ;;  %v13713_v54 = vld [vmem:[%s15182_s21 + $0x1728] ss:$16 sps:$4 sm:$0xff]  }
 0x578   : > { %10818 = vmatpush1.bf16.msra.mxu0 %v13644_v53  ;;  %v13718_v15 = vld [vmem:[%s15182_s21 + $0x150c] ss:$16 sps:$4 sm:$0xff]   ;;  %v13716_v53 = vld [vmem:[%s15182_s21 + $0x1508] ss:$16 sps:$4 sm:$0xff]  }
 0x579   : > { %10859 = vmatpush1.bf16.msra.mxu1 %v13647_v30  ;;  %10819 = vmatprep.subr.bf16.mxu0 %v13652_v32  ;;  %v13721_v23 = vld [vmem:[%s15182_s21 + $0x170c] ss:$16 sps:$4 sm:$0xff]   ;;  %v13719_v30 = vld [vmem:[%s15182_s21 + $0x1708] ss:$16 sps:$4 sm:$0xff]  }
 0x57a   : > { %10860 = vmatprep.subr.bf16.mxu1 %v13655_v35  ;;  %v13724_v32 = vld [vmem:[%s15182_s21 + $0x18ec] ss:$16 sps:$4 sm:$0xff]  }
 0x57b   : > { %v13727_v35 = vld [vmem:[%s15182_s21 + $0x1aec] ss:$16 sps:$4 sm:$0xff]  }
 0x57c   : > { %10820 = vmatpush1.bf16.msra.mxu0 %v13650_v33  ;;  %v13722_v33 = vld [vmem:[%s15182_s21 + $0x18e8] ss:$16 sps:$4 sm:$0xff]  }
 0x57d   : > { %10861 = vmatpush1.bf16.msra.mxu1 %v13653_v7  ;;  %10821 = vmatprep.subr.bf16.mxu0 %v13658_v45  ;;  %v13725_v7 = vld [vmem:[%s15182_s21 + $0x1ae8] ss:$16 sps:$4 sm:$0xff]   ;;  %v13730_v45 = vld [vmem:[%s15182_s21 + $0x18cc] ss:$16 sps:$4 sm:$0xff]  }
 0x57e   : > { %10862 = vmatprep.subr.bf16.mxu1 %v13661_v47  ;;  %v13733_v47 = vld [vmem:[%s15182_s21 + $0x1acc] ss:$16 sps:$4 sm:$0xff]  }
 0x580   : > { %10822 = vmatpush1.bf16.msra.mxu0 %v13656_v51 }
 0x581   : > { %10863 = vmatpush1.bf16.msra.mxu1 %v13659_v37  ;;  %10823 = vmatprep.subr.bf16.mxu0 %v13664_v13 }
 0x582   : > { %10864 = vmatprep.subr.bf16.mxu1 %v13667_v21  ;;  %v13728_v21 = vld [vmem:[%s15182_s21 + $0x18c8] ss:$16 sps:$4 sm:$0xff]  }
 0x584   : > { %10824 = vmatpush1.bf16.msra.mxu0 %v13662_v11  ;;  %v13731_v11 = vld [vmem:[%s15182_s21 + $0x1ac8] ss:$16 sps:$4 sm:$0xff]  }
 0x585   : > { %10865 = vmatpush1.bf16.msra.mxu1 %v13665_v57  ;;  %10825 = vmatprep.subr.bf16.mxu0 %v13670_v0 }
 0x586   : > { %10866 = vmatprep.subr.bf16.mxu1 %v13673_v62  ;;  %v13736_v62 = vld [vmem:[%s15182_s21 + $0x18ac] ss:$16 sps:$4 sm:$0xff]  }
 0x588   : > { %10826 = vmatpush1.bf16.msra.mxu0 %v13668_v41  ;;  %v13739_v41 = vld [vmem:[%s15182_s21 + $0x1aac] ss:$16 sps:$4 sm:$0xff]  }
 0x589   : > { %10867 = vmatpush1.bf16.msra.mxu1 %v13671_v20  ;;  %10827 = vmatprep.subr.bf16.mxu0 %v13676_v26 }
 0x58a   : > { %10868 = vmatprep.subr.bf16.mxu1 %v13679_v61  ;;  %v13734_v61 = vld [vmem:[%s15182_s21 + $0x18a8] ss:$16 sps:$4 sm:$0xff]  }
 0x58c   : > { %10828 = vmatpush2.bf16.msra.mxu0 %v13674_v1  ;;  %v13737_v1 = vld [vmem:[%s15182_s21 + $0x1aa8] ss:$16 sps:$4 sm:$0xff]  }
 0x58d   : > { %10869 = vmatpush2.bf16.msra.mxu1 %v13677_v2  ;;  %10829 = vmatprep.subr.bf16.mxu0 %v13682_v3 }
 0x58e   : > { %10870 = vmatprep.subr.bf16.mxu1 %v13685_v49  ;;  %v13743_v49 = vld [vmem:[%s15182_s21 + $0x1a88] ss:$16 sps:$4 sm:$0xff]  }
 0x590   : > { %10830 = vmatpush2.bf16.msra.mxu0 %v13680_v56  ;;  %v13748_v56 = vld [vmem:[%s15182_s21 + $0x186c] ss:$16 sps:$4 sm:$0xff]  }
 0x591   : > { %10871 = vmatpush2.bf16.msra.mxu1 %v13683_v16  ;;  %10831 = vmatprep.subr.bf16.mxu0 %v13688_v39  ;;  %v13751_v16 = vld [vmem:[%s15182_s21 + $0x1a6c] ss:$16 sps:$4 sm:$0xff]   ;;  %v13746_v39 = vld [vmem:[%s15182_s21 + $0x1868] ss:$16 sps:$4 sm:$0xff]  }
 0x592   : > { %10872 = vmatprep.subr.bf16.mxu1 %v13691_v12  ;;  %v13749_v12 = vld [vmem:[%s15182_s21 + $0x1a68] ss:$16 sps:$4 sm:$0xff]  }
 0x594   : > { %10832 = vmatpush2.bf16.msra.mxu0 %v13686_v27  ;;  %v13754_v27 = vld [vmem:[%s15182_s21 + $0x184c] ss:$16 sps:$4 sm:$0xff]  }
 0x595   : > { %10873 = vmatpush2.bf16.msra.mxu1 %v13689_v31  ;;  %10833 = vmatprep.subr.bf16.mxu0 %v13694_v55  ;;  %v13757_v31 = vld [vmem:[%s15182_s21 + $0x1a4c] ss:$16 sps:$4 sm:$0xff]   ;;  %v13752_v55 = vld [vmem:[%s15182_s21 + $0x1848] ss:$16 sps:$4 sm:$0xff]  }
 0x596   : > { %10874 = vmatprep.subr.bf16.mxu1 %v13697_v60  ;;  %v13755_v60 = vld [vmem:[%s15182_s21 + $0x1a48] ss:$16 sps:$4 sm:$0xff]  }
 0x598   : > { %10834 = vmatpush2.bf16.msra.mxu0 %v13692_v6  ;;  %v13760_v6 = vld [vmem:[%s15182_s21 + $0x182c] ss:$16 sps:$4 sm:$0xff]  }
 0x599   : > { %10875 = vmatpush2.bf16.msra.mxu1 %v13695_v48  ;;  %10835 = vmatprep.subr.bf16.mxu0 %v13700_v18  ;;  %v13763_v48 = vld [vmem:[%s15182_s21 + $0x1a2c] ss:$16 sps:$4 sm:$0xff]   ;;  %v13758_v18 = vld [vmem:[%s15182_s21 + $0x1828] ss:$16 sps:$4 sm:$0xff]  }
 0x59a   : > { %10876 = vmatprep.subr.bf16.mxu1 %v13703_v24  ;;  %v13761_v24 = vld [vmem:[%s15182_s21 + $0x1a28] ss:$16 sps:$4 sm:$0xff]  }
 0x59c   : > { %10836 = vmatpush2.bf16.msra.mxu0 %v13698_v58  ;;  %v13766_v58 = vld [vmem:[%s15182_s21 + $0x180c] ss:$16 sps:$4 sm:$0xff]  }
 0x59d   : > { %10877 = vmatpush2.bf16.msra.mxu1 %v13701_v42  ;;  %10837 = vmatprep.subr.bf16.mxu0 %v13706_v43  ;;  %v13769_v42 = vld [vmem:[%s15182_s21 + $0x1a0c] ss:$16 sps:$4 sm:$0xff]   ;;  %v13764_v43 = vld [vmem:[%s15182_s21 + $0x1808] ss:$16 sps:$4 sm:$0xff]  }
 0x59e   : > { %10878 = vmatprep.subr.bf16.mxu1 %v13709_v4  ;;  %v13767_v4 = vld [vmem:[%s15182_s21 + $0x1a08] ss:$16 sps:$4 sm:$0xff]  }
 0x5a0   : > { %10838 = vmatpush2.bf16.msra.mxu0 %v13704_v5  ;;  %v13772_v5 = vld [vmem:[%s15182_s21 + $0x19ec] ss:$16 sps:$4 sm:$0xff]  }
 0x5a1   : > { %10879 = vmatpush2.bf16.msra.mxu1 %v13707_v38  ;;  %10839 = vmatprep.subr.bf16.mxu0 %v13712_v28  ;;  %v13775_v38 = vld [vmem:[%s15182_s21 + $0x1bec] ss:$16 sps:$4 sm:$0xff]   ;;  %v13770_v28 = vld [vmem:[%s15182_s21 + $0x19e8] ss:$16 sps:$4 sm:$0xff]  }
 0x5a2   : > { %10880 = vmatprep.subr.bf16.mxu1 %v13715_v50  ;;  %v13773_v50 = vld [vmem:[%s15182_s21 + $0x1be8] ss:$16 sps:$4 sm:$0xff]  }
 0x5a4   : > { %10840 = vmatpush2.bf16.msra.mxu0 %v13710_v29  ;;  %v13778_v29 = vld [vmem:[%s15182_s21 + $0x19cc] ss:$16 sps:$4 sm:$0xff]  }
 0x5a5   : > { %10881 = vmatpush2.bf16.msra.mxu1 %v13713_v54  ;;  %10841 = vmatprep.subr.bf16.mxu0 %v13718_v15  ;;  %v13781_v54 = vld [vmem:[%s15182_s21 + $0x1bcc] ss:$16 sps:$4 sm:$0xff]   ;;  %v13776_v15 = vld [vmem:[%s15182_s21 + $0x19c8] ss:$16 sps:$4 sm:$0xff]  }
 0x5a6   : > { %10882 = vmatprep.subr.bf16.mxu1 %v13721_v23  ;;  %v13779_v23 = vld [vmem:[%s15182_s21 + $0x1bc8] ss:$16 sps:$4 sm:$0xff]  }
 0x5a8   : > { %10842 = vmatpush2.bf16.msra.mxu0 %v13716_v53  ;;  %v13784_v53 = vld [vmem:[%s15182_s21 + $0x19ac] ss:$16 sps:$4 sm:$0xff]  }
 0x5a9   : > { %10883 = vmatpush2.bf16.msra.mxu1 %v13719_v30  ;;  %10893 = vmatprep.subr.bf16.mxu0 %v13724_v32  ;;  %v13787_v30 = vld [vmem:[%s15182_s21 + $0x1bac] ss:$16 sps:$4 sm:$0xff]   ;;  %v13782_v32 = vld [vmem:[%s15182_s21 + $0x19a8] ss:$16 sps:$4 sm:$0xff]  }
 0x5aa   : > { %10934 = vmatprep.subr.bf16.mxu1 %v13727_v35  ;;  %v13785_v35 = vld [vmem:[%s15182_s21 + $0x1ba8] ss:$16 sps:$4 sm:$0xff]  }
 0x5ab   : > { %v10599_v51 = vpop.f32.mrf.mxu0  ;;  %10844 = vmatmul.mubr.bf16.vlgmr.msra.gmra.mxu0 %v15736_v10 }
 0x5ac   : > { %v10640_v37 = vpop.f32.mrf.mxu1  ;;  %10885 = vmatmul.mubr.bf16.vlgmr.msra.gmra.mxu1 %v15749_v59  ;;  %v10600_v13 = vadd.f32 %v10599_v51, %v16312_v8  ;;  %10894 = vmatpush1.bf16.msra.mxu0 %v13722_v33  ;;  %v13790_v33 = vld [vmem:[%s15182_s21 + $0x198c] ss:$16 sps:$4 sm:$0xff]  }
 0x5ad   : > { %10935 = vmatpush1.bf16.msra.mxu1 %v13725_v7  ;;  %v10601_v57 = vpop.f32.mrf.mxu0  ;;  %10895 = vmatprep.subr.bf16.mxu0 %v13730_v45  ;;  %v13793_v7 = vld [vmem:[%s15182_s21 + $0x1b8c] ss:$16 sps:$4 sm:$0xff]   ;;  %v13788_v45 = vld [vmem:[%s15182_s21 + $0x1988] ss:$16 sps:$4 sm:$0xff]  }
 0x5ae   : > { %v10642_v0 = vpop.f32.mrf.mxu1  ;;  %10936 = vmatprep.subr.bf16.mxu1 %v13733_v47  ;;  %v16386_v20 = vadd.f32 %v10640_v37, %v10600_v13  ;;  %v10602_v10 = vadd.f32 %v10601_v57, %v16317_v22  ;;  %10925 = vmatprep.mubr.bf16.mxu0 %v15745_v25  ;;  %v13742_v25 = vld [vmem:[%s15182_s21 + $0x188c] ss:$16 sps:$4 sm:$0xff]   ;;  %v13740_v22 = vld [vmem:[%s15182_s21 + $0x1888] ss:$16 sps:$4 sm:$0xff]  }
 0x5af   : > { %10966 = vmatprep.mubr.bf16.mxu1 %v15757_v34  ;;  %v10603_v59 = vpop.f32.mrf.mxu0  ;;  %v13745_v34 = vld [vmem:[%s15182_s21 + $0x1a8c] ss:$16 sps:$4 sm:$0xff]   ;;  %v13791_v47 = vld [vmem:[%s15182_s21 + $0x1b88] ss:$16 sps:$4 sm:$0xff]  }
 0x5b0   : > { %v10644_v8 = vpop.f32.mrf.mxu1  ;;  %v16391_v26 = vadd.f32 %v10642_v0, %v10602_v10  ;;  %10896 = vmatpush1.bf16.msra.mxu0 %v13728_v21  ;;  %v13796_v51 = vld [vmem:[%s15182_s21 + $0x196c] ss:$16 sps:$4 sm:$0xff]   ;;  %v13794_v13 = vld [vmem:[%s15182_s21 + $0x1968] ss:$16 sps:$4 sm:$0xff]  }
 0x5b1   : > { %10937 = vmatpush1.bf16.msra.mxu1 %v13731_v11  ;;  %v10604_v2 = vpop.f32.mrf.mxu0  ;;  %10897 = vmatprep.subr.bf16.mxu0 %v13736_v62  ;;  %v13799_v37 = vld [vmem:[%s15182_s21 + $0x1b6c] ss:$16 sps:$4 sm:$0xff]   ;;  %v13797_v21 = vld [vmem:[%s15182_s21 + $0x1b68] ss:$16 sps:$4 sm:$0xff]  }
 0x5b2   : > { %v10645_v3 = vpop.f32.mrf.mxu1  ;;  %10938 = vmatprep.subr.bf16.mxu1 %v13739_v41  ;;  %v13802_v11 = vld [vmem:[%s15182_s21 + $0x194c] ss:$16 sps:$4 sm:$0xff]   ;;  %v13800_v0 = vld [vmem:[%s15182_s21 + $0x1948] ss:$16 sps:$4 sm:$0xff]  }
 0x5b3   : > { %v13805_v57 = vld [vmem:[%s15182_s21 + $0x1b4c] ss:$16 sps:$4 sm:$0xff]   ;;  %v13803_v62 = vld [vmem:[%s15182_s21 + $0x1b48] ss:$16 sps:$4 sm:$0xff]  }
 0x5b4   : > { %10898 = vmatpush1.bf16.msra.mxu0 %v13734_v61  ;;  %v13808_v41 = vld [vmem:[%s15182_s21 + $0x192c] ss:$16 sps:$4 sm:$0xff]   ;;  %v13806_v59 = vld [vmem:[%s15182_s21 + $0x1928] ss:$16 sps:$4 sm:$0xff]  }
 0x5b5   : > { %10939 = vmatpush1.bf16.msra.mxu1 %v13737_v1  ;;  %10899 = vmatprep.subr.bf16.mxu0 %v13742_v25  ;;  %v13811_v10 = vld [vmem:[%s15182_s21 + $0x1b2c] ss:$16 sps:$4 sm:$0xff]   ;;  %v13809_v8 = vld [vmem:[%s15182_s21 + $0x1b28] ss:$16 sps:$4 sm:$0xff]  }
 0x5b6   : > { %10940 = vmatprep.subr.bf16.mxu1 %v13745_v34  ;;  %v13814_v61 = vld [vmem:[%s15182_s21 + $0x190c] ss:$16 sps:$4 sm:$0xff]   ;;  %v13812_v2 = vld [vmem:[%s15182_s21 + $0x1908] ss:$16 sps:$4 sm:$0xff]  }
 0x5b7   : > { %v13817_v1 = vld [vmem:[%s15182_s21 + $0x1b0c] ss:$16 sps:$4 sm:$0xff]   ;;  %v13815_v3 = vld [vmem:[%s15182_s21 + $0x1b08] ss:$16 sps:$4 sm:$0xff]  }
 0x5b8   : > { %10900 = vmatpush1.bf16.msra.mxu0 %v13740_v22  ;;  %v13820_v25 = vld [vmem:[%s15182_s21 + $0x1cec] ss:$16 sps:$4 sm:$0xff]   ;;  %v13818_v22 = vld [vmem:[%s15182_s21 + $0x1ce8] ss:$16 sps:$4 sm:$0xff]  }
 0x5b9   : > { %10941 = vmatpush1.bf16.msra.mxu1 %v13743_v49  ;;  %10901 = vmatprep.subr.bf16.mxu0 %v13748_v56  ;;  %v13823_v34 = vld [vmem:[%s15182_s21 + $0x1eec] ss:$16 sps:$4 sm:$0xff]   ;;  %v13821_v49 = vld [vmem:[%s15182_s21 + $0x1ee8] ss:$16 sps:$4 sm:$0xff]  }
 0x5ba   : > { %10942 = vmatprep.subr.bf16.mxu1 %v13751_v16  ;;  %v13826_v56 = vld [vmem:[%s15182_s21 + $0x1ccc] ss:$16 sps:$4 sm:$0xff]  }
 0x5bb   : > { %v13829_v16 = vld [vmem:[%s15182_s21 + $0x1ecc] ss:$16 sps:$4 sm:$0xff]  }
 0x5bc   : > { %10902 = vmatpush1.bf16.msra.mxu0 %v13746_v39 }
 0x5bd   : > { %10943 = vmatpush1.bf16.msra.mxu1 %v13749_v12  ;;  %10903 = vmatprep.subr.bf16.mxu0 %v13754_v27 }
 0x5be   : > { %10944 = vmatprep.subr.bf16.mxu1 %v13757_v31  ;;  %v13824_v31 = vld [vmem:[%s15182_s21 + $0x1cc8] ss:$16 sps:$4 sm:$0xff]  }
 0x5c0   : > { %10904 = vmatpush1.bf16.msra.mxu0 %v13752_v55  ;;  %v13827_v55 = vld [vmem:[%s15182_s21 + $0x1ec8] ss:$16 sps:$4 sm:$0xff]  }
 0x5c1   : > { %10945 = vmatpush1.bf16.msra.mxu1 %v13755_v60  ;;  %10905 = vmatprep.subr.bf16.mxu0 %v13760_v6 }
 0x5c2   : > { %10946 = vmatprep.subr.bf16.mxu1 %v13763_v48  ;;  %v13832_v48 = vld [vmem:[%s15182_s21 + $0x1cac] ss:$16 sps:$4 sm:$0xff]  }
 0x5c4   : > { %10906 = vmatpush1.bf16.msra.mxu0 %v13758_v18  ;;  %v13835_v18 = vld [vmem:[%s15182_s21 + $0x1eac] ss:$16 sps:$4 sm:$0xff]  }
 0x5c5   : > { %10947 = vmatpush1.bf16.msra.mxu1 %v13761_v24  ;;  %10907 = vmatprep.subr.bf16.mxu0 %v13766_v58 }
 0x5c6   : > { %10948 = vmatprep.subr.bf16.mxu1 %v13769_v42  ;;  %v13830_v42 = vld [vmem:[%s15182_s21 + $0x1ca8] ss:$16 sps:$4 sm:$0xff]  }
 0x5c8   : > { %10908 = vmatpush1.bf16.msra.mxu0 %v13764_v43  ;;  %v13833_v43 = vld [vmem:[%s15182_s21 + $0x1ea8] ss:$16 sps:$4 sm:$0xff]  }
 0x5c9   : > { %10949 = vmatpush1.bf16.msra.mxu1 %v13767_v4  ;;  %10909 = vmatprep.subr.bf16.mxu0 %v13772_v5 }
 0x5ca   : > { %10950 = vmatprep.subr.bf16.mxu1 %v13775_v38  ;;  %v13839_v38 = vld [vmem:[%s15182_s21 + $0x1e88] ss:$16 sps:$4 sm:$0xff]  }
 0x5cc   : > { %10910 = vmatpush2.bf16.msra.mxu0 %v13770_v28  ;;  %v13844_v28 = vld [vmem:[%s15182_s21 + $0x1c6c] ss:$16 sps:$4 sm:$0xff]  }
 0x5cd   : > { %10951 = vmatpush2.bf16.msra.mxu1 %v13773_v50  ;;  %10911 = vmatprep.subr.bf16.mxu0 %v13778_v29  ;;  %v13847_v50 = vld [vmem:[%s15182_s21 + $0x1e6c] ss:$16 sps:$4 sm:$0xff]   ;;  %v13842_v29 = vld [vmem:[%s15182_s21 + $0x1c68] ss:$16 sps:$4 sm:$0xff]  }
 0x5ce   : > { %10952 = vmatprep.subr.bf16.mxu1 %v13781_v54  ;;  %v13845_v54 = vld [vmem:[%s15182_s21 + $0x1e68] ss:$16 sps:$4 sm:$0xff]  }
 0x5d0   : > { %10912 = vmatpush2.bf16.msra.mxu0 %v13776_v15  ;;  %v13850_v15 = vld [vmem:[%s15182_s21 + $0x1c4c] ss:$16 sps:$4 sm:$0xff]  }
 0x5d1   : > { %10953 = vmatpush2.bf16.msra.mxu1 %v13779_v23  ;;  %10913 = vmatprep.subr.bf16.mxu0 %v13784_v53  ;;  %v13853_v23 = vld [vmem:[%s15182_s21 + $0x1e4c] ss:$16 sps:$4 sm:$0xff]   ;;  %v13848_v53 = vld [vmem:[%s15182_s21 + $0x1c48] ss:$16 sps:$4 sm:$0xff]  }
 0x5d2   : > { %10954 = vmatprep.subr.bf16.mxu1 %v13787_v30  ;;  %v13851_v30 = vld [vmem:[%s15182_s21 + $0x1e48] ss:$16 sps:$4 sm:$0xff]  }
 0x5d4   : > { %10914 = vmatpush2.bf16.msra.mxu0 %v13782_v32  ;;  %v13856_v32 = vld [vmem:[%s15182_s21 + $0x1c2c] ss:$16 sps:$4 sm:$0xff]  }
 0x5d5   : > { %10955 = vmatpush2.bf16.msra.mxu1 %v13785_v35  ;;  %10915 = vmatprep.subr.bf16.mxu0 %v13790_v33  ;;  %v13859_v35 = vld [vmem:[%s15182_s21 + $0x1e2c] ss:$16 sps:$4 sm:$0xff]   ;;  %v13854_v33 = vld [vmem:[%s15182_s21 + $0x1c28] ss:$16 sps:$4 sm:$0xff]  }
 0x5d6   : > { %10956 = vmatprep.subr.bf16.mxu1 %v13793_v7  ;;  %v13857_v7 = vld [vmem:[%s15182_s21 + $0x1e28] ss:$16 sps:$4 sm:$0xff]  }
 0x5d8   : > { %10916 = vmatpush2.bf16.msra.mxu0 %v13788_v45  ;;  %v13862_v45 = vld [vmem:[%s15182_s21 + $0x1c0c] ss:$16 sps:$4 sm:$0xff]  }
 0x5d9   : > { %10957 = vmatpush2.bf16.msra.mxu1 %v13791_v47  ;;  %10917 = vmatprep.subr.bf16.mxu0 %v13796_v51  ;;  %v13865_v47 = vld [vmem:[%s15182_s21 + $0x1e0c] ss:$16 sps:$4 sm:$0xff]   ;;  %v13860_v51 = vld [vmem:[%s15182_s21 + $0x1c08] ss:$16 sps:$4 sm:$0xff]  }
 0x5da   : > { %10958 = vmatprep.subr.bf16.mxu1 %v13799_v37  ;;  %v13863_v37 = vld [vmem:[%s15182_s21 + $0x1e08] ss:$16 sps:$4 sm:$0xff]  }
 0x5dc   : > { %10918 = vmatpush2.bf16.msra.mxu0 %v13794_v13  ;;  %v13868_v13 = vld [vmem:[%s15182_s21 + $0x1dec] ss:$16 sps:$4 sm:$0xff]  }
 0x5dd   : > { %10959 = vmatpush2.bf16.msra.mxu1 %v13797_v21  ;;  %10919 = vmatprep.subr.bf16.mxu0 %v13802_v11  ;;  %v13871_v21 = vld [vmem:[%s15182_s21 + $0x1fec] ss:$16 sps:$4 sm:$0xff]   ;;  %v13866_v11 = vld [vmem:[%s15182_s21 + $0x1de8] ss:$16 sps:$4 sm:$0xff]  }
 0x5de   : > { %10960 = vmatprep.subr.bf16.mxu1 %v13805_v57  ;;  %v13869_v57 = vld [vmem:[%s15182_s21 + $0x1fe8] ss:$16 sps:$4 sm:$0xff]  }
 0x5e0   : > { %10920 = vmatpush2.bf16.msra.mxu0 %v13800_v0  ;;  %v13874_v0 = vld [vmem:[%s15182_s21 + $0x1dcc] ss:$16 sps:$4 sm:$0xff]  }
 0x5e1   : > { %10961 = vmatpush2.bf16.msra.mxu1 %v13803_v62  ;;  %10921 = vmatprep.subr.bf16.mxu0 %v13808_v41  ;;  %v13877_v62 = vld [vmem:[%s15182_s21 + $0x1fcc] ss:$16 sps:$4 sm:$0xff]   ;;  %v13872_v41 = vld [vmem:[%s15182_s21 + $0x1dc8] ss:$16 sps:$4 sm:$0xff]  }
 0x5e2   : > { %10962 = vmatprep.subr.bf16.mxu1 %v13811_v10  ;;  %v13875_v10 = vld [vmem:[%s15182_s21 + $0x1fc8] ss:$16 sps:$4 sm:$0xff]  }
 0x5e4   : > { %10922 = vmatpush2.bf16.msra.mxu0 %v13806_v59  ;;  %v13880_v59 = vld [vmem:[%s15182_s21 + $0x1dac] ss:$16 sps:$4 sm:$0xff]  }
 0x5e5   : > { %10963 = vmatpush2.bf16.msra.mxu1 %v13809_v8  ;;  %10923 = vmatprep.subr.bf16.mxu0 %v13814_v61  ;;  %v13883_v8 = vld [vmem:[%s15182_s21 + $0x1fac] ss:$16 sps:$4 sm:$0xff]   ;;  %v13878_v61 = vld [vmem:[%s15182_s21 + $0x1da8] ss:$16 sps:$4 sm:$0xff]  }
 0x5e6   : > { %10964 = vmatprep.subr.bf16.mxu1 %v13817_v1  ;;  %v13881_v1 = vld [vmem:[%s15182_s21 + $0x1fa8] ss:$16 sps:$4 sm:$0xff]  }
 0x5e8   : > { %10924 = vmatpush2.bf16.msra.mxu0 %v13812_v2  ;;  %v13886_v2 = vld [vmem:[%s15182_s21 + $0x1d8c] ss:$16 sps:$4 sm:$0xff]  }
 0x5e9   : > { %10965 = vmatpush2.bf16.msra.mxu1 %v13815_v3  ;;  %10975 = vmatprep.subr.bf16.mxu0 %v13820_v25  ;;  %v13889_v3 = vld [vmem:[%s15182_s21 + $0x1f8c] ss:$16 sps:$4 sm:$0xff]   ;;  %v13884_v25 = vld [vmem:[%s15182_s21 + $0x1d88] ss:$16 sps:$4 sm:$0xff]  }
 0x5ea   : > { %11016 = vmatprep.subr.bf16.mxu1 %v13823_v34  ;;  %v13887_v34 = vld [vmem:[%s15182_s21 + $0x1f88] ss:$16 sps:$4 sm:$0xff]  }
 0x5eb   : > { %v10681_v39 = vpop.f32.mrf.mxu0  ;;  %10926 = vmatmul.mubr.bf16.vlgmr.msra.gmra.mxu0 %v15832_v40 }
 0x5ec   : > { %v10722_v12 = vpop.f32.mrf.mxu1  ;;  %10967 = vmatmul.mubr.bf16.vlgmr.msra.gmra.mxu1 %v15845_v63  ;;  %v10682_v27 = vadd.f32 %v10681_v39, %v16386_v20  ;;  %10976 = vmatpush1.bf16.msra.mxu0 %v13818_v22  ;;  %v13892_v22 = vld [vmem:[%s15182_s21 + $0x1d6c] ss:$16 sps:$4 sm:$0xff]  }
 0x5ed   : > { %11017 = vmatpush1.bf16.msra.mxu1 %v13821_v49  ;;  %v10683_v60 = vpop.f32.mrf.mxu0  ;;  %10977 = vmatprep.subr.bf16.mxu0 %v13826_v56  ;;  %v13895_v49 = vld [vmem:[%s15182_s21 + $0x1f6c] ss:$16 sps:$4 sm:$0xff]   ;;  %v13890_v56 = vld [vmem:[%s15182_s21 + $0x1d68] ss:$16 sps:$4 sm:$0xff]  }
 0x5ee   : > { %v10724_v6 = vpop.f32.mrf.mxu1  ;;  %11018 = vmatprep.subr.bf16.mxu1 %v13829_v16  ;;  %v16460_v24 = vadd.f32 %v10722_v12, %v10682_v27  ;;  %v10684_v40 = vadd.f32 %v10683_v60, %v16391_v26  ;;  %11007 = vmatprep.mubr.bf16.mxu0 %v15841_v52  ;;  %v13838_v52 = vld [vmem:[%s15182_s21 + $0x1c8c] ss:$16 sps:$4 sm:$0xff]   ;;  %v13836_v26 = vld [vmem:[%s15182_s21 + $0x1c88] ss:$16 sps:$4 sm:$0xff]  }
 0x5ef   : > { %11048 = vmatprep.mubr.bf16.mxu1 %v15853_v46  ;;  %v10685_v63 = vpop.f32.mrf.mxu0  ;;  %v13841_v46 = vld [vmem:[%s15182_s21 + $0x1e8c] ss:$16 sps:$4 sm:$0xff]   ;;  %v13893_v16 = vld [vmem:[%s15182_s21 + $0x1f68] ss:$16 sps:$4 sm:$0xff]  }
 0x5f0   : > { %v10726_v20 = vpop.f32.mrf.mxu1  ;;  %v16465_v58 = vadd.f32 %v10724_v6, %v10684_v40  ;;  %10978 = vmatpush1.bf16.msra.mxu0 %v13824_v31  ;;  %v13898_v39 = vld [vmem:[%s15182_s21 + $0x1d4c] ss:$16 sps:$4 sm:$0xff]   ;;  %v13896_v27 = vld [vmem:[%s15182_s21 + $0x1d48] ss:$16 sps:$4 sm:$0xff]  }
 0x5f1   : > { %11019 = vmatpush1.bf16.msra.mxu1 %v13827_v55  ;;  %v10686_v4 = vpop.f32.mrf.mxu0  ;;  %10979 = vmatprep.subr.bf16.mxu0 %v13832_v48  ;;  %v13901_v12 = vld [vmem:[%s15182_s21 + $0x1f4c] ss:$16 sps:$4 sm:$0xff]   ;;  %v13899_v31 = vld [vmem:[%s15182_s21 + $0x1f48] ss:$16 sps:$4 sm:$0xff]  }
 0x5f2   : > { %v10727_v5 = vpop.f32.mrf.mxu1  ;;  %11020 = vmatprep.subr.bf16.mxu1 %v13835_v18  ;;  %v13904_v55 = vld [vmem:[%s15182_s21 + $0x1d2c] ss:$16 sps:$4 sm:$0xff]   ;;  %v13902_v6 = vld [vmem:[%s15182_s21 + $0x1d28] ss:$16 sps:$4 sm:$0xff]  }
 0x5f3   : > { %v13907_v60 = vld [vmem:[%s15182_s21 + $0x1f2c] ss:$16 sps:$4 sm:$0xff]   ;;  %v13905_v48 = vld [vmem:[%s15182_s21 + $0x1f28] ss:$16 sps:$4 sm:$0xff]  }
 0x5f4   : > { %10980 = vmatpush1.bf16.msra.mxu0 %v13830_v42  ;;  %v13910_v18 = vld [vmem:[%s15182_s21 + $0x1d0c] ss:$16 sps:$4 sm:$0xff]   ;;  %v13908_v63 = vld [vmem:[%s15182_s21 + $0x1d08] ss:$16 sps:$4 sm:$0xff]  }
 0x5f5   : > { %11021 = vmatpush1.bf16.msra.mxu1 %v13833_v43  ;;  %10981 = vmatprep.subr.bf16.mxu0 %v13838_v52  ;;  %v13913_v40 = vld [vmem:[%s15182_s21 + $0x1f0c] ss:$16 sps:$4 sm:$0xff]   ;;  %v13911_v20 = vld [vmem:[%s15182_s21 + $0x1f08] ss:$16 sps:$4 sm:$0xff]  }
 0x5f6   : > { %11022 = vmatprep.subr.bf16.mxu1 %v13841_v46 }
 0x5f8   : > { %10982 = vmatpush1.bf16.msra.mxu0 %v13836_v26 }
 0x5f9   : > { %11023 = vmatpush1.bf16.msra.mxu1 %v13839_v38  ;;  %10983 = vmatprep.subr.bf16.mxu0 %v13844_v28 }
 0x5fa   : > { %11024 = vmatprep.subr.bf16.mxu1 %v13847_v50 }
 0x5fc   : > { %10984 = vmatpush1.bf16.msra.mxu0 %v13842_v29 }
 0x5fd   : > { %11025 = vmatpush1.bf16.msra.mxu1 %v13845_v54  ;;  %10985 = vmatprep.subr.bf16.mxu0 %v13850_v15 }
 0x5fe   : > { %11026 = vmatprep.subr.bf16.mxu1 %v13853_v23 }
 0x600   : > { %10986 = vmatpush1.bf16.msra.mxu0 %v13848_v53 }
 0x601   : > { %11027 = vmatpush1.bf16.msra.mxu1 %v13851_v30  ;;  %10987 = vmatprep.subr.bf16.mxu0 %v13856_v32 }
 0x602   : > { %11028 = vmatprep.subr.bf16.mxu1 %v13859_v35 }
 0x604   : > { %10988 = vmatpush1.bf16.msra.mxu0 %v13854_v33 }
 0x605   : > { %11029 = vmatpush1.bf16.msra.mxu1 %v13857_v7  ;;  %10989 = vmatprep.subr.bf16.mxu0 %v13862_v45 }
 0x606   : > { %11030 = vmatprep.subr.bf16.mxu1 %v13865_v47 }
 0x608   : > { %10990 = vmatpush1.bf16.msra.mxu0 %v13860_v51 }
 0x609   : > { %11031 = vmatpush1.bf16.msra.mxu1 %v13863_v37  ;;  %10991 = vmatprep.subr.bf16.mxu0 %v13868_v13 }
 0x60a   : > { %11032 = vmatprep.subr.bf16.mxu1 %v13871_v21 }
 0x60c   : > { %10992 = vmatpush2.bf16.msra.mxu0 %v13866_v11 }
 0x60d   : > { %11033 = vmatpush2.bf16.msra.mxu1 %v13869_v57  ;;  %10993 = vmatprep.subr.bf16.mxu0 %v13874_v0 }
 0x60e   : > { %11034 = vmatprep.subr.bf16.mxu1 %v13877_v62 }
 0x610   : > { %10994 = vmatpush2.bf16.msra.mxu0 %v13872_v41  ;;  %v14004_v41 = vmov 1983009808  }
 0x611   : > { %11035 = vmatpush2.bf16.msra.mxu1 %v13875_v10  ;;  %10995 = vmatprep.subr.bf16.mxu0 %v13880_v59  ;;  %v11064_v10 = vunpack.c.l.s4 %v14004_v41 }
 0x612   : > { %11036 = vmatprep.subr.bf16.mxu1 %v13883_v8 }
 0x614   : > { %10996 = vmatpush2.bf16.msra.mxu0 %v13878_v61 }
 0x615   : > { %11037 = vmatpush2.bf16.msra.mxu1 %v13881_v1  ;;  %10997 = vmatprep.subr.bf16.mxu0 %v13886_v2  ;;  %v11065_v1 = vunpack.c.0.s8 %v11064_v10 }
 0x616   : > { %11038 = vmatprep.subr.bf16.mxu1 %v13889_v3 }
 0x618   : > { %10998 = vmatpush2.bf16.msra.mxu0 %v13884_v25 }
 0x619   : > { %11039 = vmatpush2.bf16.msra.mxu1 %v13887_v34  ;;  %10999 = vmatprep.subr.bf16.mxu0 %v13892_v22 }
 0x61a   : > { %11040 = vmatprep.subr.bf16.mxu1 %v13895_v49 }
 0x61c   : > { %11000 = vmatpush2.bf16.msra.mxu0 %v13890_v56 }
 0x61d   : > { %11041 = vmatpush2.bf16.msra.mxu1 %v13893_v16  ;;  %11001 = vmatprep.subr.bf16.mxu0 %v13898_v39  ;;  %v11068_v16 = vsub.s32 %v11065_v1, %v15225_v44 }
 0x61e   : > { %11042 = vmatprep.subr.bf16.mxu1 %v13901_v12 }
 0x620   : > { %11002 = vmatpush2.bf16.msra.mxu0 %v13896_v27 }
 0x621   : > { %11043 = vmatpush2.bf16.msra.mxu1 %v13899_v31  ;;  %11003 = vmatprep.subr.bf16.mxu0 %v13904_v55 }
 0x622   : > { %11044 = vmatprep.subr.bf16.mxu1 %v13907_v60  ;;  %v11069_v60 = vrot.slane %v11061_v17, %v11068_v16 }
 0x624   : > { %11004 = vmatpush2.bf16.msra.mxu0 %v13902_v6 }
 0x625   : > { %11045 = vmatpush2.bf16.msra.mxu1 %v13905_v48  ;;  %11005 = vmatprep.subr.bf16.mxu0 %v13910_v18  ;;  %v3364_v48 = vld [vmem:[%s15180_s15] sm:$0xff] }
 0x626   : > { %11046 = vmatprep.subr.bf16.mxu1 %v13913_v40 }
 0x628   : > { %11006 = vmatpush2.bf16.msra.mxu0 %v13908_v63 }
 0x629   : > { %11047 = vmatpush2.bf16.msra.mxu1 %v13911_v20 }
 0x62b   : > { %v10763_v42 = vpop.f32.mrf.mxu0  ;;  %11008 = vmatmul.mubr.bf16.vlgmr.msra.gmra.mxu0 %v15921_v9 }
 0x62c   : > { %v10804_v43 = vpop.f32.mrf.mxu1  ;;  %11049 = vmatmul.mubr.bf16.vlgmr.msra.gmra.mxu1 %v15931_v36  ;;  %v10764_v4 = vadd.f32 %v10763_v42, %v16460_v24 }
 0x62d   : > { %v10765_v5 = vpop.f32.mrf.mxu0 }
 0x62e   : > { %v10806_v52 = vpop.f32.mrf.mxu1  ;;  %v10805_v46 = vadd.f32 %v10804_v43, %v10764_v4  ;;  %v10766_v26 = vadd.f32 %v10765_v5, %v16465_v58 }
 0x62f   : > { %v10767_v38 = vpop.f32.mrf.mxu0 }
 0x630   : > { %v10808_v28 = vpop.f32.mrf.mxu1  ;;  %v10807_v50 = vadd.f32 %v10806_v52, %v10766_v26 }
 0x631   : > { %v10768_v29 = vpop.f32.mrf.mxu0 }
 0x632   : > { %v10809_v54 = vpop.f32.mrf.mxu1 }
 0x66b   : > { %v10845_v15 = vpop.f32.mrf.mxu0 }
 0x66c   : > { %v10886_v23 = vpop.f32.mrf.mxu1  ;;  %v10846_v53 = vadd.f32 %v10845_v15, %v10805_v46 }
 0x66d   : > { %v10847_v30 = vpop.f32.mrf.mxu0 }
 0x66e   : > { %v10888_v32 = vpop.f32.mrf.mxu1  ;;  %v10887_v9 = vadd.f32 %v10886_v23, %v10846_v53  ;;  %v10848_v35 = vadd.f32 %v10847_v30, %v10807_v50 }
 0x66f   : > { %v10849_v36 = vpop.f32.mrf.mxu0 }
 0x670   : > { %v10890_v33 = vpop.f32.mrf.mxu1  ;;  %v10889_v24 = vadd.f32 %v10888_v32, %v10848_v35 }
 0x671   : > { %v10850_v7 = vpop.f32.mrf.mxu0 }
 0x672   : > { %v10891_v45 = vpop.f32.mrf.mxu1 }
 0x6ab   : > { %v10927_v47 = vpop.f32.mrf.mxu0 }
 0x6ac   : > { %v10968_v51 = vpop.f32.mrf.mxu1  ;;  %v10928_v58 = vadd.f32 %v10927_v47, %v10887_v9 }
 0x6ad   : > { %v10929_v37 = vpop.f32.mrf.mxu0 }
 0x6ae   : > { %v10970_v13 = vpop.f32.mrf.mxu1  ;;  %v10969_v21 = vadd.f32 %v10968_v51, %v10928_v58  ;;  %v10930_v59 = vadd.f32 %v10929_v37, %v10889_v24 }
 0x6af   : > { %v10931_v11 = vpop.f32.mrf.mxu0 }
 0x6b0   : > { %v10972_v57 = vpop.f32.mrf.mxu1  ;;  %v10971_v2 = vadd.f32 %v10970_v13, %v10930_v59 }
 0x6b1   : > { %v10932_v0 = vpop.f32.mrf.mxu0 }
 0x6b2   : > { %v10973_v62 = vpop.f32.mrf.mxu1 }
 0x6eb   : > { %v11009_v8 = vpop.f32.mrf.mxu0 }
 0x6ec   : > { %v11050_v61 = vpop.f32.mrf.mxu1  ;;  %v11010_v3 = vadd.f32 %v11009_v8, %v10969_v21 }
 0x6ed   : > { %v11011_v25 = vpop.f32.mrf.mxu0 }
 0x6ee   : > { %v11052_v34 = vpop.f32.mrf.mxu1  ;;  %v11012_v22 = vadd.f32 %v11011_v25, %v10971_v2  ;;  %v11051_v39 = vadd.f32 %v11050_v61, %v11010_v3 }
 0x6ef   : > { %v11013_v49 = vpop.f32.mrf.mxu0 }
 0x6f0   : > { %v11054_v56 = vpop.f32.mrf.mxu1  ;;  %v11053_v12 = vadd.f32 %v11052_v34, %v11012_v22 }
 0x6f1   : > { %v11014_v27 = vpop.f32.mrf.mxu0 }
 0x6f2   : > { %v11055_v31 = vpop.f32.mrf.mxu1  ;;  %v11062_v55 = vcombine.low %v11051_v39, %v11053_v12 }
 0x6f4   : > { %v11076_v6 = vrot.slane %v11062_v55, %v11068_v16 }
 0x6f6   : > { %v11077_v18 = vcombine.low %v11069_v60, %v11076_v6  ;;  %11084 = sbr.rel (%p12279_p1) target bundleno = 1800 (0x708), region = 77 }
 0x6f8   : > { %v11079_v40 = vadd.f32 %v11077_v18, %v3364_v48 }
 0x6fa   : > { %11080 = vst [vmem:[%s15180_s15] sm:$0xff] %v11079_v40 }
 0x6fb   : > { %v11086_v63 = vld [vmem:[%s3351_s9] sm:$0xf]  ;;  %v11090_v20 = vsub.s32 0, %v15225_v44  ;;  %v11094_v14 = vsub.s32 1, %v15225_v44  ;;  %v11098_v19 = vsub.s32 2, %v15225_v44  ;;  %v11102_v17 = vsub.s32 3, %v15225_v44 }
 0x6fd   : > { %v11091_v42 = vrot.slane %v11086_v63, %v11090_v20  ;;  %v11095_v43 = vrot.slane %v11086_v63, %v11094_v14  ;;  %v11099_v4 = vrot.slane %v11086_v63, %v11098_v19  ;;  %v11103_v5 = vrot.slane %v11086_v63, %v11102_v17 }
 0x6ff   : > { %v11104_v52 = vcombine.low %v11091_v42, %v11095_v43  ;;  %v11105_v46 = vcombine.low %v11099_v4, %v11103_v5 }
 0x701   : > { %v11112_v26 = vrot.slane %v11104_v52, %v11068_v16  ;;  %v11119_v38 = vrot.slane %v11105_v46, %v11068_v16  ;;  %v11085_v28 = vld [vmem:[%s15180_s15] sm:$0xff] }
 0x703   : > { %v11120_v50 = vcombine.low %v11112_v26, %v11119_v38 }
 0x705   : > { %v11122_v29 = vadd.f32 %v11120_v50, %v11085_v28 }
 0x707   : > { %11123 = vst [vmem:[%s15180_s15] sm:$0xff] %v11122_v29 }
 0x708 PF: > { %s13_s18 = sadd.s32 1, %s13984_s18   ;;  %s16573_s12 = smov %s13964_s13 }
 0x709   : > { %p10_p2 = scmp.ge.s32.totalorder %s13_s18, 6   ;;  %s16574_s13 = smov %s14076_s25 }
 0x70a   : > { %s16575_s14 = smov %s13976_s16  ;;  %s16576_s15 = smov %s13980_s17 }
 0x70b   : > { %s16577_s16 = smov %s16580_s19  ;;  %s16578_s17 = smov %s16584_s20 }
 0x70c   :  { %12 = sbr.rel (!%p10_p2) target bundleno = 4 (0x4), region = 131 }

</bundles_post_ra>
